<compile_context>
chip_gen: v5e
topology: v5e:2x2
jax: 0.10.0
libtpu: 0.0.40
codegen_flags: <defaults>
</compile_context>

<pallas_src>
import functools

import jax
import jax.numpy as jnp
import numpy as np
from jax.experimental import pallas as pl
from jax.experimental.pallas import tpu as pltpu


# ----------------------------------------------------------------------------
# Kernel
# ----------------------------------------------------------------------------
def _silu(z):
    # z * sigmoid(z), exp + reciprocal both routed to the EUP.
    return z * pl.reciprocal(1.0 + jnp.exp(-z), approx=False)


def c1_fused_kernel(xpad_ref, mpad_ref, macc_ref, w1_ref, b1_ref, w3_ref, b3_ref,
                    o_ref, zbuf_ref, y_ref, acc_ref, *, n_layers, H, W, R):
    # xpad_ref : (1, (H+2)*R, C1)   spatially padded input, flattened row-major
    # mpad_ref : ((H+2)*R, 1)       1.0 on interior pixels, 0.0 on the halo ring
    # macc_ref : (H*R, 1)           1.0 on valid columns (w < W) of acc layout
    # w1_ref   : (C1, C2)           folded 1x1 conv weight
    # b1_ref   : (1, C2)            folded 1x1 conv bias
    # w3_ref   : (L, 9, C2, C2)     folded 3x3 conv weights (tap-major)
    # b3_ref   : (L, 1, C2)         folded 3x3 conv biases
    # o_ref    : (1, H*W, C2)
    # zbuf_ref : ((H+2)*R + 8, C2)  padded activation buffer (VMEM resident)
    # y_ref    : (H*R, C2)          residual y in acc layout
    # acc_ref  : (H*R, C2)          conv accumulator
    n_pad = (H + 2) * R          # rows of the padded, flattened image
    n_acc = H * R                # rows of the output-aligned ("acc") layout
    shift = R + 1                # acc row j  ->  padded row j + shift (aligned: R%8==7)

    # (1) Zero the padded buffer once; halo ring / margin rows stay zero forever.
    zbuf_ref[...] = jnp.zeros_like(zbuf_ref)

    # (2) cv1: 1x1 conv (+folded BN) + SiLU, evaluated on the padded layout and
    #     masked so the halo ring is exactly zero.
    x = xpad_ref[0]                                                 # (n_pad, C1)
    y = jnp.dot(x, w1_ref[...], preferred_element_type=jnp.float32)
    y = _silu(y + b1_ref[...]) * mpad_ref[...]                      # (n_pad, C2)
    zbuf_ref[0:n_pad, :] = y
    y_ref[...] = y[shift:shift + n_acc, :]                          # residual (acc layout)

    macc = macc_ref[...]                                            # (n_acc, 1)
    z = y_ref[...]                                                  # n_layers == 0 -> identity

    # (3) n x (3x3 conv + folded BN + SiLU), fully VMEM resident.
    for li in range(n_layers):
        for k in range(9):                                          # 9 shifted matmuls
            kh, kw = divmod(k, 3)
            off = kh * R + kw
            win = zbuf_ref[off:off + n_acc, :]                      # contiguous row window
            part = jnp.dot(win, w3_ref[li, k],
                           preferred_element_type=jnp.float32)
            if k == 0:
                acc_ref[...] = part
            else:
                acc_ref[...] += part
        z = _silu(acc_ref[...] + b3_ref[li]) * macc                 # (n_acc, C2)
        if li + 1 < n_layers:
            # Re-pad for the next layer: aligned masked write into the interior.
            zbuf_ref[shift:shift + n_acc, :] = z

    # (4) Residual add + interior extraction (drop the R-W junk cols per row).
    out = z + y_ref[...]
    for h in range(H):
        o_ref[0, h * W:(h + 1) * W, :] = out[h * R:h * R + W, :].astype(o_ref.dtype)


# ----------------------------------------------------------------------------
# Forward (wrapper around one fused pallas_call)
# ----------------------------------------------------------------------------
def c1_forward(x_nchw, cv1_params, m_params):
    N, C1, H, W = x_nchw.shape
    w1, b1 = cv1_params
    C2 = w1.shape[1]
    n = len(m_params)
    L = max(n, 1)

    # Row stride of the internal padded layout: R >= W+2 and R % 8 == 7 so the
    # per-layer write-back window (offset R+1) is sublane aligned.
    R = (W + 2) + ((7 - (W + 2)) % 8)
    n_pad = (H + 2) * R
    n_acc = H * R

    # One NCHW->NHWC transpose and one spatial pad of the (small) input; every
    # intermediate activation stays inside the kernel's VMEM.
    x_nhwc = jnp.transpose(x_nchw, (0, 2, 3, 1))
    xpad = jnp.pad(x_nhwc, ((0, 0), (1, 1), (1, R - 1 - W), (0, 0)))
    xpad = xpad.reshape(N, n_pad, C1)

    # Static masks (built host-side, tiny).
    mp = np.zeros((H + 2, R), np.float32)
    mp[1:H + 1, 1:W + 1] = 1.0
    mpad = jnp.asarray(mp.reshape(n_pad, 1))
    ma = np.zeros((H, R), np.float32)
    ma[:, :W] = 1.0
    macc = jnp.asarray(ma.reshape(n_acc, 1))

    if n == 0:
        # nn.Sequential() is the identity; dummy (unused) weights keep shapes valid.
        w3s = jnp.zeros((1, 9, C2, C2), jnp.float32)
        b3s = jnp.zeros((1, 1, C2), jnp.float32)
    else:
        w3s = jnp.stack([w for (w, _) in m_params])        # (n, 9, C2, C2)
        b3s = jnp.stack([b for (_, b) in m_params])        # (n, 1, C2)

    kern = functools.partial(c1_fused_kernel, n_layers=n, H=H, W=W, R=R)
    out2d = pl.pallas_call(
        kern,
        out_shape=jax.ShapeDtypeStruct((N, H * W, C2), x_nchw.dtype),
        grid=(N,),
        in_specs=[
            pl.BlockSpec((1, n_pad, C1), lambda i: (i, 0, 0)),
            pl.BlockSpec((n_pad, 1), lambda i: (0, 0)),
            pl.BlockSpec((n_acc, 1), lambda i: (0, 0)),
            pl.BlockSpec((C1, C2), lambda i: (0, 0)),
            pl.BlockSpec((1, C2), lambda i: (0, 0)),
            pl.BlockSpec((L, 9, C2, C2), lambda i: (0, 0, 0, 0)),
            pl.BlockSpec((L, 1, C2), lambda i: (0, 0, 0)),
        ],
        out_specs=pl.BlockSpec((1, H * W, C2), lambda i: (i, 0, 0)),
        scratch_shapes=[
            pltpu.VMEM((n_pad + 8, C2), jnp.float32),   # padded activation buffer
            pltpu.VMEM((n_acc, C2), jnp.float32),       # residual y
            pltpu.VMEM((n_acc, C2), jnp.float32),       # conv accumulator
        ],
        compiler_params=pltpu.CompilerParams(
            dimension_semantics=("parallel",),
            vmem_limit_bytes=32 * 1024 * 1024,
        ),
    )(xpad, mpad, macc, w1, b1, w3s, b3s)

    out_nhwc = out2d.reshape(N, H, W, C2)
    return jnp.transpose(out_nhwc, (0, 3, 1, 2))           # back to NCHW


# ----------------------------------------------------------------------------
# Parameter construction (deterministic, BN folded into the convs)
# ----------------------------------------------------------------------------
def fold_bn(w, gamma, beta, mean, var, eps=1e-5):
    scale = gamma / jnp.sqrt(var + eps)
    w_eff = w * scale[:, None, None, None]
    b_eff = beta - mean * scale
    return w_eff, b_eff


def make_params(c1, c2, n, key):
    keys = jax.random.split(key, 5 + 5 * n)
    # cv1: 1x1 conv + BN
    w1 = 0.1 * jax.random.normal(keys[0], (c2, c1, 1, 1), jnp.float32)
    g1 = 1.0 + 0.05 * jax.random.normal(keys[1], (c2,), jnp.float32)
    bt1 = 0.05 * jax.random.normal(keys[2], (c2,), jnp.float32)
    mu1 = 0.05 * jax.random.normal(keys[3], (c2,), jnp.float32)
    var1 = jnp.abs(0.1 * jax.random.normal(keys[4], (c2,), jnp.float32)) + 1.0
    w1e, b1e = fold_bn(w1, g1, bt1, mu1, var1)
    w1k = jnp.transpose(w1e.reshape(c2, c1), (1, 0))        # (C1, C2)
    b1k = b1e.reshape(1, c2)

    m_params = []
    for li in range(n):
        k = keys[5 + 5 * li: 5 + 5 * (li + 1)]
        w3 = 0.1 * jax.random.normal(k[0], (c2, c2, 3, 3), jnp.float32)
        g3 = 1.0 + 0.05 * jax.random.normal(k[1], (c2,), jnp.float32)
        bt3 = 0.05 * jax.random.normal(k[2], (c2,), jnp.float32)
        mu3 = 0.05 * jax.random.normal(k[3], (c2,), jnp.float32)
        var3 = jnp.abs(0.1 * jax.random.normal(k[4], (c2,), jnp.float32)) + 1.0
        w3e, b3e = fold_bn(w3, g3, bt3, mu3, var3)
        w3k = jnp.transpose(w3e, (2, 3, 1, 0)).reshape(9, c2, c2)   # (tap, Cin, Cout)
        b3k = b3e.reshape(1, c2)
        m_params.append((w3k, b3k))
    return (w1k, b1k), m_params


# ----------------------------------------------------------------------------
# Pure-JAX reference (for correctness check)
# ----------------------------------------------------------------------------
def c1_reference(x_nchw, cv1_params, m_params):
    w1, b1 = cv1_params
    N, C1, H, W = x_nchw.shape
    C2 = w1.shape[1]
    x_nhwc = jnp.transpose(x_nchw, (0, 2, 3, 1))
    y = jnp.einsum("nhwc,cd->nhwd", x_nhwc, w1) + b1.reshape(1, 1, 1, C2)
    y = y * jax.nn.sigmoid(y)
    z = y
    for (w3, b3) in m_params:
        zp = jnp.pad(z, ((0, 0), (1, 1), (1, 1), (0, 0)))
        acc = jnp.zeros_like(y)
        for kh in range(3):
            for kw in range(3):
                acc = acc + jnp.einsum("nhwc,cd->nhwd",
                                       zp[:, kh:kh + H, kw:kw + W, :],
                                       w3[kh * 3 + kw])
        zc = acc + b3.reshape(1, 1, 1, C2)
        z = zc * jax.nn.sigmoid(zc)
    out = z + y
    return jnp.transpose(out, (0, 3, 1, 2))


# ----------------------------------------------------------------------------
if __name__ == "__main__":
    fwd = jax.jit(c1_forward)

    configs = [
        # (N, c1, c2, H, W, n)
        (2, 4, 8, 16, 16, 1),     # the headline test shape
        (1, 3, 16, 8, 16, 2),     # exercises the multi-layer VMEM re-pad path
    ]
    key = jax.random.PRNGKey(0)
    for (N, c1_ch, c2_ch, H, W, nrep) in configs:
        key, kx, kp = jax.random.split(key, 3)
        x = jax.random.normal(kx, (N, c1_ch, H, W), jnp.float32)
        cv1_params, m_params = make_params(c1_ch, c2_ch, nrep, kp)

        out = jax.block_until_ready(fwd(x, cv1_params, m_params))
        ref = jax.block_until_ready(c1_reference(x, cv1_params, m_params))
        np.testing.assert_allclose(np.asarray(out), np.asarray(ref),
                                   rtol=1e-4, atol=1e-4)

    print("KERNEL_OK")
</pallas_src>

<mosaic_0001>
module attributes {stable_mosaic.version = 11 : i64} {
  func.func @c1_fused_kernel(%arg0: i32, %arg1: memref<1x414x4xf32, #tpu.memory_space<vmem>>, %arg2: memref<414x1xf32, #tpu.memory_space<vmem>>, %arg3: memref<368x1xf32, #tpu.memory_space<vmem>>, %arg4: memref<4x8xf32, #tpu.memory_space<vmem>>, %arg5: memref<1x8xf32, #tpu.memory_space<vmem>>, %arg6: memref<1x9x8x8xf32, #tpu.memory_space<vmem>>, %arg7: memref<1x1x8xf32, #tpu.memory_space<vmem>>, %arg8: memref<1x256x8xf32, #tpu.memory_space<vmem>>, %arg9: memref<422x8xf32, #tpu.memory_space<vmem>>, %arg10: memref<368x8xf32, #tpu.memory_space<vmem>>, %arg11: memref<368x8xf32, #tpu.memory_space<vmem>>) attributes {dimension_semantics = [#tpu.dimension_semantics<parallel>], iteration_bounds = array<i64: 2>, scalar_prefetch = 0 : i64, scratch_operands = 3 : i64, tpu.core_type = #tpu.core_type<tc>, window_params = [{transform_indices = @transform_0, window_bounds = array<i64: 1, 414, 4>}, {pipeline_mode = #tpu.pipeline_mode<synchronous>, transform_indices = @transform_1, window_bounds = array<i64: 414, 1>}, {pipeline_mode = #tpu.pipeline_mode<synchronous>, transform_indices = @transform_2, window_bounds = array<i64: 368, 1>}, {pipeline_mode = #tpu.pipeline_mode<synchronous>, transform_indices = @transform_3, window_bounds = array<i64: 4, 8>}, {pipeline_mode = #tpu.pipeline_mode<synchronous>, transform_indices = @transform_4, window_bounds = array<i64: 1, 8>}, {pipeline_mode = #tpu.pipeline_mode<synchronous>, transform_indices = @transform_5, window_bounds = array<i64: 1, 9, 8, 8>}, {pipeline_mode = #tpu.pipeline_mode<synchronous>, transform_indices = @transform_6, window_bounds = array<i64: 1, 1, 8>}, {transform_indices = @transform_7, window_bounds = array<i64: 1, 256, 8>}]} {
    %cst = arith.constant 0.000000e+00 : f32
    %0 = vector.broadcast %cst : f32 to vector<422x8xf32>
    %c0 = arith.constant 0 : index
    %c0_0 = arith.constant 0 : index
    %1 = vector.load %arg9[%c0, %c0_0] : memref<422x8xf32, #tpu.memory_space<vmem>>, vector<422x8xf32>
    tpu.vector_store %arg9[%c0, %c0_0], %0 {strides = array<i32>} : memref<422x8xf32, #tpu.memory_space<vmem>>, vector<422x8xf32>,
    %c0_1 = arith.constant 0 : index
    %c0_2 = arith.constant 0 : index
    %c0_3 = arith.constant 0 : index
    %2 = vector.load %arg1[%c0_1, %c0_2, %c0_3] : memref<1x414x4xf32, #tpu.memory_space<vmem>>, vector<1x414x4xf32>
    %3 = vector.shape_cast %2 : vector<1x414x4xf32> to vector<414x4xf32>
    %c0_4 = arith.constant 0 : index
    %c0_5 = arith.constant 0 : index
    %4 = vector.load %arg4[%c0_4, %c0_5] : memref<4x8xf32, #tpu.memory_space<vmem>>, vector<4x8xf32>
    %cst_6 = arith.constant dense<0.000000e+00> : vector<414x8xf32>
    %5 = tpu.matmul %3, %4, %cst_6 {dimension_numbers = #tpu.dot_dimension_numbers<[1], [0], [0], [1], [0, 0, 1, 1], [], []>} : vector<414x4xf32>, vector<4x8xf32>, vector<414x8xf32> -> vector<414x8xf32>
    %c0_7 = arith.constant 0 : index
    %c0_8 = arith.constant 0 : index
    %6 = vector.load %arg5[%c0_7, %c0_8] : memref<1x8xf32, #tpu.memory_space<vmem>>, vector<1x8xf32>
    %7 = vector.broadcast %6 : vector<1x8xf32> to vector<414x8xf32>
    %8 = arith.addf %5, %7 : vector<414x8xf32>
    %cst_9 = arith.constant 0.000000e+00 : f32
    %9 = vector.broadcast %cst_9 : f32 to vector<414x8xf32>
    %10 = arith.subf %9, %8 : vector<414x8xf32>
    %11 = math.exp %10 : vector<414x8xf32>
    %cst_10 = arith.constant 1.000000e+00 : f32
    %12 = vector.broadcast %cst_10 : f32 to vector<414x8xf32>
    %13 = arith.addf %12, %11 : vector<414x8xf32>
    %14 = tpu.reciprocal %13 : vector<414x8xf32> -> vector<414x8xf32>
    %15 = arith.mulf %8, %14 : vector<414x8xf32>
    %c0_11 = arith.constant 0 : index
    %c0_12 = arith.constant 0 : index
    %16 = vector.load %arg2[%c0_11, %c0_12] : memref<414x1xf32, #tpu.memory_space<vmem>>, vector<414x1xf32>
    %17 = vector.broadcast %16 : vector<414x1xf32> to vector<414x8xf32>
    %18 = arith.mulf %15, %17 : vector<414x8xf32>
    %c0_13 = arith.constant 0 : index
    %c0_14 = arith.constant 0 : index
    %19 = vector.load %arg9[%c0_13, %c0_14] : memref<422x8xf32, #tpu.memory_space<vmem>>, vector<414x8xf32>
    tpu.vector_store %arg9[%c0_13, %c0_14], %18 {strides = array<i32>} : memref<422x8xf32, #tpu.memory_space<vmem>>, vector<414x8xf32>,
    %20 = vector.extract_strided_slice %18 {offsets = [24, 0], sizes = [368, 8], strides = [1, 1]} : vector<414x8xf32> to vector<368x8xf32>
    %c0_15 = arith.constant 0 : index
    %c0_16 = arith.constant 0 : index
    %21 = vector.load %arg10[%c0_15, %c0_16] : memref<368x8xf32, #tpu.memory_space<vmem>>, vector<368x8xf32>
    tpu.vector_store %arg10[%c0_15, %c0_16], %20 {strides = array<i32>} : memref<368x8xf32, #tpu.memory_space<vmem>>, vector<368x8xf32>,
    %c0_17 = arith.constant 0 : index
    %c0_18 = arith.constant 0 : index
    %22 = vector.load %arg3[%c0_17, %c0_18] : memref<368x1xf32, #tpu.memory_space<vmem>>, vector<368x1xf32>
    %c0_19 = arith.constant 0 : index
    %c0_20 = arith.constant 0 : index
    %23 = vector.load %arg9[%c0_19, %c0_20] : memref<422x8xf32, #tpu.memory_space<vmem>>, vector<368x8xf32>
    %c0_21 = arith.constant 0 : index
    %c0_22 = arith.constant 0 : index
    %c0_23 = arith.constant 0 : index
    %c0_24 = arith.constant 0 : index
    %24 = vector.load %arg6[%c0_21, %c0_22, %c0_23, %c0_24] : memref<1x9x8x8xf32, #tpu.memory_space<vmem>>, vector<1x1x8x8xf32>
    %25 = vector.shape_cast %24 : vector<1x1x8x8xf32> to vector<8x8xf32>
    %cst_25 = arith.constant dense<0.000000e+00> : vector<368x8xf32>
    %26 = tpu.matmul %23, %25, %cst_25 {dimension_numbers = #tpu.dot_dimension_numbers<[1], [0], [0], [1], [0, 0, 1, 1], [], []>} : vector<368x8xf32>, vector<8x8xf32>, vector<368x8xf32> -> vector<368x8xf32>
    %c0_26 = arith.constant 0 : index
    %c0_27 = arith.constant 0 : index
    %27 = vector.load %arg11[%c0_26, %c0_27] : memref<368x8xf32, #tpu.memory_space<vmem>>, vector<368x8xf32>
    tpu.vector_store %arg11[%c0_26, %c0_27], %26 {strides = array<i32>} : memref<368x8xf32, #tpu.memory_space<vmem>>, vector<368x8xf32>,
    %c1 = arith.constant 1 : index
    %c0_28 = arith.constant 0 : index
    %28 = vector.load %arg9[%c1, %c0_28] : memref<422x8xf32, #tpu.memory_space<vmem>>, vector<368x8xf32>
    %c0_29 = arith.constant 0 : index
    %c1_30 = arith.constant 1 : index
    %c0_31 = arith.constant 0 : index
    %c0_32 = arith.constant 0 : index
    %29 = vector.load %arg6[%c0_29, %c1_30, %c0_31, %c0_32] : memref<1x9x8x8xf32, #tpu.memory_space<vmem>>, vector<1x1x8x8xf32>
    %30 = vector.shape_cast %29 : vector<1x1x8x8xf32> to vector<8x8xf32>
    %cst_33 = arith.constant dense<0.000000e+00> : vector<368x8xf32>
    %31 = tpu.matmul %28, %30, %cst_33 {dimension_numbers = #tpu.dot_dimension_numbers<[1], [0], [0], [1], [0, 0, 1, 1], [], []>} : vector<368x8xf32>, vector<8x8xf32>, vector<368x8xf32> -> vector<368x8xf32>
    %c0_34 = arith.constant 0 : index
    %c0_35 = arith.constant 0 : index
    %32 = vector.load %arg11[%c0_34, %c0_35] : memref<368x8xf32, #tpu.memory_space<vmem>>, vector<368x8xf32>
    %33 = arith.addf %32, %31 : vector<368x8xf32>
    %c0_36 = arith.constant 0 : index
    %c0_37 = arith.constant 0 : index
    %34 = vector.load %arg11[%c0_36, %c0_37] : memref<368x8xf32, #tpu.memory_space<vmem>>, vector<368x8xf32>
    tpu.vector_store %arg11[%c0_36, %c0_37], %33 {strides = array<i32>} : memref<368x8xf32, #tpu.memory_space<vmem>>, vector<368x8xf32>,
    %c2 = arith.constant 2 : index
    %c0_38 = arith.constant 0 : index
    %35 = vector.load %arg9[%c2, %c0_38] : memref<422x8xf32, #tpu.memory_space<vmem>>, vector<368x8xf32>
    %c0_39 = arith.constant 0 : index
    %c2_40 = arith.constant 2 : index
    %c0_41 = arith.constant 0 : index
    %c0_42 = arith.constant 0 : index
    %36 = vector.load %arg6[%c0_39, %c2_40, %c0_41, %c0_42] : memref<1x9x8x8xf32, #tpu.memory_space<vmem>>, vector<1x1x8x8xf32>
    %37 = vector.shape_cast %36 : vector<1x1x8x8xf32> to vector<8x8xf32>
    %cst_43 = arith.constant dense<0.000000e+00> : vector<368x8xf32>
    %38 = tpu.matmul %35, %37, %cst_43 {dimension_numbers = #tpu.dot_dimension_numbers<[1], [0], [0], [1], [0, 0, 1, 1], [], []>} : vector<368x8xf32>, vector<8x8xf32>, vector<368x8xf32> -> vector<368x8xf32>
    %c0_44 = arith.constant 0 : index
    %c0_45 = arith.constant 0 : index
    %39 = vector.load %arg11[%c0_44, %c0_45] : memref<368x8xf32, #tpu.memory_space<vmem>>, vector<368x8xf32>
    %40 = arith.addf %39, %38 : vector<368x8xf32>
    %c0_46 = arith.constant 0 : index
    %c0_47 = arith.constant 0 : index
    %41 = vector.load %arg11[%c0_46, %c0_47] : memref<368x8xf32, #tpu.memory_space<vmem>>, vector<368x8xf32>
    tpu.vector_store %arg11[%c0_46, %c0_47], %40 {strides = array<i32>} : memref<368x8xf32, #tpu.memory_space<vmem>>, vector<368x8xf32>,
    %c23 = arith.constant 23 : index
    %c0_48 = arith.constant 0 : index
    %42 = vector.load %arg9[%c23, %c0_48] : memref<422x8xf32, #tpu.memory_space<vmem>>, vector<368x8xf32>
    %c0_49 = arith.constant 0 : index
    %c3 = arith.constant 3 : index
    %c0_50 = arith.constant 0 : index
    %c0_51 = arith.constant 0 : index
    %43 = vector.load %arg6[%c0_49, %c3, %c0_50, %c0_51] : memref<1x9x8x8xf32, #tpu.memory_space<vmem>>, vector<1x1x8x8xf32>
    %44 = vector.shape_cast %43 : vector<1x1x8x8xf32> to vector<8x8xf32>
    %cst_52 = arith.constant dense<0.000000e+00> : vector<368x8xf32>
    %45 = tpu.matmul %42, %44, %cst_52 {dimension_numbers = #tpu.dot_dimension_numbers<[1], [0], [0], [1], [0, 0, 1, 1], [], []>} : vector<368x8xf32>, vector<8x8xf32>, vector<368x8xf32> -> vector<368x8xf32>
    %c0_53 = arith.constant 0 : index
    %c0_54 = arith.constant 0 : index
    %46 = vector.load %arg11[%c0_53, %c0_54] : memref<368x8xf32, #tpu.memory_space<vmem>>, vector<368x8xf32>
    %47 = arith.addf %46, %45 : vector<368x8xf32>
    %c0_55 = arith.constant 0 : index
    %c0_56 = arith.constant 0 : index
    %48 = vector.load %arg11[%c0_55, %c0_56] : memref<368x8xf32, #tpu.memory_space<vmem>>, vector<368x8xf32>
    tpu.vector_store %arg11[%c0_55, %c0_56], %47 {strides = array<i32>} : memref<368x8xf32, #tpu.memory_space<vmem>>, vector<368x8xf32>,
    %c24 = arith.constant 24 : index
    %c0_57 = arith.constant 0 : index
    %49 = vector.load %arg9[%c24, %c0_57] : memref<422x8xf32, #tpu.memory_space<vmem>>, vector<368x8xf32>
    %c0_58 = arith.constant 0 : index
    %c4 = arith.constant 4 : index
    %c0_59 = arith.constant 0 : index
    %c0_60 = arith.constant 0 : index
    %50 = vector.load %arg6[%c0_58, %c4, %c0_59, %c0_60] : memref<1x9x8x8xf32, #tpu.memory_space<vmem>>, vector<1x1x8x8xf32>
    %51 = vector.shape_cast %50 : vector<1x1x8x8xf32> to vector<8x8xf32>
    %cst_61 = arith.constant dense<0.000000e+00> : vector<368x8xf32>
    %52 = tpu.matmul %49, %51, %cst_61 {dimension_numbers = #tpu.dot_dimension_numbers<[1], [0], [0], [1], [0, 0, 1, 1], [], []>} : vector<368x8xf32>, vector<8x8xf32>, vector<368x8xf32> -> vector<368x8xf32>
    %c0_62 = arith.constant 0 : index
    %c0_63 = arith.constant 0 : index
    %53 = vector.load %arg11[%c0_62, %c0_63] : memref<368x8xf32, #tpu.memory_space<vmem>>, vector<368x8xf32>
    %54 = arith.addf %53, %52 : vector<368x8xf32>
    %c0_64 = arith.constant 0 : index
    %c0_65 = arith.constant 0 : index
    %55 = vector.load %arg11[%c0_64, %c0_65] : memref<368x8xf32, #tpu.memory_space<vmem>>, vector<368x8xf32>
    tpu.vector_store %arg11[%c0_64, %c0_65], %54 {strides = array<i32>} : memref<368x8xf32, #tpu.memory_space<vmem>>, vector<368x8xf32>,
    %c25 = arith.constant 25 : index
    %c0_66 = arith.constant 0 : index
    %56 = vector.load %arg9[%c25, %c0_66] : memref<422x8xf32, #tpu.memory_space<vmem>>, vector<368x8xf32>
    %c0_67 = arith.constant 0 : index
    %c5 = arith.constant 5 : index
    %c0_68 = arith.constant 0 : index
    %c0_69 = arith.constant 0 : index
    %57 = vector.load %arg6[%c0_67, %c5, %c0_68, %c0_69] : memref<1x9x8x8xf32, #tpu.memory_space<vmem>>, vector<1x1x8x8xf32>
    %58 = vector.shape_cast %57 : vector<1x1x8x8xf32> to vector<8x8xf32>
    %cst_70 = arith.constant dense<0.000000e+00> : vector<368x8xf32>
    %59 = tpu.matmul %56, %58, %cst_70 {dimension_numbers = #tpu.dot_dimension_numbers<[1], [0], [0], [1], [0, 0, 1, 1], [], []>} : vector<368x8xf32>, vector<8x8xf32>, vector<368x8xf32> -> vector<368x8xf32>
    %c0_71 = arith.constant 0 : index
    %c0_72 = arith.constant 0 : index
    %60 = vector.load %arg11[%c0_71, %c0_72] : memref<368x8xf32, #tpu.memory_space<vmem>>, vector<368x8xf32>
    %61 = arith.addf %60, %59 : vector<368x8xf32>
    %c0_73 = arith.constant 0 : index
    %c0_74 = arith.constant 0 : index
    %62 = vector.load %arg11[%c0_73, %c0_74] : memref<368x8xf32, #tpu.memory_space<vmem>>, vector<368x8xf32>
    tpu.vector_store %arg11[%c0_73, %c0_74], %61 {strides = array<i32>} : memref<368x8xf32, #tpu.memory_space<vmem>>, vector<368x8xf32>,
    %c46 = arith.constant 46 : index
    %c0_75 = arith.constant 0 : index
    %63 = vector.load %arg9[%c46, %c0_75] : memref<422x8xf32, #tpu.memory_space<vmem>>, vector<368x8xf32>
    %c0_76 = arith.constant 0 : index
    %c6 = arith.constant 6 : index
    %c0_77 = arith.constant 0 : index
    %c0_78 = arith.constant 0 : index
    %64 = vector.load %arg6[%c0_76, %c6, %c0_77, %c0_78] : memref<1x9x8x8xf32, #tpu.memory_space<vmem>>, vector<1x1x8x8xf32>
    %65 = vector.shape_cast %64 : vector<1x1x8x8xf32> to vector<8x8xf32>
    %cst_79 = arith.constant dense<0.000000e+00> : vector<368x8xf32>
    %66 = tpu.matmul %63, %65, %cst_79 {dimension_numbers = #tpu.dot_dimension_numbers<[1], [0], [0], [1], [0, 0, 1, 1], [], []>} : vector<368x8xf32>, vector<8x8xf32>, vector<368x8xf32> -> vector<368x8xf32>
    %c0_80 = arith.constant 0 : index
    %c0_81 = arith.constant 0 : index
    %67 = vector.load %arg11[%c0_80, %c0_81] : memref<368x8xf32, #tpu.memory_space<vmem>>, vector<368x8xf32>
    %68 = arith.addf %67, %66 : vector<368x8xf32>
    %c0_82 = arith.constant 0 : index
    %c0_83 = arith.constant 0 : index
    %69 = vector.load %arg11[%c0_82, %c0_83] : memref<368x8xf32, #tpu.memory_space<vmem>>, vector<368x8xf32>
    tpu.vector_store %arg11[%c0_82, %c0_83], %68 {strides = array<i32>} : memref<368x8xf32, #tpu.memory_space<vmem>>, vector<368x8xf32>,
    %c47 = arith.constant 47 : index
    %c0_84 = arith.constant 0 : index
    %70 = vector.load %arg9[%c47, %c0_84] : memref<422x8xf32, #tpu.memory_space<vmem>>, vector<368x8xf32>
    %c0_85 = arith.constant 0 : index
    %c7 = arith.constant 7 : index
    %c0_86 = arith.constant 0 : index
    %c0_87 = arith.constant 0 : index
    %71 = vector.load %arg6[%c0_85, %c7, %c0_86, %c0_87] : memref<1x9x8x8xf32, #tpu.memory_space<vmem>>, vector<1x1x8x8xf32>
    %72 = vector.shape_cast %71 : vector<1x1x8x8xf32> to vector<8x8xf32>
    %cst_88 = arith.constant dense<0.000000e+00> : vector<368x8xf32>
    %73 = tpu.matmul %70, %72, %cst_88 {dimension_numbers = #tpu.dot_dimension_numbers<[1], [0], [0], [1], [0, 0, 1, 1], [], []>} : vector<368x8xf32>, vector<8x8xf32>, vector<368x8xf32> -> vector<368x8xf32>
    %c0_89 = arith.constant 0 : index
    %c0_90 = arith.constant 0 : index
    %74 = vector.load %arg11[%c0_89, %c0_90] : memref<368x8xf32, #tpu.memory_space<vmem>>, vector<368x8xf32>
    %75 = arith.addf %74, %73 : vector<368x8xf32>
    %c0_91 = arith.constant 0 : index
    %c0_92 = arith.constant 0 : index
    %76 = vector.load %arg11[%c0_91, %c0_92] : memref<368x8xf32, #tpu.memory_space<vmem>>, vector<368x8xf32>
    tpu.vector_store %arg11[%c0_91, %c0_92], %75 {strides = array<i32>} : memref<368x8xf32, #tpu.memory_space<vmem>>, vector<368x8xf32>,
    %c48 = arith.constant 48 : index
    %c0_93 = arith.constant 0 : index
    %77 = vector.load %arg9[%c48, %c0_93] : memref<422x8xf32, #tpu.memory_space<vmem>>, vector<368x8xf32>
    %c0_94 = arith.constant 0 : index
    %c8 = arith.constant 8 : index
    %c0_95 = arith.constant 0 : index
    %c0_96 = arith.constant 0 : index
    %78 = vector.load %arg6[%c0_94, %c8, %c0_95, %c0_96] : memref<1x9x8x8xf32, #tpu.memory_space<vmem>>, vector<1x1x8x8xf32>
    %79 = vector.shape_cast %78 : vector<1x1x8x8xf32> to vector<8x8xf32>
    %cst_97 = arith.constant dense<0.000000e+00> : vector<368x8xf32>
    %80 = tpu.matmul %77, %79, %cst_97 {dimension_numbers = #tpu.dot_dimension_numbers<[1], [0], [0], [1], [0, 0, 1, 1], [], []>} : vector<368x8xf32>, vector<8x8xf32>, vector<368x8xf32> -> vector<368x8xf32>
    %c0_98 = arith.constant 0 : index
    %c0_99 = arith.constant 0 : index
    %81 = vector.load %arg11[%c0_98, %c0_99] : memref<368x8xf32, #tpu.memory_space<vmem>>, vector<368x8xf32>
    %82 = arith.addf %81, %80 : vector<368x8xf32>
    %c0_100 = arith.constant 0 : index
    %c0_101 = arith.constant 0 : index
    %83 = vector.load %arg11[%c0_100, %c0_101] : memref<368x8xf32, #tpu.memory_space<vmem>>, vector<368x8xf32>
    tpu.vector_store %arg11[%c0_100, %c0_101], %82 {strides = array<i32>} : memref<368x8xf32, #tpu.memory_space<vmem>>, vector<368x8xf32>,
    %c0_102 = arith.constant 0 : index
    %c0_103 = arith.constant 0 : index
    %84 = vector.load %arg11[%c0_102, %c0_103] : memref<368x8xf32, #tpu.memory_space<vmem>>, vector<368x8xf32>
    %c0_104 = arith.constant 0 : index
    %c0_105 = arith.constant 0 : index
    %c0_106 = arith.constant 0 : index
    %85 = vector.load %arg7[%c0_104, %c0_105, %c0_106] : memref<1x1x8xf32, #tpu.memory_space<vmem>>, vector<1x1x8xf32>
    %86 = vector.shape_cast %85 : vector<1x1x8xf32> to vector<1x8xf32>
    %87 = vector.broadcast %86 : vector<1x8xf32> to vector<368x8xf32>
    %88 = arith.addf %84, %87 : vector<368x8xf32>
    %cst_107 = arith.constant 0.000000e+00 : f32
    %89 = vector.broadcast %cst_107 : f32 to vector<368x8xf32>
    %90 = arith.subf %89, %88 : vector<368x8xf32>
    %91 = math.exp %90 : vector<368x8xf32>
    %cst_108 = arith.constant 1.000000e+00 : f32
    %92 = vector.broadcast %cst_108 : f32 to vector<368x8xf32>
    %93 = arith.addf %92, %91 : vector<368x8xf32>
    %94 = tpu.reciprocal %93 : vector<368x8xf32> -> vector<368x8xf32>
    %95 = arith.mulf %88, %94 : vector<368x8xf32>
    %96 = vector.broadcast %22 : vector<368x1xf32> to vector<368x8xf32>
    %97 = arith.mulf %95, %96 : vector<368x8xf32>
    %c0_109 = arith.constant 0 : index
    %c0_110 = arith.constant 0 : index
    %98 = vector.load %arg10[%c0_109, %c0_110] : memref<368x8xf32, #tpu.memory_space<vmem>>, vector<368x8xf32>
    %99 = arith.addf %97, %98 : vector<368x8xf32>
    %100 = vector.extract_strided_slice %99 {offsets = [0, 0], sizes = [16, 8], strides = [1, 1]} : vector<368x8xf32> to vector<16x8xf32>
    %c0_111 = arith.constant 0 : index
    %c0_112 = arith.constant 0 : index
    %c0_113 = arith.constant 0 : index
    %101 = vector.load %arg8[%c0_111, %c0_112, %c0_113] : memref<1x256x8xf32, #tpu.memory_space<vmem>>, vector<1x16x8xf32>
    %102 = vector.shape_cast %101 : vector<1x16x8xf32> to vector<16x8xf32>
    %103 = vector.shape_cast %100 : vector<16x8xf32> to vector<1x16x8xf32>
    tpu.vector_store %arg8[%c0_111, %c0_112, %c0_113], %103 {strides = array<i32>} : memref<1x256x8xf32, #tpu.memory_space<vmem>>, vector<1x16x8xf32>,
    %104 = vector.extract_strided_slice %99 {offsets = [23, 0], sizes = [16, 8], strides = [1, 1]} : vector<368x8xf32> to vector<16x8xf32>
    %c0_114 = arith.constant 0 : index
    %c16 = arith.constant 16 : index
    %c0_115 = arith.constant 0 : index
    %105 = vector.load %arg8[%c0_114, %c16, %c0_115] : memref<1x256x8xf32, #tpu.memory_space<vmem>>, vector<1x16x8xf32>
    %106 = vector.shape_cast %105 : vector<1x16x8xf32> to vector<16x8xf32>
    %107 = vector.shape_cast %104 : vector<16x8xf32> to vector<1x16x8xf32>
    tpu.vector_store %arg8[%c0_114, %c16, %c0_115], %107 {strides = array<i32>} : memref<1x256x8xf32, #tpu.memory_space<vmem>>, vector<1x16x8xf32>,
    %108 = vector.extract_strided_slice %99 {offsets = [46, 0], sizes = [16, 8], strides = [1, 1]} : vector<368x8xf32> to vector<16x8xf32>
    %c0_116 = arith.constant 0 : index
    %c32 = arith.constant 32 : index
    %c0_117 = arith.constant 0 : index
    %109 = vector.load %arg8[%c0_116, %c32, %c0_117] : memref<1x256x8xf32, #tpu.memory_space<vmem>>, vector<1x16x8xf32>
    %110 = vector.shape_cast %109 : vector<1x16x8xf32> to vector<16x8xf32>
    %111 = vector.shape_cast %108 : vector<16x8xf32> to vector<1x16x8xf32>
    tpu.vector_store %arg8[%c0_116, %c32, %c0_117], %111 {strides = array<i32>} : memref<1x256x8xf32, #tpu.memory_space<vmem>>, vector<1x16x8xf32>,
    %112 = vector.extract_strided_slice %99 {offsets = [69, 0], sizes = [16, 8], strides = [1, 1]} : vector<368x8xf32> to vector<16x8xf32>
    %c0_118 = arith.constant 0 : index
    %c48_119 = arith.constant 48 : index
    %c0_120 = arith.constant 0 : index
    %113 = vector.load %arg8[%c0_118, %c48_119, %c0_120] : memref<1x256x8xf32, #tpu.memory_space<vmem>>, vector<1x16x8xf32>
    %114 = vector.shape_cast %113 : vector<1x16x8xf32> to vector<16x8xf32>
    %115 = vector.shape_cast %112 : vector<16x8xf32> to vector<1x16x8xf32>
    tpu.vector_store %arg8[%c0_118, %c48_119, %c0_120], %115 {strides = array<i32>} : memref<1x256x8xf32, #tpu.memory_space<vmem>>, vector<1x16x8xf32>,
    %116 = vector.extract_strided_slice %99 {offsets = [92, 0], sizes = [16, 8], strides = [1, 1]} : vector<368x8xf32> to vector<16x8xf32>
    %c0_121 = arith.constant 0 : index
    %c64 = arith.constant 64 : index
    %c0_122 = arith.constant 0 : index
    %117 = vector.load %arg8[%c0_121, %c64, %c0_122] : memref<1x256x8xf32, #tpu.memory_space<vmem>>, vector<1x16x8xf32>
    %118 = vector.shape_cast %117 : vector<1x16x8xf32> to vector<16x8xf32>
    %119 = vector.shape_cast %116 : vector<16x8xf32> to vector<1x16x8xf32>
    tpu.vector_store %arg8[%c0_121, %c64, %c0_122], %119 {strides = array<i32>} : memref<1x256x8xf32, #tpu.memory_space<vmem>>, vector<1x16x8xf32>,
    %120 = vector.extract_strided_slice %99 {offsets = [115, 0], sizes = [16, 8], strides = [1, 1]} : vector<368x8xf32> to vector<16x8xf32>
    %c0_123 = arith.constant 0 : index
    %c80 = arith.constant 80 : index
    %c0_124 = arith.constant 0 : index
    %121 = vector.load %arg8[%c0_123, %c80, %c0_124] : memref<1x256x8xf32, #tpu.memory_space<vmem>>, vector<1x16x8xf32>
    %122 = vector.shape_cast %121 : vector<1x16x8xf32> to vector<16x8xf32>
    %123 = vector.shape_cast %120 : vector<16x8xf32> to vector<1x16x8xf32>
    tpu.vector_store %arg8[%c0_123, %c80, %c0_124], %123 {strides = array<i32>} : memref<1x256x8xf32, #tpu.memory_space<vmem>>, vector<1x16x8xf32>,
    %124 = vector.extract_strided_slice %99 {offsets = [138, 0], sizes = [16, 8], strides = [1, 1]} : vector<368x8xf32> to vector<16x8xf32>
    %c0_125 = arith.constant 0 : index
    %c96 = arith.constant 96 : index
    %c0_126 = arith.constant 0 : index
    %125 = vector.load %arg8[%c0_125, %c96, %c0_126] : memref<1x256x8xf32, #tpu.memory_space<vmem>>, vector<1x16x8xf32>
    %126 = vector.shape_cast %125 : vector<1x16x8xf32> to vector<16x8xf32>
    %127 = vector.shape_cast %124 : vector<16x8xf32> to vector<1x16x8xf32>
    tpu.vector_store %arg8[%c0_125, %c96, %c0_126], %127 {strides = array<i32>} : memref<1x256x8xf32, #tpu.memory_space<vmem>>, vector<1x16x8xf32>,
    %128 = vector.extract_strided_slice %99 {offsets = [161, 0], sizes = [16, 8], strides = [1, 1]} : vector<368x8xf32> to vector<16x8xf32>
    %c0_127 = arith.constant 0 : index
    %c112 = arith.constant 112 : index
    %c0_128 = arith.constant 0 : index
    %129 = vector.load %arg8[%c0_127, %c112, %c0_128] : memref<1x256x8xf32, #tpu.memory_space<vmem>>, vector<1x16x8xf32>
    %130 = vector.shape_cast %129 : vector<1x16x8xf32> to vector<16x8xf32>
    %131 = vector.shape_cast %128 : vector<16x8xf32> to vector<1x16x8xf32>
    tpu.vector_store %arg8[%c0_127, %c112, %c0_128], %131 {strides = array<i32>} : memref<1x256x8xf32, #tpu.memory_space<vmem>>, vector<1x16x8xf32>,
    %132 = vector.extract_strided_slice %99 {offsets = [184, 0], sizes = [16, 8], strides = [1, 1]} : vector<368x8xf32> to vector<16x8xf32>
    %c0_129 = arith.constant 0 : index
    %c128 = arith.constant 128 : index
    %c0_130 = arith.constant 0 : index
    %133 = vector.load %arg8[%c0_129, %c128, %c0_130] : memref<1x256x8xf32, #tpu.memory_space<vmem>>, vector<1x16x8xf32>
    %134 = vector.shape_cast %133 : vector<1x16x8xf32> to vector<16x8xf32>
    %135 = vector.shape_cast %132 : vector<16x8xf32> to vector<1x16x8xf32>
    tpu.vector_store %arg8[%c0_129, %c128, %c0_130], %135 {strides = array<i32>} : memref<1x256x8xf32, #tpu.memory_space<vmem>>, vector<1x16x8xf32>,
    %136 = vector.extract_strided_slice %99 {offsets = [207, 0], sizes = [16, 8], strides = [1, 1]} : vector<368x8xf32> to vector<16x8xf32>
    %c0_131 = arith.constant 0 : index
    %c144 = arith.constant 144 : index
    %c0_132 = arith.constant 0 : index
    %137 = vector.load %arg8[%c0_131, %c144, %c0_132] : memref<1x256x8xf32, #tpu.memory_space<vmem>>, vector<1x16x8xf32>
    %138 = vector.shape_cast %137 : vector<1x16x8xf32> to vector<16x8xf32>
    %139 = vector.shape_cast %136 : vector<16x8xf32> to vector<1x16x8xf32>
    tpu.vector_store %arg8[%c0_131, %c144, %c0_132], %139 {strides = array<i32>} : memref<1x256x8xf32, #tpu.memory_space<vmem>>, vector<1x16x8xf32>,
    %140 = vector.extract_strided_slice %99 {offsets = [230, 0], sizes = [16, 8], strides = [1, 1]} : vector<368x8xf32> to vector<16x8xf32>
    %c0_133 = arith.constant 0 : index
    %c160 = arith.constant 160 : index
    %c0_134 = arith.constant 0 : index
    %141 = vector.load %arg8[%c0_133, %c160, %c0_134] : memref<1x256x8xf32, #tpu.memory_space<vmem>>, vector<1x16x8xf32>
    %142 = vector.shape_cast %141 : vector<1x16x8xf32> to vector<16x8xf32>
    %143 = vector.shape_cast %140 : vector<16x8xf32> to vector<1x16x8xf32>
    tpu.vector_store %arg8[%c0_133, %c160, %c0_134], %143 {strides = array<i32>} : memref<1x256x8xf32, #tpu.memory_space<vmem>>, vector<1x16x8xf32>,
    %144 = vector.extract_strided_slice %99 {offsets = [253, 0], sizes = [16, 8], strides = [1, 1]} : vector<368x8xf32> to vector<16x8xf32>
    %c0_135 = arith.constant 0 : index
    %c176 = arith.constant 176 : index
    %c0_136 = arith.constant 0 : index
    %145 = vector.load %arg8[%c0_135, %c176, %c0_136] : memref<1x256x8xf32, #tpu.memory_space<vmem>>, vector<1x16x8xf32>
    %146 = vector.shape_cast %145 : vector<1x16x8xf32> to vector<16x8xf32>
    %147 = vector.shape_cast %144 : vector<16x8xf32> to vector<1x16x8xf32>
    tpu.vector_store %arg8[%c0_135, %c176, %c0_136], %147 {strides = array<i32>} : memref<1x256x8xf32, #tpu.memory_space<vmem>>, vector<1x16x8xf32>,
    %148 = vector.extract_strided_slice %99 {offsets = [276, 0], sizes = [16, 8], strides = [1, 1]} : vector<368x8xf32> to vector<16x8xf32>
    %c0_137 = arith.constant 0 : index
    %c192 = arith.constant 192 : index
    %c0_138 = arith.constant 0 : index
    %149 = vector.load %arg8[%c0_137, %c192, %c0_138] : memref<1x256x8xf32, #tpu.memory_space<vmem>>, vector<1x16x8xf32>
    %150 = vector.shape_cast %149 : vector<1x16x8xf32> to vector<16x8xf32>
    %151 = vector.shape_cast %148 : vector<16x8xf32> to vector<1x16x8xf32>
    tpu.vector_store %arg8[%c0_137, %c192, %c0_138], %151 {strides = array<i32>} : memref<1x256x8xf32, #tpu.memory_space<vmem>>, vector<1x16x8xf32>,
    %152 = vector.extract_strided_slice %99 {offsets = [299, 0], sizes = [16, 8], strides = [1, 1]} : vector<368x8xf32> to vector<16x8xf32>
    %c0_139 = arith.constant 0 : index
    %c208 = arith.constant 208 : index
    %c0_140 = arith.constant 0 : index
    %153 = vector.load %arg8[%c0_139, %c208, %c0_140] : memref<1x256x8xf32, #tpu.memory_space<vmem>>, vector<1x16x8xf32>
    %154 = vector.shape_cast %153 : vector<1x16x8xf32> to vector<16x8xf32>
    %155 = vector.shape_cast %152 : vector<16x8xf32> to vector<1x16x8xf32>
    tpu.vector_store %arg8[%c0_139, %c208, %c0_140], %155 {strides = array<i32>} : memref<1x256x8xf32, #tpu.memory_space<vmem>>, vector<1x16x8xf32>,
    %156 = vector.extract_strided_slice %99 {offsets = [322, 0], sizes = [16, 8], strides = [1, 1]} : vector<368x8xf32> to vector<16x8xf32>
    %c0_141 = arith.constant 0 : index
    %c224 = arith.constant 224 : index
    %c0_142 = arith.constant 0 : index
    %157 = vector.load %arg8[%c0_141, %c224, %c0_142] : memref<1x256x8xf32, #tpu.memory_space<vmem>>, vector<1x16x8xf32>
    %158 = vector.shape_cast %157 : vector<1x16x8xf32> to vector<16x8xf32>
    %159 = vector.shape_cast %156 : vector<16x8xf32> to vector<1x16x8xf32>
    tpu.vector_store %arg8[%c0_141, %c224, %c0_142], %159 {strides = array<i32>} : memref<1x256x8xf32, #tpu.memory_space<vmem>>, vector<1x16x8xf32>,
    %160 = vector.extract_strided_slice %99 {offsets = [345, 0], sizes = [16, 8], strides = [1, 1]} : vector<368x8xf32> to vector<16x8xf32>
    %c0_143 = arith.constant 0 : index
    %c240 = arith.constant 240 : index
    %c0_144 = arith.constant 0 : index
    %161 = vector.load %arg8[%c0_143, %c240, %c0_144] : memref<1x256x8xf32, #tpu.memory_space<vmem>>, vector<1x16x8xf32>
    %162 = vector.shape_cast %161 : vector<1x16x8xf32> to vector<16x8xf32>
    %163 = vector.shape_cast %160 : vector<16x8xf32> to vector<1x16x8xf32>
    tpu.vector_store %arg8[%c0_143, %c240, %c0_144], %163 {strides = array<i32>} : memref<1x256x8xf32, #tpu.memory_space<vmem>>, vector<1x16x8xf32>,
    return
  }
  func.func @transform_0(%arg0: i32) -> (i32, i32, i32) {
    %c0_i32 = arith.constant 0 : i32
    %c0_i32_0 = arith.constant 0 : i32
    %c0_i32_1 = arith.constant 0 : i32
    return %arg0, %c0_i32, %c0_i32_0 : i32, i32, i32
  }
  func.func @transform_1(%arg0: i32) -> (i32, i32) {
    %c0_i32 = arith.constant 0 : i32
    %c0_i32_0 = arith.constant 0 : i32
    %c0_i32_1 = arith.constant 0 : i32
    return %c0_i32, %c0_i32_0 : i32, i32
  }
  func.func @transform_2(%arg0: i32) -> (i32, i32) {
    %c0_i32 = arith.constant 0 : i32
    %c0_i32_0 = arith.constant 0 : i32
    %c0_i32_1 = arith.constant 0 : i32
    return %c0_i32, %c0_i32_0 : i32, i32
  }
  func.func @transform_3(%arg0: i32) -> (i32, i32) {
    %c0_i32 = arith.constant 0 : i32
    %c0_i32_0 = arith.constant 0 : i32
    %c0_i32_1 = arith.constant 0 : i32
    return %c0_i32, %c0_i32_0 : i32, i32
  }
  func.func @transform_4(%arg0: i32) -> (i32, i32) {
    %c0_i32 = arith.constant 0 : i32
    %c0_i32_0 = arith.constant 0 : i32
    %c0_i32_1 = arith.constant 0 : i32
    return %c0_i32, %c0_i32_0 : i32, i32
  }
  func.func @transform_5(%arg0: i32) -> (i32, i32, i32, i32) {
    %c0_i32 = arith.constant 0 : i32
    %c0_i32_0 = arith.constant 0 : i32
    %c0_i32_1 = arith.constant 0 : i32
    %c0_i32_2 = arith.constant 0 : i32
    %c0_i32_3 = arith.constant 0 : i32
    return %c0_i32, %c0_i32_0, %c0_i32_1, %c0_i32_2 : i32, i32, i32, i32
  }
  func.func @transform_6(%arg0: i32) -> (i32, i32, i32) {
    %c0_i32 = arith.constant 0 : i32
    %c0_i32_0 = arith.constant 0 : i32
    %c0_i32_1 = arith.constant 0 : i32
    %c0_i32_2 = arith.constant 0 : i32
    return %c0_i32, %c0_i32_0, %c0_i32_1 : i32, i32, i32
  }
  func.func @transform_7(%arg0: i32) -> (i32, i32, i32) {
    %c0_i32 = arith.constant 0 : i32
    %c0_i32_0 = arith.constant 0 : i32
    %c0_i32_1 = arith.constant 0 : i32
    return %arg0, %c0_i32, %c0_i32_0 : i32, i32, i32
  }
}

</mosaic_0001>

<bundles_post_ra>
// kernel: c1_forward.1
= control target key start
LH: loop header
LB: loop body
LE: loop exit
PB: predicated region body
PF: predicated region fallthrough
CT: control target
= control target key end

     0   :  { %s8844_s24 = smov 0   ;;  %s12482_s0 = inlined_call_operand.vmem [shape: f32[2,414,4], index: 0, kind: input, shape index: {}]   ;;  %s12483_s1 = inlined_call_operand.vmem [shape: f32[414,1], index: 1, kind: input, shape index: {}]   ;;  %s12484_s2 = inlined_call_operand.vmem [shape: f32[368,1], index: 2, kind: input, shape index: {}]   ;;  %s12485_s3 = inlined_call_operand.vmem [shape: f32[4,8], index: 3, kind: input, shape index: {}]   ;;  %s12486_s4 = inlined_call_operand.vmem [shape: f32[1,8], index: 4, kind: input, shape index: {}]   ;;  %s12487_s5 = inlined_call_operand.vmem [shape: f32[1,9,8,8], index: 5, kind: input, shape index: {}]   ;;  %s12488_s6 = inlined_call_operand.vmem [shape: f32[1,1,8], index: 6, kind: input, shape index: {}]   ;;  %s12489_s7 = inlined_call_operand.vmem [shape: f32[2,256,8], index: 7, kind: output, shape index: {}]  }
   0x1 LB: > { %s7891_s25 = sadd.s32 4294967295, %s8800_s24   ;;  %p7895_p0 = scmp.ge.s32.totalorder %s8800_s24, 1  ;;  %s8800_s24 = sphi %s8844_s24, %s17_s24  }
   0x2   : > { %p237_p1 = scmp.lt.s32.totalorder %s8800_s24, 3 }
   0x4   : > { %p238_p2 = pnand %p7895_p0, %p237_p1 }
   0x5   : > { %p269_p3 = scmp.lt.s32.totalorder (!%p238_p2), %s7891_s25, 1 }
   0x6   : > { %241 = sbr.rel (%p238_p2) target bundleno = 1495 (0x5d7), region = 48 }
   0xb   : > { %v1735_v0 = vld [vmem:[%s12483_s1 + $0xb0] sm:$0xff]  ;;  %v1713_v1 = vld [vmem:[%s12483_s1] sm:$0xff]  ;;  %vm548_vm0 = vcmask 1043456   ;;  %v8802_v3 = vmov 0   ;;  %s12533_s25 = smov (!%p269_p3, %s7891_s25), 1  ;;  %v1714_v4 = vld [vmem:[%s12483_s1 + $0x8] sm:$0xff] }
   0xc   : > { %v386_v2 = vld [vmem:[%s12485_s3] sm:$0xf]  ;;  %8392 = vset.pattern.permute.xlu1 %v8802_v3  ;;  %8391 = vset.pattern.permute.xlu0 %v8802_v3  ;;  %s8380_s11 = smul.u32 416, %s12533_s25  ;;  %vm391_vm1 = vcmask 31744   ;;  %v1738_v5 = vld [vmem:[%s12483_s1 + $0xc8] sm:$0xff]  ;;  %v1736_v8 = vld [vmem:[%s12483_s1 + $0xb8] sm:$0xff] }
   0xd   : > { %1877 = vperm.xlu1 %8392, %v1735_v0   ;;  %1767 = vperm.xlu0 %8391, %v1713_v1   ;;  %v1734_v6 = vld [vmem:[%s12483_s1 + $0xa8] sm:$0xff]  ;;  %v1715_v10 = vld [vmem:[%s12483_s1 + $0x10] sm:$0xff]  ;;  %v1737_v12 = vld [vmem:[%s12483_s1 + $0xc0] sm:$0xff]  ;;  %vm279_vm2 = vcmask 64512   ;;  %v8803_v53 = vmov 0.0  }
   0xe   : > { %7899 = vmatpush.msk.msra.mxu0 %vm548_vm0, %v386_v2  ;;  %8393 = vset.pattern.permute.xlu2 %v8802_v3  ;;  %s8870_s14 = scalar_lea.vmem %s12482_s0, %s8380_s11  ;;  %v1739_v11 = vld [vmem:[%s12483_s1 + $0xd0] sm:$0xff]  ;;  %v1716_v14 = vld [vmem:[%s12483_s1 + $0x18] sm:$0xff]  ;;  %v1741_v16 = vld [vmem:[%s12483_s1 + $0xe0] sm:$0xff]  ;;  %280 = vst.msk [vmem:[#allocation2] sm:$0xff] %vm279_vm2, %v8803_v53  ;;  %s8376_s11 = sshll.u32 %s12533_s25, 8 }
   0xf   : > { %1772 = vperm.xlu2 %8393, %v1714_v4   ;;  %8377 = vmatpush.msk.msra.mxu3 %vm548_vm0, %v386_v2  ;;  %v334_v7 = vld [vmem:[%s8870_s14] sm:$0xff]  ;;  %v335_v9 = vld [vmem:[%s8870_s14 + $0x8] sm:$0xff]  ;;  %v336_v13 = vld [vmem:[%s8870_s14 + $0x10] sm:$0xff]  ;;  %281 = vst.msk [vmem:[#allocation2 + $0x8] sm:$0xff] %vm279_vm2, %v8803_v53  ;;  %s11235_s13 = scalar_lea.vmem %s12489_s7, %s8376_s11 }
  0x10   : > { %7900 = vmatmul.msk.f32.vlgmr.msra.gmra.mxu0 %vm391_vm1, %v334_v7  ;;  %v1740_v15 = vld [vmem:[%s12483_s1 + $0xd8] sm:$0xff]  ;;  %v1742_v18 = vld [vmem:[%s12483_s1 + $0xe8] sm:$0xff]  ;;  %v1717_v19 = vld [vmem:[%s12483_s1 + $0x20] sm:$0xff]  ;;  %282 = vst.msk [vmem:[#allocation2 + $0x10] sm:$0xff] %vm279_vm2, %v8803_v53 }
  0x11   : > { %v337_v17 = vld [vmem:[%s8870_s14 + $0x18] sm:$0xff]  ;;  %v1718_v20 = vld [vmem:[%s12483_s1 + $0x28] sm:$0xff]  ;;  %v338_v21 = vld [vmem:[%s8870_s14 + $0x20] sm:$0xff]  ;;  %283 = vst.msk [vmem:[#allocation2 + $0x18] sm:$0xff] %vm279_vm2, %v8803_v53 }
  0x12   : > { %v1719_v22 = vld [vmem:[%s12483_s1 + $0x30] sm:$0xff]  ;;  %v1744_v24 = vld [vmem:[%s12483_s1 + $0xf8] sm:$0xff]  ;;  %v339_v25 = vld [vmem:[%s8870_s14 + $0x28] sm:$0xff]  ;;  %284 = vst.msk [vmem:[#allocation2 + $0x20] sm:$0xff] %vm279_vm2, %v8803_v53 }
  0x13   : > { %v1743_v23 = vld [vmem:[%s12483_s1 + $0xf0] sm:$0xff]  ;;  %v1745_v26 = vld [vmem:[%s12483_s1 + $0x100] sm:$0xff]  ;;  %v1720_v27 = vld [vmem:[%s12483_s1 + $0x38] sm:$0xff]  ;;  %285 = vst.msk [vmem:[#allocation2 + $0x28] sm:$0xff] %vm279_vm2, %v8803_v53 }
  0x14   : > { %v1721_v28 = vld [vmem:[%s12483_s1 + $0x40] sm:$0xff]  ;;  %v340_v29 = vld [vmem:[%s8870_s14 + $0x30] sm:$0xff]  ;;  %v1722_v30 = vld [vmem:[%s12483_s1 + $0x48] sm:$0xff]  ;;  %286 = vst.msk [vmem:[#allocation2 + $0x30] sm:$0xff] %vm279_vm2, %v8803_v53 }
  0x15   : > { %1892 = vperm.xlu1 %8392, %v1738_v5   ;;  %1872 = vperm.xlu0 %8391, %v1734_v6   ;;  %v1746_v31 = vld [vmem:[%s12483_s1 + $0x108] sm:$0xff]  ;;  %v1747_v32 = vld [vmem:[%s12483_s1 + $0x110] sm:$0xff]  ;;  %v341_v33 = vld [vmem:[%s8870_s14 + $0x38] sm:$0xff]  ;;  %287 = vst.msk [vmem:[#allocation2 + $0x38] sm:$0xff] %vm279_vm2, %v8803_v53 }
  0x16   : > { %v1748_v34 = vld [vmem:[%s12483_s1 + $0x118] sm:$0xff]  ;;  %v1723_v35 = vld [vmem:[%s12483_s1 + $0x50] sm:$0xff]  ;;  %v342_v37 = vld [vmem:[%s8870_s14 + $0x40] sm:$0xff]  ;;  %288 = vst.msk [vmem:[#allocation2 + $0x40] sm:$0xff] %vm279_vm2, %v8803_v53 }
  0x17   : > { %1882 = vperm.xlu2 %8393, %v1736_v8   ;;  %v1724_v36 = vld [vmem:[%s12483_s1 + $0x58] sm:$0xff]  ;;  %v1725_v38 = vld [vmem:[%s12483_s1 + $0x60] sm:$0xff]  ;;  %v1750_v40 = vld [vmem:[%s12483_s1 + $0x128] sm:$0xff]  ;;  %289 = vst.msk [vmem:[#allocation2 + $0x48] sm:$0xff] %vm279_vm2, %v8803_v53 }
  0x18   : > { %7901 = vmatmul.msk.f32.gmra.mxu0 %vm391_vm1, %v335_v9  ;;  %v1749_v39 = vld [vmem:[%s12483_s1 + $0x120] sm:$0xff]  ;;  %v343_v41 = vld [vmem:[%s8870_s14 + $0x48] sm:$0xff]  ;;  %v1751_v42 = vld [vmem:[%s12483_s1 + $0x130] sm:$0xff]  ;;  %290 = vst.msk [vmem:[#allocation2 + $0x50] sm:$0xff] %vm279_vm2, %v8803_v53 }
  0x19   : > { %v1726_v43 = vld [vmem:[%s12483_s1 + $0x68] sm:$0xff]  ;;  %v1727_v44 = vld [vmem:[%s12483_s1 + $0x70] sm:$0xff]  ;;  %v1728_v46 = vld [vmem:[%s12483_s1 + $0x78] sm:$0xff]  ;;  %291 = vst.msk [vmem:[#allocation2 + $0x58] sm:$0xff] %vm279_vm2, %v8803_v53 }
  0x1a   : > { %v344_v45 = vld [vmem:[%s8870_s14 + $0x50] sm:$0xff]  ;;  %v1752_v47 = vld [vmem:[%s12483_s1 + $0x138] sm:$0xff]  ;;  %v1753_v48 = vld [vmem:[%s12483_s1 + $0x140] sm:$0xff]  ;;  %292 = vst.msk [vmem:[#allocation2 + $0x60] sm:$0xff] %vm279_vm2, %v8803_v53 }
  0x1b   : > { %v345_v49 = vld [vmem:[%s8870_s14 + $0x58] sm:$0xff]  ;;  %v1754_v50 = vld [vmem:[%s12483_s1 + $0x148] sm:$0xff]  ;;  %v1729_v51 = vld [vmem:[%s12483_s1 + $0x80] sm:$0xff]  ;;  %293 = vst.msk [vmem:[#allocation2 + $0x68] sm:$0xff] %vm279_vm2, %v8803_v53 }
  0x1c   : > { %v1730_v52 = vld [vmem:[%s12483_s1 + $0x88] sm:$0xff]  ;;  %v346_v54 = vld [vmem:[%s8870_s14 + $0x60] sm:$0xff]  ;;  %v1731_v55 = vld [vmem:[%s12483_s1 + $0x90] sm:$0xff]  ;;  %294 = vst.msk [vmem:[#allocation2 + $0x70] sm:$0xff] %vm279_vm2, %v8803_v53 }
  0x1d   : > { %1777 = vperm.xlu1 %8392, %v1715_v10   ;;  %1897 = vperm.xlu0 %8391, %v1739_v11   ;;  %v1755_v56 = vld [vmem:[%s12483_s1 + $0x150] sm:$0xff]  ;;  %v1756_v57 = vld [vmem:[%s12483_s1 + $0x158] sm:$0xff]  ;;  %v347_v58 = vld [vmem:[%s8870_s14 + $0x68] sm:$0xff]  ;;  %295 = vst.msk [vmem:[#allocation2 + $0x78] sm:$0xff] %vm279_vm2, %v8803_v53 }
  0x1e   : > { %v1757_v59 = vld [vmem:[%s12483_s1 + $0x160] sm:$0xff]  ;;  %v1732_v60 = vld [vmem:[%s12483_s1 + $0x98] sm:$0xff]  ;;  %296 = vst.msk [vmem:[#allocation2 + $0x80] sm:$0xff] %vm279_vm2, %v8803_v53  ;;  %v348_v62 = vld [vmem:[%s8870_s14 + $0x70] sm:$0xff] }
  0x1f   : > { %1887 = vperm.xlu2 %8393, %v1737_v12   ;;  %v1733_v61 = vld [vmem:[%s12483_s1 + $0xa0] sm:$0xff]  ;;  %297 = vst.msk [vmem:[#allocation2 + $0x88] sm:$0xff] %vm279_vm2, %v8803_v53  ;;  %v1759_v63 = vld [vmem:[%s12483_s1 + $0x170] sm:$0xff]  ;;  %v1758_v0 = vld [vmem:[%s12483_s1 + $0x168] sm:$0xff] }
  0x20   : > { %7902 = vmatmul.msk.f32.gmra.mxu0 %vm391_vm1, %v336_v13  ;;  %298 = vst.msk [vmem:[#allocation2 + $0x90] sm:$0xff] %vm279_vm2, %v8803_v53  ;;  %v1760_v1 = vld [vmem:[%s12483_s1 + $0x178] sm:$0xff]  ;;  %v1762_v3 = vld [vmem:[%s12483_s1 + $0x188] sm:$0xff]  ;;  %v1761_v4 = vld [vmem:[%s12483_s1 + $0x180] sm:$0xff] }
  0x21   : > { %299 = vst.msk [vmem:[#allocation2 + $0x98] sm:$0xff] %vm279_vm2, %v8803_v53  ;;  %v349_v2 = vld [vmem:[%s8870_s14 + $0x78] sm:$0xff]  ;;  %v1763_v5 = vld [vmem:[%s12483_s1 + $0x190] sm:$0xff]  ;;  %v9111_v6 = vld [vmem:[%s12486_s4] ss:$0 sm:$0xff] }
  0x22   : > { %300 = vst.msk [vmem:[#allocation2 + $0xa0] sm:$0xff] %vm279_vm2, %v8803_v53  ;;  %v350_v8 = vld [vmem:[%s8870_s14 + $0x80] sm:$0xff]  ;;  %v1764_v11 = vld [vmem:[%s12483_s1 + $0x198] sm:$0x3f]  ;;  %v2176_v13 = vld [vmem:[%s12484_s2 + $0x8] sm:$0xff] }
  0x23   : > { %301 = vst.msk [vmem:[#allocation2 + $0xa8] sm:$0xff] %vm279_vm2, %v8803_v53  ;;  %v2175_v10 = vld [vmem:[%s12484_s2] sm:$0xff] }
  0x24   : > { %302 = vst.msk [vmem:[#allocation2 + $0xb0] sm:$0xff] %vm279_vm2, %v8803_v53 }
  0x25   : > { %1782 = vperm.xlu1 %8392, %v1716_v14   ;;  %1902 = vperm.xlu0 %8391, %v1740_v15   ;;  %303 = vst.msk [vmem:[#allocation2 + $0xb8] sm:$0xff] %vm279_vm2, %v8803_v53 }
  0x26   : > { %304 = vst.msk [vmem:[#allocation2 + $0xc0] sm:$0xff] %vm279_vm2, %v8803_v53 }
  0x27   : > { %1907 = vperm.xlu2 %8393, %v1741_v16   ;;  %305 = vst.msk [vmem:[#allocation2 + $0xc8] sm:$0xff] %vm279_vm2, %v8803_v53  ;;  %v351_v16 = vld [vmem:[%s8870_s14 + $0x88] sm:$0xff] }
  0x28   : > { %7903 = vmatmul.msk.f32.gmra.mxu0 %vm391_vm1, %v337_v17  ;;  %306 = vst.msk [vmem:[#allocation2 + $0xd0] sm:$0xff] %vm279_vm2, %v8803_v53 }
  0x29   : > { %307 = vst.msk [vmem:[#allocation2 + $0xd8] sm:$0xff] %vm279_vm2, %v8803_v53 }
  0x2a   : > { %308 = vst.msk [vmem:[#allocation2 + $0xe0] sm:$0xff] %vm279_vm2, %v8803_v53 }
  0x2b   : > { %309 = vst.msk [vmem:[#allocation2 + $0xe8] sm:$0xff] %vm279_vm2, %v8803_v53 }
  0x2c   : > { %310 = vst.msk [vmem:[#allocation2 + $0xf0] sm:$0xff] %vm279_vm2, %v8803_v53 }
  0x2d   : > { %1912 = vperm.xlu1 %8392, %v1742_v18   ;;  %1787 = vperm.xlu0 %8391, %v1717_v19   ;;  %311 = vst.msk [vmem:[#allocation2 + $0xf8] sm:$0xff] %vm279_vm2, %v8803_v53  ;;  %v2178_v18 = vld [vmem:[%s12484_s2 + $0x18] sm:$0xff]  ;;  %v2177_v19 = vld [vmem:[%s12484_s2 + $0x10] sm:$0xff] }
  0x2e   : > { %312 = vst.msk [vmem:[#allocation2 + $0x100] sm:$0xff] %vm279_vm2, %v8803_v53 }
  0x2f   : > { %1792 = vperm.xlu2 %8393, %v1718_v20   ;;  %313 = vst.msk [vmem:[#allocation2 + $0x108] sm:$0xff] %vm279_vm2, %v8803_v53 }
  0x30   : > { %7904 = vmatmul.msk.f32.gmra.mxu0 %vm391_vm1, %v338_v21  ;;  %314 = vst.msk [vmem:[#allocation2 + $0x110] sm:$0xff] %vm279_vm2, %v8803_v53  ;;  %v2179_v21 = vld [vmem:[%s12484_s2 + $0x20] sm:$0xff] }
  0x31   : > { %315 = vst.msk [vmem:[#allocation2 + $0x118] sm:$0xff] %vm279_vm2, %v8803_v53 }
  0x32   : > { %316 = vst.msk [vmem:[#allocation2 + $0x120] sm:$0xff] %vm279_vm2, %v8803_v53 }
  0x33   : > { %317 = vst.msk [vmem:[#allocation2 + $0x128] sm:$0xff] %vm279_vm2, %v8803_v53 }
  0x34   : > { %318 = vst.msk [vmem:[#allocation2 + $0x130] sm:$0xff] %vm279_vm2, %v8803_v53 }
  0x35   : > { %1797 = vperm.xlu1 %8392, %v1719_v22   ;;  %1917 = vperm.xlu0 %8391, %v1743_v23   ;;  %319 = vst.msk [vmem:[#allocation2 + $0x138] sm:$0xff] %vm279_vm2, %v8803_v53  ;;  %v2267_v22 = vld [vmem:[%s12487_s5] sm:$0xff] }
  0x36   : > { %320 = vst.msk [vmem:[#allocation2 + $0x140] sm:$0xff] %vm279_vm2, %v8803_v53  ;;  %2421 = vmatpush.msra.mxu1 %v2267_v22  ;;  %8378 = vmatpush.msrb.mxu3 %v2267_v22 }
  0x37   : > { %1922 = vperm.xlu2 %8393, %v1744_v24   ;;  %321 = vst.msk [vmem:[#allocation2 + $0x148] sm:$0xff] %vm279_vm2, %v8803_v53 }
  0x38   : > { %7905 = vmatmul.msk.f32.gmra.mxu0 %vm391_vm1, %v339_v25  ;;  %322 = vst.msk [vmem:[#allocation2 + $0x150] sm:$0xff] %vm279_vm2, %v8803_v53 }
  0x39   : > { %323 = vst.msk [vmem:[#allocation2 + $0x158] sm:$0xff] %vm279_vm2, %v8803_v53 }
  0x3a   : > { %324 = vst.msk [vmem:[#allocation2 + $0x160] sm:$0xff] %vm279_vm2, %v8803_v53 }
  0x3b   : > { %325 = vst.msk [vmem:[#allocation2 + $0x168] sm:$0xff] %vm279_vm2, %v8803_v53 }
  0x3c   : > { %326 = vst.msk [vmem:[#allocation2 + $0x170] sm:$0xff] %vm279_vm2, %v8803_v53 }
  0x3d   : > { %1927 = vperm.xlu1 %8392, %v1745_v26   ;;  %1802 = vperm.xlu0 %8391, %v1720_v27   ;;  %327 = vst.msk [vmem:[#allocation2 + $0x178] sm:$0xff] %vm279_vm2, %v8803_v53  ;;  %v352_v27 = vld [vmem:[%s8870_s14 + $0x90] sm:$0xff] }
  0x3e   : > { %328 = vst.msk [vmem:[#allocation2 + $0x180] sm:$0xff] %vm279_vm2, %v8803_v53 }
  0x3f   : > { %1807 = vperm.xlu2 %8393, %v1721_v28   ;;  %329 = vst.msk [vmem:[#allocation2 + $0x188] sm:$0xff] %vm279_vm2, %v8803_v53 }
  0x40   : > { %7906 = vmatmul.msk.f32.gmra.mxu0 %vm391_vm1, %v340_v29  ;;  %330 = vst.msk [vmem:[#allocation2 + $0x190] sm:$0xff] %vm279_vm2, %v8803_v53  ;;  %v2181_v29 = vld [vmem:[%s12484_s2 + $0x30] sm:$0xff] }
  0x41   : > { %331 = vst.msk [vmem:[#allocation2 + $0x198] sm:$0xff] %vm279_vm2, %v8803_v53 }
  0x45   : > { %1812 = vperm.xlu1 %8392, %v1722_v30   ;;  %1932 = vperm.xlu0 %8391, %v1746_v31   ;;  %v2180_v30 = vld [vmem:[%s12484_s2 + $0x28] sm:$0xff] }
  0x47   : > { %1937 = vperm.xlu2 %8393, %v1747_v32   ;;  %v2182_v32 = vld [vmem:[%s12484_s2 + $0x38] sm:$0xff] }
  0x48   : > { %7907 = vmatmul.msk.f32.gmra.mxu0 %vm391_vm1, %v341_v33  ;;  %v384_v33 = vld [vmem:[%s8870_s14 + $0x190] sm:$0xff] }
  0x49   : > { %7950 = vmatmul.msk.f32.vlgmr.msra.gmra.mxu3 %vm391_vm1, %v384_v33 }
  0x4d   : > { %1942 = vperm.xlu1 %8392, %v1748_v34   ;;  %1817 = vperm.xlu0 %8391, %v1723_v35  }
  0x4f   : > { %1822 = vperm.xlu2 %8393, %v1724_v36  }
  0x50   : > { %7908 = vmatmul.msk.f32.gmra.mxu0 %vm391_vm1, %v342_v37 }
  0x55   : > { %1827 = vperm.xlu1 %8392, %v1725_v38   ;;  %1947 = vperm.xlu0 %8391, %v1749_v39  }
  0x57   : > { %1952 = vperm.xlu2 %8393, %v1750_v40   ;;  %v353_v40 = vld [vmem:[%s8870_s14 + $0x98] sm:$0xff] }
  0x58   : > { %7909 = vmatmul.msk.f32.gmra.mxu0 %vm391_vm1, %v343_v41 }
  0x5d   : > { %1957 = vperm.xlu1 %8392, %v1751_v42   ;;  %1832 = vperm.xlu0 %8391, %v1726_v43   ;;  %v2184_v43 = vld [vmem:[%s12484_s2 + $0x48] sm:$0xff] }
  0x5f   : > { %1837 = vperm.xlu2 %8393, %v1727_v44   ;;  %v2183_v44 = vld [vmem:[%s12484_s2 + $0x40] sm:$0xff] }
  0x60   : > { %7910 = vmatmul.msk.f32.gmra.mxu0 %vm391_vm1, %v344_v45 }
  0x65   : > { %1842 = vperm.xlu1 %8392, %v1728_v46   ;;  %1962 = vperm.xlu0 %8391, %v1752_v47  }
  0x67   : > { %1967 = vperm.xlu2 %8393, %v1753_v48  }
  0x68   : > { %7911 = vmatmul.msk.f32.gmra.mxu0 %vm391_vm1, %v345_v49 }
  0x6d   : > { %1972 = vperm.xlu1 %8392, %v1754_v50   ;;  %1847 = vperm.xlu0 %8391, %v1729_v51   ;;  %v2185_v50 = vld [vmem:[%s12484_s2 + $0x50] sm:$0xff]  ;;  %v385_v51 = vld [vmem:[%s8870_s14 + $0x198] sm:$0x3f] }
  0x6e   : > { %7951 = vmatmul.msk.f32.gmra.mxu3 %vm391_vm1, %v385_v51 }
  0x6f   : > { %1852 = vperm.xlu2 %8393, %v1730_v52  }
  0x70   : > { %7912 = vmatmul.msk.f32.gmra.mxu0 %vm391_vm1, %v346_v54 }
  0x75   : > { %1857 = vperm.xlu1 %8392, %v1731_v55   ;;  %1977 = vperm.xlu0 %8391, %v1755_v56  }
  0x77   : > { %1982 = vperm.xlu2 %8393, %v1756_v57  }
  0x78   : > { %7913 = vmatmul.msk.f32.gmra.mxu0 %vm391_vm1, %v347_v58 }
  0x7d   : > { %1987 = vperm.xlu1 %8392, %v1757_v59   ;;  %1862 = vperm.xlu0 %8391, %v1732_v60  }
  0x7f   : > { %1867 = vperm.xlu2 %8393, %v1733_v61   ;;  %v1768_v45 = vpop.permute.xlu0 %1767  ;;  %v9226_v52 = vpop.permute.xlu1 %1877 }
  0x80   : > { %7914 = vmatmul.msk.f32.gmra.mxu0 %vm391_vm1, %v348_v62 }
  0x85   : > { %1997 = vperm.xlu1 %8392, %v1759_v63   ;;  %1992 = vperm.xlu0 %8391, %v1758_v0   ;;  %v354_v63 = vld [vmem:[%s8870_s14 + $0xa0] sm:$0xff] }
  0x87   : > { %2002 = vperm.xlu2 %8393, %v1760_v1  }
  0x88   : > { %7915 = vmatmul.msk.f32.gmra.mxu0 %vm391_vm1, %v349_v2 }
  0x8d   : > { %2012 = vperm.xlu1 %8392, %v1762_v3   ;;  %2007 = vperm.xlu0 %8391, %v1761_v4   ;;  %v569_v7 = vpop.f32.mrf.mxu0  ;;  %v2187_v3 = vld [vmem:[%s12484_s2 + $0x60] sm:$0xff]  ;;  %v2186_v4 = vld [vmem:[%s12484_s2 + $0x58] sm:$0xff] }
  0x8e   : > { %v9123_v9 = vadd.f32 %v9111_v6, %v569_v7 }
  0x8f   : > { %2017 = vperm.xlu2 %8393, %v1763_v5   ;;  %v1773_v5 = vpop.permute.xlu2 %1772 }
  0x90   : > { %v725_v12 = vsub.f32 0.0, %v9123_v9  ;;  %7916 = vmatmul.msk.f32.gmra.mxu0 %vm391_vm1, %v350_v8 }
  0x92   : > { %v777_v14 = vmul.f32 1.442695, %v725_v12  ;;  %v2188_v12 = vld [vmem:[%s12484_s2 + $0x68] sm:$0xff] }
  0x94   : > { %8396 = vpow2.f32 %v777_v14 }
  0x95   : > { %7411 = vperm.xlu1 %8392, %v2175_v10   ;;  %2022 = vperm.xlu0 %8391, %v1764_v11   ;;  %v572_v15 = vpop.f32.mrf.mxu0 }
  0x96   : > { %v9156_v17 = vadd.f32 %v9111_v6, %v572_v15 }
  0x97   : > { %7416 = vperm.xlu2 %8393, %v2176_v13   ;;  %v9252_v13 = vpop.permute.xlu0 %1872 }
  0x98   : > { %v726_v20 = vsub.f32 0.0, %v9156_v17  ;;  %7917 = vmatmul.msk.f32.gmra.mxu0 %vm391_vm1, %v351_v16 }
  0x9a   : > { %v8397_v23 = vpop.eup %8396  ;;  %v779_v24 = vmul.f32 1.442695, %v726_v20 }
  0x9b   : > { %v881_v25 = vadd.f32 1.0, %v8397_v23 }
  0x9c   : > { %8398 = vpow2.f32 %v779_v24 }
  0x9d   : > { %7426 = vperm.xlu1 %8392, %v2178_v18   ;;  %7421 = vperm.xlu0 %8391, %v2177_v19   ;;  %8400 = vrcp.f32 %v881_v25  ;;  %v575_v26 = vpop.f32.mrf.mxu0  ;;  %v944_v46 = vand.u32 2147483648, %v881_v25  ;;  %v942_v48 = vand.u32 2147483647, %v881_v25  ;;  %vm938_vm4 = vweird.f32 %v881_v25  ;;  %v9256_v19 = vpop.permute.xlu1 %1892 }
  0x9e   : > { %v9190_v28 = vadd.f32 %v9111_v6, %v575_v26  ;;  %v355_v26 = vld [vmem:[%s8870_s14 + $0xa8] sm:$0xff] }
  0x9f   : > { %7431 = vperm.xlu2 %8393, %v2179_v21   ;;  %v945_v57 = vor.u32 1.1754944e-38, %v944_v46  ;;  %vm943_vm6 = vcmp.eq.f32.partialorder %v942_v48, 8.507059e+37 }
  0xa0   : > { %v727_v31 = vsub.f32 0.0, %v9190_v28  ;;  %7918 = vmatmul.msk.f32.gmra.mxu0 %vm391_vm1, %v352_v27 }
  0xa2   : > { %v8399_v34 = vpop.eup %8398  ;;  %v781_v35 = vmul.f32 1.442695, %v727_v31  ;;  %v2190_v31 = vld [vmem:[%s12484_s2 + $0x78] sm:$0xff] }
  0xa3   : > { %v8401_v36 = vpop.eup %8400  ;;  %v9207_v37 = vadd.f32 1.0, %v8399_v34 }
  0xa4   : > { %v934_v38 = vmul.f32 %v8401_v36, %v881_v25  ;;  %8402 = vpow2.f32 %v781_v35  ;;  %vm939_vm3 = vweird.f32 %v8401_v36 }
  0xa5   : > { %7441 = vperm.xlu1 %8392, %v2181_v29   ;;  %7436 = vperm.xlu0 %8391, %v2180_v30   ;;  %8404 = vrcp.f32 %v9207_v37  ;;  %v578_v39 = vpop.f32.mrf.mxu0  ;;  %vm940_vm5 = vmor %vm938_vm4, %vm939_vm3  ;;  %v956_v7 = vand.u32 2147483647, %v9207_v37  ;;  %v958_v8 = vand.u32 2147483648, %v9207_v37  ;;  %vm952_vm8 = vweird.f32 %v9207_v37 }
  0xa6   : > { %v935_v41 = vsub.f32 1.0, %v934_v38  ;;  %v9212_v42 = vadd.f32 %v9111_v6, %v578_v39  ;;  %v9280_v38 = vpop.permute.xlu2 %1882 }
  0xa7   : > { %7446 = vperm.xlu2 %8393, %v2182_v32   ;;  %v959_v20 = vor.u32 1.1754944e-38, %v958_v8  ;;  %vm957_vm10 = vcmp.eq.f32.partialorder %v956_v7, 8.507059e+37  ;;  %v2189_v32 = vld [vmem:[%s12484_s2 + $0x70] sm:$0xff] }
  0xa8   : > { %v936_v47 = vmul.f32 %v8401_v36, %v935_v41  ;;  %v728_v49 = vsub.f32 0.0, %v9212_v42  ;;  %7919 = vmatmul.msk.f32.gmra.mxu0 %vm391_vm1, %v353_v40 }
  0xaa   : > { %v8403_v53 = vpop.eup %8402  ;;  %v937_v54 = vadd.f32 %v8401_v36, %v936_v47  ;;  %v783_v55 = vmul.f32 1.442695, %v728_v49 }
  0xab   : > { %v8405_v56 = vpop.eup %8404  ;;  %v9230_v58 = vadd.f32 1.0, %v8403_v53 }
  0xac   : > { %v941_v59 = vsel %vm940_vm5, %v8401_v36, %v937_v54  ;;  %v948_v60 = vmul.f32 %v8405_v56, %v9207_v37  ;;  %8406 = vpow2.f32 %v783_v55  ;;  %vm953_vm7 = vweird.f32 %v8405_v56  ;;  %v2191_v37 = vld [vmem:[%s12484_s2 + $0x80] sm:$0xff]  ;;  %v356_v54 = vld [vmem:[%s8870_s14 + $0xb0] sm:$0xff] }
  0xad   : > { %7456 = vperm.xlu1 %8392, %v2184_v43   ;;  %7451 = vperm.xlu0 %8391, %v2183_v44   ;;  %v946_v61 = vsel %vm943_vm6, %v945_v57, %v941_v59  ;;  %8408 = vrcp.f32 %v9230_v58  ;;  %v581_v62 = vpop.f32.mrf.mxu0  ;;  %vm954_vm9 = vmor %vm952_vm8, %vm953_vm7  ;;  %v970_v33 = vand.u32 2147483647, %v9230_v58  ;;  %v972_v34 = vand.u32 2147483648, %v9230_v58  ;;  %v2192_v59 = vld [vmem:[%s12484_s2 + $0x88] sm:$0xff] }
  0xae   : > { %v1661_v0 = vmul.f32 %v946_v61, %v9123_v9  ;;  %v949_v1 = vsub.f32 1.0, %v948_v60  ;;  %v9237_v2 = vadd.f32 %v9111_v6, %v581_v62  ;;  %vm966_vm12 = vweird.f32 %v9230_v58  ;;  %v9313_v8 = vpop.permute.xlu2 %1887 }
  0xaf   : > { %7461 = vperm.xlu2 %8393, %v2185_v50   ;;  %v973_v46 = vor.u32 1.1754944e-38, %v972_v34  ;;  %vm971_vm14 = vcmp.eq.f32.partialorder %v970_v33, 8.507059e+37  ;;  %v1778_v50 = vpop.permute.xlu1 %1777 }
  0xb0   : > { %v2025_v10 = vmul.f32 %v1768_v45, %v1661_v0  ;;  %v950_v11 = vmul.f32 %v8405_v56, %v949_v1  ;;  %v729_v9 = vsub.f32 0.0, %v9237_v2  ;;  %7920 = vmatmul.msk.f32.gmra.mxu0 %vm391_vm1, %v354_v63  ;;  %v9285_v45 = vpop.permute.xlu0 %1897  ;;  %v2194_v0 = vld [vmem:[%s12484_s2 + $0x98] sm:$0xff] }
  0xb2   : > { %v8407_v14 = vpop.eup %8406  ;;  %2077 = vst.msk [vmem:[#allocation2] sm:$0xff] %vm279_vm2, %v2025_v10  ;;  %v951_v15 = vadd.f32 %v8405_v56, %v950_v11  ;;  %v785_v16 = vmul.f32 1.442695, %v729_v9 }
  0xb3   : > { %v8409_v18 = vpop.eup %8408  ;;  %v9258_v21 = vadd.f32 1.0, %v8407_v14 }
  0xb4   : > { %v955_v22 = vsel %vm954_vm9, %v8405_v56, %v951_v15  ;;  %v962_v23 = vmul.f32 %v8409_v18, %v9230_v58  ;;  %8410 = vpow2.f32 %v785_v16  ;;  %vm967_vm11 = vweird.f32 %v8409_v18  ;;  %v2193_v58 = vld [vmem:[%s12484_s2 + $0x90] sm:$0xff] }
  0xb5   : > { %7471 = vperm.xlu1 %8392, %v2187_v3   ;;  %7466 = vperm.xlu0 %8391, %v2186_v4   ;;  %v960_v24 = vsel %vm957_vm10, %v959_v20, %v955_v22  ;;  %8412 = vrcp.f32 %v9258_v21  ;;  %v584_v25 = vpop.f32.mrf.mxu0  ;;  %vm968_vm13 = vmor %vm966_vm12, %vm967_vm11  ;;  %v984_v60 = vand.u32 2147483647, %v9258_v21  ;;  %v986_v61 = vand.u32 2147483648, %v9258_v21 }
  0xb6   : > { %v1662_v27 = vmul.f32 %v960_v24, %v9156_v17  ;;  %v963_v29 = vsub.f32 1.0, %v962_v23  ;;  %v9265_v30 = vadd.f32 %v9111_v6, %v584_v25  ;;  %vm980_vm0 = vweird.f32 %v9258_v21  ;;  %v2196_v23 = vld [vmem:[%s12484_s2 + $0xa8] sm:$0xff]  ;;  %v2195_v24 = vld [vmem:[%s12484_s2 + $0xa0] sm:$0xff] }
  0xb7   : > { %7476 = vperm.xlu2 %8393, %v2188_v12   ;;  %v987_v10 = vor.u32 1.1754944e-38, %v986_v61  ;;  %vm985_vm4 = vcmp.eq.f32.partialorder %v984_v60, 8.507059e+37  ;;  %v1783_v25 = vpop.permute.xlu1 %1782  ;;  %v2200_v60 = vld [vmem:[%s12484_s2 + $0xc8] sm:$0xff] }
  0xb8   : > { %v2026_v35 = vmul.f32 %v1773_v5, %v1662_v27  ;;  %v964_v36 = vmul.f32 %v8409_v18, %v963_v29  ;;  %v730_v17 = vsub.f32 0.0, %v9265_v30  ;;  %7921 = vmatmul.msk.f32.gmra.mxu0 %vm391_vm1, %v355_v26  ;;  %v9319_v14 = vpop.permute.xlu0 %1902 }
  0xb9   : > { %v2221_v39 = vld [vmem:[#allocation2] sm:$0xff] }
  0xba   : > { %v8411_v40 = vpop.eup %8410  ;;  %2078 = vst.msk [vmem:[#allocation2 + $0x8] sm:$0xff] %vm279_vm2, %v2026_v35  ;;  %v965_v41 = vadd.f32 %v8409_v18, %v964_v36  ;;  %v787_v43 = vmul.f32 1.442695, %v730_v17  ;;  %7952 = vmatmul.msk.f32.vlgmr.msra.gmra.mxu1 %vm279_vm2, %v2221_v39 }
  0xbb   : > { %v8413_v44 = vpop.eup %8412  ;;  %v9288_v47 = vadd.f32 1.0, %v8411_v40 }
  0xbc   : > { %v969_v48 = vsel %vm968_vm13, %v8409_v18, %v965_v41  ;;  %v976_v49 = vmul.f32 %v8413_v44, %v9258_v21  ;;  %8414 = vpow2.f32 %v787_v43  ;;  %vm981_vm15 = vweird.f32 %v8413_v44  ;;  %v357_v18 = vld [vmem:[%s8870_s14 + $0xb8] sm:$0xff]  ;;  %v9348_v43 = vpop.permute.xlu2 %1907 }
  0xbd   : > { %7486 = vperm.xlu1 %8392, %v2190_v31   ;;  %7481 = vperm.xlu0 %8391, %v2189_v32   ;;  %v974_v51 = vsel %vm971_vm14, %v973_v46, %v969_v48  ;;  %8416 = vrcp.f32 %v9288_v47  ;;  %v587_v53 = vpop.f32.mrf.mxu0  ;;  %vm982_vm3 = vmor %vm980_vm0, %vm981_vm15  ;;  %v998_v26 = vand.u32 2147483647, %v9288_v47  ;;  %v1000_v27 = vand.u32 2147483648, %v9288_v47  ;;  %v2197_v32 = vld [vmem:[%s12484_s2 + $0xb0] sm:$0xff] }
  0xbe   : > { %v1663_v55 = vmul.f32 %v974_v51, %v9190_v28  ;;  %v977_v56 = vsub.f32 1.0, %v976_v49  ;;  %v9295_v57 = vadd.f32 %v9111_v6, %v587_v53  ;;  %vm994_vm6 = vweird.f32 %v9288_v47  ;;  %v2199_v51 = vld [vmem:[%s12484_s2 + $0xc0] sm:$0xff]  ;;  %v2198_v53 = vld [vmem:[%s12484_s2 + $0xb8] sm:$0xff] }
  0xbf   : > { %7491 = vperm.xlu2 %8393, %v2191_v37   ;;  %v1001_v37 = vor.u32 1.1754944e-38, %v1000_v27  ;;  %vm999_vm8 = vcmp.eq.f32.partialorder %v998_v26, 8.507059e+37  ;;  %v2203_v27 = vld [vmem:[%s12484_s2 + $0xe0] sm:$0xff] }
  0xc0   : > { %v2027_v62 = vmul.f32 %v1778_v50, %v1663_v55  ;;  %v978_v63 = vmul.f32 %v8413_v44, %v977_v56  ;;  %v731_v28 = vsub.f32 0.0, %v9295_v57  ;;  %7922 = vmatmul.msk.f32.gmra.mxu0 %vm391_vm1, %v356_v54  ;;  %v1788_v54 = vpop.permute.xlu0 %1787 }
  0xc1   : > { %v2222_v1 = vld [vmem:[#allocation2 + $0x8] sm:$0xff] }
  0xc2   : > { %v8415_v3 = vpop.eup %8414  ;;  %2079 = vst.msk [vmem:[#allocation2 + $0x10] sm:$0xff] %vm279_vm2, %v2027_v62  ;;  %v979_v4 = vadd.f32 %v8413_v44, %v978_v63  ;;  %v789_v5 = vmul.f32 1.442695, %v731_v28  ;;  %7953 = vmatmul.msk.f32.gmra.mxu1 %vm279_vm2, %v2222_v1 }
  0xc3   : > { %v8417_v7 = vpop.eup %8416  ;;  %v9316_v11 = vadd.f32 1.0, %v8415_v3 }
  0xc4   : > { %v983_v9 = vsel %vm982_vm3, %v8413_v44, %v979_v4  ;;  %v990_v12 = vmul.f32 %v8417_v7, %v9288_v47  ;;  %8418 = vpow2.f32 %v789_v5  ;;  %vm995_vm5 = vweird.f32 %v8417_v7  ;;  %v358_v47 = vld [vmem:[%s8870_s14 + $0xc0] sm:$0xff] }
  0xc5   : > { %7501 = vperm.xlu1 %8392, %v2193_v58   ;;  %7496 = vperm.xlu0 %8391, %v2192_v59   ;;  %v988_v15 = vsel %vm985_vm4, %v987_v10, %v983_v9  ;;  %8420 = vrcp.f32 %v9316_v11  ;;  %v590_v16 = vpop.f32.mrf.mxu0  ;;  %vm996_vm7 = vmor %vm994_vm6, %vm995_vm5  ;;  %v1012_v55 = vand.u32 2147483647, %v9316_v11  ;;  %v1014_v56 = vand.u32 2147483648, %v9316_v11  ;;  %v359_v9 = vld [vmem:[%s8870_s14 + $0xc8] sm:$0xff] }
  0xc6   : > { %v1664_v20 = vmul.f32 %v988_v15, %v9212_v42  ;;  %v991_v21 = vsub.f32 1.0, %v990_v12  ;;  %v9325_v22 = vadd.f32 %v9111_v6, %v590_v16  ;;  %vm1008_vm10 = vweird.f32 %v9316_v11 }
  0xc7   : > { %7506 = vperm.xlu2 %8393, %v2194_v0   ;;  %v1015_v1 = vor.u32 1.1754944e-38, %v1014_v56  ;;  %vm1013_vm12 = vcmp.eq.f32.partialorder %v1012_v55, 8.507059e+37 }
  0xc8   : > { %v2028_v29 = vmul.f32 %v1783_v25, %v1664_v20  ;;  %v992_v31 = vmul.f32 %v8417_v7, %v991_v21  ;;  %v732_v42 = vsub.f32 0.0, %v9325_v22  ;;  %7923 = vmatmul.msk.f32.gmra.mxu0 %vm391_vm1, %v357_v18  ;;  %v2202_v18 = vld [vmem:[%s12484_s2 + $0xd8] sm:$0xff]  ;;  %v2201_v20 = vld [vmem:[%s12484_s2 + $0xd0] sm:$0xff]  ;;  %v1793_v21 = vpop.permute.xlu2 %1792 }
  0xc9   : > { %v2223_v33 = vld [vmem:[#allocation2 + $0x10] sm:$0xff] }
  0xca   : > { %v8419_v34 = vpop.eup %8418  ;;  %2080 = vst.msk [vmem:[#allocation2 + $0x18] sm:$0xff] %vm279_vm2, %v2028_v29  ;;  %v993_v35 = vadd.f32 %v8417_v7, %v992_v31  ;;  %v791_v36 = vmul.f32 1.442695, %v732_v42  ;;  %7954 = vmatmul.msk.f32.gmra.mxu1 %vm279_vm2, %v2223_v33 }
  0xcb   : > { %v8421_v17 = vpop.eup %8420  ;;  %2129 = vst.msk [vmem:[#allocation3] sm:$0xff] %vm279_vm2, %v2028_v29  ;;  %v9345_v39 = vadd.f32 1.0, %v8419_v34 }
  0xcc   : > { %v997_v40 = vsel %vm996_vm7, %v8417_v7, %v993_v35  ;;  %v1004_v41 = vmul.f32 %v8421_v17, %v9316_v11  ;;  %8422 = vpow2.f32 %v791_v36  ;;  %vm1009_vm9 = vweird.f32 %v8421_v17  ;;  %v9377_v7 = vpop.permute.xlu1 %1912 }
  0xcd   : > { %7516 = vperm.xlu1 %8392, %v2196_v23   ;;  %7511 = vperm.xlu0 %8391, %v2195_v24   ;;  %v1002_v44 = vsel %vm999_vm8, %v1001_v37, %v997_v40  ;;  %8424 = vrcp.f32 %v9345_v39  ;;  %v593_v46 = vpop.f32.mrf.mxu0  ;;  %vm1010_vm11 = vmor %vm1008_vm10, %vm1009_vm9  ;;  %v1026_v23 = vand.u32 2147483647, %v9345_v39  ;;  %v1028_v24 = vand.u32 2147483648, %v9345_v39  ;;  %v9406_v37 = vpop.permute.xlu0 %1917 }
  0xce   : > { %v1665_v48 = vmul.f32 %v1002_v44, %v9237_v2  ;;  %v1005_v49 = vsub.f32 1.0, %v1004_v41  ;;  %v9354_v50 = vadd.f32 %v9111_v6, %v593_v46  ;;  %vm1022_vm14 = vweird.f32 %v9345_v39  ;;  %v360_v41 = vld [vmem:[%s8870_s14 + $0xd0] sm:$0xff] }
  0xcf   : > { %7521 = vperm.xlu2 %8393, %v2197_v32   ;;  %v1029_v34 = vor.u32 1.1754944e-38, %v1028_v24  ;;  %vm1027_vm0 = vcmp.eq.f32.partialorder %v1026_v23, 8.507059e+37 }
  0xd0   : > { %v2029_v58 = vmul.f32 %v1788_v54, %v1665_v48  ;;  %v1006_v59 = vmul.f32 %v8421_v17, %v1005_v49  ;;  %v733_v2 = vsub.f32 0.0, %v9354_v50  ;;  %7924 = vmatmul.msk.f32.gmra.mxu0 %vm391_vm1, %v358_v47  ;;  %v2205_v48 = vld [vmem:[%s12484_s2 + $0xf0] sm:$0xff]  ;;  %v2204_v49 = vld [vmem:[%s12484_s2 + $0xe8] sm:$0xff] }
  0xd1   : > { %v2224_v61 = vld [vmem:[#allocation2 + $0x18] sm:$0xff] }
  0xd2   : > { %v8423_v62 = vpop.eup %8422  ;;  %2081 = vst.msk [vmem:[#allocation2 + $0x20] sm:$0xff] %vm279_vm2, %v2029_v58  ;;  %v1007_v63 = vadd.f32 %v8421_v17, %v1006_v59  ;;  %v793_v28 = vmul.f32 1.442695, %v733_v2  ;;  %7955 = vmatmul.msk.f32.gmra.mxu1 %vm279_vm2, %v2224_v61 }
  0xd3   : > { %v8425_v0 = vpop.eup %8424  ;;  %2130 = vst.msk [vmem:[#allocation3 + $0x8] sm:$0xff] %vm279_vm2, %v2029_v58  ;;  %v9374_v3 = vadd.f32 1.0, %v8423_v62  ;;  %v2206_v58 = vld [vmem:[%s12484_s2 + $0xf8] sm:$0xff] }
  0xd4   : > { %v1011_v4 = vsel %vm1010_vm11, %v8421_v17, %v1007_v63  ;;  %v1018_v5 = vmul.f32 %v8425_v0, %v9345_v39  ;;  %8426 = vpow2.f32 %v793_v28  ;;  %vm1023_vm13 = vweird.f32 %v8425_v0 }
  0xd5   : > { %7531 = vperm.xlu1 %8392, %v2199_v51   ;;  %7526 = vperm.xlu0 %8391, %v2198_v53   ;;  %v1016_v10 = vsel %vm1013_vm12, %v1015_v1, %v1011_v4  ;;  %8428 = vrcp.f32 %v9374_v3  ;;  %v596_v11 = vpop.f32.mrf.mxu0  ;;  %vm1024_vm15 = vmor %vm1022_vm14, %vm1023_vm13  ;;  %v1798_v51 = vpop.permute.xlu1 %1797  ;;  %v1040_v53 = vand.u32 2147483647, %v9374_v3  ;;  %v1042_v54 = vand.u32 2147483648, %v9374_v3 }
  0xd6   : > { %v1666_v12 = vmul.f32 %v1016_v10, %v9265_v30  ;;  %v1019_v15 = vsub.f32 1.0, %v1018_v5  ;;  %v9383_v16 = vadd.f32 %v9111_v6, %v596_v11  ;;  %vm1036_vm4 = vweird.f32 %v9374_v3  ;;  %v361_v10 = vld [vmem:[%s8870_s14 + $0xd8] sm:$0xff] }
  0xd7   : > { %7536 = vperm.xlu2 %8393, %v2200_v60   ;;  %v1043_v63 = vor.u32 1.1754944e-38, %v1042_v54  ;;  %vm1041_vm6 = vcmp.eq.f32.partialorder %v1040_v53, 8.507059e+37 }
  0xd8   : > { %v2030_v25 = vmul.f32 %v1793_v21, %v1666_v12  ;;  %v1020_v26 = vmul.f32 %v8425_v0, %v1019_v15  ;;  %v734_v30 = vsub.f32 0.0, %v9383_v16  ;;  %7925 = vmatmul.msk.f32.gmra.mxu0 %vm391_vm1, %v359_v9  ;;  %v2208_v15 = vld [vmem:[%s12484_s2 + $0x108] sm:$0xff] }
  0xd9   : > { %v2225_v29 = vld [vmem:[#allocation2 + $0x20] sm:$0xff] }
  0xda   : > { %v8427_v31 = vpop.eup %8426  ;;  %2082 = vst.msk [vmem:[#allocation2 + $0x28] sm:$0xff] %vm279_vm2, %v2030_v25  ;;  %v1021_v42 = vadd.f32 %v8425_v0, %v1020_v26  ;;  %v795_v32 = vmul.f32 1.442695, %v734_v30  ;;  %7956 = vmatmul.msk.f32.gmra.mxu1 %vm279_vm2, %v2225_v29  ;;  %v2209_v26 = vld [vmem:[%s12484_s2 + $0x110] sm:$0xff] }
  0xdb   : > { %v8429_v33 = vpop.eup %8428  ;;  %2131 = vst.msk [vmem:[#allocation3 + $0x10] sm:$0xff] %vm279_vm2, %v2030_v25  ;;  %v9403_v35 = vadd.f32 1.0, %v8427_v31 }
  0xdc   : > { %v1025_v36 = vsel %vm1024_vm15, %v8425_v0, %v1021_v42  ;;  %v1032_v17 = vmul.f32 %v8429_v33, %v9374_v3  ;;  %8430 = vpow2.f32 %v795_v32  ;;  %vm1037_vm3 = vweird.f32 %v8429_v33  ;;  %v9434_v0 = vpop.permute.xlu2 %1922 }
  0xdd   : > { %7546 = vperm.xlu1 %8392, %v2202_v18   ;;  %7541 = vperm.xlu0 %8391, %v2201_v20   ;;  %v1030_v39 = vsel %vm1027_vm0, %v1029_v34, %v1025_v36  ;;  %8432 = vrcp.f32 %v9403_v35  ;;  %v599_v40 = vpop.f32.mrf.mxu0  ;;  %vm1038_vm5 = vmor %vm1036_vm4, %vm1037_vm3  ;;  %v2207_v18 = vld [vmem:[%s12484_s2 + $0x100] sm:$0xff]  ;;  %v1803_v20 = vpop.permute.xlu0 %1802  ;;  %v1054_v21 = vand.u32 2147483647, %v9403_v35  ;;  %v1056_v23 = vand.u32 2147483648, %v9403_v35 }
  0xde   : > { %v1667_v44 = vmul.f32 %v1030_v39, %v9295_v57  ;;  %v1033_v46 = vsub.f32 1.0, %v1032_v17  ;;  %v9412_v47 = vadd.f32 %v9111_v6, %v599_v40  ;;  %vm1050_vm8 = vweird.f32 %v9403_v35  ;;  %v9464_v17 = vpop.permute.xlu1 %1927  ;;  %v362_v40 = vld [vmem:[%s8870_s14 + $0xe0] sm:$0xff] }
  0xdf   : > { %7551 = vperm.xlu2 %8393, %v2203_v27   ;;  %v1057_v32 = vor.u32 1.1754944e-38, %v1056_v23  ;;  %vm1055_vm10 = vcmp.eq.f32.partialorder %v1054_v21, 8.507059e+37 }
  0xe0   : > { %v2031_v55 = vmul.f32 %v1798_v51, %v1667_v44  ;;  %v1034_v56 = vmul.f32 %v8429_v33, %v1033_v46  ;;  %v735_v57 = vsub.f32 0.0, %v9412_v47  ;;  %7926 = vmatmul.msk.f32.gmra.mxu0 %vm391_vm1, %v360_v41  ;;  %v2210_v51 = vld [vmem:[%s12484_s2 + $0x118] sm:$0xff] }
  0xe1   : > { %v2226_v59 = vld [vmem:[#allocation2 + $0x28] sm:$0xff] }
  0xe2   : > { %v8431_v2 = vpop.eup %8430  ;;  %2083 = vst.msk [vmem:[#allocation2 + $0x30] sm:$0xff] %vm279_vm2, %v2031_v55  ;;  %v1035_v60 = vadd.f32 %v8429_v33, %v1034_v56  ;;  %v797_v61 = vmul.f32 1.442695, %v735_v57  ;;  %7957 = vmatmul.msk.f32.gmra.mxu1 %vm279_vm2, %v2226_v59  ;;  %v2212_v57 = vld [vmem:[%s12484_s2 + $0x128] sm:$0xff] }
  0xe3   : > { %v8433_v62 = vpop.eup %8432  ;;  %2132 = vst.msk [vmem:[#allocation3 + $0x18] sm:$0xff] %vm279_vm2, %v2031_v55  ;;  %v9432_v28 = vadd.f32 1.0, %v8431_v2 }
  0xe4   : > { %v1039_v1 = vsel %vm1038_vm5, %v8429_v33, %v1035_v60  ;;  %v1046_v4 = vmul.f32 %v8433_v62, %v9403_v35  ;;  %8434 = vpow2.f32 %v797_v61  ;;  %vm1051_vm7 = vweird.f32 %v8433_v62  ;;  %v1808_v41 = vpop.permute.xlu2 %1807 }
  0xe5   : > { %7561 = vperm.xlu1 %8392, %v2205_v48   ;;  %7556 = vperm.xlu0 %8391, %v2204_v49   ;;  %v1044_v3 = vsel %vm1041_vm6, %v1043_v63, %v1039_v1  ;;  %8436 = vrcp.f32 %v9432_v28  ;;  %v602_v5 = vpop.f32.mrf.mxu0  ;;  %vm1052_vm9 = vmor %vm1050_vm8, %vm1051_vm7  ;;  %v2211_v49 = vld [vmem:[%s12484_s2 + $0x120] sm:$0xff]  ;;  %v1068_v53 = vand.u32 2147483647, %v9432_v28  ;;  %v1070_v54 = vand.u32 2147483648, %v9432_v28 }
  0xe6   : > { %v1668_v11 = vmul.f32 %v1044_v3, %v9325_v22  ;;  %v1047_v9 = vsub.f32 1.0, %v1046_v4  ;;  %v9441_v12 = vadd.f32 %v9111_v6, %v602_v5  ;;  %vm1064_vm12 = vweird.f32 %v9432_v28  ;;  %v9493_v3 = vpop.permute.xlu0 %1932  ;;  %v1813_v21 = vpop.permute.xlu1 %1812 }
  0xe7   : > { %7566 = vperm.xlu2 %8393, %v2206_v58   ;;  %vm1069_vm14 = vcmp.eq.f32.partialorder %v1068_v53, 8.507059e+37  ;;  %v2216_v53 = vld [vmem:[%s12484_s2 + $0x148] sm:$0xff] }
  0xe8   : > { %v2032_v24 = vmul.f32 %v1803_v20, %v1668_v11  ;;  %v1048_v25 = vmul.f32 %v8433_v62, %v1047_v9  ;;  %v736_v22 = vsub.f32 0.0, %v9441_v12  ;;  %7927 = vmatmul.msk.f32.gmra.mxu0 %vm391_vm1, %v361_v10  ;;  %v363_v10 = vld [vmem:[%s8870_s14 + $0xe8] sm:$0xff]  ;;  %v2213_v20 = vld [vmem:[%s12484_s2 + $0x130] sm:$0xff] }
  0xe9   : > { %v2227_v30 = vld [vmem:[#allocation2 + $0x30] sm:$0xff] }
  0xea   : > { %v8435_v27 = vpop.eup %8434  ;;  %2084 = vst.msk [vmem:[#allocation2 + $0x38] sm:$0xff] %vm279_vm2, %v2032_v24  ;;  %v1049_v29 = vadd.f32 %v8433_v62, %v1048_v25  ;;  %v799_v31 = vmul.f32 1.442695, %v736_v22  ;;  %7958 = vmatmul.msk.f32.gmra.mxu1 %vm279_vm2, %v2227_v30  ;;  %v2215_v30 = vld [vmem:[%s12484_s2 + $0x140] sm:$0xff] }
  0xeb   : > { %v8437_v42 = vpop.eup %8436  ;;  %2133 = vst.msk [vmem:[#allocation3 + $0x20] sm:$0xff] %vm279_vm2, %v2032_v24  ;;  %v9461_v33 = vadd.f32 1.0, %v8435_v27 }
  0xec   : > { %v1053_v34 = vsel %vm1052_vm9, %v8433_v62, %v1049_v29  ;;  %v1060_v36 = vmul.f32 %v8437_v42, %v9432_v28  ;;  %8438 = vpow2.f32 %v799_v31  ;;  %vm1065_vm11 = vweird.f32 %v8437_v42  ;;  %v9509_v25 = vpop.permute.xlu2 %1937 }
  0xed   : > { %7576 = vperm.xlu1 %8392, %v2208_v15   ;;  %7571 = vperm.xlu0 %8391, %v2207_v18   ;;  %v1058_v35 = vsel %vm1055_vm10, %v1057_v32, %v1053_v34  ;;  %8440 = vrcp.f32 %v9461_v33  ;;  %v605_v39 = vpop.f32.mrf.mxu0  ;;  %vm1066_vm13 = vmor %vm1064_vm12, %vm1065_vm11  ;;  %v1071_v62 = vor.u32 1.1754944e-38, %v1070_v54  ;;  %v2214_v18 = vld [vmem:[%s12484_s2 + $0x138] sm:$0xff]  ;;  %v1082_v23 = vand.u32 2147483647, %v9461_v33 }
  0xee   : > { %v1669_v44 = vmul.f32 %v1058_v35, %v9354_v50  ;;  %v1061_v46 = vsub.f32 1.0, %v1060_v36  ;;  %v9470_v48 = vadd.f32 %v9111_v6, %v605_v39  ;;  %v1084_v24 = vand.u32 2147483648, %v9461_v33  ;;  %v1818_v54 = vpop.permute.xlu0 %1817 }
  0xef   : > { %7581 = vperm.xlu2 %8393, %v2209_v26   ;;  %vm1078_vm0 = vweird.f32 %v9461_v33  ;;  %vm1083_vm4 = vcmp.eq.f32.partialorder %v1082_v23, 8.507059e+37 }
  0xf0   : > { %v2033_v55 = vmul.f32 %v1808_v41, %v1669_v44  ;;  %v1062_v56 = vmul.f32 %v8437_v42, %v1061_v46  ;;  %v737_v50 = vsub.f32 0.0, %v9470_v48  ;;  %7928 = vmatmul.msk.f32.gmra.mxu0 %vm391_vm1, %v362_v40  ;;  %v1085_v34 = vor.u32 1.1754944e-38, %v1084_v24  ;;  %v364_v41 = vld [vmem:[%s8870_s14 + $0xf0] sm:$0xff]  ;;  %v2220_v24 = vld [vmem:[%s12484_s2 + $0x168] sm:$0xff] }
  0xf1   : > { %v2228_v58 = vld [vmem:[#allocation2 + $0x38] sm:$0xff] }
  0xf2   : > { %v8439_v59 = vpop.eup %8438  ;;  %2085 = vst.msk [vmem:[#allocation2 + $0x40] sm:$0xff] %vm279_vm2, %v2033_v55  ;;  %v1063_v2 = vadd.f32 %v8437_v42, %v1062_v56  ;;  %v801_v60 = vmul.f32 1.442695, %v737_v50  ;;  %7959 = vmatmul.msk.f32.gmra.mxu1 %vm279_vm2, %v2228_v58 }
  0xf3   : > { %v8441_v61 = vpop.eup %8440  ;;  %2134 = vst.msk [vmem:[#allocation3 + $0x28] sm:$0xff] %vm279_vm2, %v2033_v55  ;;  %v9490_v63 = vadd.f32 1.0, %v8439_v59 }
  0xf4   : > { %v1067_v1 = vsel %vm1066_vm13, %v8437_v42, %v1063_v2  ;;  %v1074_v4 = vmul.f32 %v8441_v61, %v9461_v33  ;;  %8442 = vpow2.f32 %v801_v60  ;;  %vm1079_vm15 = vweird.f32 %v8441_v61  ;;  %v1823_v2 = vpop.permute.xlu2 %1822 }
  0xf5   : > { %7591 = vperm.xlu1 %8392, %v2211_v49   ;;  %7586 = vperm.xlu0 %8391, %v2210_v51   ;;  %v1072_v28 = vsel %vm1069_vm14, %v1071_v62, %v1067_v1  ;;  %8444 = vrcp.f32 %v9490_v63  ;;  %v608_v5 = vpop.f32.mrf.mxu0  ;;  %vm1080_vm3 = vmor %vm1078_vm0, %vm1079_vm15  ;;  %v2217_v51 = vld [vmem:[%s12484_s2 + $0x150] sm:$0xff]  ;;  %v1096_v55 = vand.u32 2147483647, %v9490_v63  ;;  %v1098_v56 = vand.u32 2147483648, %v9490_v63 }
  0xf6   : > { %v1670_v11 = vmul.f32 %v1072_v28, %v9383_v16  ;;  %v1075_v9 = vsub.f32 1.0, %v1074_v4  ;;  %v9499_v15 = vadd.f32 %v9111_v6, %v608_v5  ;;  %vm1092_vm6 = vweird.f32 %v9490_v63 }
  0xf7   : > { %7596 = vperm.xlu2 %8393, %v2212_v57   ;;  %v1099_v1 = vor.u32 1.1754944e-38, %v1098_v56  ;;  %vm1097_vm8 = vcmp.eq.f32.partialorder %v1096_v55, 8.507059e+37 }
  0xf8   : > { %v2034_v16 = vmul.f32 %v1813_v21, %v1670_v11  ;;  %v1076_v22 = vmul.f32 %v8441_v61, %v1075_v9  ;;  %v738_v26 = vsub.f32 0.0, %v9499_v15  ;;  %7929 = vmatmul.msk.f32.gmra.mxu0 %vm391_vm1, %v363_v10  ;;  %v9551_v10 = vpop.permute.xlu1 %1942  ;;  %v365_v9 = vld [vmem:[%s8870_s14 + $0xf8] sm:$0xff]  ;;  %v9559_v21 = vld [vmem:[%s12486_s4] ss:$0 sm:$0xff] }
  0xf9   : > { %v2229_v27 = vld [vmem:[#allocation2 + $0x40] sm:$0xff] }
  0xfa   : > { %v8443_v29 = vpop.eup %8442  ;;  %2086 = vst.msk [vmem:[#allocation2 + $0x48] sm:$0xff] %vm279_vm2, %v2034_v16  ;;  %v1077_v31 = vadd.f32 %v8441_v61, %v1076_v22  ;;  %v803_v42 = vmul.f32 1.442695, %v738_v26  ;;  %7960 = vmatmul.msk.f32.gmra.mxu1 %vm279_vm2, %v2229_v27 }
  0xfb   : > { %v8445_v32 = vpop.eup %8444  ;;  %2135 = vst.msk [vmem:[#allocation3 + $0x30] sm:$0xff] %vm279_vm2, %v2034_v16  ;;  %v9521_v36 = vadd.f32 1.0, %v8443_v29  ;;  %v2219_v16 = vld [vmem:[%s12484_s2 + $0x160] sm:$0xff] }
  0xfc   : > { %v1081_v35 = vsel %vm1080_vm3, %v8441_v61, %v1077_v31  ;;  %v1088_v39 = vmul.f32 %v8445_v32, %v9490_v63  ;;  %8446 = vpow2.f32 %v803_v42  ;;  %vm1093_vm5 = vweird.f32 %v8445_v32  ;;  %v9574_v42 = vpop.permute.xlu0 %1947 }
  0xfd   : > { %7606 = vperm.xlu1 %8392, %v2214_v18   ;;  %7601 = vperm.xlu0 %8391, %v2213_v20   ;;  %v1086_v40 = vsel %vm1083_vm4, %v1085_v34, %v1081_v35  ;;  %8448 = vrcp.f32 %v9521_v36  ;;  %v611_v33 = vpop.f32.mrf.mxu0  ;;  %vm1094_vm7 = vmor %vm1092_vm6, %vm1093_vm5  ;;  %v1110_v22 = vand.u32 2147483647, %v9521_v36  ;;  %vm1106_vm10 = vweird.f32 %v9521_v36 }
  0xfe   : > { %v1671_v44 = vmul.f32 %v1086_v40, %v9412_v47  ;;  %v1089_v46 = vsub.f32 1.0, %v1088_v39  ;;  %v9528_v49 = vadd.f32 %v9111_v6, %v611_v33  ;;  %v2218_v6 = vld [vmem:[%s12484_s2 + $0x158] sm:$0xff]  ;;  %v9583_v33 = vpop.permute.xlu2 %1952 }
  0xff   : > { %7611 = vperm.xlu2 %8393, %v2215_v30   ;;  %vm1111_vm12 = vcmp.eq.f32.partialorder %v1110_v22, 8.507059e+37 }
 0x100   : > { %v2035_v50 = vmul.f32 %v1818_v54, %v1671_v44  ;;  %v1090_v57 = vmul.f32 %v8445_v32, %v1089_v46  ;;  %v739_v47 = vsub.f32 0.0, %v9528_v49  ;;  %7930 = vmatmul.msk.f32.gmra.mxu0 %vm391_vm1, %v364_v41  ;;  %v1828_v56 = vpop.permute.xlu1 %1827 }
 0x101   : > { %v2230_v58 = vld [vmem:[#allocation2 + $0x48] sm:$0xff] }
 0x102   : > { %v8447_v59 = vpop.eup %8446  ;;  %2087 = vst.msk [vmem:[#allocation2 + $0x50] sm:$0xff] %vm279_vm2, %v2035_v50  ;;  %v1091_v60 = vadd.f32 %v8445_v32, %v1090_v57  ;;  %v805_v61 = vmul.f32 1.442695, %v739_v47  ;;  %7961 = vmatmul.msk.f32.gmra.mxu1 %vm279_vm2, %v2230_v58 }
 0x103   : > { %v8449_v62 = vpop.eup %8448  ;;  %2136 = vst.msk [vmem:[#allocation3 + $0x38] sm:$0xff] %vm279_vm2, %v2035_v50  ;;  %v9548_v4 = vadd.f32 1.0, %v8447_v59 }
 0x104   : > { %v1095_v28 = vsel %vm1094_vm7, %v8445_v32, %v1091_v60  ;;  %v1102_v5 = vmul.f32 %v8449_v62, %v9521_v36  ;;  %8450 = vpow2.f32 %v805_v61  ;;  %vm1107_vm9 = vweird.f32 %v8449_v62 }
 0x105   : > { %7621 = vperm.xlu1 %8392, %v2217_v51   ;;  %7616 = vperm.xlu0 %8391, %v2216_v53   ;;  %v1100_v63 = vsel %vm1097_vm8, %v1099_v1, %v1095_v28  ;;  %8452 = vrcp.f32 %v9548_v4  ;;  %v614_v11 = vpop.f32.mrf.mxu0  ;;  %vm1108_vm11 = vmor %vm1106_vm10, %vm1107_vm9  ;;  %v366_v51 = vld [vmem:[%s8870_s14 + $0x100] sm:$0xff]  ;;  %v1124_v50 = vand.u32 2147483647, %v9548_v4  ;;  %v1126_v57 = vand.u32 2147483648, %v9548_v4  ;;  %v1833_v28 = vpop.permute.xlu0 %1832 }
 0x106   : > { %v1672_v18 = vmul.f32 %v1100_v63, %v9441_v12  ;;  %v1103_v20 = vsub.f32 1.0, %v1102_v5  ;;  %v9562_v23 = vadd.f32 %v9559_v21, %v614_v11  ;;  %v1112_v12 = vand.u32 2147483648, %v9521_v36 }
 0x107   : > { %7626 = vperm.xlu2 %8393, %v2218_v6   ;;  %vm1120_vm14 = vweird.f32 %v9548_v4  ;;  %vm1125_vm0 = vcmp.eq.f32.partialorder %v1124_v50, 8.507059e+37 }
 0x108   : > { %v2036_v26 = vmul.f32 %v1823_v2, %v1672_v18  ;;  %v1104_v30 = vmul.f32 %v8449_v62, %v1103_v20  ;;  %v740_v27 = vsub.f32 0.0, %v9562_v23  ;;  %7931 = vmatmul.msk.f32.gmra.mxu0 %vm391_vm1, %v365_v9  ;;  %v1113_v39 = vor.u32 1.1754944e-38, %v1112_v12  ;;  %v367_v9 = vld [vmem:[%s8870_s14 + $0x108] sm:$0xff]  ;;  %v1838_v18 = vpop.permute.xlu2 %1837 }
 0x109   : > { %v2231_v29 = vld [vmem:[#allocation2 + $0x50] sm:$0xff] }
 0x10a   : > { %v8451_v31 = vpop.eup %8450  ;;  %2088 = vst.msk [vmem:[#allocation2 + $0x58] sm:$0xff] %vm279_vm2, %v2036_v26  ;;  %v1105_v32 = vadd.f32 %v8449_v62, %v1104_v30  ;;  %v807_v34 = vmul.f32 1.442695, %v740_v27  ;;  %7962 = vmatmul.msk.f32.gmra.mxu1 %vm279_vm2, %v2231_v29 }
 0x10b   : > { %v8453_v35 = vpop.eup %8452  ;;  %2137 = vst.msk [vmem:[#allocation3 + $0x40] sm:$0xff] %vm279_vm2, %v2036_v26  ;;  %v9581_v40 = vadd.f32 1.0, %v8451_v31 }
 0x10c   : > { %v1109_v41 = vsel %vm1108_vm11, %v8449_v62, %v1105_v32  ;;  %v1116_v44 = vmul.f32 %v8453_v35, %v9548_v4  ;;  %8454 = vpow2.f32 %v807_v34  ;;  %vm1121_vm13 = vweird.f32 %v8453_v35 }
 0x10d   : > { %7636 = vperm.xlu1 %8392, %v2220_v24   ;;  %7631 = vperm.xlu0 %8391, %v2219_v16   ;;  %v1114_v36 = vsel %vm1111_vm12, %v1113_v39, %v1109_v41  ;;  %8456 = vrcp.f32 %v9581_v40  ;;  %v617_v46 = vpop.f32.mrf.mxu0  ;;  %vm1122_vm15 = vmor %vm1120_vm14, %vm1121_vm13  ;;  %v1127_v62 = vor.u32 1.1754944e-38, %v1126_v57  ;;  %v1138_v22 = vand.u32 2147483647, %v9581_v40 }
 0x10e   : > { %v1673_v53 = vmul.f32 %v1114_v36, %v9470_v48  ;;  %v1117_v54 = vsub.f32 1.0, %v1116_v44  ;;  %v9590_v55 = vadd.f32 %v9559_v21, %v617_v46  ;;  %v1140_v12 = vand.u32 2147483648, %v9581_v40  ;;  %v9620_v36 = vpop.permute.xlu1 %1957 }
 0x10f   : > { %vm1134_vm4 = vweird.f32 %v9581_v40  ;;  %vm1139_vm6 = vcmp.eq.f32.partialorder %v1138_v22, 8.507059e+37 }
 0x110   : > { %v2037_v47 = vmul.f32 %v1828_v56, %v1673_v53  ;;  %v1118_v6 = vmul.f32 %v8453_v35, %v1117_v54  ;;  %v741_v58 = vsub.f32 0.0, %v9590_v55  ;;  %7932 = vmatmul.msk.f32.gmra.mxu0 %vm391_vm1, %v366_v51  ;;  %v368_v51 = vld [vmem:[%s8870_s14 + $0x110] sm:$0xff]  ;;  %v9624_v53 = vpop.permute.xlu0 %1962 }
 0x111   : > { %v2232_v59 = vld [vmem:[#allocation2 + $0x58] sm:$0xff] }
 0x112   : > { %v8455_v2 = vpop.eup %8454  ;;  %2089 = vst.msk [vmem:[#allocation2 + $0x60] sm:$0xff] %vm279_vm2, %v2037_v47  ;;  %v1119_v48 = vadd.f32 %v8453_v35, %v1118_v6  ;;  %v809_v60 = vmul.f32 1.442695, %v741_v58  ;;  %7963 = vmatmul.msk.f32.gmra.mxu1 %vm279_vm2, %v2232_v59  ;;  %v9632_v6 = vpop.permute.xlu2 %1967 }
 0x113   : > { %v8457_v61 = vpop.eup %8456  ;;  %2138 = vst.msk [vmem:[#allocation3 + $0x48] sm:$0xff] %vm279_vm2, %v2037_v47  ;;  %v9600_v1 = vadd.f32 1.0, %v8455_v2 }
 0x114   : > { %v1123_v5 = vsel %vm1122_vm15, %v8453_v35, %v1119_v48  ;;  %v1130_v63 = vmul.f32 %v8457_v61, %v9581_v40  ;;  %8458 = vpow2.f32 %v809_v60  ;;  %vm1135_vm3 = vweird.f32 %v8457_v61 }
 0x115   : > { %v1128_v11 = vsel %vm1125_vm0, %v1127_v62, %v1123_v5  ;;  %8460 = vrcp.f32 %v9600_v1  ;;  %v620_v4 = vpop.f32.mrf.mxu0  ;;  %vm1136_vm5 = vmor %vm1134_vm4, %vm1135_vm3  ;;  %v1141_v35 = vor.u32 1.1754944e-38, %v1140_v12  ;;  %v1152_v57 = vand.u32 2147483647, %v9600_v1 }
 0x116   : > { %v1674_v20 = vmul.f32 %v1128_v11, %v9499_v15  ;;  %v1131_v24 = vsub.f32 1.0, %v1130_v63  ;;  %v9607_v16 = vadd.f32 %v9559_v21, %v620_v4  ;;  %v1154_v47 = vand.u32 2147483648, %v9600_v1  ;;  %v1843_v22 = vpop.permute.xlu1 %1842 }
 0x117   : > { %vm1148_vm8 = vweird.f32 %v9600_v1  ;;  %vm1153_vm10 = vcmp.eq.f32.partialorder %v1152_v57, 8.507059e+37 }
 0x118   : > { %v2038_v26 = vmul.f32 %v1833_v28, %v1674_v20  ;;  %v1132_v30 = vmul.f32 %v8457_v61, %v1131_v24  ;;  %v742_v27 = vsub.f32 0.0, %v9607_v16  ;;  %7933 = vmatmul.msk.f32.gmra.mxu0 %vm391_vm1, %v367_v9  ;;  %v1155_v28 = vor.u32 1.1754944e-38, %v1154_v47 }
 0x119   : > { %v2233_v29 = vld [vmem:[#allocation2 + $0x60] sm:$0xff] }
 0x11a   : > { %v8459_v31 = vpop.eup %8458  ;;  %2090 = vst.msk [vmem:[#allocation2 + $0x68] sm:$0xff] %vm279_vm2, %v2038_v26  ;;  %v1133_v15 = vadd.f32 %v8457_v61, %v1132_v30  ;;  %v811_v32 = vmul.f32 1.442695, %v742_v27  ;;  %7964 = vmatmul.msk.f32.gmra.mxu1 %vm279_vm2, %v2233_v29  ;;  %v719_v30 = vpop.f32.mrf.mxu3 }
 0x11b   : > { %v8461_v34 = vpop.eup %8460  ;;  %2139 = vst.msk [vmem:[#allocation3 + $0x50] sm:$0xff] %vm279_vm2, %v2038_v26  ;;  %v9617_v39 = vadd.f32 1.0, %v8459_v31  ;;  %v1848_v27 = vpop.permute.xlu0 %1847 }
 0x11c   : > { %v1137_v41 = vsel %vm1136_vm5, %v8457_v61, %v1133_v15  ;;  %v1144_v44 = vmul.f32 %v8461_v34, %v9600_v1  ;;  %8462 = vpow2.f32 %v811_v32  ;;  %vm1149_vm7 = vweird.f32 %v8461_v34  ;;  %v369_v1 = vld [vmem:[%s8870_s14 + $0x118] sm:$0xff] }
 0x11d   : > { %v1142_v46 = vsel %vm1139_vm6, %v1141_v35, %v1137_v41  ;;  %8464 = vrcp.f32 %v9617_v39  ;;  %v623_v40 = vpop.f32.mrf.mxu0  ;;  %vm1150_vm9 = vmor %vm1148_vm8, %vm1149_vm7  ;;  %v1166_v12 = vand.u32 2147483647, %v9617_v39  ;;  %v1168_v26 = vand.u32 2147483648, %v9617_v39 }
 0x11e   : > { %v1675_v54 = vmul.f32 %v1142_v46, %v9528_v49  ;;  %v1145_v56 = vsub.f32 1.0, %v1144_v44  ;;  %v9628_v50 = vadd.f32 %v9559_v21, %v623_v40  ;;  %vm1162_vm12 = vweird.f32 %v9617_v39 }
 0x11f   : > { %v1169_v46 = vor.u32 1.1754944e-38, %v1168_v26  ;;  %vm1167_vm14 = vcmp.eq.f32.partialorder %v1166_v12, 8.507059e+37 }
 0x120   : > { %v2039_v58 = vmul.f32 %v1838_v18, %v1675_v54  ;;  %v1146_v59 = vmul.f32 %v8461_v34, %v1145_v56  ;;  %v743_v2 = vsub.f32 0.0, %v9628_v50  ;;  %7934 = vmatmul.msk.f32.gmra.mxu0 %vm391_vm1, %v368_v51 }
 0x121   : > { %v2234_v48 = vld [vmem:[#allocation2 + $0x68] sm:$0xff] }
 0x122   : > { %v8463_v60 = vpop.eup %8462  ;;  %2091 = vst.msk [vmem:[#allocation2 + $0x70] sm:$0xff] %vm279_vm2, %v2039_v58  ;;  %v1147_v49 = vadd.f32 %v8461_v34, %v1146_v59  ;;  %v813_v61 = vmul.f32 1.442695, %v743_v2  ;;  %7965 = vmatmul.msk.f32.gmra.mxu1 %vm279_vm2, %v2234_v48 }
 0x123   : > { %v8465_v62 = vpop.eup %8464  ;;  %2140 = vst.msk [vmem:[#allocation3 + $0x58] sm:$0xff] %vm279_vm2, %v2039_v58  ;;  %v9640_v5 = vadd.f32 1.0, %v8463_v60  ;;  %v9671_v60 = vadd.f32 %v9559_v21, %v719_v30 }
 0x124   : > { %v1151_v63 = vsel %vm1150_vm9, %v8461_v34, %v1147_v49  ;;  %v1158_v11 = vmul.f32 %v8465_v62, %v9617_v39  ;;  %8466 = vpow2.f32 %v813_v61  ;;  %vm1163_vm11 = vweird.f32 %v8465_v62  ;;  %v9653_v34 = vpop.permute.xlu2 %1852  ;;  %v370_v39 = vld [vmem:[%s8870_s14 + $0x120] sm:$0xff] }
 0x125   : > { %v1156_v4 = vsel %vm1153_vm10, %v1155_v28, %v1151_v63  ;;  %8468 = vrcp.f32 %v9640_v5  ;;  %v626_v9 = vpop.f32.mrf.mxu0  ;;  %vm1164_vm13 = vmor %vm1162_vm12, %vm1163_vm11  ;;  %v1180_v2 = vand.u32 2147483647, %v9640_v5  ;;  %v1182_v48 = vand.u32 2147483648, %v9640_v5  ;;  %v722_v63 = vpop.f32.mrf.mxu3 }
 0x126   : > { %v1676_v18 = vmul.f32 %v1156_v4, %v9562_v23  ;;  %v1159_v20 = vsub.f32 1.0, %v1158_v11  ;;  %v9647_v24 = vadd.f32 %v9559_v21, %v626_v9  ;;  %v9676_v4 = vpop.permute.xlu0 %1977  ;;  %vm1176_vm0 = vweird.f32 %v9640_v5 }
 0x127   : > { %v9686_v26 = vadd.f32 %v9559_v21, %v722_v63  ;;  %vm1181_vm4 = vcmp.eq.f32.partialorder %v1180_v2, 8.507059e+37 }
 0x128   : > { %v2040_v29 = vmul.f32 %v1843_v22, %v1676_v18  ;;  %v1160_v31 = vmul.f32 %v8465_v62, %v1159_v20  ;;  %v744_v15 = vsub.f32 0.0, %v9647_v24  ;;  %7935 = vmatmul.msk.f32.gmra.mxu0 %vm391_vm1, %v369_v1  ;;  %v1183_v20 = vor.u32 1.1754944e-38, %v1182_v48 }
 0x129   : > { %v2235_v32 = vld [vmem:[#allocation2 + $0x70] sm:$0xff] }
 0x12a   : > { %v8467_v23 = vpop.eup %8466  ;;  %2092 = vst.msk [vmem:[#allocation2 + $0x78] sm:$0xff] %vm279_vm2, %v2040_v29  ;;  %v1161_v35 = vadd.f32 %v8465_v62, %v1160_v31  ;;  %v815_v41 = vmul.f32 1.442695, %v744_v15  ;;  %7966 = vmatmul.msk.f32.gmra.mxu1 %vm279_vm2, %v2235_v32  ;;  %v371_v32 = vld [vmem:[%s8870_s14 + $0x128] sm:$0xff] }
 0x12b   : > { %v8469_v44 = vpop.eup %8468  ;;  %2141 = vst.msk [vmem:[#allocation3 + $0x60] sm:$0xff] %vm279_vm2, %v2040_v29  ;;  %v9659_v40 = vadd.f32 1.0, %v8467_v23  ;;  %v9691_v29 = vpop.permute.xlu1 %1972 }
 0x12c   : > { %v1165_v51 = vsel %vm1164_vm13, %v8465_v62, %v1161_v35  ;;  %v1172_v54 = vmul.f32 %v8469_v44, %v9640_v5  ;;  %8470 = vpow2.f32 %v815_v41  ;;  %vm1177_vm15 = vweird.f32 %v8469_v44  ;;  %v9688_v30 = vpop.permute.xlu2 %1982 }
 0x12d   : > { %v1170_v56 = vsel %vm1167_vm14, %v1169_v46, %v1165_v51  ;;  %8472 = vrcp.f32 %v9659_v40  ;;  %v629_v57 = vpop.f32.mrf.mxu0  ;;  %vm1178_vm3 = vmor %vm1176_vm0, %vm1177_vm15  ;;  %v1194_v46 = vand.u32 2147483647, %v9659_v40  ;;  %vm1190_vm6 = vweird.f32 %v9659_v40 }
 0x12e   : > { %v1677_v47 = vmul.f32 %v1170_v56, %v9590_v55  ;;  %v1173_v58 = vsub.f32 1.0, %v1172_v54  ;;  %v9666_v59 = vadd.f32 %v9559_v21, %v629_v57  ;;  %v775_v55 = vsub.f32 0.0, %v9671_v60 }
 0x12f   : > { %v776_v54 = vsub.f32 0.0, %v9686_v26  ;;  %vm1195_vm8 = vcmp.eq.f32.partialorder %v1194_v46, 8.507059e+37 }
 0x130   : > { %v2041_v49 = vmul.f32 %v1848_v27, %v1677_v47  ;;  %v1174_v61 = vmul.f32 %v8469_v44, %v1173_v58  ;;  %v745_v62 = vsub.f32 0.0, %v9666_v59  ;;  %7936 = vmatmul.msk.f32.gmra.mxu0 %vm391_vm1, %v370_v39  ;;  %v877_v12 = vmul.f32 1.442695, %v775_v55 }
 0x131   : > { %v2236_v28 = vld [vmem:[#allocation2 + $0x78] sm:$0xff]  ;;  %v879_v47 = vmul.f32 1.442695, %v776_v54 }
 0x132   : > { %v8471_v11 = vpop.eup %8470  ;;  %2093 = vst.msk [vmem:[#allocation2 + $0x80] sm:$0xff] %vm279_vm2, %v2041_v49  ;;  %v1175_v9 = vadd.f32 %v8469_v44, %v1174_v61  ;;  %v817_v1 = vmul.f32 1.442695, %v745_v62  ;;  %7967 = vmatmul.msk.f32.gmra.mxu1 %vm279_vm2, %v2236_v28  ;;  %v1863_v62 = vpop.permute.xlu0 %1862 }
 0x133   : > { %v8473_v18 = vpop.eup %8472  ;;  %2142 = vst.msk [vmem:[#allocation3 + $0x68] sm:$0xff] %vm279_vm2, %v2041_v49  ;;  %v9683_v22 = vadd.f32 1.0, %v8471_v11 }
 0x134   : > { %v1179_v27 = vsel %vm1178_vm3, %v8469_v44, %v1175_v9  ;;  %v1186_v5 = vmul.f32 %v8473_v18, %v9659_v40  ;;  %8474 = vpow2.f32 %v817_v1  ;;  %v1196_v44 = vand.u32 2147483648, %v9659_v40  ;;  %v372_v9 = vld [vmem:[%s8870_s14 + $0x130] sm:$0xff]  ;;  %v9715_v1 = vpop.permute.xlu2 %1867 }
 0x135   : > { %v1184_v31 = vsel %vm1181_vm4, %v1183_v20, %v1179_v27  ;;  %8476 = vrcp.f32 %v9683_v22  ;;  %v632_v15 = vpop.f32.mrf.mxu0  ;;  %vm1191_vm5 = vweird.f32 %v8473_v18  ;;  %vm1204_vm10 = vweird.f32 %v9683_v22 }
 0x136   : > { %v1678_v23 = vmul.f32 %v1184_v31, %v9607_v16  ;;  %v1187_v35 = vsub.f32 1.0, %v1186_v5  ;;  %v9697_v41 = vadd.f32 %v9559_v21, %v632_v15  ;;  %8478 = vpow2.f32 %v877_v12  ;;  %vm1192_vm7 = vmor %vm1190_vm6, %vm1191_vm5  ;;  %v1858_v5 = vpop.permute.xlu1 %1857 }
 0x137   : > { %v2423_v51 = vpop.f32.mrf.mxu1  ;;  %v1197_v49 = vor.u32 1.1754944e-38, %v1196_v44  ;;  %8480 = vpow2.f32 %v879_v47  ;;  %v1210_v31 = vand.u32 2147483648, %v9683_v22 }
 0x138   : > { %v2042_v56 = vmul.f32 %v9653_v34, %v1678_v23  ;;  %v1188_v57 = vmul.f32 %v8473_v18, %v1187_v35  ;;  %v746_v39 = vsub.f32 0.0, %v9697_v41  ;;  %2561 = vst.msk [vmem:[#allocation4] sm:$0xff] %vm279_vm2, %v2423_v51  ;;  %7937 = vmatmul.msk.f32.gmra.mxu0 %vm391_vm1, %v371_v32 }
 0x139   : > { %v2237_v16 = vld [vmem:[#allocation2 + $0x80] sm:$0xff] }
 0x13a   : > { %v8475_v58 = vpop.eup %8474  ;;  %2094 = vst.msk [vmem:[#allocation2 + $0x88] sm:$0xff] %vm279_vm2, %v2042_v56  ;;  %v1189_v2 = vadd.f32 %v8473_v18, %v1188_v57  ;;  %v819_v48 = vmul.f32 1.442695, %v746_v39  ;;  %7968 = vmatmul.msk.f32.gmra.mxu1 %vm279_vm2, %v2237_v16  ;;  %v1211_v39 = vor.u32 1.1754944e-38, %v1210_v31 }
 0x13b   : > { %v8477_v34 = vpop.eup %8476  ;;  %2143 = vst.msk [vmem:[#allocation3 + $0x70] sm:$0xff] %vm279_vm2, %v2042_v56  ;;  %v9710_v61 = vadd.f32 1.0, %v8475_v58 }
 0x13c   : > { %v1193_v28 = vsel %vm1192_vm7, %v8473_v18, %v1189_v2  ;;  %v1200_v55 = vmul.f32 %v8477_v34, %v9683_v22  ;;  %8482 = vpow2.f32 %v819_v48  ;;  %v8479_v63 = vpop.eup %8478  ;;  %v1208_v18 = vand.u32 2147483647, %v9683_v22 }
 0x13d   : > { %v1198_v40 = vsel %vm1195_vm8, %v1197_v49, %v1193_v28  ;;  %8484 = vrcp.f32 %v9710_v61  ;;  %v635_v11 = vpop.f32.mrf.mxu0  ;;  %v9723_v32 = vadd.f32 1.0, %v8479_v63  ;;  %vm1205_vm9 = vweird.f32 %v8477_v34  ;;  %v373_v49 = vld [vmem:[%s8870_s14 + $0x138] sm:$0xff]  ;;  %v9741_v28 = vpop.permute.xlu0 %1992 }
 0x13e   : > { %v1679_v20 = vmul.f32 %v1198_v40, %v9628_v50  ;;  %v1201_v12 = vsub.f32 1.0, %v1200_v55  ;;  %v9719_v27 = vadd.f32 %v9559_v21, %v635_v11  ;;  %v8481_v50 = vpop.eup %8480  ;;  %vm1206_vm11 = vmor %vm1204_vm10, %vm1205_vm9  ;;  %vm1209_vm12 = vcmp.eq.f32.partialorder %v1208_v18, 8.507059e+37 }
 0x13f   : > { %v2426_v15 = vpop.f32.mrf.mxu1  ;;  %8486 = vrcp.f32 %v9723_v32  ;;  %v9736_v47 = vadd.f32 1.0, %v8481_v50  ;;  %v1222_v11 = vand.u32 2147483647, %v9710_v61  ;;  %vm1218_vm14 = vweird.f32 %v9710_v61 }
 0x140   : > { %v2043_v23 = vmul.f32 %v1858_v5, %v1679_v20  ;;  %v1202_v35 = vmul.f32 %v8477_v34, %v1201_v12  ;;  %v747_v46 = vsub.f32 0.0, %v9719_v27  ;;  %2562 = vst.msk [vmem:[#allocation4 + $0x8] sm:$0xff] %vm279_vm2, %v2426_v15  ;;  %7938 = vmatmul.msk.f32.gmra.mxu0 %vm391_vm1, %v372_v9  ;;  %v1224_v9 = vand.u32 2147483648, %v9710_v61 }
 0x141   : > { %v2238_v44 = vld [vmem:[#allocation2 + $0x88] sm:$0xff]  ;;  %vm1638_vm15 = vweird.f32 %v9723_v32  ;;  %v1644_v31 = vand.u32 2147483648, %v9723_v32  ;;  %vm1223_vm4 = vcmp.eq.f32.partialorder %v1222_v11, 8.507059e+37  ;;  %vm1652_vm9 = vweird.f32 %v9736_v47 }
 0x142   : > { %v8483_v51 = vpop.eup %8482  ;;  %2095 = vst.msk [vmem:[#allocation2 + $0x90] sm:$0xff] %vm279_vm2, %v2043_v23  ;;  %v1203_v54 = vadd.f32 %v8477_v34, %v1202_v35  ;;  %v821_v56 = vmul.f32 1.442695, %v747_v46  ;;  %7969 = vmatmul.msk.f32.gmra.mxu1 %vm279_vm2, %v2238_v44  ;;  %v1642_v46 = vand.u32 2147483647, %v9723_v32 }
 0x143   : > { %v8485_v57 = vpop.eup %8484  ;;  %2144 = vst.msk [vmem:[#allocation3 + $0x78] sm:$0xff] %vm279_vm2, %v2043_v23  ;;  %v9734_v16 = vadd.f32 1.0, %v8483_v51 }
 0x144   : > { %v1207_v58 = vsel %vm1206_vm11, %v8477_v34, %v1203_v54  ;;  %v1214_v2 = vmul.f32 %v8485_v57, %v9710_v61  ;;  %8488 = vpow2.f32 %v821_v56  ;;  %vm1219_vm13 = vweird.f32 %v8485_v57 }
 0x145   : > { %v1212_v22 = vsel %vm1209_vm12, %v1211_v39, %v1207_v58  ;;  %8490 = vrcp.f32 %v9734_v16  ;;  %v638_v48 = vpop.f32.mrf.mxu0  ;;  %v8487_v40 = vpop.eup %8486  ;;  %vm1220_vm3 = vmor %vm1218_vm14, %vm1219_vm13  ;;  %v1225_v61 = vor.u32 1.1754944e-38, %v1224_v9  ;;  %vm1232_vm5 = vweird.f32 %v9734_v16 }
 0x146   : > { %v1680_v55 = vmul.f32 %v1212_v22, %v9647_v24  ;;  %v1215_v63 = vsub.f32 1.0, %v1214_v2  ;;  %v9747_v34 = vadd.f32 %v9559_v21, %v638_v48  ;;  %8492 = vrcp.f32 %v9736_v47  ;;  %v9753_v24 = vpop.permute.xlu2 %2002 }
 0x147   : > { %v2429_v20 = vpop.f32.mrf.mxu1  ;;  %v1634_v18 = vmul.f32 %v8487_v40, %v9723_v32  ;;  %vm1639_vm0 = vweird.f32 %v8487_v40  ;;  %v1236_v22 = vand.u32 2147483647, %v9734_v16  ;;  %vm1643_vm7 = vcmp.eq.f32.partialorder %v1642_v46, 8.507059e+37 }
 0x148   : > { %v2044_v12 = vmul.f32 %v1863_v62, %v1680_v55  ;;  %v1216_v5 = vmul.f32 %v8485_v57, %v1215_v63  ;;  %2563 = vst.msk [vmem:[#allocation4 + $0x10] sm:$0xff] %vm279_vm2, %v2429_v20  ;;  %7939 = vmatmul.msk.f32.gmra.mxu0 %vm391_vm1, %v373_v49  ;;  %v748_v51 = vsub.f32 0.0, %v9747_v34  ;;  %vm9778_vm6 = vmor %vm1638_vm15, %vm1639_vm0  ;;  %v374_v55 = vld [vmem:[%s8870_s14 + $0x140] sm:$0xff]  ;;  %v1238_v20 = vand.u32 2147483648, %v9734_v16 }
 0x149   : > { %v2239_v15 = vld [vmem:[#allocation2 + $0x90] sm:$0xff]  ;;  %v1635_v35 = vsub.f32 1.0, %v1634_v18  ;;  %v9788_v18 = vpop.permute.xlu0 %2007  ;;  %vm1237_vm12 = vcmp.eq.f32.partialorder %v1236_v22, 8.507059e+37  ;;  %vm332_vm14 = vcmask 62464  }
 0x14a   : > { %v8489_v23 = vpop.eup %8488  ;;  %2096 = vst.msk [vmem:[#allocation2 + $0x98] sm:$0xff] %vm279_vm2, %v2044_v12  ;;  %v1217_v62 = vadd.f32 %v8485_v57, %v1216_v5  ;;  %7970 = vmatmul.msk.f32.gmra.mxu1 %vm279_vm2, %v2239_v15 }
 0x14b   : > { %v9761_v50 = vpop.eup %8490  ;;  %2145 = vst.msk [vmem:[#allocation3 + $0x80] sm:$0xff] %vm279_vm2, %v2044_v12  ;;  %v9765_v44 = vadd.f32 1.0, %v8489_v23  ;;  %v1636_v39 = vmul.f32 %v8487_v40, %v1635_v35  ;;  %v823_v12 = vmul.f32 1.442695, %v748_v51  ;;  %v7998_v23 = vld [vmem:[%s12487_s5 + $0x8] sm:$0xff]  ;;  %v1658_v51 = vand.u32 2147483648, %v9736_v47 }
 0x14c   : > { %v1221_v54 = vsel %vm1220_vm3, %v8485_v57, %v1217_v62  ;;  %v1228_v56 = vmul.f32 %v9761_v50, %v9734_v16  ;;  %v9771_v58 = vpop.eup %8492  ;;  %v1645_v57 = vor.u32 1.1754944e-38, %v1644_v31  ;;  %vm1233_vm8 = vweird.f32 %v9761_v50  ;;  %8379 = vmatpush.msra.mxu2 %v7998_v23  ;;  %2808 = vmatpush.msrb.mxu0 %v7998_v23 }
 0x14d   : > { %v1226_v2 = vsel %vm1223_vm4, %v1225_v61, %v1221_v54  ;;  %8494 = vrcp.f32 %v9765_v44  ;;  %v641_v49 = vpop.f32.mrf.mxu0  ;;  %v1637_v9 = vadd.f32 %v8487_v40, %v1636_v39  ;;  %v1648_v32 = vmul.f32 %v9771_v58, %v9736_v47  ;;  %vm1234_vm11 = vmor %vm1232_vm5, %vm1233_vm8 }
 0x14e   : > { %v1681_v63 = vmul.f32 %v1226_v2, %v9666_v59  ;;  %v1229_v11 = vsub.f32 1.0, %v1228_v56  ;;  %8496 = vpow2.f32 %v823_v12  ;;  %vm1653_vm10 = vweird.f32 %v9771_v58  ;;  %v2018_v56 = vpop.permute.xlu2 %2017 }
 0x14f   : > { %v2432_v5 = vpop.f32.mrf.mxu1  ;;  %v1641_v59 = vsel %vm9778_vm6, %v8487_v40, %v1637_v9  ;;  %v1649_v35 = vsub.f32 1.0, %v1648_v32  ;;  %v1656_v61 = vand.u32 2147483647, %v9736_v47  ;;  %v1239_v39 = vor.u32 1.1754944e-38, %v1238_v20  ;;  %vm9823_vm13 = vmor %vm1652_vm9, %vm1653_vm10  ;;  %v375_v9 = vld [vmem:[%s8870_s14 + $0x148] sm:$0xff] }
 0x150   : > { %v2045_v31 = vmul.f32 %v9715_v1, %v1681_v63  ;;  %v1230_v15 = vmul.f32 %v9761_v50, %v1229_v11  ;;  %2564 = vst.msk [vmem:[#allocation4 + $0x18] sm:$0xff] %vm279_vm2, %v2432_v5  ;;  %7940 = vmatmul.msk.f32.gmra.mxu0 %vm391_vm1, %v374_v55  ;;  %v1646_v62 = vsel %vm1643_vm7, %v1645_v57, %v1641_v59  ;;  %v1250_v55 = vand.u32 2147483647, %v9765_v44 }
 0x151   : > { %v2240_v1 = vld [vmem:[#allocation2 + $0x98] sm:$0xff]  ;;  %v1711_v46 = vmul.f32 %v1646_v62, %v9671_v60  ;;  %v1650_v60 = vmul.f32 %v9771_v58, %v1649_v35  ;;  %v9814_v2 = vadd.f32 %v9559_v21, %v641_v49  ;;  %vm9828_vm15 = vcmp.eq.f32.partialorder %v1656_v61, 8.507059e+37 }
 0x152   : > { %2097 = vst.msk [vmem:[#allocation2 + $0xa0] sm:$0xff] %vm279_vm2, %v2045_v31  ;;  %v1231_v40 = vadd.f32 %v9761_v50, %v1230_v15  ;;  %7971 = vmatmul.msk.f32.gmra.mxu1 %vm279_vm2, %v2240_v1  ;;  %v1659_v47 = vor.u32 1.1754944e-38, %v1658_v51  ;;  %v2023_v51 = vpop.permute.xlu0 %2022  ;;  %vm1246_vm3 = vweird.f32 %v9765_v44  ;;  %vm1251_vm5 = vcmp.eq.f32.partialorder %v1250_v55, 8.507059e+37 }
 0x153   : > { %v8495_v54 = vpop.eup %8494  ;;  %2146 = vst.msk [vmem:[#allocation3 + $0x88] sm:$0xff] %vm279_vm2, %v2045_v31  ;;  %v2075_v63 = vmul.f32 %v2018_v56, %v1711_v46  ;;  %v1651_v49 = vadd.f32 %v9771_v58, %v1650_v60  ;;  %v749_v32 = vsub.f32 0.0, %v9814_v2  ;;  %v1252_v31 = vand.u32 2147483648, %v9765_v44 }
 0x154   : > { %v1235_v48 = vsel %vm1234_vm11, %v9761_v50, %v1231_v40  ;;  %v1242_v57 = vmul.f32 %v8495_v54, %v9765_v44  ;;  %v8497_v5 = vpop.eup %8496  ;;  %vm1247_vm0 = vweird.f32 %v8495_v54  ;;  %v376_v44 = vld [vmem:[%s8870_s14 + $0x150] sm:$0xff] }
 0x155   : > { %v1240_v22 = vsel %vm1237_vm12, %v1239_v39, %v1235_v48  ;;  %v644_v50 = vpop.f32.mrf.mxu0  ;;  %2127 = vst.msk [vmem:[#allocation2 + $0x190] sm:$0xff] %vm279_vm2, %v2075_v63  ;;  %v1655_v15 = vsel %vm9823_vm13, %v9771_v58, %v1651_v49  ;;  %v9844_v35 = vadd.f32 1.0, %v8497_v5  ;;  %v825_v46 = vmul.f32 1.442695, %v749_v32  ;;  %vm1248_vm4 = vmor %vm1246_vm3, %vm1247_vm0 }
 0x156   : > { %v1682_v20 = vmul.f32 %v1240_v22, %v9697_v41  ;;  %v1243_v12 = vsub.f32 1.0, %v1242_v57  ;;  %v9841_v59 = vadd.f32 %v9559_v21, %v644_v50  ;;  %v1660_v1 = vsel %vm9828_vm15, %v1659_v47, %v1655_v15 }
 0x157   : > { %v2435_v23 = vpop.f32.mrf.mxu1  ;;  %v1712_v40 = vmul.f32 %v1660_v1, %v9686_v26  ;;  %8498 = vrcp.f32 %v9844_v35  ;;  %v1253_v26 = vor.u32 1.1754944e-38, %v1252_v31  ;;  %v1264_v47 = vand.u32 2147483647, %v9844_v35 }
 0x158   : > { %v2046_v41 = vmul.f32 %v9252_v13, %v1682_v20  ;;  %v1244_v62 = vmul.f32 %v8495_v54, %v1243_v12  ;;  %2565 = vst.msk [vmem:[#allocation4 + $0x20] sm:$0xff] %vm279_vm2, %v2435_v23  ;;  %7941 = vmatmul.msk.f32.gmra.mxu0 %vm391_vm1, %v375_v9  ;;  %v750_v58 = vsub.f32 0.0, %v9841_v59  ;;  %8500 = vpow2.f32 %v825_v46  ;;  %v377_v23 = vld [vmem:[%s8870_s14 + $0x158] sm:$0xff] }
 0x159   : > { %v2241_v61 = vld [vmem:[#allocation2 + $0xa0] sm:$0xff]  ;;  %v2076_v56 = vmul.f32 %v2023_v51, %v1712_v40  ;;  %v1266_v32 = vand.u32 2147483648, %v9844_v35  ;;  %vm1260_vm7 = vweird.f32 %v9844_v35  ;;  %vm1265_vm9 = vcmp.eq.f32.partialorder %v1264_v47, 8.507059e+37 }
 0x15a   : > { %2098 = vst.msk [vmem:[#allocation2 + $0xa8] sm:$0xff] %vm279_vm2, %v2046_v41  ;;  %v1245_v13 = vadd.f32 %v8495_v54, %v1244_v62  ;;  %7972 = vmatmul.msk.f32.gmra.mxu1 %vm279_vm2, %v2241_v61  ;;  %v827_v39 = vmul.f32 1.442695, %v750_v58  ;;  %v8092_v58 = vld [vmem:[%s12487_s5 + $0x18] sm:$0xff] }
 0x15b   : > { %2147 = vst.msk [vmem:[#allocation3 + $0x90] sm:$0xff] %vm279_vm2, %v2046_v41  ;;  %v1267_v40 = vor.u32 1.1754944e-38, %v1266_v32  ;;  %3766 = vmatpush.msrb.mxu1 %v8092_v58 }
 0x15c   : > { %v1249_v60 = vsel %vm1248_vm4, %v8495_v54, %v1245_v13  ;;  %2128 = vst.msk [vmem:[#allocation2 + $0x198] sm:$0x3f] %vm332_vm14, %v2076_v56  ;;  %8502 = vpow2.f32 %v827_v39 }
 0x15d   : > { %v1254_v48 = vsel %vm1251_vm5, %v1253_v26, %v1249_v60  ;;  %v647_v57 = vpop.f32.mrf.mxu0  ;;  %v8499_v49 = vpop.eup %8498 }
 0x15e   : > { %v1683_v63 = vmul.f32 %v1254_v48, %v9719_v27  ;;  %v9862_v16 = vadd.f32 %v9559_v21, %v647_v57  ;;  %v8501_v54 = vpop.eup %8500  ;;  %v1256_v55 = vmul.f32 %v8499_v49, %v9844_v35  ;;  %vm1261_vm6 = vweird.f32 %v8499_v49 }
 0x15f   : > { %v2438_v22 = vpop.f32.mrf.mxu1  ;;  %v9870_v27 = vadd.f32 1.0, %v8501_v54  ;;  %vm1262_vm8 = vmor %vm1260_vm7, %vm1261_vm6 }
 0x160   : > { %v2047_v11 = vmul.f32 %v9226_v52, %v1683_v63  ;;  %v751_v50 = vsub.f32 0.0, %v9862_v16  ;;  %2566 = vst.msk [vmem:[#allocation4 + $0x28] sm:$0xff] %vm279_vm2, %v2438_v22  ;;  %7942 = vmatmul.msk.f32.gmra.mxu0 %vm391_vm1, %v376_v44  ;;  %v1257_v52 = vsub.f32 1.0, %v1256_v55 }
 0x161   : > { %v2242_v9 = vld [vmem:[#allocation2 + $0xa8] sm:$0xff]  ;;  %8504 = vrcp.f32 %v9870_v27  ;;  %v1278_v55 = vand.u32 2147483647, %v9870_v27  ;;  %vm1274_vm11 = vweird.f32 %v9870_v27 }
 0x162   : > { %2099 = vst.msk [vmem:[#allocation2 + $0xb0] sm:$0xff] %vm279_vm2, %v2047_v11  ;;  %v829_v20 = vmul.f32 1.442695, %v751_v50  ;;  %7973 = vmatmul.msk.f32.gmra.mxu1 %vm279_vm2, %v2242_v9  ;;  %v8503_v12 = vpop.eup %8502  ;;  %v1258_v5 = vmul.f32 %v8499_v49, %v1257_v52  ;;  %v1280_v50 = vand.u32 2147483648, %v9870_v27 }
 0x163   : > { %2148 = vst.msk [vmem:[#allocation3 + $0x98] sm:$0xff] %vm279_vm2, %v2047_v11  ;;  %v9877_v31 = vadd.f32 1.0, %v8503_v12  ;;  %v378_v11 = vld [vmem:[%s8870_s14 + $0x160] sm:$0xff]  ;;  %vm1279_vm15 = vcmp.eq.f32.partialorder %v1278_v55, 8.507059e+37 }
 0x164   : > { %8506 = vpow2.f32 %v829_v20  ;;  %v1259_v62 = vadd.f32 %v8499_v49, %v1258_v5  ;;  %v1281_v5 = vor.u32 1.1754944e-38, %v1280_v50 }
 0x165   : > { %v650_v15 = vpop.f32.mrf.mxu0  ;;  %8508 = vrcp.f32 %v9877_v31  ;;  %v1294_v52 = vand.u32 2147483648, %v9877_v31  ;;  %vm1288_vm0 = vweird.f32 %v9877_v31 }
 0x166   : > { %v9881_v41 = vadd.f32 %v9559_v21, %v650_v15  ;;  %v1263_v61 = vsel %vm1262_vm8, %v8499_v49, %v1259_v62  ;;  %v1292_v15 = vand.u32 2147483647, %v9877_v31 }
 0x167   : > { %v2441_v1 = vpop.f32.mrf.mxu1  ;;  %v8505_v35 = vpop.eup %8504  ;;  %v1268_v26 = vsel %vm1265_vm9, %v1267_v40, %v1263_v61  ;;  %v1295_v61 = vor.u32 1.1754944e-38, %v1294_v52 }
 0x168   : > { %v752_v46 = vsub.f32 0.0, %v9881_v41  ;;  %2567 = vst.msk [vmem:[#allocation4 + $0x30] sm:$0xff] %vm279_vm2, %v2441_v1  ;;  %7943 = vmatmul.msk.f32.gmra.mxu0 %vm391_vm1, %v377_v23  ;;  %v1684_v60 = vmul.f32 %v1268_v26, %v9747_v34  ;;  %v1270_v48 = vmul.f32 %v8505_v35, %v9870_v27  ;;  %vm1275_vm10 = vweird.f32 %v8505_v35  ;;  %v379_v26 = vld [vmem:[%s8870_s14 + $0x168] sm:$0xff] }
 0x169   : > { %v2243_v51 = vld [vmem:[#allocation2 + $0xb0] sm:$0xff]  ;;  %vm1276_vm12 = vmor %vm1274_vm11, %vm1275_vm10  ;;  %vm1293_vm4 = vcmp.eq.f32.partialorder %v1292_v15, 8.507059e+37 }
 0x16a   : > { %v2628_v13 = vld [vmem:[#allocation2 + $0xa9] sm:$0xff]  ;;  %v831_v56 = vmul.f32 1.442695, %v752_v46  ;;  %7974 = vmatmul.msk.f32.gmra.mxu1 %vm279_vm2, %v2243_v51  ;;  %v8507_v39 = vpop.eup %8506  ;;  %v2048_v63 = vmul.f32 %v9280_v38, %v1684_v60  ;;  %v1271_v22 = vsub.f32 1.0, %v1270_v48 }
 0x16b   : > { %8020 = vmatmul.msk.f32.vlgmr.msra.gmra.mxu2 %vm279_vm2, %v2628_v13  ;;  %v9895_v57 = vadd.f32 1.0, %v8507_v39  ;;  %v8509_v44 = vpop.eup %8508 }
 0x16c   : > { %8510 = vpow2.f32 %v831_v56  ;;  %v1284_v54 = vmul.f32 %v8509_v44, %v9877_v31  ;;  %2100 = vst.msk [vmem:[#allocation2 + $0xb8] sm:$0xff] %vm279_vm2, %v2048_v63  ;;  %v1272_v34 = vmul.f32 %v8505_v35, %v1271_v22  ;;  %vm1289_vm13 = vweird.f32 %v8509_v44 }
 0x16d   : > { %v653_v49 = vpop.f32.mrf.mxu0  ;;  %8512 = vrcp.f32 %v9895_v57  ;;  %2149 = vst.msk [vmem:[#allocation3 + $0xa0] sm:$0xff] %vm279_vm2, %v2048_v63  ;;  %vm1290_vm3 = vmor %vm1288_vm0, %vm1289_vm13  ;;  %v1308_v22 = vand.u32 2147483648, %v9895_v57  ;;  %vm1302_vm6 = vweird.f32 %v9895_v57 }
 0x16e   : > { %v9905_v9 = vadd.f32 %v9559_v21, %v653_v49  ;;  %v1285_v38 = vsub.f32 1.0, %v1284_v54  ;;  %v1273_v12 = vadd.f32 %v8505_v35, %v1272_v34 }
 0x16f   : > { %v2444_v20 = vpop.f32.mrf.mxu1  ;;  %v1309_v55 = vor.u32 1.1754944e-38, %v1308_v22 }
 0x170   : > { %7944 = vmatmul.msk.f32.gmra.mxu0 %vm391_vm1, %v378_v11  ;;  %v753_v47 = vsub.f32 0.0, %v9905_v9  ;;  %2568 = vst.msk [vmem:[#allocation4 + $0x38] sm:$0xff] %vm279_vm2, %v2444_v20  ;;  %v1286_v21 = vmul.f32 %v8509_v44, %v1285_v38  ;;  %v1277_v23 = vsel %vm1276_vm12, %v8505_v35, %v1273_v12 }
 0x171   : > { %v1282_v40 = vsel %vm1279_vm15, %v1281_v5, %v1277_v23 }
 0x172   : > { %v8511_v32 = vpop.eup %8510  ;;  %v833_v1 = vmul.f32 1.442695, %v753_v47  ;;  %v1287_v46 = vadd.f32 %v8509_v44, %v1286_v21  ;;  %v1685_v58 = vmul.f32 %v1282_v40, %v9814_v2 }
 0x173   : > { %v9914_v62 = vadd.f32 1.0, %v8511_v32  ;;  %v8513_v27 = vpop.eup %8512  ;;  %v2244_v56 = vld [vmem:[#allocation2 + $0xb8] sm:$0xff] }
 0x174   : > { %v1298_v51 = vmul.f32 %v8513_v27, %v9895_v57  ;;  %v1291_v35 = vsel %vm1290_vm3, %v8509_v44, %v1287_v46  ;;  %v2629_v39 = vld [vmem:[#allocation2 + $0xb1] sm:$0xff]  ;;  %v2049_v60 = vmul.f32 %v9313_v8, %v1685_v58  ;;  %7975 = vmatmul.msk.f32.gmra.mxu1 %vm279_vm2, %v2244_v56  ;;  %v9929_v44 = vld [vmem:[%s12486_s4] ss:$0 sm:$0xff]  ;;  %vm1303_vm5 = vweird.f32 %v8513_v27 }
 0x175   : > { %8514 = vrcp.f32 %v9914_v62  ;;  %v656_v13 = vpop.f32.mrf.mxu0  ;;  %v1296_v48 = vsel %vm1293_vm4, %v1295_v61, %v1291_v35  ;;  %8021 = vmatmul.msk.f32.gmra.mxu2 %vm279_vm2, %v2629_v39  ;;  %vm1304_vm7 = vmor %vm1302_vm6, %vm1303_vm5  ;;  %v1322_v15 = vand.u32 2147483648, %v9914_v62  ;;  %vm1316_vm10 = vweird.f32 %v9914_v62 }
 0x176   : > { %v1299_v63 = vsub.f32 1.0, %v1298_v51  ;;  %8516 = vpow2.f32 %v833_v1  ;;  %v1686_v31 = vmul.f32 %v1296_v48, %v9841_v59  ;;  %v9932_v49 = vadd.f32 %v9929_v44, %v656_v13  ;;  %2101 = vst.msk [vmem:[#allocation2 + $0xc0] sm:$0xff] %vm279_vm2, %v2049_v60 }
 0x177   : > { %v2447_v2 = vpop.f32.mrf.mxu1  ;;  %v1306_v59 = vand.u32 2147483647, %v9895_v57  ;;  %2150 = vst.msk [vmem:[#allocation3 + $0xa8] sm:$0xff] %vm279_vm2, %v2049_v60  ;;  %v1323_v13 = vor.u32 1.1754944e-38, %v1322_v15  ;;  %v382_v15 = vld [vmem:[%s8870_s14 + $0x180] sm:$0xff] }
 0x178   : > { %2569 = vst.msk [vmem:[#allocation4 + $0x40] sm:$0xff] %vm279_vm2, %v2447_v2  ;;  %7945 = vmatmul.msk.f32.gmra.mxu0 %vm391_vm1, %v379_v26  ;;  %v1300_v8 = vmul.f32 %v8513_v27, %v1299_v63  ;;  %v2050_v11 = vmul.f32 %v9256_v19, %v1686_v31  ;;  %v754_v50 = vsub.f32 0.0, %v9932_v49  ;;  %v380_v19 = vld [vmem:[%s8870_s14 + $0x170] sm:$0xff]  ;;  %v381_v63 = vld [vmem:[%s8870_s14 + $0x178] sm:$0xff] }
 0x179   : > { %vm1307_vm8 = vcmp.eq.f32.partialorder %v1306_v59, 8.507059e+37 }
 0x17a   : > { %v1301_v34 = vadd.f32 %v8513_v27, %v1300_v8  ;;  %2102 = vst.msk [vmem:[#allocation2 + $0xc8] sm:$0xff] %vm279_vm2, %v2050_v11  ;;  %v835_v38 = vmul.f32 1.442695, %v754_v50  ;;  %v3565_v50 = vld [vmem:[#allocation2 + $0x17] sm:$0xff] }
 0x17b   : > { %v8515_v54 = vpop.eup %8514  ;;  %2151 = vst.msk [vmem:[#allocation3 + $0xb0] sm:$0xff] %vm279_vm2, %v2050_v11 }
 0x17c   : > { %v1312_v20 = vmul.f32 %v8515_v54, %v9914_v62  ;;  %v8517_v12 = vpop.eup %8516  ;;  %v1305_v52 = vsel %vm1304_vm7, %v8513_v27, %v1301_v34  ;;  %8518 = vpow2.f32 %v835_v38  ;;  %vm1317_vm9 = vweird.f32 %v8515_v54 }
 0x17d   : > { %v659_v47 = vpop.f32.mrf.mxu0  ;;  %v1310_v32 = vsel %vm1307_vm8, %v1309_v55, %v1305_v52  ;;  %v9946_v21 = vadd.f32 1.0, %v8517_v12  ;;  %v1320_v27 = vand.u32 2147483647, %v9914_v62  ;;  %v2245_v46 = vld [vmem:[#allocation2 + $0xc0] sm:$0xff]  ;;  %vm1318_vm11 = vmor %vm1316_vm10, %vm1317_vm9 }
 0x17e   : > { %v1313_v5 = vsub.f32 1.0, %v1312_v20  ;;  %v1687_v57 = vmul.f32 %v1310_v32, %v9862_v16  ;;  %v9951_v23 = vadd.f32 %v9929_v44, %v659_v47  ;;  %v2630_v58 = vld [vmem:[#allocation2 + $0xb9] sm:$0xff]  ;;  %7976 = vmatmul.msk.f32.gmra.mxu1 %vm279_vm2, %v2245_v46  ;;  %v8045_v47 = vld [vmem:[%s12487_s5 + $0x10] sm:$0xff] }
 0x17f   : > { %v2450_v1 = vpop.f32.mrf.mxu1  ;;  %8520 = vrcp.f32 %v9946_v21  ;;  %8022 = vmatmul.msk.f32.gmra.mxu2 %vm279_vm2, %v2630_v58  ;;  %vm1321_vm12 = vcmp.eq.f32.partialorder %v1320_v27, 8.507059e+37  ;;  %v1334_v12 = vand.u32 2147483647, %v9946_v21  ;;  %v8139_v52 = vld [vmem:[%s12487_s5 + $0x20] sm:$0xff]  ;;  %3287 = vmatpush.msra.mxu3 %v8045_v47  ;;  %vm1330_vm15 = vweird.f32 %v9946_v21 }
 0x180   : > { %v1314_v40 = vmul.f32 %v8515_v54, %v1313_v5  ;;  %2570 = vst.msk [vmem:[#allocation4 + $0x48] sm:$0xff] %vm279_vm2, %v2450_v1  ;;  %7946 = vmatmul.msk.f32.gmra.mxu0 %vm391_vm1, %v380_v19  ;;  %v2051_v16 = vmul.f32 %v9285_v45, %v1687_v57  ;;  %v755_v61 = vsub.f32 0.0, %v9951_v23  ;;  %4245 = vmatpush.msrb.mxu2 %v8139_v52 }
 0x181   : > { %v2246_v35 = vld [vmem:[#allocation2 + $0xc8] sm:$0xff]  ;;  %vm1335_vm3 = vcmp.eq.f32.partialorder %v1334_v12, 8.507059e+37 }
 0x182   : > { %v1315_v51 = vadd.f32 %v8515_v54, %v1314_v40  ;;  %2103 = vst.msk [vmem:[#allocation2 + $0xd0] sm:$0xff] %vm279_vm2, %v2051_v16  ;;  %v837_v26 = vmul.f32 1.442695, %v755_v61  ;;  %v8519_v56 = vpop.eup %8518  ;;  %7977 = vmatmul.msk.f32.vlgmr.msrb.gmra.mxu3 %vm279_vm2, %v2246_v35  ;;  %v2631_v31 = vld [vmem:[#allocation2 + $0xc1] sm:$0xff] }
 0x183   : > { %2152 = vst.msk [vmem:[#allocation3 + $0xb8] sm:$0xff] %vm279_vm2, %v2051_v16  ;;  %v9965_v60 = vadd.f32 1.0, %v8519_v56 }
 0x184   : > { %v1319_v45 = vsel %vm1318_vm11, %v8515_v54, %v1315_v51  ;;  %8522 = vpow2.f32 %v837_v26 }
 0x185   : > { %v1324_v39 = vsel %vm1321_vm12, %v1323_v13, %v1319_v45  ;;  %v662_v48 = vpop.f32.mrf.mxu0  ;;  %v8521_v62 = vpop.eup %8520  ;;  %8524 = vrcp.f32 %v9965_v60  ;;  %v1350_v26 = vand.u32 2147483648, %v9965_v60  ;;  %vm1344_vm5 = vweird.f32 %v9965_v60 }
 0x186   : > { %v1688_v2 = vmul.f32 %v1324_v39, %v9881_v41  ;;  %v9970_v22 = vadd.f32 %v9929_v44, %v662_v48  ;;  %v1326_v8 = vmul.f32 %v8521_v62, %v9946_v21  ;;  %8093 = vmatmul.msk.f32.vlgmr.msrb.gmra.mxu1 %vm279_vm2, %v3565_v50  ;;  %v1336_v41 = vand.u32 2147483648, %v9946_v21  ;;  %v3566_v21 = vld [vmem:[#allocation2 + $0x1f] sm:$0xff]  ;;  %v383_v50 = vld [vmem:[%s8870_s14 + $0x188] sm:$0xff] }
 0x187   : > { %v2453_v59 = vpop.f32.mrf.mxu1  ;;  %8023 = vmatmul.msk.f32.gmra.mxu2 %vm279_vm2, %v2631_v31  ;;  %vm1331_vm13 = vweird.f32 %v8521_v62  ;;  %v1348_v39 = vand.u32 2147483647, %v9965_v60 }
 0x188   : > { %v2052_v11 = vmul.f32 %v9319_v14, %v1688_v2  ;;  %v756_v54 = vsub.f32 0.0, %v9970_v22  ;;  %2571 = vst.msk [vmem:[#allocation4 + $0x50] sm:$0xff] %vm279_vm2, %v2453_v59  ;;  %7947 = vmatmul.msk.f32.gmra.mxu0 %vm391_vm1, %v381_v63  ;;  %v1327_v34 = vsub.f32 1.0, %v1326_v8  ;;  %vm1332_vm0 = vmor %vm1330_vm15, %vm1331_vm13  ;;  %v1337_v1 = vor.u32 1.1754944e-38, %v1336_v41 }
 0x189   : > { %v2247_v20 = vld [vmem:[#allocation2 + $0xd0] sm:$0xff]  ;;  %v1351_v8 = vor.u32 1.1754944e-38, %v1350_v26  ;;  %vm1349_vm7 = vcmp.eq.f32.partialorder %v1348_v39, 8.507059e+37 }
 0x18a   : > { %2104 = vst.msk [vmem:[#allocation2 + $0xd8] sm:$0xff] %vm279_vm2, %v2052_v11  ;;  %v839_v55 = vmul.f32 1.442695, %v756_v54  ;;  %v8523_v38 = vpop.eup %8522  ;;  %v1328_v14 = vmul.f32 %v8521_v62, %v1327_v34  ;;  %7978 = vmatmul.msk.f32.gmra.mxu3 %vm279_vm2, %v2247_v20  ;;  %v2632_v27 = vld [vmem:[#allocation2 + $0xc9] sm:$0xff] }
 0x18b   : > { %2153 = vst.msk [vmem:[#allocation3 + $0xc0] sm:$0xff] %vm279_vm2, %v2052_v11  ;;  %v9990_v19 = vadd.f32 1.0, %v8523_v38  ;;  %v8525_v32 = vpop.eup %8524 }
 0x18c   : > { %8526 = vpow2.f32 %v839_v55  ;;  %v1329_v5 = vadd.f32 %v8521_v62, %v1328_v14  ;;  %v1340_v40 = vmul.f32 %v8525_v32, %v9965_v60  ;;  %vm1345_vm4 = vweird.f32 %v8525_v32  ;;  %v3567_v14 = vld [vmem:[#allocation2 + $0x27] sm:$0xff] }
 0x18d   : > { %v665_v57 = vpop.f32.mrf.mxu0  ;;  %8528 = vrcp.f32 %v9990_v19  ;;  %vm1346_vm6 = vmor %vm1344_vm5, %vm1345_vm4  ;;  %v1364_v38 = vand.u32 2147483648, %v9990_v19  ;;  %v1362_v52 = vand.u32 2147483647, %v9990_v19  ;;  %vm1358_vm9 = vweird.f32 %v9990_v19 }
 0x18e   : > { %v1333_v46 = vsel %vm1332_vm0, %v8521_v62, %v1329_v5  ;;  %v9998_v58 = vadd.f32 %v9929_v44, %v665_v57  ;;  %v1341_v51 = vsub.f32 1.0, %v1340_v40  ;;  %8094 = vmatmul.msk.f32.gmra.mxu1 %vm279_vm2, %v3566_v21 }
 0x18f   : > { %v2456_v16 = vpop.f32.mrf.mxu1  ;;  %v1338_v61 = vsel %vm1335_vm3, %v1337_v1, %v1333_v46  ;;  %8024 = vmatmul.msk.f32.gmra.mxu2 %vm279_vm2, %v2632_v27  ;;  %v1365_v1 = vor.u32 1.1754944e-38, %v1364_v38  ;;  %vm1363_vm10 = vcmp.eq.f32.partialorder %v1362_v52, 8.507059e+37  ;;  %v2608_v38 = vld [vmem:[#allocation2 + $0x9] sm:$0xff]  ;;  %v3569_v52 = vld [vmem:[#allocation2 + $0x37] sm:$0xff] }
 0x190   : > { %2572 = vst.msk [vmem:[#allocation4 + $0x58] sm:$0xff] %vm279_vm2, %v2456_v16  ;;  %7948 = vmatmul.msk.f32.gmra.mxu0 %vm391_vm1, %v382_v15  ;;  %v1689_v13 = vmul.f32 %v1338_v61, %v9905_v9  ;;  %v757_v35 = vsub.f32 0.0, %v9998_v58  ;;  %v1342_v45 = vmul.f32 %v8525_v32, %v1341_v51 }
 0x191   : > { %v2248_v48 = vld [vmem:[#allocation2 + $0xd8] sm:$0xff] }
 0x192   : > { %v8527_v56 = vpop.eup %8526  ;;  %v2053_v63 = vmul.f32 %v9348_v43, %v1689_v13  ;;  %v841_v9 = vmul.f32 1.442695, %v757_v35  ;;  %v1343_v31 = vadd.f32 %v8525_v32, %v1342_v45  ;;  %7979 = vmatmul.msk.f32.gmra.mxu3 %vm279_vm2, %v2248_v48  ;;  %v2633_v54 = vld [vmem:[#allocation2 + $0xd1] sm:$0xff] }
 0x193   : > { %v10009_v62 = vadd.f32 1.0, %v8527_v56  ;;  %v8529_v2 = vpop.eup %8528  ;;  %v2607_v56 = vld [vmem:[#allocation2 + $0x1] sm:$0xff]  ;;  %v3568_v48 = vld [vmem:[#allocation2 + $0x2f] sm:$0xff] }
 0x194   : > { %2105 = vst.msk [vmem:[#allocation2 + $0xe0] sm:$0xff] %vm279_vm2, %v2053_v63  ;;  %v1354_v59 = vmul.f32 %v8529_v2, %v9990_v19  ;;  %v1347_v43 = vsel %vm1346_vm6, %v8525_v32, %v1343_v31  ;;  %vm1359_vm8 = vweird.f32 %v8529_v2 }
 0x195   : > { %8530 = vrcp.f32 %v10009_v62  ;;  %v668_v11 = vpop.f32.mrf.mxu0  ;;  %2154 = vst.msk [vmem:[#allocation3 + $0xc8] sm:$0xff] %vm279_vm2, %v2053_v63  ;;  %v1352_v34 = vsel %vm1349_vm7, %v1351_v8, %v1347_v43  ;;  %v1378_v26 = vand.u32 2147483648, %v10009_v62  ;;  %v1376_v39 = vand.u32 2147483647, %v10009_v62 }
 0x196   : > { %8532 = vpow2.f32 %v841_v9  ;;  %v1355_v60 = vsub.f32 1.0, %v1354_v59  ;;  %v10019_v41 = vadd.f32 %v9929_v44, %v668_v11  ;;  %v1690_v20 = vmul.f32 %v1352_v34, %v9932_v49  ;;  %8095 = vmatmul.msk.f32.gmra.mxu1 %vm279_vm2, %v3567_v14 }
 0x197   : > { %v2459_v55 = vpop.f32.mrf.mxu1  ;;  %8025 = vmatmul.msk.f32.gmra.mxu2 %vm279_vm2, %v2633_v54  ;;  %vm1372_vm12 = vweird.f32 %v10009_v62  ;;  %v1379_v8 = vor.u32 1.1754944e-38, %v1378_v26  ;;  %vm1377_vm15 = vcmp.eq.f32.partialorder %v1376_v39, 8.507059e+37  ;;  %v3570_v39 = vld [vmem:[#allocation2 + $0x3f] sm:$0xff] }
 0x198   : > { %2573 = vst.msk [vmem:[#allocation4 + $0x60] sm:$0xff] %vm279_vm2, %v2459_v55  ;;  %7949 = vmatmul.msk.f32.gmra.mxu0 %vm391_vm1, %v383_v50  ;;  %v1356_v12 = vmul.f32 %v8529_v2, %v1355_v60  ;;  %v758_v47 = vsub.f32 0.0, %v10019_v41  ;;  %v2054_v32 = vmul.f32 %v9377_v7, %v1690_v20  ;;  %vm1360_vm1 = vmor %vm1358_vm9, %vm1359_vm8 }
 0x19a   : > { %v1357_v5 = vadd.f32 %v8529_v2, %v1356_v12  ;;  %v843_v57 = vmul.f32 1.442695, %v758_v47  ;;  %2106 = vst.msk [vmem:[#allocation2 + $0xe8] sm:$0xff] %vm279_vm2, %v2054_v32 }
 0x19b   : > { %v8531_v49 = vpop.eup %8530  ;;  %v2249_v27 = vld [vmem:[#allocation2 + $0xe0] sm:$0xff]  ;;  %2155 = vst.msk [vmem:[#allocation3 + $0xd0] sm:$0xff] %vm279_vm2, %v2054_v32 }
 0x19c   : > { %v8533_v15 = vpop.eup %8532  ;;  %v1368_v40 = vmul.f32 %v8531_v49, %v10009_v62  ;;  %v1361_v46 = vsel %vm1360_vm1, %v8529_v2, %v1357_v5  ;;  %8534 = vpow2.f32 %v843_v57  ;;  %7980 = vmatmul.msk.f32.gmra.mxu3 %vm279_vm2, %v2249_v27  ;;  %v2634_v51 = vld [vmem:[#allocation2 + $0xd9] sm:$0xff]  ;;  %vm1373_vm11 = vweird.f32 %v8531_v49 }
 0x19d   : > { %v10034_v16 = vadd.f32 1.0, %v8533_v15  ;;  %v671_v7 = vpop.f32.mrf.mxu0  ;;  %v1366_v19 = vsel %vm1363_vm10, %v1365_v1, %v1361_v46  ;;  %vm1374_vm13 = vmor %vm1372_vm12, %vm1373_vm11 }
 0x19e   : > { %v1369_v61 = vsub.f32 1.0, %v1368_v40  ;;  %v10038_v21 = vadd.f32 %v9929_v44, %v671_v7  ;;  %v1691_v13 = vmul.f32 %v1366_v19, %v9951_v23  ;;  %8096 = vmatmul.msk.f32.gmra.mxu1 %vm279_vm2, %v3568_v48 }
 0x19f   : > { %8536 = vrcp.f32 %v10034_v16  ;;  %v2462_v35 = vpop.f32.mrf.mxu1  ;;  %8026 = vmatmul.msk.f32.gmra.mxu2 %vm279_vm2, %v2634_v51  ;;  %vm1386_vm3 = vweird.f32 %v10034_v16 }
 0x1a0   : > { %v1370_v45 = vmul.f32 %v8531_v49, %v1369_v61  ;;  %v759_v63 = vsub.f32 0.0, %v10038_v21  ;;  %2574 = vst.msk [vmem:[#allocation4 + $0x68] sm:$0xff] %vm279_vm2, %v2462_v35  ;;  %7999 = vmatmul.msk.f32.vlgmr.msrb.gmra.mxu0 %vm279_vm2, %v2607_v56  ;;  %v2055_v9 = vmul.f32 %v9406_v37, %v1691_v13 }
 0x1a1   : > { %v2250_v59 = vld [vmem:[#allocation2 + $0xe8] sm:$0xff] }
 0x1a2   : > { %v1371_v23 = vadd.f32 %v8531_v49, %v1370_v45  ;;  %v845_v2 = vmul.f32 1.442695, %v759_v63  ;;  %v8535_v31 = vpop.eup %8534  ;;  %2107 = vst.msk [vmem:[#allocation2 + $0xf0] sm:$0xff] %vm279_vm2, %v2055_v9  ;;  %v2635_v60 = vld [vmem:[#allocation2 + $0xe1] sm:$0xff] }
 0x1a3   : > { %2156 = vst.msk [vmem:[#allocation3 + $0xd8] sm:$0xff] %vm279_vm2, %v2055_v9  ;;  %v10053_v50 = vadd.f32 1.0, %v8535_v31 }
 0x1a4   : > { %v1375_v11 = vsel %vm1374_vm13, %v8531_v49, %v1371_v23  ;;  %8538 = vpow2.f32 %v845_v2  ;;  %7981 = vmatmul.msk.f32.gmra.mxu3 %vm279_vm2, %v2250_v59 }
 0x1a5   : > { %v8537_v37 = vpop.eup %8536  ;;  %v1380_v43 = vsel %vm1377_vm15, %v1379_v8, %v1375_v11  ;;  %v674_v54 = vpop.f32.mrf.mxu0  ;;  %8540 = vrcp.f32 %v10053_v50  ;;  %v1406_v45 = vand.u32 2147483648, %v10053_v50  ;;  %v1404_v63 = vand.u32 2147483647, %v10053_v50 }
 0x1a6   : > { %v1692_v62 = vmul.f32 %v1380_v43, %v9970_v22  ;;  %v1382_v34 = vmul.f32 %v8537_v37, %v10034_v16  ;;  %v10060_v55 = vadd.f32 %v9929_v44, %v674_v54  ;;  %v1392_v22 = vand.u32 2147483648, %v10034_v16  ;;  %8097 = vmatmul.msk.f32.gmra.mxu1 %vm279_vm2, %v3569_v52 }
 0x1a7   : > { %v2465_v20 = vpop.f32.mrf.mxu1  ;;  %8027 = vmatmul.msk.f32.gmra.mxu2 %vm279_vm2, %v2635_v60  ;;  %vm1387_vm0 = vweird.f32 %v8537_v37  ;;  %vm1400_vm7 = vweird.f32 %v10053_v50  ;;  %v1407_v11 = vor.u32 1.1754944e-38, %v1406_v45  ;;  %vm1405_vm9 = vcmp.eq.f32.partialorder %v1404_v63, 8.507059e+37  ;;  %v3572_v45 = vld [vmem:[#allocation2 + $0x4f] sm:$0xff] }
 0x1a8   : > { %v2056_v14 = vmul.f32 %v9434_v0, %v1692_v62  ;;  %v1383_v12 = vsub.f32 1.0, %v1382_v34  ;;  %2575 = vst.msk [vmem:[#allocation4 + $0x70] sm:$0xff] %vm279_vm2, %v2465_v20  ;;  %8000 = vmatmul.msk.f32.gmra.mxu0 %vm279_vm2, %v2608_v38  ;;  %v760_v47 = vsub.f32 0.0, %v10060_v55  ;;  %v1390_v0 = vand.u32 2147483647, %v10034_v16  ;;  %vm1388_vm4 = vmor %vm1386_vm3, %vm1387_vm0  ;;  %v2609_v16 = vld [vmem:[#allocation2 + $0x11] sm:$0xff] }
 0x1a9   : > { %v2251_v5 = vld [vmem:[#allocation2 + $0xf0] sm:$0xff]  ;;  %v1393_v27 = vor.u32 1.1754944e-38, %v1392_v22 }
 0x1aa   : > { %v8539_v32 = vpop.eup %8538  ;;  %2108 = vst.msk [vmem:[#allocation2 + $0xf8] sm:$0xff] %vm279_vm2, %v2056_v14  ;;  %v1384_v49 = vmul.f32 %v8537_v37, %v1383_v12  ;;  %v847_v15 = vmul.f32 1.442695, %v760_v47  ;;  %vm1391_vm5 = vcmp.eq.f32.partialorder %v1390_v0, 8.507059e+37  ;;  %v2636_v61 = vld [vmem:[#allocation2 + $0xe9] sm:$0xff]  ;;  %v2610_v12 = vld [vmem:[#allocation2 + $0x19] sm:$0xff] }
 0x1ab   : > { %2157 = vst.msk [vmem:[#allocation3 + $0xe0] sm:$0xff] %vm279_vm2, %v2056_v14  ;;  %v10072_v57 = vadd.f32 1.0, %v8539_v32  ;;  %v8541_v1 = vpop.eup %8540  ;;  %v3571_v47 = vld [vmem:[#allocation2 + $0x47] sm:$0xff] }
 0x1ac   : > { %v1385_v40 = vadd.f32 %v8537_v37, %v1384_v49  ;;  %v1396_v46 = vmul.f32 %v8541_v1, %v10053_v50  ;;  %7982 = vmatmul.msk.f32.gmra.mxu3 %vm279_vm2, %v2251_v5  ;;  %vm1401_vm6 = vweird.f32 %v8541_v1 }
 0x1ad   : > { %8542 = vrcp.f32 %v10072_v57  ;;  %v677_v7 = vpop.f32.mrf.mxu0  ;;  %vm1402_vm8 = vmor %vm1400_vm7, %vm1401_vm6  ;;  %v1420_v38 = vand.u32 2147483648, %v10072_v57  ;;  %v1418_v22 = vand.u32 2147483647, %v10072_v57  ;;  %vm1414_vm10 = vweird.f32 %v10072_v57 }
 0x1ae   : > { %v1389_v19 = vsel %vm1388_vm4, %v8537_v37, %v1385_v40  ;;  %8544 = vpow2.f32 %v847_v15  ;;  %v1397_v13 = vsub.f32 1.0, %v1396_v46  ;;  %v10079_v26 = vadd.f32 %v9929_v44, %v677_v7  ;;  %8098 = vmatmul.msk.f32.gmra.mxu1 %vm279_vm2, %v3570_v39 }
 0x1af   : > { %v1394_v51 = vsel %vm1391_vm5, %v1393_v27, %v1389_v19  ;;  %v2468_v35 = vpop.f32.mrf.mxu1  ;;  %8028 = vmatmul.msk.f32.gmra.mxu2 %vm279_vm2, %v2636_v61  ;;  %v1421_v15 = vor.u32 1.1754944e-38, %v1420_v38  ;;  %vm1419_vm12 = vcmp.eq.f32.partialorder %v1418_v22, 8.507059e+37 }
 0x1b0   : > { %v1693_v56 = vmul.f32 %v1394_v51, %v9998_v58  ;;  %2576 = vst.msk [vmem:[#allocation4 + $0x78] sm:$0xff] %vm279_vm2, %v2468_v35  ;;  %8001 = vmatmul.msk.f32.gmra.mxu0 %vm279_vm2, %v2609_v16  ;;  %v1398_v48 = vmul.f32 %v8541_v1, %v1397_v13  ;;  %v761_v9 = vsub.f32 0.0, %v10079_v26  ;;  %v2611_v35 = vld [vmem:[#allocation2 + $0x21] sm:$0xff] }
 0x1b1   : > { %v2252_v58 = vld [vmem:[#allocation2 + $0xf8] sm:$0xff] }
 0x1b2   : > { %v2057_v23 = vmul.f32 %v9464_v17, %v1693_v56  ;;  %v1399_v31 = vadd.f32 %v8541_v1, %v1398_v48  ;;  %v849_v8 = vmul.f32 1.442695, %v761_v9  ;;  %v2637_v34 = vld [vmem:[#allocation2 + $0xf1] sm:$0xff] }
 0x1b3   : > { %v8543_v2 = vpop.eup %8542 }
 0x1b4   : > { %v8545_v59 = vpop.eup %8544  ;;  %2109 = vst.msk [vmem:[#allocation2 + $0x100] sm:$0xff] %vm279_vm2, %v2057_v23  ;;  %v1410_v37 = vmul.f32 %v8543_v2, %v10072_v57  ;;  %v1403_v43 = vsel %vm1402_vm8, %v8541_v1, %v1399_v31  ;;  %8546 = vpow2.f32 %v849_v8  ;;  %7983 = vmatmul.msk.f32.gmra.mxu3 %vm279_vm2, %v2252_v58  ;;  %vm1415_vm1 = vweird.f32 %v8543_v2 }
 0x1b5   : > { %2158 = vst.msk [vmem:[#allocation3 + $0xe8] sm:$0xff] %vm279_vm2, %v2057_v23  ;;  %v10094_v54 = vadd.f32 1.0, %v8545_v59  ;;  %v680_v17 = vpop.f32.mrf.mxu0  ;;  %v1408_v62 = vsel %vm1405_vm9, %v1407_v11, %v1403_v43  ;;  %vm1416_vm11 = vmor %vm1414_vm10, %vm1415_vm1 }
 0x1b6   : > { %v1411_v50 = vsub.f32 1.0, %v1410_v37  ;;  %v10098_v60 = vadd.f32 %v9929_v44, %v680_v17  ;;  %v1694_v20 = vmul.f32 %v1408_v62, %v10019_v41  ;;  %8099 = vmatmul.msk.f32.gmra.mxu1 %vm279_vm2, %v3571_v47 }
 0x1b7   : > { %8548 = vrcp.f32 %v10094_v54  ;;  %v2471_v14 = vpop.f32.mrf.mxu1  ;;  %8029 = vmatmul.msk.f32.gmra.mxu2 %vm279_vm2, %v2637_v34  ;;  %vm1428_vm15 = vweird.f32 %v10094_v54 }
 0x1b8   : > { %v1412_v52 = vmul.f32 %v8543_v2, %v1411_v50  ;;  %v762_v32 = vsub.f32 0.0, %v10098_v60  ;;  %2577 = vst.msk [vmem:[#allocation4 + $0x80] sm:$0xff] %vm279_vm2, %v2471_v14  ;;  %8002 = vmatmul.msk.f32.gmra.mxu0 %vm279_vm2, %v2610_v12  ;;  %v2058_v49 = vmul.f32 %v9493_v3, %v1694_v20  ;;  %v3573_v14 = vld [vmem:[#allocation2 + $0x57] sm:$0xff] }
 0x1ba   : > { %v1413_v41 = vadd.f32 %v8543_v2, %v1412_v52  ;;  %v851_v0 = vmul.f32 1.442695, %v762_v32  ;;  %v8547_v5 = vpop.eup %8546  ;;  %2110 = vst.msk [vmem:[#allocation2 + $0x108] sm:$0xff] %vm279_vm2, %v2058_v49 }
 0x1bb   : > { %v2253_v1 = vld [vmem:[#allocation2 + $0x100] sm:$0xff]  ;;  %2159 = vst.msk [vmem:[#allocation3 + $0xf0] sm:$0xff] %vm279_vm2, %v2058_v49  ;;  %v10113_v27 = vadd.f32 1.0, %v8547_v5 }
 0x1bc   : > { %v1417_v40 = vsel %vm1416_vm11, %v8543_v2, %v1413_v41  ;;  %8550 = vpow2.f32 %v851_v0  ;;  %7984 = vmatmul.msk.f32.gmra.mxu3 %vm279_vm2, %v2253_v1  ;;  %v2638_v61 = vld [vmem:[#allocation2 + $0xf9] sm:$0xff] }
 0x1bd   : > { %v8549_v3 = vpop.eup %8548  ;;  %v1422_v46 = vsel %vm1419_vm12, %v1421_v15, %v1417_v40  ;;  %v683_v7 = vpop.f32.mrf.mxu0  ;;  %8552 = vrcp.f32 %v10113_v27  ;;  %v1448_v38 = vand.u32 2147483648, %v10113_v27  ;;  %v1446_v52 = vand.u32 2147483647, %v10113_v27 }
 0x1be   : > { %v1695_v57 = vmul.f32 %v1422_v46, %v10038_v21  ;;  %v1424_v19 = vmul.f32 %v8549_v3, %v10094_v54  ;;  %v10120_v51 = vadd.f32 %v9929_v44, %v683_v7  ;;  %v1434_v21 = vand.u32 2147483648, %v10094_v54  ;;  %8100 = vmatmul.msk.f32.gmra.mxu1 %vm279_vm2, %v3572_v45 }
 0x1bf   : > { %v2474_v13 = vpop.f32.mrf.mxu1  ;;  %8030 = vmatmul.msk.f32.gmra.mxu2 %vm279_vm2, %v2638_v61  ;;  %vm1429_vm13 = vweird.f32 %v8549_v3  ;;  %vm1442_vm5 = vweird.f32 %v10113_v27  ;;  %v1449_v5 = vor.u32 1.1754944e-38, %v1448_v38  ;;  %vm1447_vm7 = vcmp.eq.f32.partialorder %v1446_v52, 8.507059e+37 }
 0x1c0   : > { %v2059_v16 = vmul.f32 %v9509_v25, %v1695_v57  ;;  %v1425_v56 = vsub.f32 1.0, %v1424_v19  ;;  %2578 = vst.msk [vmem:[#allocation4 + $0x88] sm:$0xff] %vm279_vm2, %v2474_v13  ;;  %8003 = vmatmul.msk.f32.gmra.mxu0 %vm279_vm2, %v2611_v35  ;;  %v763_v39 = vsub.f32 0.0, %v10120_v51  ;;  %v1432_v25 = vand.u32 2147483647, %v10094_v54  ;;  %vm1430_vm0 = vmor %vm1428_vm15, %vm1429_vm13  ;;  %v2612_v54 = vld [vmem:[#allocation2 + $0x29] sm:$0xff] }
 0x1c1   : > { %v2254_v9 = vld [vmem:[#allocation2 + $0x108] sm:$0xff]  ;;  %v1435_v8 = vor.u32 1.1754944e-38, %v1434_v21  ;;  %v2613_v13 = vld [vmem:[#allocation2 + $0x31] sm:$0xff] }
 0x1c2   : > { %v8551_v48 = vpop.eup %8550  ;;  %2111 = vst.msk [vmem:[#allocation2 + $0x110] sm:$0xff] %vm279_vm2, %v2059_v16  ;;  %v1426_v63 = vmul.f32 %v8549_v3, %v1425_v56  ;;  %v853_v58 = vmul.f32 1.442695, %v763_v39  ;;  %vm1433_vm3 = vcmp.eq.f32.partialorder %v1432_v25, 8.507059e+37  ;;  %v2639_v43 = vld [vmem:[#allocation2 + $0x101] sm:$0xff] }
 0x1c3   : > { %2160 = vst.msk [vmem:[#allocation3 + $0xf8] sm:$0xff] %vm279_vm2, %v2059_v16  ;;  %v10132_v23 = vadd.f32 1.0, %v8551_v48  ;;  %v8553_v2 = vpop.eup %8552  ;;  %v3574_v56 = vld [vmem:[#allocation2 + $0x5f] sm:$0xff] }
 0x1c4   : > { %v1427_v31 = vadd.f32 %v8549_v3, %v1426_v63  ;;  %v1438_v59 = vmul.f32 %v8553_v2, %v10113_v27  ;;  %7985 = vmatmul.msk.f32.gmra.mxu3 %vm279_vm2, %v2254_v9  ;;  %vm1443_vm4 = vweird.f32 %v8553_v2 }
 0x1c5   : > { %8554 = vrcp.f32 %v10132_v23  ;;  %v686_v11 = vpop.f32.mrf.mxu0  ;;  %vm1444_vm6 = vmor %vm1442_vm5, %vm1443_vm4  ;;  %v1462_v19 = vand.u32 2147483648, %v10132_v23  ;;  %v1460_v16 = vand.u32 2147483647, %v10132_v23  ;;  %vm1456_vm9 = vweird.f32 %v10132_v23 }
 0x1c6   : > { %v1431_v37 = vsel %vm1430_vm0, %v8549_v3, %v1427_v31  ;;  %8556 = vpow2.f32 %v853_v58  ;;  %v1439_v62 = vsub.f32 1.0, %v1438_v59  ;;  %v10139_v50 = vadd.f32 %v9929_v44, %v686_v11  ;;  %8101 = vmatmul.msk.f32.gmra.mxu1 %vm279_vm2, %v3573_v14 }
 0x1c7   : > { %v1436_v17 = vsel %vm1433_vm3, %v1435_v8, %v1431_v37  ;;  %v2477_v34 = vpop.f32.mrf.mxu1  ;;  %8031 = vmatmul.msk.f32.gmra.mxu2 %vm279_vm2, %v2639_v43  ;;  %v1463_v63 = vor.u32 1.1754944e-38, %v1462_v19  ;;  %vm1461_vm10 = vcmp.eq.f32.partialorder %v1460_v16, 8.507059e+37  ;;  %v2614_v43 = vld [vmem:[#allocation2 + $0x39] sm:$0xff] }
 0x1c8   : > { %v1696_v20 = vmul.f32 %v1436_v17, %v10060_v55  ;;  %2579 = vst.msk [vmem:[#allocation4 + $0x90] sm:$0xff] %vm279_vm2, %v2477_v34  ;;  %8004 = vmatmul.msk.f32.gmra.mxu0 %vm279_vm2, %v2612_v54  ;;  %v1440_v12 = vmul.f32 %v8553_v2, %v1439_v62  ;;  %v764_v22 = vsub.f32 0.0, %v10139_v50  ;;  %v3575_v34 = vld [vmem:[#allocation2 + $0x67] sm:$0xff] }
 0x1c9   : > { %v2255_v55 = vld [vmem:[#allocation2 + $0x110] sm:$0xff] }
 0x1ca   : > { %v2060_v47 = vmul.f32 %v9551_v10, %v1696_v20  ;;  %v1441_v49 = vadd.f32 %v8553_v2, %v1440_v12  ;;  %v855_v41 = vmul.f32 1.442695, %v764_v22  ;;  %v2640_v46 = vld [vmem:[#allocation2 + $0x109] sm:$0xff] }
 0x1cb   : > { %v8555_v32 = vpop.eup %8554 }
 0x1cc   : > { %v8557_v0 = vpop.eup %8556  ;;  %2112 = vst.msk [vmem:[#allocation2 + $0x118] sm:$0xff] %vm279_vm2, %v2060_v47  ;;  %v1452_v15 = vmul.f32 %v8555_v32, %v10132_v23  ;;  %v1445_v1 = vsel %vm1444_vm6, %v8553_v2, %v1441_v49  ;;  %8558 = vpow2.f32 %v855_v41  ;;  %7986 = vmatmul.msk.f32.gmra.mxu3 %vm279_vm2, %v2255_v55  ;;  %vm1457_vm8 = vweird.f32 %v8555_v32 }
 0x1cd   : > { %2161 = vst.msk [vmem:[#allocation3 + $0x100] sm:$0xff] %vm279_vm2, %v2060_v47  ;;  %v10154_v40 = vadd.f32 1.0, %v8557_v0  ;;  %v689_v10 = vpop.f32.mrf.mxu0  ;;  %v1450_v3 = vsel %vm1447_vm7, %v1449_v5, %v1445_v1  ;;  %vm1458_vm1 = vmor %vm1456_vm9, %vm1457_vm8 }
 0x1ce   : > { %v1453_v27 = vsub.f32 1.0, %v1452_v15  ;;  %v10158_v7 = vadd.f32 %v9929_v44, %v689_v10  ;;  %v1697_v57 = vmul.f32 %v1450_v3, %v10079_v26  ;;  %8102 = vmatmul.msk.f32.gmra.mxu1 %vm279_vm2, %v3574_v56 }
 0x1cf   : > { %8560 = vrcp.f32 %v10154_v40  ;;  %v2480_v61 = vpop.f32.mrf.mxu1  ;;  %8032 = vmatmul.msk.f32.gmra.mxu2 %vm279_vm2, %v2640_v46  ;;  %vm1470_vm12 = vweird.f32 %v10154_v40  ;;  %v3576_v46 = vld [vmem:[#allocation2 + $0x6f] sm:$0xff] }
 0x1d0   : > { %v1454_v35 = vmul.f32 %v8555_v32, %v1453_v27  ;;  %v765_v45 = vsub.f32 0.0, %v10158_v7  ;;  %2580 = vst.msk [vmem:[#allocation4 + $0x98] sm:$0xff] %vm279_vm2, %v2480_v61  ;;  %8005 = vmatmul.msk.f32.gmra.mxu0 %vm279_vm2, %v2613_v13  ;;  %v2061_v21 = vmul.f32 %v9574_v42, %v1697_v57 }
 0x1d2   : > { %v1455_v26 = vadd.f32 %v8555_v32, %v1454_v35  ;;  %v857_v39 = vmul.f32 1.442695, %v765_v45  ;;  %v8559_v48 = vpop.eup %8558  ;;  %2113 = vst.msk [vmem:[#allocation2 + $0x120] sm:$0xff] %vm279_vm2, %v2061_v21 }
 0x1d3   : > { %v2256_v25 = vld [vmem:[#allocation2 + $0x118] sm:$0xff]  ;;  %2162 = vst.msk [vmem:[#allocation3 + $0x108] sm:$0xff] %vm279_vm2, %v2061_v21  ;;  %v10173_v58 = vadd.f32 1.0, %v8559_v48 }
 0x1d4   : > { %v1459_v9 = vsel %vm1458_vm1, %v8555_v32, %v1455_v26  ;;  %8562 = vpow2.f32 %v857_v39  ;;  %7987 = vmatmul.msk.f32.gmra.mxu3 %vm279_vm2, %v2256_v25  ;;  %v2641_v59 = vld [vmem:[#allocation2 + $0x111] sm:$0xff] }
 0x1d5   : > { %v8561_v42 = vpop.eup %8560  ;;  %v1464_v2 = vsel %vm1461_vm10, %v1463_v63, %v1459_v9  ;;  %v692_v31 = vpop.f32.mrf.mxu0  ;;  %8564 = vrcp.f32 %v10173_v58  ;;  %v1490_v27 = vand.u32 2147483648, %v10173_v58  ;;  %v1488_v19 = vand.u32 2147483647, %v10173_v58 }
 0x1d6   : > { %v1698_v23 = vmul.f32 %v1464_v2, %v10098_v60  ;;  %v1466_v8 = vmul.f32 %v8561_v42, %v10154_v40  ;;  %v10180_v11 = vadd.f32 %v9929_v44, %v692_v31  ;;  %v1476_v60 = vand.u32 2147483648, %v10154_v40  ;;  %8103 = vmatmul.msk.f32.gmra.mxu1 %vm279_vm2, %v3575_v34 }
 0x1d7   : > { %v2483_v37 = vpop.f32.mrf.mxu1  ;;  %8033 = vmatmul.msk.f32.gmra.mxu2 %vm279_vm2, %v2641_v59  ;;  %vm1471_vm11 = vweird.f32 %v8561_v42  ;;  %vm1484_vm3 = vweird.f32 %v10173_v58  ;;  %v1491_v21 = vor.u32 1.1754944e-38, %v1490_v27  ;;  %vm1489_vm5 = vcmp.eq.f32.partialorder %v1488_v19, 8.507059e+37 }
 0x1d8   : > { %v2062_v17 = vmul.f32 %v9583_v33, %v1698_v23  ;;  %v1467_v62 = vsub.f32 1.0, %v1466_v8  ;;  %2581 = vst.msk [vmem:[#allocation4 + $0xa0] sm:$0xff] %vm279_vm2, %v2483_v37  ;;  %8006 = vmatmul.msk.f32.gmra.mxu0 %vm279_vm2, %v2614_v43  ;;  %v766_v54 = vsub.f32 0.0, %v10180_v11  ;;  %v1474_v33 = vand.u32 2147483647, %v10154_v40  ;;  %vm1472_vm13 = vmor %vm1470_vm12, %vm1471_vm11  ;;  %v2615_v40 = vld [vmem:[#allocation2 + $0x41] sm:$0xff] }
 0x1d9   : > { %v2257_v14 = vld [vmem:[#allocation2 + $0x120] sm:$0xff]  ;;  %v1477_v55 = vor.u32 1.1754944e-38, %v1476_v60  ;;  %v2616_v23 = vld [vmem:[#allocation2 + $0x49] sm:$0xff]  ;;  %v3577_v37 = vld [vmem:[#allocation2 + $0x77] sm:$0xff] }
 0x1da   : > { %v8563_v20 = vpop.eup %8562  ;;  %2114 = vst.msk [vmem:[#allocation2 + $0x128] sm:$0xff] %vm279_vm2, %v2062_v17  ;;  %v1468_v38 = vmul.f32 %v8561_v42, %v1467_v62  ;;  %v859_v52 = vmul.f32 1.442695, %v766_v54  ;;  %vm1475_vm15 = vcmp.eq.f32.partialorder %v1474_v33, 8.507059e+37  ;;  %v2642_v0 = vld [vmem:[#allocation2 + $0x119] sm:$0xff] }
 0x1db   : > { %2163 = vst.msk [vmem:[#allocation3 + $0x110] sm:$0xff] %vm279_vm2, %v2062_v17  ;;  %v10192_v12 = vadd.f32 1.0, %v8563_v20  ;;  %v8565_v22 = vpop.eup %8564 }
 0x1dc   : > { %v1469_v47 = vadd.f32 %v8561_v42, %v1468_v38  ;;  %v1480_v32 = vmul.f32 %v8565_v22, %v10173_v58  ;;  %7988 = vmatmul.msk.f32.gmra.mxu3 %vm279_vm2, %v2257_v14  ;;  %vm1485_vm0 = vweird.f32 %v8565_v22 }
 0x1dd   : > { %8566 = vrcp.f32 %v10192_v12  ;;  %v695_v49 = vpop.f32.mrf.mxu0  ;;  %vm1486_vm4 = vmor %vm1484_vm3, %vm1485_vm0  ;;  %v1504_v2 = vand.u32 2147483648, %v10192_v12  ;;  %v1502_v59 = vand.u32 2147483647, %v10192_v12  ;;  %vm1498_vm7 = vweird.f32 %v10192_v12 }
 0x1de   : > { %v1473_v41 = vsel %vm1472_vm13, %v8561_v42, %v1469_v47  ;;  %8568 = vpow2.f32 %v859_v52  ;;  %v1481_v15 = vsub.f32 1.0, %v1480_v32  ;;  %v10199_v1 = vadd.f32 %v9929_v44, %v695_v49  ;;  %8104 = vmatmul.msk.f32.gmra.mxu1 %vm279_vm2, %v3576_v46  ;;  %v10242_v47 = vld [vmem:[%s12486_s4] ss:$0 sm:$0xff]  ;;  %v2617_v49 = vld [vmem:[#allocation2 + $0x51] sm:$0xff] }
 0x1df   : > { %v1478_v5 = vsel %vm1475_vm15, %v1477_v55, %v1473_v41  ;;  %v2486_v10 = vpop.f32.mrf.mxu1  ;;  %8034 = vmatmul.msk.f32.gmra.mxu2 %vm279_vm2, %v2642_v0  ;;  %v1505_v34 = vor.u32 1.1754944e-38, %v1504_v2  ;;  %vm1503_vm9 = vcmp.eq.f32.partialorder %v1502_v59, 8.507059e+37 }
 0x1e0   : > { %v1699_v3 = vmul.f32 %v1478_v5, %v10120_v51  ;;  %2582 = vst.msk [vmem:[#allocation4 + $0xa8] sm:$0xff] %vm279_vm2, %v2486_v10  ;;  %8007 = vmatmul.msk.f32.gmra.mxu0 %vm279_vm2, %v2615_v40  ;;  %v1482_v57 = vmul.f32 %v8565_v22, %v1481_v15  ;;  %v767_v61 = vsub.f32 0.0, %v10199_v1  ;;  %v3578_v5 = vld [vmem:[#allocation2 + $0x7f] sm:$0xff] }
 0x1e1   : > { %v2258_v51 = vld [vmem:[#allocation2 + $0x128] sm:$0xff] }
 0x1e2   : > { %v2063_v13 = vmul.f32 %v9620_v36, %v1699_v3  ;;  %v1483_v16 = vadd.f32 %v8565_v22, %v1482_v57  ;;  %v861_v56 = vmul.f32 1.442695, %v767_v61  ;;  %v2643_v9 = vld [vmem:[#allocation2 + $0x121] sm:$0xff] }
 0x1e3   : > { %v8567_v35 = vpop.eup %8566 }
 0x1e4   : > { %v8569_v45 = vpop.eup %8568  ;;  %2115 = vst.msk [vmem:[#allocation2 + $0x130] sm:$0xff] %vm279_vm2, %v2063_v13  ;;  %v1494_v26 = vmul.f32 %v8567_v35, %v10192_v12  ;;  %v1487_v39 = vsel %vm1486_vm4, %v8565_v22, %v1483_v16  ;;  %8570 = vpow2.f32 %v861_v56  ;;  %7989 = vmatmul.msk.f32.gmra.mxu3 %vm279_vm2, %v2258_v51  ;;  %vm1499_vm6 = vweird.f32 %v8567_v35 }
 0x1e5   : > { %2164 = vst.msk [vmem:[#allocation3 + $0x118] sm:$0xff] %vm279_vm2, %v2063_v13  ;;  %v10214_v48 = vadd.f32 1.0, %v8569_v45  ;;  %v698_v36 = vpop.f32.mrf.mxu0  ;;  %v1492_v63 = vsel %vm1489_vm5, %v1491_v21, %v1487_v39  ;;  %vm1500_vm8 = vmor %vm1498_vm7, %vm1499_vm6 }
 0x1e6   : > { %v1495_v25 = vsub.f32 1.0, %v1494_v26  ;;  %v10218_v58 = vadd.f32 %v9929_v44, %v698_v36  ;;  %v1700_v42 = vmul.f32 %v1492_v63, %v10139_v50  ;;  %8105 = vmatmul.msk.f32.gmra.mxu1 %vm279_vm2, %v3577_v37 }
 0x1e7   : > { %8572 = vrcp.f32 %v10214_v48  ;;  %v2489_v31 = vpop.f32.mrf.mxu1  ;;  %8035 = vmatmul.msk.f32.gmra.mxu2 %vm279_vm2, %v2643_v9  ;;  %v2969_v32 = vld [vmem:[#allocation4 + $0xa8] sm:$0xff]  ;;  %v1518_v15 = vand.u32 2147483648, %v10214_v48  ;;  %vm1512_vm10 = vweird.f32 %v10214_v48 }
 0x1e8   : > { %v1496_v8 = vmul.f32 %v8567_v35, %v1495_v25  ;;  %v768_v43 = vsub.f32 0.0, %v10218_v58  ;;  %2583 = vst.msk [vmem:[#allocation4 + $0xb0] sm:$0xff] %vm279_vm2, %v2489_v31  ;;  %8008 = vmatmul.msk.f32.gmra.mxu0 %vm279_vm2, %v2616_v23  ;;  %v2064_v44 = vmul.f32 %v9624_v53, %v1700_v42  ;;  %v3579_v25 = vld [vmem:[#allocation2 + $0x87] sm:$0xff] }
 0x1e9   : > { %v1519_v51 = vor.u32 1.1754944e-38, %v1518_v15 }
 0x1ea   : > { %v1497_v50 = vadd.f32 %v8567_v35, %v1496_v8  ;;  %v863_v17 = vmul.f32 1.442695, %v768_v43  ;;  %v8571_v62 = vpop.eup %8570  ;;  %2116 = vst.msk [vmem:[#allocation2 + $0x138] sm:$0xff] %vm279_vm2, %v2064_v44 }
 0x1eb   : > { %v2259_v60 = vld [vmem:[#allocation2 + $0x130] sm:$0xff]  ;;  %2165 = vst.msk [vmem:[#allocation3 + $0x120] sm:$0xff] %vm279_vm2, %v2064_v44  ;;  %v10233_v20 = vadd.f32 1.0, %v8571_v62 }
 0x1ec   : > { %v1501_v54 = vsel %vm1500_vm8, %v8567_v35, %v1497_v50  ;;  %8574 = vpow2.f32 %v863_v17  ;;  %7990 = vmatmul.msk.f32.gmra.mxu3 %vm279_vm2, %v2259_v60  ;;  %v2644_v22 = vld [vmem:[#allocation2 + $0x129] sm:$0xff] }
 0x1ed   : > { %v8573_v53 = vpop.eup %8572  ;;  %v1506_v38 = vsel %vm1503_vm9, %v1505_v34, %v1501_v54  ;;  %v701_v33 = vpop.f32.mrf.mxu0  ;;  %8576 = vrcp.f32 %v10233_v20  ;;  %v1532_v63 = vand.u32 2147483648, %v10233_v20  ;;  %v1530_v42 = vand.u32 2147483647, %v10233_v20 }
 0x1ee   : > { %v2873_v14 = vpop.f32.mrf.mxu2  ;;  %v1701_v12 = vmul.f32 %v1506_v38, %v10158_v7  ;;  %v1508_v52 = vmul.f32 %v8573_v53, %v10214_v48  ;;  %v10245_v55 = vadd.f32 %v10242_v47, %v701_v33  ;;  %8106 = vmatmul.msk.f32.gmra.mxu1 %vm279_vm2, %v3578_v5  ;;  %vm1513_vm1 = vweird.f32 %v8573_v53 }
 0x1ef   : > { %v3015_v7 = vadd.f32 %v2969_v32, %v2873_v14  ;;  %8036 = vmatmul.msk.f32.gmra.mxu2 %vm279_vm2, %v2644_v22  ;;  %vm1514_vm11 = vmor %vm1512_vm10, %vm1513_vm1  ;;  %v2970_v8 = vld [vmem:[#allocation4 + $0xb0] sm:$0xff]  ;;  %vm1526_vm15 = vweird.f32 %v10233_v20  ;;  %v1533_v17 = vor.u32 1.1754944e-38, %v1532_v63  ;;  %vm1531_vm3 = vcmp.eq.f32.partialorder %v1530_v42, 8.507059e+37 }
 0x1f0   : > { %v2065_v41 = vmul.f32 %v9632_v6, %v1701_v12  ;;  %v1509_v0 = vsub.f32 1.0, %v1508_v52  ;;  %8009 = vmatmul.msk.f32.gmra.mxu0 %vm279_vm2, %v2617_v49  ;;  %v769_v10 = vsub.f32 0.0, %v10245_v55  ;;  %v1516_v6 = vand.u32 2147483647, %v10214_v48  ;;  %v2618_v48 = vld [vmem:[#allocation2 + $0x59] sm:$0xff]  ;;  %v2619_v52 = vld [vmem:[#allocation2 + $0x61] sm:$0xff] }
 0x1f1   : > { %v2260_v27 = vld [vmem:[#allocation2 + $0x138] sm:$0xff]  ;;  %3061 = vst.msk [vmem:[#allocation4 + $0xa8] sm:$0xff] %vm279_vm2, %v3015_v7  ;;  %v2492_v13 = vpop.f32.mrf.mxu1  ;;  %v3580_v49 = vld [vmem:[#allocation2 + $0x8f] sm:$0xff] }
 0x1f2   : > { %v8575_v40 = vpop.eup %8574  ;;  %2117 = vst.msk [vmem:[#allocation2 + $0x140] sm:$0xff] %vm279_vm2, %v2065_v41  ;;  %v1510_v3 = vmul.f32 %v8573_v53, %v1509_v0  ;;  %v865_v57 = vmul.f32 1.442695, %v769_v10  ;;  %vm1517_vm12 = vcmp.eq.f32.partialorder %v1516_v6, 8.507059e+37  ;;  %v2645_v45 = vld [vmem:[#allocation2 + $0x131] sm:$0xff] }
 0x1f3   : > { %2166 = vst.msk [vmem:[#allocation3 + $0x128] sm:$0xff] %vm279_vm2, %v2065_v41  ;;  %v10256_v46 = vadd.f32 1.0, %v8575_v40  ;;  %v8577_v19 = vpop.eup %8576 }
 0x1f4   : > { %v1511_v61 = vadd.f32 %v8573_v53, %v1510_v3  ;;  %v1522_v35 = vmul.f32 %v8577_v19, %v10233_v20  ;;  %2584 = vst.msk [vmem:[#allocation4 + $0xb8] sm:$0xff] %vm279_vm2, %v2492_v13  ;;  %7991 = vmatmul.msk.f32.gmra.mxu3 %vm279_vm2, %v2260_v27  ;;  %vm1527_vm13 = vweird.f32 %v8577_v19 }
 0x1f5   : > { %8578 = vrcp.f32 %v10256_v46  ;;  %v704_v16 = vpop.f32.mrf.mxu0  ;;  %vm1528_vm0 = vmor %vm1526_vm15, %vm1527_vm13  ;;  %v1546_v12 = vand.u32 2147483648, %v10256_v46  ;;  %v1544_v32 = vand.u32 2147483647, %v10256_v46  ;;  %vm1540_vm5 = vweird.f32 %v10256_v46 }
 0x1f6   : > { %v1515_v56 = vsel %vm1514_vm11, %v8573_v53, %v1511_v61  ;;  %8580 = vpow2.f32 %v865_v57  ;;  %v1523_v26 = vsub.f32 1.0, %v1522_v35  ;;  %v10265_v39 = vadd.f32 %v10242_v47, %v704_v16  ;;  %8107 = vmatmul.msk.f32.gmra.mxu1 %vm279_vm2, %v3579_v25 }
 0x1f7   : > { %v1520_v21 = vsel %vm1517_vm12, %v1519_v51, %v1515_v56  ;;  %8037 = vmatmul.msk.f32.gmra.mxu2 %vm279_vm2, %v2645_v45  ;;  %v1547_v15 = vor.u32 1.1754944e-38, %v1546_v12  ;;  %vm1545_vm7 = vcmp.eq.f32.partialorder %v1544_v32, 8.507059e+37  ;;  %v2620_v45 = vld [vmem:[#allocation2 + $0x69] sm:$0xff] }
 0x1f8   : > { %v1702_v36 = vmul.f32 %v1520_v21, %v10180_v11  ;;  %8010 = vmatmul.msk.f32.gmra.mxu0 %vm279_vm2, %v2618_v48  ;;  %v1524_v9 = vmul.f32 %v8577_v19, %v1523_v26  ;;  %v770_v2 = vsub.f32 0.0, %v10265_v39  ;;  %v2876_v23 = vpop.f32.mrf.mxu2  ;;  %v3581_v48 = vld [vmem:[#allocation2 + $0x97] sm:$0xff] }
 0x1f9   : > { %v2261_v11 = vld [vmem:[#allocation2 + $0x140] sm:$0xff]  ;;  %v3016_v44 = vadd.f32 %v2970_v8, %v2876_v23 }
 0x1fa   : > { %v2066_v31 = vmul.f32 %v9691_v29, %v1702_v36  ;;  %v1525_v37 = vadd.f32 %v8577_v19, %v1524_v9  ;;  %v867_v43 = vmul.f32 1.442695, %v770_v2  ;;  %v2646_v38 = vld [vmem:[#allocation2 + $0x139] sm:$0xff] }
 0x1fb   : > { %v8579_v59 = vpop.eup %8578  ;;  %3062 = vst.msk [vmem:[#allocation4 + $0xb0] sm:$0xff] %vm279_vm2, %v3016_v44  ;;  %v2495_v53 = vpop.f32.mrf.mxu1  ;;  %v2971_v6 = vld [vmem:[#allocation4 + $0xb8] sm:$0xff] }
 0x1fc   : > { %v8581_v50 = vpop.eup %8580  ;;  %2118 = vst.msk [vmem:[#allocation2 + $0x148] sm:$0xff] %vm279_vm2, %v2066_v31  ;;  %v1536_v62 = vmul.f32 %v8579_v59, %v10256_v46  ;;  %v1529_v29 = vsel %vm1528_vm0, %v8577_v19, %v1525_v37  ;;  %8582 = vpow2.f32 %v867_v43  ;;  %7992 = vmatmul.msk.f32.gmra.mxu3 %vm279_vm2, %v2261_v11  ;;  %vm1541_vm4 = vweird.f32 %v8579_v59 }
 0x1fd   : > { %2167 = vst.msk [vmem:[#allocation3 + $0x130] sm:$0xff] %vm279_vm2, %v2066_v31  ;;  %v10280_v34 = vadd.f32 1.0, %v8581_v50  ;;  %v707_v60 = vpop.f32.mrf.mxu0  ;;  %v1534_v54 = vsel %vm1531_vm3, %v1533_v17, %v1529_v29  ;;  %vm1542_vm6 = vmor %vm1540_vm5, %vm1541_vm4 }
 0x1fe   : > { %v1537_v20 = vsub.f32 1.0, %v1536_v62  ;;  %v10285_v33 = vadd.f32 %v10242_v47, %v707_v60  ;;  %v1703_v14 = vmul.f32 %v1534_v54, %v10199_v1  ;;  %2585 = vst.msk [vmem:[#allocation4 + $0xc0] sm:$0xff] %vm279_vm2, %v2495_v53  ;;  %8108 = vmatmul.msk.f32.gmra.mxu1 %vm279_vm2, %v3580_v49  ;;  %v2621_v53 = vld [vmem:[#allocation2 + $0x71] sm:$0xff] }
 0x1ff   : > { %8584 = vrcp.f32 %v10280_v34  ;;  %8038 = vmatmul.msk.f32.gmra.mxu2 %vm279_vm2, %v2646_v38  ;;  %v1560_v36 = vand.u32 2147483648, %v10280_v34  ;;  %vm1554_vm9 = vweird.f32 %v10280_v34 }
 0x200   : > { %v1538_v22 = vmul.f32 %v8579_v59, %v1537_v20  ;;  %v771_v41 = vsub.f32 0.0, %v10285_v33  ;;  %8011 = vmatmul.msk.f32.gmra.mxu0 %vm279_vm2, %v2619_v52  ;;  %v2067_v0 = vmul.f32 %v9676_v4, %v1703_v14  ;;  %v3582_v14 = vld [vmem:[#allocation2 + $0x9f] sm:$0xff]  ;;  %v1988_v52 = vpop.permute.xlu1 %1987 }
 0x201   : > { %v1561_v11 = vor.u32 1.1754944e-38, %v1560_v36 }
 0x202   : > { %v1539_v1 = vadd.f32 %v8579_v59, %v1538_v22  ;;  %v869_v5 = vmul.f32 1.442695, %v771_v41  ;;  %v8583_v7 = vpop.eup %8582  ;;  %2119 = vst.msk [vmem:[#allocation2 + $0x150] sm:$0xff] %vm279_vm2, %v2067_v0  ;;  %v2879_v4 = vpop.f32.mrf.mxu2 }
 0x203   : > { %v2262_v10 = vld [vmem:[#allocation2 + $0x148] sm:$0xff]  ;;  %2168 = vst.msk [vmem:[#allocation3 + $0x138] sm:$0xff] %vm279_vm2, %v2067_v0  ;;  %v10300_v3 = vadd.f32 1.0, %v8583_v7  ;;  %v3017_v19 = vadd.f32 %v2971_v6, %v2879_v4  ;;  %v10306_v51 = vpop.f32.mrf.mxu1 }
 0x204   : > { %v1543_v40 = vsel %vm1542_vm6, %v8579_v59, %v1539_v1  ;;  %8586 = vpow2.f32 %v869_v5  ;;  %7993 = vmatmul.msk.f32.gmra.mxu3 %vm279_vm2, %v2262_v10  ;;  %v2647_v35 = vld [vmem:[#allocation2 + $0x141] sm:$0xff] }
 0x205   : > { %v8585_v27 = vpop.eup %8584  ;;  %v1548_v57 = vsel %vm1545_vm7, %v1547_v15, %v1543_v40  ;;  %v710_v46 = vpop.f32.mrf.mxu0  ;;  %8588 = vrcp.f32 %v10300_v3  ;;  %3063 = vst.msk [vmem:[#allocation4 + $0xb8] sm:$0xff] %vm279_vm2, %v3017_v19  ;;  %v1572_v44 = vand.u32 2147483647, %v10300_v3  ;;  %v1574_v50 = vand.u32 2147483648, %v10300_v3  ;;  %v2972_v17 = vld [vmem:[#allocation4 + $0xc0] sm:$0xff] }
 0x206   : > { %v1704_v61 = vmul.f32 %v1548_v57, %v10218_v58  ;;  %v1550_v13 = vmul.f32 %v8585_v27, %v10280_v34  ;;  %v10310_v16 = vadd.f32 %v10242_v47, %v710_v46  ;;  %v2498_v56 = vpop.f32.mrf.mxu3  ;;  %v1558_v58 = vand.u32 2147483647, %v10280_v34  ;;  %8109 = vmatmul.msk.f32.gmra.mxu1 %vm279_vm2, %v3581_v48 }
 0x207   : > { %2586 = vst.msk [vmem:[#allocation4 + $0xc8] sm:$0xff] %vm279_vm2, %v2498_v56  ;;  %8039 = vmatmul.msk.f32.gmra.mxu2 %vm279_vm2, %v2647_v35  ;;  %vm1555_vm8 = vweird.f32 %v8585_v27  ;;  %vm1568_vm12 = vweird.f32 %v10300_v3  ;;  %vm10343_vm13 = vcmp.eq.f32.partialorder %v1572_v44, 8.507059e+37  ;;  %v1575_v7 = vor.u32 1.1754944e-38, %v1574_v50 }
 0x208   : > { %v2068_v21 = vmul.f32 %v9688_v30, %v1704_v61  ;;  %v1551_v26 = vsub.f32 1.0, %v1550_v13  ;;  %8012 = vmatmul.msk.f32.gmra.mxu0 %vm279_vm2, %v2620_v45  ;;  %v772_v63 = vsub.f32 0.0, %v10310_v16  ;;  %vm1556_vm1 = vmor %vm1554_vm9, %vm1555_vm8  ;;  %vm1559_vm10 = vcmp.eq.f32.partialorder %v1558_v58, 8.507059e+37  ;;  %v3583_v58 = vld [vmem:[#allocation2 + $0xa7] sm:$0xff] }
 0x209   : > { %v2263_v9 = vld [vmem:[#allocation2 + $0x150] sm:$0xff] }
 0x20a   : > { %v8587_v25 = vpop.eup %8586  ;;  %2120 = vst.msk [vmem:[#allocation2 + $0x158] sm:$0xff] %vm279_vm2, %v2068_v21  ;;  %v1552_v30 = vmul.f32 %v8585_v27, %v1551_v26  ;;  %v871_v2 = vmul.f32 1.442695, %v772_v63  ;;  %v2882_v8 = vpop.f32.mrf.mxu2  ;;  %v2648_v29 = vld [vmem:[#allocation2 + $0x149] sm:$0xff]  ;;  %v2622_v26 = vld [vmem:[#allocation2 + $0x79] sm:$0xff] }
 0x20b   : > { %2169 = vst.msk [vmem:[#allocation3 + $0x140] sm:$0xff] %vm279_vm2, %v2068_v21  ;;  %v10322_v42 = vadd.f32 1.0, %v8587_v25  ;;  %v8589_v31 = vpop.eup %8588  ;;  %v10330_v62 = vpop.f32.mrf.mxu1  ;;  %v3018_v54 = vadd.f32 %v2972_v17, %v2882_v8 }
 0x20c   : > { %v1553_v23 = vadd.f32 %v8585_v27, %v1552_v30  ;;  %v1564_v59 = vmul.f32 %v8589_v31, %v10300_v3  ;;  %7994 = vmatmul.msk.f32.gmra.mxu3 %vm279_vm2, %v2263_v9  ;;  %vm1569_vm11 = vweird.f32 %v8589_v31 }
 0x20d   : > { %8590 = vrcp.f32 %v10322_v42  ;;  %v713_v37 = vpop.f32.mrf.mxu0  ;;  %3064 = vst.msk [vmem:[#allocation4 + $0xc0] sm:$0xff] %vm279_vm2, %v3018_v54  ;;  %vm1570_vm15 = vmor %vm1568_vm12, %vm1569_vm11  ;;  %vm1582_vm0 = vweird.f32 %v10322_v42  ;;  %v1586_v3 = vand.u32 2147483647, %v10322_v42  ;;  %v1588_v4 = vand.u32 2147483648, %v10322_v42 }
 0x20e   : > { %v1557_v43 = vsel %vm1556_vm1, %v8585_v27, %v1553_v23  ;;  %8592 = vpow2.f32 %v871_v2  ;;  %v1565_v60 = vsub.f32 1.0, %v1564_v59  ;;  %v10333_v20 = vadd.f32 %v10242_v47, %v713_v37  ;;  %v2501_v12 = vpop.f32.mrf.mxu3  ;;  %8110 = vmatmul.msk.f32.gmra.mxu1 %vm279_vm2, %v3582_v14  ;;  %v2623_v14 = vld [vmem:[#allocation2 + $0x81] sm:$0xff] }
 0x20f   : > { %v1562_v34 = vsel %vm1559_vm10, %v1561_v11, %v1557_v43  ;;  %8040 = vmatmul.msk.f32.gmra.mxu2 %vm279_vm2, %v2648_v29  ;;  %2587 = vst.msk [vmem:[#allocation4 + $0xd0] sm:$0xff] %vm279_vm2, %v2501_v12  ;;  %vm1587_vm5 = vcmp.eq.f32.partialorder %v1586_v3, 8.507059e+37 }
 0x210   : > { %v1705_v38 = vmul.f32 %v1562_v34, %v10245_v55  ;;  %8013 = vmatmul.msk.f32.gmra.mxu0 %vm279_vm2, %v2621_v53  ;;  %v1566_v22 = vmul.f32 %v8589_v31, %v1565_v60  ;;  %v773_v32 = vsub.f32 0.0, %v10333_v20  ;;  %v2973_v55 = vld [vmem:[#allocation4 + $0xc8] sm:$0xff]  ;;  %v1998_v60 = vpop.permute.xlu1 %1997 }
 0x211   : > { %v2264_v41 = vld [vmem:[#allocation2 + $0x158] sm:$0xff] }
 0x212   : > { %v2069_v49 = vmul.f32 %v1988_v52, %v1705_v38  ;;  %v1567_v1 = vadd.f32 %v8589_v31, %v1566_v22  ;;  %v873_v15 = vmul.f32 1.442695, %v773_v32  ;;  %v2885_v6 = vpop.f32.mrf.mxu2  ;;  %v2649_v56 = vld [vmem:[#allocation2 + $0x151] sm:$0xff] }
 0x213   : > { %v8591_v0 = vpop.eup %8590  ;;  %v3019_v19 = vadd.f32 %v2973_v55, %v2885_v6  ;;  %v10359_v35 = vpop.f32.mrf.mxu1  ;;  %v2948_v38 = vld [vmem:[#allocation4] sm:$0xff]  ;;  %v3584_v52 = vld [vmem:[#allocation2 + $0xaf] sm:$0xff] }
 0x214   : > { %v8593_v10 = vpop.eup %8592  ;;  %2121 = vst.msk [vmem:[#allocation2 + $0x160] sm:$0xff] %vm279_vm2, %v2069_v49  ;;  %v1578_v40 = vmul.f32 %v8591_v0, %v10322_v42  ;;  %v1571_v27 = vsel %vm1570_vm15, %v8589_v31, %v1567_v1  ;;  %8594 = vpow2.f32 %v873_v15  ;;  %7995 = vmatmul.msk.f32.gmra.mxu3 %vm279_vm2, %v2264_v41  ;;  %vm1583_vm3 = vweird.f32 %v8591_v0  ;;  %v8186_v42 = vld [vmem:[%s12487_s5 + $0x28] sm:$0xff] }
 0x215   : > { %2170 = vst.msk [vmem:[#allocation3 + $0x148] sm:$0xff] %vm279_vm2, %v2069_v49  ;;  %v10354_v57 = vadd.f32 1.0, %v8593_v10  ;;  %v716_v46 = vpop.f32.mrf.mxu0  ;;  %v1576_v61 = vsel %vm10343_vm13, %v1575_v7, %v1571_v27  ;;  %vm10372_vm4 = vmor %vm1582_vm0, %vm1583_vm3  ;;  %4724 = vmatpush.msrb.mxu3 %v8186_v42  ;;  %v3086_v42 = vld [vmem:[#allocation2 + $0x2] sm:$0xff] }
 0x216   : > { %v1579_v13 = vsub.f32 1.0, %v1578_v40  ;;  %v10362_v45 = vadd.f32 %v10242_v47, %v716_v46  ;;  %v1706_v21 = vmul.f32 %v1576_v61, %v10265_v39  ;;  %3065 = vst.msk [vmem:[#allocation4 + $0xc8] sm:$0xff] %vm279_vm2, %v3019_v19  ;;  %v2504_v63 = vpop.f32.mrf.mxu3  ;;  %v1589_v39 = vor.u32 1.1754944e-38, %v1588_v4  ;;  %8111 = vmatmul.msk.f32.gmra.mxu1 %vm279_vm2, %v3583_v58  ;;  %v2974_v2 = vld [vmem:[#allocation4 + $0xd0] sm:$0xff]  ;;  %v8280_v47 = vld [vmem:[%s12487_s5 + $0x38] sm:$0xff] }
 0x217   : > { %8596 = vrcp.f32 %v10354_v57  ;;  %8041 = vmatmul.msk.f32.gmra.mxu2 %vm279_vm2, %v2649_v56  ;;  %2588 = vst.msk [vmem:[#allocation4 + $0xd8] sm:$0xff] %vm279_vm2, %v2504_v63  ;;  %vm1596_vm6 = vweird.f32 %v10354_v57  ;;  %v1600_v54 = vand.u32 2147483647, %v10354_v57  ;;  %v1602_v53 = vand.u32 2147483648, %v10354_v57  ;;  %5682 = vmatpush.msra.mxu1 %v8280_v47 }
 0x218   : > { %v1580_v48 = vmul.f32 %v8591_v0, %v1579_v13  ;;  %v774_v36 = vsub.f32 0.0, %v10362_v45  ;;  %8014 = vmatmul.msk.f32.gmra.mxu0 %vm279_vm2, %v2622_v26  ;;  %v2070_v25 = vmul.f32 %v9741_v28, %v1706_v21  ;;  %v2949_v13 = vld [vmem:[#allocation4 + $0x8] sm:$0xff] }
 0x219   : > { %v1603_v1 = vor.u32 1.1754944e-38, %v1602_v53  ;;  %vm1601_vm9 = vcmp.eq.f32.partialorder %v1600_v54, 8.507059e+37  ;;  %v2625_v53 = vld [vmem:[#allocation2 + $0x91] sm:$0xff] }
 0x21a   : > { %v1581_v30 = vadd.f32 %v8591_v0, %v1580_v48  ;;  %v875_v9 = vmul.f32 1.442695, %v774_v36  ;;  %v8595_v31 = vpop.eup %8594  ;;  %2122 = vst.msk [vmem:[#allocation2 + $0x168] sm:$0xff] %vm279_vm2, %v2070_v25  ;;  %v2888_v11 = vpop.f32.mrf.mxu2  ;;  %v2624_v48 = vld [vmem:[#allocation2 + $0x89] sm:$0xff]  ;;  %v3585_v36 = vld [vmem:[#allocation2 + $0xb7] sm:$0xff] }
 0x21b   : > { %v2265_v28 = vld [vmem:[#allocation2 + $0x160] sm:$0xff]  ;;  %2171 = vst.msk [vmem:[#allocation3 + $0x150] sm:$0xff] %vm279_vm2, %v2070_v25  ;;  %v10386_v8 = vadd.f32 1.0, %v8595_v31  ;;  %v3020_v43 = vadd.f32 %v2974_v2, %v2888_v11  ;;  %v10392_v29 = vpop.f32.mrf.mxu1 }
 0x21c   : > { %v1585_v23 = vsel %vm10372_vm4, %v8591_v0, %v1581_v30  ;;  %8598 = vpow2.f32 %v875_v9  ;;  %7996 = vmatmul.msk.f32.gmra.mxu3 %vm279_vm2, %v2265_v28  ;;  %v2650_v34 = vld [vmem:[#allocation2 + $0x159] sm:$0xff] }
 0x21d   : > { %v8597_v59 = vpop.eup %8596  ;;  %v1590_v37 = vsel %vm1587_vm5, %v1589_v39, %v1585_v23  ;;  %v2810_v44 = vpop.f32.mrf.mxu0  ;;  %8600 = vrcp.f32 %v10386_v8  ;;  %3066 = vst.msk [vmem:[#allocation4 + $0xd0] sm:$0xff] %vm279_vm2, %v3020_v43  ;;  %vm1610_vm1 = vweird.f32 %v10386_v8  ;;  %v1614_v27 = vand.u32 2147483647, %v10386_v8  ;;  %v2950_v43 = vld [vmem:[#allocation4 + $0x10] sm:$0xff] }
 0x21e   : > { %v1707_v50 = vmul.f32 %v1590_v37, %v10285_v33  ;;  %v1592_v17 = vmul.f32 %v8597_v59, %v10354_v57  ;;  %vm1597_vm7 = vweird.f32 %v8597_v59  ;;  %v2994_v32 = vadd.f32 %v2948_v38, %v2810_v44  ;;  %8112 = vmatmul.msk.f32.gmra.mxu1 %vm279_vm2, %v3584_v52  ;;  %v2975_v7 = vld [vmem:[#allocation4 + $0xd8] sm:$0xff] }
 0x21f   : > { %v2507_v22 = vpop.f32.mrf.mxu3  ;;  %8042 = vmatmul.msk.f32.gmra.mxu2 %vm279_vm2, %v2650_v34  ;;  %vm10406_vm8 = vmor %vm1596_vm6, %vm1597_vm7  ;;  %v1616_v57 = vand.u32 2147483648, %v10386_v8  ;;  %vm1615_vm12 = vcmp.eq.f32.partialorder %v1614_v27, 8.507059e+37  ;;  %v8233_v38 = vld [vmem:[%s12487_s5 + $0x30] sm:$0xff]  ;;  %v3587_v27 = vld [vmem:[#allocation2 + $0xc7] sm:$0xff] }
 0x220   : > { %v2071_v12 = vmul.f32 %v1998_v60, %v1707_v50  ;;  %v1593_v33 = vsub.f32 1.0, %v1592_v17  ;;  %8015 = vmatmul.msk.f32.gmra.mxu0 %vm279_vm2, %v2623_v14  ;;  %2589 = vst.msk [vmem:[#allocation4 + $0xe0] sm:$0xff] %vm279_vm2, %v2507_v22  ;;  %v8327_v14 = vld [vmem:[%s12487_s5 + $0x40] sm:$0xff] }
 0x221   : > { %v2266_v41 = vld [vmem:[#allocation2 + $0x168] sm:$0xff]  ;;  %3040 = vst.msk [vmem:[#allocation4] sm:$0xff] %vm279_vm2, %v2994_v32  ;;  %v1617_v30 = vor.u32 1.1754944e-38, %v1616_v57  ;;  %6161 = vmatpush.msra.mxu2 %v8327_v14  ;;  %5203 = vmatpush.msra.mxu0 %v8233_v38  ;;  %v4044_v57 = vld [vmem:[#allocation2 + $0x18] sm:$0xff]  ;;  %v4047_v14 = vld [vmem:[#allocation2 + $0x30] sm:$0xff] }
 0x222   : > { %v8599_v49 = vpop.eup %8598  ;;  %2123 = vst.msk [vmem:[#allocation2 + $0x170] sm:$0xff] %vm279_vm2, %v2071_v12  ;;  %v1594_v55 = vmul.f32 %v8597_v59, %v1593_v33  ;;  %v2891_v40 = vpop.f32.mrf.mxu2  ;;  %v2651_v61 = vld [vmem:[#allocation2 + $0x161] sm:$0xff] }
 0x223   : > { %2172 = vst.msk [vmem:[#allocation3 + $0x158] sm:$0xff] %vm279_vm2, %v2071_v12  ;;  %v10410_v5 = vadd.f32 1.0, %v8599_v49  ;;  %v8601_v15 = vpop.eup %8600  ;;  %v3021_v19 = vadd.f32 %v2975_v7, %v2891_v40  ;;  %v10421_v46 = vpop.f32.mrf.mxu1  ;;  %v3586_v33 = vld [vmem:[#allocation2 + $0xbf] sm:$0xff]  ;;  %v2951_v7 = vld [vmem:[#allocation4 + $0x18] sm:$0xff] }
 0x224   : > { %v1595_v10 = vadd.f32 %v8597_v59, %v1594_v55  ;;  %v1606_v3 = vmul.f32 %v8601_v15, %v10386_v8  ;;  %7997 = vmatmul.msk.f32.gmra.mxu3 %vm279_vm2, %v2266_v41  ;;  %vm1611_vm10 = vweird.f32 %v8601_v15  ;;  %v3087_v41 = vld [vmem:[#allocation2 + $0xa] sm:$0xff]  ;;  %v3590_v38 = vld [vmem:[#allocation2 + $0xdf] sm:$0xff] }
 0x225   : > { %8602 = vrcp.f32 %v10410_v5  ;;  %v2813_v4 = vpop.f32.mrf.mxu0  ;;  %3067 = vst.msk [vmem:[#allocation4 + $0xd8] sm:$0xff] %vm279_vm2, %v3021_v19  ;;  %vm10435_vm11 = vmor %vm1610_vm1, %vm1611_vm10  ;;  %vm1624_vm13 = vweird.f32 %v10410_v5  ;;  %v1628_v8 = vand.u32 2147483647, %v10410_v5  ;;  %v1630_v11 = vand.u32 2147483648, %v10410_v5 }
 0x226   : > { %v1599_v6 = vsel %vm10406_vm8, %v8597_v59, %v1595_v10  ;;  %v1607_v21 = vsub.f32 1.0, %v1606_v3  ;;  %v2995_v26 = vadd.f32 %v2949_v13, %v2813_v4  ;;  %8113 = vmatmul.msk.f32.gmra.mxu1 %vm279_vm2, %v3585_v36  ;;  %v2013_v3 = vpop.permute.xlu1 %2012  ;;  %v2626_v4 = vld [vmem:[#allocation2 + $0x99] sm:$0xff]  ;;  %v2627_v36 = vld [vmem:[#allocation2 + $0xa1] sm:$0xff] }
 0x227   : > { %v1604_v56 = vsel %vm1601_vm9, %v1603_v1, %v1599_v6  ;;  %v2510_v63 = vpop.f32.mrf.mxu3  ;;  %8043 = vmatmul.msk.f32.gmra.mxu2 %vm279_vm2, %v2651_v61  ;;  %v2976_v9 = vld [vmem:[#allocation4 + $0xe0] sm:$0xff]  ;;  %v1631_v22 = vor.u32 1.1754944e-38, %v1630_v11  ;;  %vm1629_vm3 = vcmp.eq.f32.partialorder %v1628_v8, 8.507059e+37  ;;  %v4046_v8 = vld [vmem:[#allocation2 + $0x28] sm:$0xff] }
 0x228   : > { %v1708_v58 = vmul.f32 %v1604_v56, %v10310_v16  ;;  %8016 = vmatmul.msk.f32.gmra.mxu0 %vm279_vm2, %v2624_v48  ;;  %v1608_v25 = vmul.f32 %v8601_v15, %v1607_v21  ;;  %2590 = vst.msk [vmem:[#allocation4 + $0xe8] sm:$0xff] %vm279_vm2, %v2510_v63  ;;  %v3088_v13 = vld [vmem:[#allocation2 + $0x12] sm:$0xff] }
 0x229   : > { %3041 = vst.msk [vmem:[#allocation4 + $0x8] sm:$0xff] %vm279_vm2, %v2995_v26  ;;  %v2652_v34 = vld [vmem:[#allocation2 + $0x169] sm:$0xff]  ;;  %v2952_v26 = vld [vmem:[#allocation4 + $0x20] sm:$0xff] }
 0x22a   : > { %v2072_v39 = vmul.f32 %v9753_v24, %v1708_v58  ;;  %v1609_v31 = vadd.f32 %v8601_v15, %v1608_v25  ;;  %v2894_v24 = vpop.f32.mrf.mxu2  ;;  %v3588_v63 = vld [vmem:[#allocation2 + $0xcf] sm:$0xff]  ;;  %v4045_v25 = vld [vmem:[#allocation2 + $0x20] sm:$0xff] }
 0x22b   : > { %v8603_v2 = vpop.eup %8602  ;;  %v3022_v59 = vadd.f32 %v2976_v9, %v2894_v24  ;;  %v10449_v17 = vpop.f32.mrf.mxu1 }
 0x22c   : > { %2124 = vst.msk [vmem:[#allocation2 + $0x178] sm:$0xff] %vm279_vm2, %v2072_v39  ;;  %v1620_v28 = vmul.f32 %v8603_v2, %v10410_v5  ;;  %v1613_v23 = vsel %vm10435_vm11, %v8601_v15, %v1609_v31  ;;  %8046 = vmatmul.msk.f32.vlgmr.msra.gmra.mxu3 %vm279_vm2, %v3086_v42  ;;  %vm1625_vm15 = vweird.f32 %v8603_v2  ;;  %v2953_v31 = vld [vmem:[#allocation4 + $0x28] sm:$0xff]  ;;  %v5002_v42 = vld [vmem:[#allocation2 + $0x2e] sm:$0xff] }
 0x22d   : > { %2173 = vst.msk [vmem:[#allocation3 + $0x160] sm:$0xff] %vm279_vm2, %v2072_v39  ;;  %v2816_v37 = vpop.f32.mrf.mxu0  ;;  %v1618_v44 = vsel %vm1615_vm12, %v1617_v30, %v1613_v23  ;;  %vm1626_vm0 = vmor %vm1624_vm13, %vm1625_vm15  ;;  %v3089_v30 = vld [vmem:[#allocation2 + $0x1a] sm:$0xff] }
 0x22e   : > { %v1621_v50 = vsub.f32 1.0, %v1620_v28  ;;  %v2996_v60 = vadd.f32 %v2950_v43, %v2816_v37  ;;  %v1709_v54 = vmul.f32 %v1618_v44, %v10333_v20  ;;  %3068 = vst.msk [vmem:[#allocation4 + $0xe0] sm:$0xff] %vm279_vm2, %v3022_v59  ;;  %8114 = vmatmul.msk.f32.gmra.mxu1 %vm279_vm2, %v3586_v33  ;;  %v3589_v23 = vld [vmem:[#allocation2 + $0xd7] sm:$0xff]  ;;  %v3090_v43 = vld [vmem:[#allocation2 + $0x22] sm:$0xff] }
 0x22f   : > { %v2513_v52 = vpop.f32.mrf.mxu3  ;;  %8044 = vmatmul.msk.f32.gmra.mxu2 %vm279_vm2, %v2652_v34  ;;  %v2977_v49 = vld [vmem:[#allocation4 + $0xe8] sm:$0xff]  ;;  %v2954_v34 = vld [vmem:[#allocation4 + $0x30] sm:$0xff] }
 0x230   : > { %v1622_v12 = vmul.f32 %v8603_v2, %v1621_v50  ;;  %3042 = vst.msk [vmem:[#allocation4 + $0x10] sm:$0xff] %vm279_vm2, %v2996_v60  ;;  %8017 = vmatmul.msk.f32.gmra.mxu0 %vm279_vm2, %v2625_v53  ;;  %v2073_v20 = vmul.f32 %v9788_v18, %v1709_v54  ;;  %v5003_v53 = vld [vmem:[#allocation2 + $0x36] sm:$0xff] }
 0x231   : > { %2591 = vst.msk [vmem:[#allocation4 + $0xf0] sm:$0xff] %vm279_vm2, %v2513_v52 }
 0x232   : > { %v1623_v32 = vadd.f32 %v8603_v2, %v1622_v12  ;;  %2125 = vst.msk [vmem:[#allocation2 + $0x180] sm:$0xff] %vm279_vm2, %v2073_v20  ;;  %v2897_v55 = vpop.f32.mrf.mxu2 }
 0x233   : > { %2174 = vst.msk [vmem:[#allocation3 + $0x168] sm:$0xff] %vm279_vm2, %v2073_v20  ;;  %v3023_v1 = vadd.f32 %v2977_v49, %v2897_v55  ;;  %v10472_v10 = vpop.f32.mrf.mxu1  ;;  %v3091_v20 = vld [vmem:[#allocation2 + $0x2a] sm:$0xff] }
 0x234   : > { %v1627_v18 = vsel %vm1626_vm0, %v8603_v2, %v1623_v32  ;;  %8047 = vmatmul.msk.f32.gmra.mxu3 %vm279_vm2, %v3087_v41  ;;  %v2955_v49 = vld [vmem:[#allocation4 + $0x38] sm:$0xff]  ;;  %v5004_v41 = vld [vmem:[#allocation2 + $0x3e] sm:$0xff] }
 0x235   : > { %v1632_v0 = vsel %vm1629_vm3, %v1631_v22, %v1627_v18  ;;  %v2819_v5 = vpop.f32.mrf.mxu0  ;;  %3069 = vst.msk [vmem:[#allocation4 + $0xe8] sm:$0xff] %vm279_vm2, %v3023_v1  ;;  %v4048_v1 = vld [vmem:[#allocation2 + $0x38] sm:$0xff]  ;;  %vm7779_vm3 = vcmask 64519  }
 0x236   : > { %v1710_v15 = vmul.f32 %v1632_v0, %v10362_v45  ;;  %v2997_v40 = vadd.f32 %v2951_v7, %v2819_v5  ;;  %8115 = vmatmul.msk.f32.gmra.mxu1 %vm279_vm2, %v3587_v27  ;;  %v3591_v0 = vld [vmem:[#allocation2 + $0xe7] sm:$0xff] }
 0x237   : > { %v2516_v19 = vpop.f32.mrf.mxu3  ;;  %8140 = vmatmul.msk.f32.vlgmr.msrb.gmra.mxu2 %vm279_vm2, %v4044_v57 }
 0x238   : > { %v2074_v6 = vmul.f32 %v2013_v3, %v1710_v15  ;;  %3043 = vst.msk [vmem:[#allocation4 + $0x18] sm:$0xff] %vm279_vm2, %v2997_v40  ;;  %8018 = vmatmul.msk.f32.gmra.mxu0 %vm279_vm2, %v2626_v4  ;;  %v2978_v45 = vld [vmem:[#allocation4 + $0xf0] sm:$0xff]  ;;  %v3092_v40 = vld [vmem:[#allocation2 + $0x32] sm:$0xff] }
 0x239   : > { %2592 = vst.msk [vmem:[#allocation4 + $0xf8] sm:$0xff] %vm279_vm2, %v2516_v19  ;;  %v5005_v19 = vld [vmem:[#allocation2 + $0x46] sm:$0xff] }
 0x23a   : > { %2126 = vst.msk [vmem:[#allocation2 + $0x188] sm:$0xff] %vm279_vm2, %v2074_v6  ;;  %v2900_v61 = vpop.f32.mrf.mxu2  ;;  %v2956_v6 = vld [vmem:[#allocation4 + $0x40] sm:$0xff] }
 0x23b   : > { %v3024_v56 = vadd.f32 %v2978_v45, %v2900_v61  ;;  %v10482_v48 = vpop.f32.mrf.mxu1  ;;  %v3592_v45 = vld [vmem:[#allocation2 + $0xef] sm:$0xff]  ;;  %v4049_v61 = vld [vmem:[#allocation2 + $0x40] sm:$0xff] }
 0x23c   : > { %8048 = vmatmul.msk.f32.gmra.mxu3 %vm279_vm2, %v3088_v13 }
 0x23d   : > { %v2822_v21 = vpop.f32.mrf.mxu0  ;;  %3070 = vst.msk [vmem:[#allocation4 + $0xf0] sm:$0xff] %vm279_vm2, %v3024_v56 }
 0x23e   : > { %v2998_v58 = vadd.f32 %v2952_v26, %v2822_v21  ;;  %8116 = vmatmul.msk.f32.gmra.mxu1 %vm279_vm2, %v3588_v63  ;;  %v3093_v26 = vld [vmem:[#allocation2 + $0x3a] sm:$0xff] }
 0x23f   : > { %v2519_v47 = vpop.f32.mrf.mxu3  ;;  %8141 = vmatmul.msk.f32.gmra.mxu2 %vm279_vm2, %v4045_v25  ;;  %v2957_v63 = vld [vmem:[#allocation4 + $0x48] sm:$0xff] }
 0x240   : > { %3044 = vst.msk [vmem:[#allocation4 + $0x20] sm:$0xff] %vm279_vm2, %v2998_v58  ;;  %8019 = vmatmul.msk.f32.gmra.mxu0 %vm279_vm2, %v2627_v36  ;;  %v2979_v39 = vld [vmem:[#allocation4 + $0xf8] sm:$0xff] }
 0x241   : > { %2593 = vst.msk [vmem:[#allocation4 + $0x100] sm:$0xff] %vm279_vm2, %v2519_v47 }
 0x242   : > { %v2903_v16 = vpop.f32.mrf.mxu2 }
 0x243   : > { %v3025_v9 = vadd.f32 %v2979_v39, %v2903_v16  ;;  %v10491_v28 = vpop.f32.mrf.mxu1  ;;  %v5006_v39 = vld [vmem:[#allocation2 + $0x4e] sm:$0xff]  ;;  %v3593_v16 = vld [vmem:[#allocation2 + $0xf7] sm:$0xff] }
 0x244   : > { %8049 = vmatmul.msk.f32.gmra.mxu3 %vm279_vm2, %v3089_v30  ;;  %v4050_v30 = vld [vmem:[#allocation2 + $0x48] sm:$0xff] }
 0x245   : > { %v2825_v2 = vpop.f32.mrf.mxu0  ;;  %3071 = vst.msk [vmem:[#allocation4 + $0xf8] sm:$0xff] %vm279_vm2, %v3025_v9 }
 0x246   : > { %v2999_v24 = vadd.f32 %v2953_v31, %v2825_v2  ;;  %8117 = vmatmul.msk.f32.gmra.mxu1 %vm279_vm2, %v3589_v23 }
 0x247   : > { %v2522_v11 = vpop.f32.mrf.mxu3  ;;  %8142 = vmatmul.msk.f32.gmra.mxu2 %vm279_vm2, %v4046_v8  ;;  %v2958_v8 = vld [vmem:[#allocation4 + $0x50] sm:$0xff] }
 0x248   : > { %3045 = vst.msk [vmem:[#allocation4 + $0x28] sm:$0xff] %vm279_vm2, %v2999_v24  ;;  %8234 = vmatmul.msk.f32.vlgmr.msra.gmra.mxu0 %vm279_vm2, %v5002_v42  ;;  %v2980_v59 = vld [vmem:[#allocation4 + $0x100] sm:$0xff]  ;;  %v3094_v24 = vld [vmem:[#allocation2 + $0x42] sm:$0xff] }
 0x249   : > { %2594 = vst.msk [vmem:[#allocation4 + $0x108] sm:$0xff] %vm279_vm2, %v2522_v11 }
 0x24a   : > { %v2906_v37 = vpop.f32.mrf.mxu2 }
 0x24b   : > { %v3026_v44 = vadd.f32 %v2980_v59, %v2906_v37  ;;  %v10500_v60 = vpop.f32.mrf.mxu1  ;;  %v5007_v37 = vld [vmem:[#allocation2 + $0x56] sm:$0xff] }
 0x24c   : > { %8050 = vmatmul.msk.f32.gmra.mxu3 %vm279_vm2, %v3090_v43  ;;  %v3594_v43 = vld [vmem:[#allocation2 + $0xff] sm:$0xff] }
 0x24d   : > { %v2828_v50 = vpop.f32.mrf.mxu0  ;;  %3072 = vst.msk [vmem:[#allocation4 + $0x100] sm:$0xff] %vm279_vm2, %v3026_v44  ;;  %v4051_v44 = vld [vmem:[#allocation2 + $0x50] sm:$0xff] }
 0x24e   : > { %v3000_v54 = vadd.f32 %v2954_v34, %v2828_v50  ;;  %8118 = vmatmul.msk.f32.gmra.mxu1 %vm279_vm2, %v3590_v38 }
 0x24f   : > { %v2525_v12 = vpop.f32.mrf.mxu3  ;;  %8143 = vmatmul.msk.f32.gmra.mxu2 %vm279_vm2, %v4047_v14 }
 0x250   : > { %3046 = vst.msk [vmem:[#allocation4 + $0x30] sm:$0xff] %vm279_vm2, %v3000_v54  ;;  %8235 = vmatmul.msk.f32.gmra.mxu0 %vm279_vm2, %v5003_v53  ;;  %v2981_v33 = vld [vmem:[#allocation4 + $0x108] sm:$0xff]  ;;  %v3095_v53 = vld [vmem:[#allocation2 + $0x4a] sm:$0xff] }
 0x251   : > { %2595 = vst.msk [vmem:[#allocation4 + $0x110] sm:$0xff] %vm279_vm2, %v2525_v12  ;;  %v2959_v12 = vld [vmem:[#allocation4 + $0x58] sm:$0xff] }
 0x252   : > { %v2909_v52 = vpop.f32.mrf.mxu2 }
 0x253   : > { %v3027_v22 = vadd.f32 %v2981_v33, %v2909_v52  ;;  %v10509_v18 = vpop.f32.mrf.mxu1 }
 0x254   : > { %8051 = vmatmul.msk.f32.gmra.mxu3 %vm279_vm2, %v3091_v20  ;;  %v5008_v20 = vld [vmem:[#allocation2 + $0x5e] sm:$0xff] }
 0x255   : > { %v2831_v32 = vpop.f32.mrf.mxu0  ;;  %3073 = vst.msk [vmem:[#allocation4 + $0x108] sm:$0xff] %vm279_vm2, %v3027_v22  ;;  %v3595_v22 = vld [vmem:[#allocation2 + $0x107] sm:$0xff] }
 0x256   : > { %v3001_v55 = vadd.f32 %v2955_v49, %v2831_v32  ;;  %8119 = vmatmul.msk.f32.gmra.mxu1 %vm279_vm2, %v3591_v0  ;;  %v4052_v32 = vld [vmem:[#allocation2 + $0x58] sm:$0xff] }
 0x257   : > { %v2528_v5 = vpop.f32.mrf.mxu3  ;;  %8144 = vmatmul.msk.f32.gmra.mxu2 %vm279_vm2, %v4048_v1  ;;  %v3096_v0 = vld [vmem:[#allocation2 + $0x52] sm:$0xff] }
 0x258   : > { %3047 = vst.msk [vmem:[#allocation4 + $0x38] sm:$0xff] %vm279_vm2, %v3001_v55  ;;  %8236 = vmatmul.msk.f32.gmra.mxu0 %vm279_vm2, %v5004_v41  ;;  %v2982_v7 = vld [vmem:[#allocation4 + $0x110] sm:$0xff] }
 0x259   : > { %2596 = vst.msk [vmem:[#allocation4 + $0x118] sm:$0xff] %vm279_vm2, %v2528_v5 }
 0x25a   : > { %v2912_v15 = vpop.f32.mrf.mxu2 }
 0x25b   : > { %v3028_v3 = vadd.f32 %v2982_v7, %v2912_v15  ;;  %v10518_v27 = vpop.f32.mrf.mxu1  ;;  %v2960_v7 = vld [vmem:[#allocation4 + $0x60] sm:$0xff] }
 0x25c   : > { %8052 = vmatmul.msk.f32.gmra.mxu3 %vm279_vm2, %v3092_v40 }
 0x25d   : > { %v2834_v4 = vpop.f32.mrf.mxu0  ;;  %3074 = vst.msk [vmem:[#allocation4 + $0x110] sm:$0xff] %vm279_vm2, %v3028_v3  ;;  %v5009_v3 = vld [vmem:[#allocation2 + $0x66] sm:$0xff] }
 0x25e   : > { %v3002_v57 = vadd.f32 %v2956_v6, %v2834_v4  ;;  %8120 = vmatmul.msk.f32.gmra.mxu1 %vm279_vm2, %v3592_v45  ;;  %v3596_v4 = vld [vmem:[#allocation2 + $0x10f] sm:$0xff]  ;;  %v4053_v6 = vld [vmem:[#allocation2 + $0x60] sm:$0xff] }
 0x25f   : > { %v2531_v13 = vpop.f32.mrf.mxu3  ;;  %8145 = vmatmul.msk.f32.gmra.mxu2 %vm279_vm2, %v4049_v61  ;;  %v3097_v61 = vld [vmem:[#allocation2 + $0x5a] sm:$0xff] }
 0x260   : > { %3048 = vst.msk [vmem:[#allocation4 + $0x40] sm:$0xff] %vm279_vm2, %v3002_v57  ;;  %8237 = vmatmul.msk.f32.gmra.mxu0 %vm279_vm2, %v5005_v19  ;;  %v2983_v56 = vld [vmem:[#allocation4 + $0x118] sm:$0xff] }
 0x261   : > { %2597 = vst.msk [vmem:[#allocation4 + $0x120] sm:$0xff] %vm279_vm2, %v2531_v13 }
 0x262   : > { %v2915_v21 = vpop.f32.mrf.mxu2 }
 0x263   : > { %v3029_v58 = vadd.f32 %v2983_v56, %v2915_v21  ;;  %v10527_v25 = vpop.f32.mrf.mxu1  ;;  %v2961_v21 = vld [vmem:[#allocation4 + $0x68] sm:$0xff] }
 0x264   : > { %8053 = vmatmul.msk.f32.gmra.mxu3 %vm279_vm2, %v3093_v26 }
 0x265   : > { %v2837_v36 = vpop.f32.mrf.mxu0  ;;  %3075 = vst.msk [vmem:[#allocation4 + $0x118] sm:$0xff] %vm279_vm2, %v3029_v58 }
 0x266   : > { %v3003_v47 = vadd.f32 %v2957_v63, %v2837_v36  ;;  %8121 = vmatmul.msk.f32.gmra.mxu1 %vm279_vm2, %v3593_v16  ;;  %v5010_v36 = vld [vmem:[#allocation2 + $0x6e] sm:$0xff]  ;;  %v3597_v63 = vld [vmem:[#allocation2 + $0x117] sm:$0xff] }
 0x267   : > { %v2534_v9 = vpop.f32.mrf.mxu3  ;;  %8146 = vmatmul.msk.f32.gmra.mxu2 %vm279_vm2, %v4050_v30 }
 0x268   : > { %3049 = vst.msk [vmem:[#allocation4 + $0x48] sm:$0xff] %vm279_vm2, %v3003_v47  ;;  %8238 = vmatmul.msk.f32.gmra.mxu0 %vm279_vm2, %v5006_v39  ;;  %v2984_v2 = vld [vmem:[#allocation4 + $0x120] sm:$0xff]  ;;  %v4054_v47 = vld [vmem:[#allocation2 + $0x68] sm:$0xff] }
 0x269   : > { %2598 = vst.msk [vmem:[#allocation4 + $0x128] sm:$0xff] %vm279_vm2, %v2534_v9  ;;  %v3098_v9 = vld [vmem:[#allocation2 + $0x62] sm:$0xff] }
 0x26a   : > { %v2918_v31 = vpop.f32.mrf.mxu2 }
 0x26b   : > { %v3030_v42 = vadd.f32 %v2984_v2, %v2918_v31  ;;  %v10536_v11 = vpop.f32.mrf.mxu1 }
 0x26c   : > { %8054 = vmatmul.msk.f32.gmra.mxu3 %vm279_vm2, %v3094_v24  ;;  %v2962_v24 = vld [vmem:[#allocation4 + $0x70] sm:$0xff] }
 0x26d   : > { %v2840_v23 = vpop.f32.mrf.mxu0  ;;  %3076 = vst.msk [vmem:[#allocation4 + $0x120] sm:$0xff] %vm279_vm2, %v3030_v42 }
 0x26e   : > { %v3004_v59 = vadd.f32 %v2958_v8, %v2840_v23  ;;  %8122 = vmatmul.msk.f32.gmra.mxu1 %vm279_vm2, %v3594_v43  ;;  %v5011_v8 = vld [vmem:[#allocation2 + $0x76] sm:$0xff] }
 0x26f   : > { %v2537_v50 = vpop.f32.mrf.mxu3  ;;  %8147 = vmatmul.msk.f32.gmra.mxu2 %vm279_vm2, %v4051_v44 }
 0x270   : > { %3050 = vst.msk [vmem:[#allocation4 + $0x50] sm:$0xff] %vm279_vm2, %v3004_v59  ;;  %8239 = vmatmul.msk.f32.gmra.mxu0 %vm279_vm2, %v5007_v37  ;;  %v2985_v34 = vld [vmem:[#allocation4 + $0x128] sm:$0xff]  ;;  %v4055_v37 = vld [vmem:[#allocation2 + $0x70] sm:$0xff] }
 0x271   : > { %2599 = vst.msk [vmem:[#allocation4 + $0x130] sm:$0xff] %vm279_vm2, %v2537_v50  ;;  %v3598_v59 = vld [vmem:[#allocation2 + $0x11f] sm:$0xff] }
 0x272   : > { %v2921_v54 = vpop.f32.mrf.mxu2 }
 0x273   : > { %v3031_v38 = vadd.f32 %v2985_v34, %v2921_v54  ;;  %v10545_v33 = vpop.f32.mrf.mxu1  ;;  %v3099_v34 = vld [vmem:[#allocation2 + $0x6a] sm:$0xff] }
 0x274   : > { %8055 = vmatmul.msk.f32.gmra.mxu3 %vm279_vm2, %v3095_v53 }
 0x275   : > { %v2843_v14 = vpop.f32.mrf.mxu0  ;;  %3077 = vst.msk [vmem:[#allocation4 + $0x128] sm:$0xff] %vm279_vm2, %v3031_v38  ;;  %v2963_v38 = vld [vmem:[#allocation4 + $0x78] sm:$0xff] }
 0x276   : > { %v3005_v52 = vadd.f32 %v2959_v12, %v2843_v14  ;;  %8123 = vmatmul.msk.f32.gmra.mxu1 %vm279_vm2, %v3595_v22  ;;  %v4056_v22 = vld [vmem:[#allocation2 + $0x78] sm:$0xff] }
 0x277   : > { %v2540_v49 = vpop.f32.mrf.mxu3  ;;  %8148 = vmatmul.msk.f32.gmra.mxu2 %vm279_vm2, %v4052_v32 }
 0x278   : > { %3051 = vst.msk [vmem:[#allocation4 + $0x58] sm:$0xff] %vm279_vm2, %v3005_v52  ;;  %8240 = vmatmul.msk.f32.gmra.mxu0 %vm279_vm2, %v5008_v20  ;;  %v2986_v55 = vld [vmem:[#allocation4 + $0x130] sm:$0xff]  ;;  %v5012_v52 = vld [vmem:[#allocation2 + $0x7e] sm:$0xff] }
 0x279   : > { %2600 = vst.msk [vmem:[#allocation4 + $0x138] sm:$0xff] %vm279_vm2, %v2540_v49  ;;  %v3599_v20 = vld [vmem:[#allocation2 + $0x127] sm:$0xff] }
 0x27a   : > { %v2924_v41 = vpop.f32.mrf.mxu2 }
 0x27b   : > { %v3032_v1 = vadd.f32 %v2986_v55, %v2924_v41  ;;  %v10554_v15 = vpop.f32.mrf.mxu1  ;;  %v3100_v41 = vld [vmem:[#allocation2 + $0x72] sm:$0xff] }
 0x27c   : > { %8056 = vmatmul.msk.f32.gmra.mxu3 %vm279_vm2, %v3096_v0 }
 0x27d   : > { %v2846_v5 = vpop.f32.mrf.mxu0  ;;  %3078 = vst.msk [vmem:[#allocation4 + $0x130] sm:$0xff] %vm279_vm2, %v3032_v1 }
 0x27e   : > { %v3006_v40 = vadd.f32 %v2960_v7, %v2846_v5  ;;  %8124 = vmatmul.msk.f32.gmra.mxu1 %vm279_vm2, %v3596_v4  ;;  %v2964_v5 = vld [vmem:[#allocation4 + $0x80] sm:$0xff]  ;;  %v3600_v4 = vld [vmem:[#allocation2 + $0x12f] sm:$0xff] }
 0x27f   : > { %v2543_v57 = vpop.f32.mrf.mxu3  ;;  %8149 = vmatmul.msk.f32.gmra.mxu2 %vm279_vm2, %v4053_v6  ;;  %v4057_v6 = vld [vmem:[#allocation2 + $0x80] sm:$0xff] }
 0x280   : > { %3052 = vst.msk [vmem:[#allocation4 + $0x60] sm:$0xff] %vm279_vm2, %v3006_v40  ;;  %8241 = vmatmul.msk.f32.gmra.mxu0 %vm279_vm2, %v5009_v3  ;;  %v2987_v19 = vld [vmem:[#allocation4 + $0x138] sm:$0xff]  ;;  %v5013_v3 = vld [vmem:[#allocation2 + $0x86] sm:$0xff] }
 0x281   : > { %2601 = vst.msk [vmem:[#allocation4 + $0x140] sm:$0xff] %vm279_vm2, %v2543_v57 }
 0x282   : > { %v2927_v45 = vpop.f32.mrf.mxu2 }
 0x283   : > { %v3033_v13 = vadd.f32 %v2987_v19, %v2927_v45  ;;  %v10563_v26 = vpop.f32.mrf.mxu1 }
 0x284   : > { %8057 = vmatmul.msk.f32.gmra.mxu3 %vm279_vm2, %v3097_v61  ;;  %v3101_v61 = vld [vmem:[#allocation2 + $0x7a] sm:$0xff] }
 0x285   : > { %v2849_v56 = vpop.f32.mrf.mxu0  ;;  %3079 = vst.msk [vmem:[#allocation4 + $0x138] sm:$0xff] %vm279_vm2, %v3033_v13 }
 0x286   : > { %v3007_v58 = vadd.f32 %v2961_v21, %v2849_v56  ;;  %8125 = vmatmul.msk.f32.gmra.mxu1 %vm279_vm2, %v3597_v63  ;;  %v2965_v21 = vld [vmem:[#allocation4 + $0x88] sm:$0xff]  ;;  %v5014_v63 = vld [vmem:[#allocation2 + $0x8e] sm:$0xff] }
 0x287   : > { %v2546_v39 = vpop.f32.mrf.mxu3  ;;  %8150 = vmatmul.msk.f32.gmra.mxu2 %vm279_vm2, %v4054_v47  ;;  %v3601_v47 = vld [vmem:[#allocation2 + $0x137] sm:$0xff] }
 0x288   : > { %3053 = vst.msk [vmem:[#allocation4 + $0x68] sm:$0xff] %vm279_vm2, %v3007_v58  ;;  %8242 = vmatmul.msk.f32.gmra.mxu0 %vm279_vm2, %v5010_v36  ;;  %v2988_v16 = vld [vmem:[#allocation4 + $0x140] sm:$0xff] }
 0x289   : > { %2602 = vst.msk [vmem:[#allocation4 + $0x148] sm:$0xff] %vm279_vm2, %v2546_v39  ;;  %v4058_v39 = vld [vmem:[#allocation2 + $0x88] sm:$0xff] }
 0x28a   : > { %v2930_v30 = vpop.f32.mrf.mxu2 }
 0x28b   : > { %v3034_v2 = vadd.f32 %v2988_v16, %v2930_v30  ;;  %v10572_v42 = vpop.f32.mrf.mxu1 }
 0x28c   : > { %8058 = vmatmul.msk.f32.gmra.mxu3 %vm279_vm2, %v3098_v9 }
 0x28d   : > { %v2852_v31 = vpop.f32.mrf.mxu0  ;;  %3080 = vst.msk [vmem:[#allocation4 + $0x140] sm:$0xff] %vm279_vm2, %v3034_v2  ;;  %v3102_v2 = vld [vmem:[#allocation2 + $0x82] sm:$0xff] }
 0x28e   : > { %v3008_v23 = vadd.f32 %v2962_v24, %v2852_v31  ;;  %8126 = vmatmul.msk.f32.gmra.mxu1 %vm279_vm2, %v3598_v59 }
 0x28f   : > { %v2549_v43 = vpop.f32.mrf.mxu3  ;;  %8151 = vmatmul.msk.f32.gmra.mxu2 %vm279_vm2, %v4055_v37  ;;  %v5015_v37 = vld [vmem:[#allocation2 + $0x96] sm:$0xff] }
 0x290   : > { %3054 = vst.msk [vmem:[#allocation4 + $0x70] sm:$0xff] %vm279_vm2, %v3008_v23  ;;  %8243 = vmatmul.msk.f32.gmra.mxu0 %vm279_vm2, %v5011_v8  ;;  %v2989_v44 = vld [vmem:[#allocation4 + $0x148] sm:$0xff]  ;;  %v2966_v23 = vld [vmem:[#allocation4 + $0x90] sm:$0xff] }
 0x291   : > { %2603 = vst.msk [vmem:[#allocation4 + $0x150] sm:$0xff] %vm279_vm2, %v2549_v43  ;;  %v3602_v43 = vld [vmem:[#allocation2 + $0x13f] sm:$0xff] }
 0x292   : > { %v2933_v50 = vpop.f32.mrf.mxu2 }
 0x293   : > { %v3035_v54 = vadd.f32 %v2989_v44, %v2933_v50  ;;  %v10581_v14 = vpop.f32.mrf.mxu1  ;;  %v4059_v44 = vld [vmem:[#allocation2 + $0x90] sm:$0xff] }
 0x294   : > { %8059 = vmatmul.msk.f32.gmra.mxu3 %vm279_vm2, %v3099_v34  ;;  %v3427_v34 = vld [vmem:[#allocation4] sm:$0xff] }
 0x295   : > { %v2855_v53 = vpop.f32.mrf.mxu0  ;;  %3081 = vst.msk [vmem:[#allocation4 + $0x148] sm:$0xff] %vm279_vm2, %v3035_v54 }
 0x296   : > { %v3009_v12 = vadd.f32 %v2963_v38, %v2855_v53  ;;  %8127 = vmatmul.msk.f32.gmra.mxu1 %vm279_vm2, %v3599_v20 }
 0x297   : > { %v2552_v32 = vpop.f32.mrf.mxu3  ;;  %8152 = vmatmul.msk.f32.gmra.mxu2 %vm279_vm2, %v4056_v22  ;;  %v2967_v22 = vld [vmem:[#allocation4 + $0x98] sm:$0xff] }
 0x298   : > { %3055 = vst.msk [vmem:[#allocation4 + $0x78] sm:$0xff] %vm279_vm2, %v3009_v12  ;;  %8244 = vmatmul.msk.f32.gmra.mxu0 %vm279_vm2, %v5012_v52  ;;  %v2990_v49 = vld [vmem:[#allocation4 + $0x150] sm:$0xff] }
 0x299   : > { %2604 = vst.msk [vmem:[#allocation4 + $0x158] sm:$0xff] %vm279_vm2, %v2552_v32  ;;  %v3103_v12 = vld [vmem:[#allocation2 + $0x8a] sm:$0xff] }
 0x29a   : > { %v2936_v55 = vpop.f32.mrf.mxu2 }
 0x29b   : > { %v3036_v0 = vadd.f32 %v2990_v49, %v2936_v55  ;;  %v10590_v7 = vpop.f32.mrf.mxu1  ;;  %v5016_v55 = vld [vmem:[#allocation2 + $0x9e] sm:$0xff] }
 0x29c   : > { %8060 = vmatmul.msk.f32.gmra.mxu3 %vm279_vm2, %v3100_v41  ;;  %v3603_v41 = vld [vmem:[#allocation2 + $0x147] sm:$0xff] }
 0x29d   : > { %v2858_v1 = vpop.f32.mrf.mxu0  ;;  %3082 = vst.msk [vmem:[#allocation4 + $0x150] sm:$0xff] %vm279_vm2, %v3036_v0  ;;  %v4060_v0 = vld [vmem:[#allocation2 + $0x98] sm:$0xff] }
 0x29e   : > { %v3010_v40 = vadd.f32 %v2964_v5, %v2858_v1  ;;  %8128 = vmatmul.msk.f32.gmra.mxu1 %vm279_vm2, %v3600_v4  ;;  %v3428_v5 = vld [vmem:[#allocation4 + $0x8] sm:$0xff] }
 0x29f   : > { %v2555_v57 = vpop.f32.mrf.mxu3  ;;  %8153 = vmatmul.msk.f32.gmra.mxu2 %vm279_vm2, %v4057_v6 }
 0x2a0   : > { %3056 = vst.msk [vmem:[#allocation4 + $0x80] sm:$0xff] %vm279_vm2, %v3010_v40  ;;  %8245 = vmatmul.msk.f32.gmra.mxu0 %vm279_vm2, %v5013_v3  ;;  %v2991_v19 = vld [vmem:[#allocation4 + $0x158] sm:$0xff] }
 0x2a1   : > { %2605 = vst.msk [vmem:[#allocation4 + $0x160] sm:$0xff] %vm279_vm2, %v2555_v57  ;;  %v3104_v57 = vld [vmem:[#allocation2 + $0x92] sm:$0xff] }
 0x2a2   : > { %v2939_v45 = vpop.f32.mrf.mxu2 }
 0x2a3   : > { %v3037_v13 = vadd.f32 %v2991_v19, %v2939_v45  ;;  %v10599_v58 = vpop.f32.mrf.mxu1  ;;  %v2968_v45 = vld [vmem:[#allocation4 + $0xa0] sm:$0xff] }
 0x2a4   : > { %8061 = vmatmul.msk.f32.gmra.mxu3 %vm279_vm2, %v3101_v61 }
 0x2a5   : > { %v2861_v56 = vpop.f32.mrf.mxu0  ;;  %3083 = vst.msk [vmem:[#allocation4 + $0x158] sm:$0xff] %vm279_vm2, %v3037_v13 }
 0x2a6   : > { %v3011_v36 = vadd.f32 %v2965_v21, %v2861_v56  ;;  %8129 = vmatmul.msk.f32.gmra.mxu1 %vm279_vm2, %v3601_v47  ;;  %v5017_v56 = vld [vmem:[#allocation2 + $0xa6] sm:$0xff]  ;;  %v3604_v21 = vld [vmem:[#allocation2 + $0x14f] sm:$0xff] }
 0x2a7   : > { %v2558_v16 = vpop.f32.mrf.mxu3  ;;  %8154 = vmatmul.msk.f32.gmra.mxu2 %vm279_vm2, %v4058_v39  ;;  %v3429_v47 = vld [vmem:[#allocation4 + $0x10] sm:$0xff] }
 0x2a8   : > { %3057 = vst.msk [vmem:[#allocation4 + $0x88] sm:$0xff] %vm279_vm2, %v3011_v36  ;;  %8246 = vmatmul.msk.f32.gmra.mxu0 %vm279_vm2, %v5014_v63  ;;  %v2992_v30 = vld [vmem:[#allocation4 + $0x160] sm:$0xff]  ;;  %v4061_v36 = vld [vmem:[#allocation2 + $0xa0] sm:$0xff] }
 0x2a9   : > { %2606 = vst.msk [vmem:[#allocation4 + $0x168] sm:$0xff] %vm279_vm2, %v2558_v16 }
 0x2aa   : > { %v2942_v9 = vpop.f32.mrf.mxu2 }
 0x2ab   : > { %v3038_v31 = vadd.f32 %v2992_v30, %v2942_v9  ;;  %v10608_v8 = vpop.f32.mrf.mxu1 }
 0x2ac   : > { %8062 = vmatmul.msk.f32.gmra.mxu3 %vm279_vm2, %v3102_v2  ;;  %v3105_v2 = vld [vmem:[#allocation2 + $0x9a] sm:$0xff] }
 0x2ad   : > { %v2864_v24 = vpop.f32.mrf.mxu0  ;;  %3084 = vst.msk [vmem:[#allocation4 + $0x160] sm:$0xff] %vm279_vm2, %v3038_v31 }
 0x2ae   : > { %v3012_v59 = vadd.f32 %v2966_v23, %v2864_v24  ;;  %8130 = vmatmul.msk.f32.gmra.mxu1 %vm279_vm2, %v3602_v43  ;;  %v5018_v23 = vld [vmem:[#allocation2 + $0xae] sm:$0xff] }
 0x2af   : > { %v3289_v50 = vpop.f32.mrf.mxu3  ;;  %8155 = vmatmul.msk.f32.gmra.mxu2 %vm279_vm2, %v4059_v44  ;;  %v3430_v44 = vld [vmem:[#allocation4 + $0x18] sm:$0xff] }
 0x2b0   : > { %3058 = vst.msk [vmem:[#allocation4 + $0x90] sm:$0xff] %vm279_vm2, %v3012_v59  ;;  %8247 = vmatmul.msk.f32.gmra.mxu0 %vm279_vm2, %v5015_v37  ;;  %v3473_v54 = vadd.f32 %v3427_v34, %v3289_v50  ;;  %v2993_v53 = vld [vmem:[#allocation4 + $0x168] sm:$0xff]  ;;  %v3605_v59 = vld [vmem:[#allocation2 + $0x157] sm:$0xff]  ;;  %v4062_v37 = vld [vmem:[#allocation2 + $0xa8] sm:$0xff] }
 0x2b2   : > { %3519 = vst.msk [vmem:[#allocation4] sm:$0xff] %vm279_vm2, %v3473_v54  ;;  %v2945_v38 = vpop.f32.mrf.mxu2 }
 0x2b3   : > { %v3039_v52 = vadd.f32 %v2993_v53, %v2945_v38  ;;  %v10617_v32 = vpop.f32.mrf.mxu1  ;;  %v3106_v38 = vld [vmem:[#allocation2 + $0xa2] sm:$0xff] }
 0x2b4   : > { %8063 = vmatmul.msk.f32.gmra.mxu3 %vm279_vm2, %v3103_v12 }
 0x2b5   : > { %v2867_v20 = vpop.f32.mrf.mxu0  ;;  %3085 = vst.msk [vmem:[#allocation4 + $0x168] sm:$0xff] %vm279_vm2, %v3039_v52 }
 0x2b6   : > { %v3013_v49 = vadd.f32 %v2967_v22, %v2867_v20  ;;  %8131 = vmatmul.msk.f32.gmra.mxu1 %vm279_vm2, %v3603_v41  ;;  %v5019_v20 = vld [vmem:[#allocation2 + $0xb6] sm:$0xff]  ;;  %v3606_v22 = vld [vmem:[#allocation2 + $0x15f] sm:$0xff] }
 0x2b7   : > { %v3292_v1 = vpop.f32.mrf.mxu3  ;;  %8156 = vmatmul.msk.f32.gmra.mxu2 %vm279_vm2, %v4060_v0  ;;  %v3431_v41 = vld [vmem:[#allocation4 + $0x20] sm:$0xff] }
 0x2b8   : > { %3059 = vst.msk [vmem:[#allocation4 + $0x98] sm:$0xff] %vm279_vm2, %v3013_v49  ;;  %8248 = vmatmul.msk.f32.gmra.mxu0 %vm279_vm2, %v5016_v55  ;;  %v3474_v40 = vadd.f32 %v3428_v5, %v3292_v1  ;;  %v4063_v49 = vld [vmem:[#allocation2 + $0xb0] sm:$0xff] }
 0x2b9   : > { %v3906_v3 = vld [vmem:[#allocation4] sm:$0xff] }
 0x2ba   : > { %3520 = vst.msk [vmem:[#allocation4 + $0x8] sm:$0xff] %vm279_vm2, %v3474_v40  ;;  %v3952_v4 = vadd.f32 %v3906_v3, %v10306_v51  ;;  %v4247_v6 = vpop.f32.mrf.mxu2  ;;  %v3107_v3 = vld [vmem:[#allocation2 + $0xaa] sm:$0xff] }
 0x2bb   : > { %v10628_v61 = vpop.f32.mrf.mxu1 }
 0x2bc   : > { %3998 = vst.msk [vmem:[#allocation4] sm:$0xff] %vm279_vm2, %v3952_v4  ;;  %8064 = vmatmul.msk.f32.gmra.mxu3 %vm279_vm2, %v3104_v57  ;;  %v5020_v57 = vld [vmem:[#allocation2 + $0xbe] sm:$0xff] }
 0x2bd   : > { %v2870_v19 = vpop.f32.mrf.mxu0 }
 0x2be   : > { %v3014_v13 = vadd.f32 %v2968_v45, %v2870_v19  ;;  %8132 = vmatmul.msk.f32.gmra.mxu1 %vm279_vm2, %v3604_v21  ;;  %v3607_v19 = vld [vmem:[#allocation2 + $0x167] sm:$0xff]  ;;  %v4064_v45 = vld [vmem:[#allocation2 + $0xb8] sm:$0xff] }
 0x2bf   : > { %v3295_v63 = vpop.f32.mrf.mxu3  ;;  %8157 = vmatmul.msk.f32.gmra.mxu2 %vm279_vm2, %v4061_v36 }
 0x2c0   : > { %3060 = vst.msk [vmem:[#allocation4 + $0xa0] sm:$0xff] %vm279_vm2, %v3014_v13  ;;  %8249 = vmatmul.msk.f32.gmra.mxu0 %vm279_vm2, %v5017_v56  ;;  %v3475_v51 = vadd.f32 %v3429_v47, %v3295_v63  ;;  %v3432_v56 = vld [vmem:[#allocation4 + $0x28] sm:$0xff] }
 0x2c1   : > { %v3907_v39 = vld [vmem:[#allocation4 + $0x8] sm:$0xff] }
 0x2c2   : > { %3521 = vst.msk [vmem:[#allocation4 + $0x10] sm:$0xff] %vm279_vm2, %v3475_v51  ;;  %v3953_v16 = vadd.f32 %v3907_v39, %v10330_v62  ;;  %v4250_v9 = vpop.f32.mrf.mxu2  ;;  %v3108_v51 = vld [vmem:[#allocation2 + $0xb2] sm:$0xff] }
 0x2c3   : > { %v4385_v30 = vld [vmem:[#allocation4] sm:$0xff]  ;;  %v10638_v24 = vpop.f32.mrf.mxu1 }
 0x2c4   : > { %v4431_v31 = vadd.f32 %v4385_v30, %v4247_v6  ;;  %3999 = vst.msk [vmem:[#allocation4 + $0x8] sm:$0xff] %vm279_vm2, %v3953_v16  ;;  %8065 = vmatmul.msk.f32.gmra.mxu3 %vm279_vm2, %v3105_v2  ;;  %v3608_v2 = vld [vmem:[#allocation2 + $0x16f] sm:$0xff] }
 0x2c5   : > { %v10668_v16 = vpop.f32.mrf.mxu0 }
 0x2c6   : > { %4477 = vst.msk [vmem:[#allocation4] sm:$0xff] %vm279_vm2, %v4431_v31  ;;  %8133 = vmatmul.msk.f32.gmra.mxu1 %vm279_vm2, %v3605_v59  ;;  %v4065_v31 = vld [vmem:[#allocation2 + $0xc0] sm:$0xff]  ;;  %v3433_v59 = vld [vmem:[#allocation4 + $0x30] sm:$0xff] }
 0x2c7   : > { %v3298_v43 = vpop.f32.mrf.mxu3  ;;  %8158 = vmatmul.msk.f32.gmra.mxu2 %vm279_vm2, %v4062_v37 }
 0x2c8   : > { %8250 = vmatmul.msk.f32.gmra.mxu0 %vm279_vm2, %v5018_v23  ;;  %v3476_v62 = vadd.f32 %v3430_v44, %v3298_v43 }
 0x2c9   : > { %v3908_v50 = vld [vmem:[#allocation4 + $0x10] sm:$0xff] }
 0x2ca   : > { %3522 = vst.msk [vmem:[#allocation4 + $0x18] sm:$0xff] %vm279_vm2, %v3476_v62  ;;  %v3954_v34 = vadd.f32 %v3908_v50, %v10359_v35  ;;  %v4253_v53 = vpop.f32.mrf.mxu2  ;;  %v3109_v50 = vld [vmem:[#allocation2 + $0xba] sm:$0xff] }
 0x2cb   : > { %v4386_v54 = vld [vmem:[#allocation4 + $0x8] sm:$0xff]  ;;  %v10648_v52 = vpop.f32.mrf.mxu1 }
 0x2cc   : > { %v4432_v12 = vadd.f32 %v4386_v54, %v4250_v9  ;;  %4000 = vst.msk [vmem:[#allocation4 + $0x10] sm:$0xff] %vm279_vm2, %v3954_v34  ;;  %8066 = vmatmul.msk.f32.gmra.mxu3 %vm279_vm2, %v3106_v38  ;;  %v5021_v9 = vld [vmem:[#allocation2 + $0xc6] sm:$0xff] }
 0x2cd   : > { %v10683_v38 = vpop.f32.mrf.mxu0 }
 0x2ce   : > { %4478 = vst.msk [vmem:[#allocation4 + $0x8] sm:$0xff] %vm279_vm2, %v4432_v12  ;;  %8134 = vmatmul.msk.f32.gmra.mxu1 %vm279_vm2, %v3606_v22  ;;  %v3609_v12 = vld [vmem:[#allocation2 + $0x177] sm:$0xff] }
 0x2cf   : > { %v3301_v55 = vpop.f32.mrf.mxu3  ;;  %8159 = vmatmul.msk.f32.gmra.mxu2 %vm279_vm2, %v4063_v49  ;;  %v3434_v49 = vld [vmem:[#allocation4 + $0x38] sm:$0xff] }
 0x2d0   : > { %8251 = vmatmul.msk.f32.gmra.mxu0 %vm279_vm2, %v5019_v20  ;;  %v3477_v35 = vadd.f32 %v3431_v41, %v3301_v55  ;;  %v4066_v20 = vld [vmem:[#allocation2 + $0xc8] sm:$0xff] }
 0x2d1   : > { %v3909_v0 = vld [vmem:[#allocation4 + $0x18] sm:$0xff] }
 0x2d2   : > { %3523 = vst.msk [vmem:[#allocation4 + $0x20] sm:$0xff] %vm279_vm2, %v3477_v35  ;;  %v3955_v1 = vadd.f32 %v3909_v0, %v10392_v29  ;;  %v4256_v40 = vpop.f32.mrf.mxu2 }
 0x2d3   : > { %v4387_v5 = vld [vmem:[#allocation4 + $0x10] sm:$0xff]  ;;  %v10658_v6 = vpop.f32.mrf.mxu1 }
 0x2d4   : > { %v4433_v4 = vadd.f32 %v4387_v5, %v4253_v53  ;;  %4001 = vst.msk [vmem:[#allocation4 + $0x18] sm:$0xff] %vm279_vm2, %v3955_v1  ;;  %8067 = vmatmul.msk.f32.gmra.mxu3 %vm279_vm2, %v3107_v3  ;;  %v5022_v53 = vld [vmem:[#allocation2 + $0xce] sm:$0xff]  ;;  %v3110_v1 = vld [vmem:[#allocation2 + $0xc2] sm:$0xff]  ;;  %v5023_v3 = vld [vmem:[#allocation2 + $0xd6] sm:$0xff] }
 0x2d6   : > { %4479 = vst.msk [vmem:[#allocation4 + $0x10] sm:$0xff] %vm279_vm2, %v4433_v4  ;;  %8135 = vmatmul.msk.f32.gmra.mxu1 %vm279_vm2, %v3607_v19  ;;  %v3610_v4 = vld [vmem:[#allocation2 + $0x17f] sm:$0xff] }
 0x2d7   : > { %v3304_v13 = vpop.f32.mrf.mxu3  ;;  %8160 = vmatmul.msk.f32.gmra.mxu2 %vm279_vm2, %v4064_v45  ;;  %v3435_v45 = vld [vmem:[#allocation4 + $0x40] sm:$0xff] }
 0x2d8   : > { %8252 = vmatmul.msk.f32.gmra.mxu0 %vm279_vm2, %v5020_v57  ;;  %v3478_v29 = vadd.f32 %v3432_v56, %v3304_v13  ;;  %v4067_v57 = vld [vmem:[#allocation2 + $0xd0] sm:$0xff]  ;;  %v10698_v13 = vpop.f32.mrf.mxu0 }
 0x2d9   : > { %v3910_v21 = vld [vmem:[#allocation4 + $0x20] sm:$0xff] }
 0x2da   : > { %3524 = vst.msk [vmem:[#allocation4 + $0x28] sm:$0xff] %vm279_vm2, %v3478_v29  ;;  %v3956_v36 = vadd.f32 %v3910_v21, %v10421_v46  ;;  %v4259_v47 = vpop.f32.mrf.mxu2 }
 0x2db   : > { %v4388_v63 = vld [vmem:[#allocation4 + $0x18] sm:$0xff]  ;;  %v10670_v30 = vpop.f32.mrf.mxu1 }
 0x2dc   : > { %v4434_v39 = vadd.f32 %v4388_v63, %v4256_v40  ;;  %4002 = vst.msk [vmem:[#allocation4 + $0x20] sm:$0xff] %vm279_vm2, %v3956_v36  ;;  %8068 = vmatmul.msk.f32.gmra.mxu3 %vm279_vm2, %v3108_v51  ;;  %v3111_v63 = vld [vmem:[#allocation2 + $0xca] sm:$0xff] }
 0x2de   : > { %4480 = vst.msk [vmem:[#allocation4 + $0x18] sm:$0xff] %vm279_vm2, %v4434_v39  ;;  %8136 = vmatmul.msk.f32.gmra.mxu1 %vm279_vm2, %v3608_v2  ;;  %v5024_v39 = vld [vmem:[#allocation2 + $0xde] sm:$0xff]  ;;  %v5481_v2 = vld [vmem:[#allocation2 + $0x2f] sm:$0xff] }
 0x2df   : > { %v3307_v23 = vpop.f32.mrf.mxu3  ;;  %8161 = vmatmul.msk.f32.gmra.mxu2 %vm279_vm2, %v4065_v31 }
 0x2e0   : > { %8253 = vmatmul.msk.f32.gmra.mxu0 %vm279_vm2, %v5021_v9  ;;  %v3479_v46 = vadd.f32 %v3433_v59, %v3307_v23  ;;  %v4068_v9 = vld [vmem:[#allocation2 + $0xd8] sm:$0xff]  ;;  %v3436_v23 = vld [vmem:[#allocation4 + $0x48] sm:$0xff] }
 0x2e1   : > { %v3911_v37 = vld [vmem:[#allocation4 + $0x28] sm:$0xff] }
 0x2e2   : > { %3525 = vst.msk [vmem:[#allocation4 + $0x30] sm:$0xff] %vm279_vm2, %v3479_v46  ;;  %v3957_v43 = vadd.f32 %v3911_v37, %v10449_v17  ;;  %v4262_v62 = vpop.f32.mrf.mxu2  ;;  %v10712_v37 = vpop.f32.mrf.mxu0 }
 0x2e3   : > { %v4389_v44 = vld [vmem:[#allocation4 + $0x20] sm:$0xff]  ;;  %v10680_v54 = vpop.f32.mrf.mxu1 }
 0x2e4   : > { %v4435_v34 = vadd.f32 %v4389_v44, %v4259_v47  ;;  %4003 = vst.msk [vmem:[#allocation4 + $0x28] sm:$0xff] %vm279_vm2, %v3957_v43  ;;  %8069 = vmatmul.msk.f32.gmra.mxu3 %vm279_vm2, %v3109_v50 }
 0x2e6   : > { %4481 = vst.msk [vmem:[#allocation4 + $0x20] sm:$0xff] %vm279_vm2, %v4435_v34  ;;  %8137 = vmatmul.msk.f32.gmra.mxu1 %vm279_vm2, %v3609_v12  ;;  %v4069_v12 = vld [vmem:[#allocation2 + $0xe0] sm:$0xff] }
 0x2e7   : > { %v3310_v22 = vpop.f32.mrf.mxu3  ;;  %8162 = vmatmul.msk.f32.gmra.mxu2 %vm279_vm2, %v4066_v20  ;;  %v5482_v20 = vld [vmem:[#allocation2 + $0x37] sm:$0xff] }
 0x2e8   : > { %8254 = vmatmul.msk.f32.gmra.mxu0 %vm279_vm2, %v5022_v53  ;;  %v3480_v17 = vadd.f32 %v3434_v49, %v3310_v22  ;;  %v5025_v53 = vld [vmem:[#allocation2 + $0xe6] sm:$0xff] }
 0x2e9   : > { %v3912_v55 = vld [vmem:[#allocation4 + $0x30] sm:$0xff] }
 0x2ea   : > { %3526 = vst.msk [vmem:[#allocation4 + $0x38] sm:$0xff] %vm279_vm2, %v3480_v17  ;;  %v3958_v41 = vadd.f32 %v3912_v55, %v10472_v10  ;;  %v4265_v0 = vpop.f32.mrf.mxu2  ;;  %v3437_v49 = vld [vmem:[#allocation4 + $0x50] sm:$0xff] }
 0x2eb   : > { %v4390_v35 = vld [vmem:[#allocation4 + $0x28] sm:$0xff]  ;;  %v10692_v40 = vpop.f32.mrf.mxu1 }
 0x2ec   : > { %v4436_v5 = vadd.f32 %v4390_v35, %v4262_v62  ;;  %4004 = vst.msk [vmem:[#allocation4 + $0x30] sm:$0xff] %vm279_vm2, %v3958_v41  ;;  %8070 = vmatmul.msk.f32.gmra.mxu3 %vm279_vm2, %v3110_v1  ;;  %v3112_v62 = vld [vmem:[#allocation2 + $0xd2] sm:$0xff] }
 0x2ee   : > { %4482 = vst.msk [vmem:[#allocation4 + $0x28] sm:$0xff] %vm279_vm2, %v4436_v5  ;;  %8138 = vmatmul.msk.f32.gmra.mxu1 %vm279_vm2, %v3610_v4  ;;  %v10726_v5 = vpop.f32.mrf.mxu0  ;;  %v5026_v4 = vld [vmem:[#allocation2 + $0xee] sm:$0xff] }
 0x2ef   : > { %v3313_v19 = vpop.f32.mrf.mxu3  ;;  %8163 = vmatmul.msk.f32.gmra.mxu2 %vm279_vm2, %v4067_v57  ;;  %v4070_v57 = vld [vmem:[#allocation2 + $0xe8] sm:$0xff] }
 0x2f0   : > { %8255 = vmatmul.msk.f32.gmra.mxu0 %vm279_vm2, %v5023_v3  ;;  %v3481_v10 = vadd.f32 %v3435_v45, %v3313_v19  ;;  %v5483_v19 = vld [vmem:[#allocation2 + $0x3f] sm:$0xff] }
 0x2f1   : > { %v3913_v56 = vld [vmem:[#allocation4 + $0x38] sm:$0xff] }
 0x2f2   : > { %3527 = vst.msk [vmem:[#allocation4 + $0x40] sm:$0xff] %vm279_vm2, %v3481_v10  ;;  %v3959_v29 = vadd.f32 %v3913_v56, %v10482_v48  ;;  %v4268_v36 = vpop.f32.mrf.mxu2  ;;  %v3438_v10 = vld [vmem:[#allocation4 + $0x58] sm:$0xff] }
 0x2f3   : > { %v4391_v21 = vld [vmem:[#allocation4 + $0x30] sm:$0xff]  ;;  %v10704_v51 = vpop.f32.mrf.mxu1 }
 0x2f4   : > { %v4437_v47 = vadd.f32 %v4391_v21, %v4265_v0  ;;  %4005 = vst.msk [vmem:[#allocation4 + $0x38] sm:$0xff] %vm279_vm2, %v3959_v29  ;;  %8071 = vmatmul.msk.f32.gmra.mxu3 %vm279_vm2, %v3111_v63  ;;  %v3113_v0 = vld [vmem:[#allocation2 + $0xda] sm:$0xff]  ;;  %v3114_v63 = vld [vmem:[#allocation2 + $0xe2] sm:$0xff] }
 0x2f6   : > { %4483 = vst.msk [vmem:[#allocation4 + $0x30] sm:$0xff] %vm279_vm2, %v4437_v47  ;;  %8281 = vmatmul.msk.f32.vlgmr.msra.gmra.mxu1 %vm279_vm2, %v5481_v2  ;;  %v10741_v2 = vpop.f32.mrf.mxu0 }
 0x2f7   : > { %v3316_v31 = vpop.f32.mrf.mxu3  ;;  %8164 = vmatmul.msk.f32.gmra.mxu2 %vm279_vm2, %v4068_v9  ;;  %v5027_v9 = vld [vmem:[#allocation2 + $0xf6] sm:$0xff] }
 0x2f8   : > { %8256 = vmatmul.msk.f32.gmra.mxu0 %vm279_vm2, %v5024_v39  ;;  %v3482_v48 = vadd.f32 %v3436_v23, %v3316_v31  ;;  %v4071_v31 = vld [vmem:[#allocation2 + $0xf0] sm:$0xff]  ;;  %v5484_v23 = vld [vmem:[#allocation2 + $0x47] sm:$0xff] }
 0x2f9   : > { %v3914_v59 = vld [vmem:[#allocation4 + $0x40] sm:$0xff] }
 0x2fa   : > { %3528 = vst.msk [vmem:[#allocation4 + $0x48] sm:$0xff] %vm279_vm2, %v3482_v48  ;;  %v3960_v46 = vadd.f32 %v3914_v59, %v10491_v28  ;;  %v4271_v44 = vpop.f32.mrf.mxu2  ;;  %v3439_v59 = vld [vmem:[#allocation4 + $0x60] sm:$0xff] }
 0x2fb   : > { %v4392_v43 = vld [vmem:[#allocation4 + $0x38] sm:$0xff]  ;;  %v10716_v34 = vpop.f32.mrf.mxu1 }
 0x2fc   : > { %v4438_v50 = vadd.f32 %v4392_v43, %v4268_v36  ;;  %4006 = vst.msk [vmem:[#allocation4 + $0x40] sm:$0xff] %vm279_vm2, %v3960_v46  ;;  %8072 = vmatmul.msk.f32.gmra.mxu3 %vm279_vm2, %v3112_v62 }
 0x2fe   : > { %4484 = vst.msk [vmem:[#allocation4 + $0x38] sm:$0xff] %vm279_vm2, %v4438_v50  ;;  %8282 = vmatmul.msk.f32.gmra.mxu1 %vm279_vm2, %v5482_v20  ;;  %v3115_v50 = vld [vmem:[#allocation2 + $0xea] sm:$0xff]  ;;  %v5028_v20 = vld [vmem:[#allocation2 + $0xfe] sm:$0xff] }
 0x2ff   : > { %v3319_v22 = vpop.f32.mrf.mxu3  ;;  %8165 = vmatmul.msk.f32.gmra.mxu2 %vm279_vm2, %v4069_v12 }
 0x300   : > { %8257 = vmatmul.msk.f32.gmra.mxu0 %vm279_vm2, %v5025_v53  ;;  %v3483_v28 = vadd.f32 %v3437_v49, %v3319_v22  ;;  %v4072_v22 = vld [vmem:[#allocation2 + $0xf8] sm:$0xff]  ;;  %v5485_v49 = vld [vmem:[#allocation2 + $0x4f] sm:$0xff] }
 0x301   : > { %v3915_v17 = vld [vmem:[#allocation4 + $0x48] sm:$0xff] }
 0x302   : > { %3529 = vst.msk [vmem:[#allocation4 + $0x50] sm:$0xff] %vm279_vm2, %v3483_v28  ;;  %v3961_v55 = vadd.f32 %v3915_v17, %v10500_v60  ;;  %v4274_v35 = vpop.f32.mrf.mxu2  ;;  %v3440_v17 = vld [vmem:[#allocation4 + $0x68] sm:$0xff] }
 0x303   : > { %v4393_v41 = vld [vmem:[#allocation4 + $0x40] sm:$0xff]  ;;  %v10728_v3 = vpop.f32.mrf.mxu1 }
 0x304   : > { %v4439_v1 = vadd.f32 %v4393_v41, %v4271_v44  ;;  %4007 = vst.msk [vmem:[#allocation4 + $0x48] sm:$0xff] %vm279_vm2, %v3961_v55  ;;  %8073 = vmatmul.msk.f32.gmra.mxu3 %vm279_vm2, %v3113_v0  ;;  %v10756_v55 = vpop.f32.mrf.mxu0 }
 0x306   : > { %4485 = vst.msk [vmem:[#allocation4 + $0x40] sm:$0xff] %vm279_vm2, %v4439_v1  ;;  %8283 = vmatmul.msk.f32.gmra.mxu1 %vm279_vm2, %v5483_v19  ;;  %v5029_v19 = vld [vmem:[#allocation2 + $0x106] sm:$0xff] }
 0x307   : > { %v3322_v45 = vpop.f32.mrf.mxu3  ;;  %8166 = vmatmul.msk.f32.gmra.mxu2 %vm279_vm2, %v4070_v57 }
 0x308   : > { %8258 = vmatmul.msk.f32.gmra.mxu0 %vm279_vm2, %v5026_v4  ;;  %v3484_v60 = vadd.f32 %v3438_v10, %v3322_v45  ;;  %v3116_v4 = vld [vmem:[#allocation2 + $0xf2] sm:$0xff]  ;;  %v4073_v45 = vld [vmem:[#allocation2 + $0x100] sm:$0xff] }
 0x309   : > { %v3916_v56 = vld [vmem:[#allocation4 + $0x50] sm:$0xff]  ;;  %v5486_v10 = vld [vmem:[#allocation2 + $0x57] sm:$0xff] }
 0x30a   : > { %3530 = vst.msk [vmem:[#allocation4 + $0x58] sm:$0xff] %vm279_vm2, %v3484_v60  ;;  %v3962_v29 = vadd.f32 %v3916_v56, %v10509_v18  ;;  %v4277_v36 = vpop.f32.mrf.mxu2  ;;  %v3441_v56 = vld [vmem:[#allocation4 + $0x70] sm:$0xff] }
 0x30b   : > { %v4394_v21 = vld [vmem:[#allocation4 + $0x48] sm:$0xff]  ;;  %v10738_v39 = vpop.f32.mrf.mxu1 }
 0x30c   : > { %v4440_v47 = vadd.f32 %v4394_v21, %v4274_v35  ;;  %4008 = vst.msk [vmem:[#allocation4 + $0x50] sm:$0xff] %vm279_vm2, %v3962_v29  ;;  %8074 = vmatmul.msk.f32.gmra.mxu3 %vm279_vm2, %v3114_v63  ;;  %v10770_v63 = vpop.f32.mrf.mxu0 }
 0x30e   : > { %4486 = vst.msk [vmem:[#allocation4 + $0x48] sm:$0xff] %vm279_vm2, %v4440_v47  ;;  %8284 = vmatmul.msk.f32.gmra.mxu1 %vm279_vm2, %v5484_v23 }
 0x30f   : > { %v3325_v48 = vpop.f32.mrf.mxu3  ;;  %8167 = vmatmul.msk.f32.gmra.mxu2 %vm279_vm2, %v4071_v31  ;;  %v3117_v31 = vld [vmem:[#allocation2 + $0xfa] sm:$0xff] }
 0x310   : > { %8259 = vmatmul.msk.f32.gmra.mxu0 %vm279_vm2, %v5027_v9  ;;  %v3485_v18 = vadd.f32 %v3439_v59, %v3325_v48  ;;  %v5030_v48 = vld [vmem:[#allocation2 + $0x10e] sm:$0xff] }
 0x311   : > { %v3917_v46 = vld [vmem:[#allocation4 + $0x58] sm:$0xff]  ;;  %v4074_v59 = vld [vmem:[#allocation2 + $0x108] sm:$0xff] }
 0x312   : > { %3531 = vst.msk [vmem:[#allocation4 + $0x60] sm:$0xff] %vm279_vm2, %v3485_v18  ;;  %v3963_v43 = vadd.f32 %v3917_v46, %v10518_v27  ;;  %v4280_v62 = vpop.f32.mrf.mxu2  ;;  %v5487_v18 = vld [vmem:[#allocation2 + $0x5f] sm:$0xff] }
 0x313   : > { %v4395_v44 = vld [vmem:[#allocation4 + $0x50] sm:$0xff]  ;;  %v10751_v12 = vpop.f32.mrf.mxu1 }
 0x314   : > { %v4441_v53 = vadd.f32 %v4395_v44, %v4277_v36  ;;  %4009 = vst.msk [vmem:[#allocation4 + $0x58] sm:$0xff] %vm279_vm2, %v3963_v43  ;;  %8075 = vmatmul.msk.f32.gmra.mxu3 %vm279_vm2, %v3115_v50  ;;  %v3442_v43 = vld [vmem:[#allocation4 + $0x78] sm:$0xff] }
 0x316   : > { %4487 = vst.msk [vmem:[#allocation4 + $0x50] sm:$0xff] %vm279_vm2, %v4441_v53  ;;  %8285 = vmatmul.msk.f32.gmra.mxu1 %vm279_vm2, %v5485_v49 }
 0x317   : > { %v3328_v28 = vpop.f32.mrf.mxu3  ;;  %8168 = vmatmul.msk.f32.gmra.mxu2 %vm279_vm2, %v4072_v22  ;;  %v3118_v22 = vld [vmem:[#allocation2 + $0x102] sm:$0xff] }
 0x318   : > { %8260 = vmatmul.msk.f32.gmra.mxu0 %vm279_vm2, %v5028_v20  ;;  %v3486_v27 = vadd.f32 %v3440_v17, %v3328_v28  ;;  %v10784_v28 = vpop.f32.mrf.mxu0  ;;  %v5031_v17 = vld [vmem:[#allocation2 + $0x116] sm:$0xff] }
 0x319   : > { %v3918_v41 = vld [vmem:[#allocation4 + $0x60] sm:$0xff] }
 0x31a   : > { %3532 = vst.msk [vmem:[#allocation4 + $0x68] sm:$0xff] %vm279_vm2, %v3486_v27  ;;  %v3964_v35 = vadd.f32 %v3918_v41, %v10527_v25  ;;  %v4283_v1 = vpop.f32.mrf.mxu2  ;;  %v4075_v27 = vld [vmem:[#allocation2 + $0x110] sm:$0xff]  ;;  %v5488_v41 = vld [vmem:[#allocation2 + $0x67] sm:$0xff] }
 0x31b   : > { %v4396_v0 = vld [vmem:[#allocation4 + $0x58] sm:$0xff]  ;;  %v10764_v29 = vpop.f32.mrf.mxu1 }
 0x31c   : > { %v4442_v57 = vadd.f32 %v4396_v0, %v4280_v62  ;;  %4010 = vst.msk [vmem:[#allocation4 + $0x60] sm:$0xff] %vm279_vm2, %v3964_v35  ;;  %8076 = vmatmul.msk.f32.gmra.mxu3 %vm279_vm2, %v3116_v4  ;;  %v3443_v0 = vld [vmem:[#allocation4 + $0x80] sm:$0xff] }
 0x31e   : > { %4488 = vst.msk [vmem:[#allocation4 + $0x58] sm:$0xff] %vm279_vm2, %v4442_v57  ;;  %8286 = vmatmul.msk.f32.gmra.mxu1 %vm279_vm2, %v5486_v10 }
 0x31f   : > { %v3331_v60 = vpop.f32.mrf.mxu3  ;;  %8169 = vmatmul.msk.f32.gmra.mxu2 %vm279_vm2, %v4073_v45  ;;  %v3119_v45 = vld [vmem:[#allocation2 + $0x10a] sm:$0xff] }
 0x320   : > { %8261 = vmatmul.msk.f32.gmra.mxu0 %vm279_vm2, %v5029_v19  ;;  %v3487_v25 = vadd.f32 %v3441_v56, %v3331_v60  ;;  %v5032_v56 = vld [vmem:[#allocation2 + $0x11e] sm:$0xff] }
 0x321   : > { %v3919_v21 = vld [vmem:[#allocation4 + $0x68] sm:$0xff] }
 0x322   : > { %3533 = vst.msk [vmem:[#allocation4 + $0x70] sm:$0xff] %vm279_vm2, %v3487_v25  ;;  %v3965_v36 = vadd.f32 %v3919_v21, %v10536_v11  ;;  %v4286_v9 = vpop.f32.mrf.mxu2  ;;  %v10797_v25 = vpop.f32.mrf.mxu0  ;;  %v4076_v21 = vld [vmem:[#allocation2 + $0x118] sm:$0xff] }
 0x323   : > { %v4397_v47 = vld [vmem:[#allocation4 + $0x60] sm:$0xff]  ;;  %v10778_v62 = vpop.f32.mrf.mxu1 }
 0x324   : > { %v4443_v23 = vadd.f32 %v4397_v47, %v4283_v1  ;;  %4011 = vst.msk [vmem:[#allocation4 + $0x68] sm:$0xff] %vm279_vm2, %v3965_v36  ;;  %8077 = vmatmul.msk.f32.gmra.mxu3 %vm279_vm2, %v3117_v31  ;;  %v5489_v36 = vld [vmem:[#allocation2 + $0x6f] sm:$0xff] }
 0x326   : > { %4489 = vst.msk [vmem:[#allocation4 + $0x60] sm:$0xff] %vm279_vm2, %v4443_v23  ;;  %8287 = vmatmul.msk.f32.gmra.mxu1 %vm279_vm2, %v5487_v18  ;;  %v3120_v18 = vld [vmem:[#allocation2 + $0x112] sm:$0xff] }
 0x327   : > { %v3334_v46 = vpop.f32.mrf.mxu3  ;;  %8170 = vmatmul.msk.f32.gmra.mxu2 %vm279_vm2, %v4074_v59 }
 0x328   : > { %8262 = vmatmul.msk.f32.gmra.mxu0 %vm279_vm2, %v5030_v48  ;;  %v3488_v11 = vadd.f32 %v3442_v43, %v3334_v46 }
 0x329   : > { %v3920_v44 = vld [vmem:[#allocation4 + $0x70] sm:$0xff] }
 0x32a   : > { %3534 = vst.msk [vmem:[#allocation4 + $0x78] sm:$0xff] %vm279_vm2, %v3488_v11  ;;  %v3966_v50 = vadd.f32 %v3920_v44, %v10545_v33  ;;  %v4289_v20 = vpop.f32.mrf.mxu2  ;;  %v5033_v11 = vld [vmem:[#allocation2 + $0x126] sm:$0xff] }
 0x32b   : > { %v4398_v53 = vld [vmem:[#allocation4 + $0x68] sm:$0xff]  ;;  %v10792_v60 = vpop.f32.mrf.mxu1 }
 0x32c   : > { %v4444_v49 = vadd.f32 %v4398_v53, %v4286_v9  ;;  %4012 = vst.msk [vmem:[#allocation4 + $0x70] sm:$0xff] %vm279_vm2, %v3966_v50  ;;  %8078 = vmatmul.msk.f32.gmra.mxu3 %vm279_vm2, %v3118_v22  ;;  %v3444_v9 = vld [vmem:[#allocation4 + $0x88] sm:$0xff]  ;;  %v5490_v50 = vld [vmem:[#allocation2 + $0x77] sm:$0xff]  ;;  %v10812_v22 = vpop.f32.mrf.mxu0 }
 0x32d   : > { %v4077_v44 = vld [vmem:[#allocation2 + $0x120] sm:$0xff] }
 0x32e   : > { %4490 = vst.msk [vmem:[#allocation4 + $0x68] sm:$0xff] %vm279_vm2, %v4444_v49  ;;  %8288 = vmatmul.msk.f32.gmra.mxu1 %vm279_vm2, %v5488_v41 }
 0x32f   : > { %v3337_v35 = vpop.f32.mrf.mxu3  ;;  %8171 = vmatmul.msk.f32.gmra.mxu2 %vm279_vm2, %v4075_v27 }
 0x330   : > { %8263 = vmatmul.msk.f32.gmra.mxu0 %vm279_vm2, %v5031_v17  ;;  %v3489_v33 = vadd.f32 %v3443_v0, %v3337_v35  ;;  %v3121_v35 = vld [vmem:[#allocation2 + $0x11a] sm:$0xff] }
 0x331   : > { %v3921_v1 = vld [vmem:[#allocation4 + $0x78] sm:$0xff] }
 0x332   : > { %3535 = vst.msk [vmem:[#allocation4 + $0x80] sm:$0xff] %vm279_vm2, %v3489_v33  ;;  %v3967_v4 = vadd.f32 %v3921_v1, %v10554_v15  ;;  %v4292_v19 = vpop.f32.mrf.mxu2  ;;  %v5034_v33 = vld [vmem:[#allocation2 + $0x12e] sm:$0xff] }
 0x333   : > { %v4399_v57 = vld [vmem:[#allocation4 + $0x70] sm:$0xff]  ;;  %v10807_v43 = vpop.f32.mrf.mxu1 }
 0x334   : > { %v4445_v10 = vadd.f32 %v4399_v57, %v4289_v20  ;;  %4013 = vst.msk [vmem:[#allocation4 + $0x78] sm:$0xff] %vm279_vm2, %v3967_v4  ;;  %8079 = vmatmul.msk.f32.gmra.mxu3 %vm279_vm2, %v3119_v45  ;;  %v3445_v20 = vld [vmem:[#allocation4 + $0x90] sm:$0xff]  ;;  %v5491_v4 = vld [vmem:[#allocation2 + $0x7f] sm:$0xff] }
 0x335   : > { %v4078_v1 = vld [vmem:[#allocation2 + $0x128] sm:$0xff] }
 0x336   : > { %4491 = vst.msk [vmem:[#allocation4 + $0x70] sm:$0xff] %vm279_vm2, %v4445_v10  ;;  %8289 = vmatmul.msk.f32.gmra.mxu1 %vm279_vm2, %v5489_v36 }
 0x337   : > { %v3340_v47 = vpop.f32.mrf.mxu3  ;;  %8172 = vmatmul.msk.f32.gmra.mxu2 %vm279_vm2, %v4076_v21  ;;  %v10826_v21 = vpop.f32.mrf.mxu0 }
 0x338   : > { %8264 = vmatmul.msk.f32.gmra.mxu0 %vm279_vm2, %v5032_v56  ;;  %v3490_v15 = vadd.f32 %v3444_v9, %v3340_v47  ;;  %v3122_v9 = vld [vmem:[#allocation2 + $0x122] sm:$0xff] }
 0x339   : > { %v3922_v31 = vld [vmem:[#allocation4 + $0x80] sm:$0xff] }
 0x33a   : > { %3536 = vst.msk [vmem:[#allocation4 + $0x88] sm:$0xff] %vm279_vm2, %v3490_v15  ;;  %v3968_v23 = vadd.f32 %v3922_v31, %v10563_v26  ;;  %v4295_v59 = vpop.f32.mrf.mxu2  ;;  %v5035_v31 = vld [vmem:[#allocation2 + $0x136] sm:$0xff] }
 0x33b   : > { %v4400_v48 = vld [vmem:[#allocation4 + $0x78] sm:$0xff]  ;;  %v10820_v45 = vpop.f32.mrf.mxu1 }
 0x33c   : > { %v4446_v46 = vadd.f32 %v4400_v48, %v4292_v19  ;;  %4014 = vst.msk [vmem:[#allocation4 + $0x80] sm:$0xff] %vm279_vm2, %v3968_v23  ;;  %8080 = vmatmul.msk.f32.gmra.mxu3 %vm279_vm2, %v3120_v18  ;;  %v3446_v19 = vld [vmem:[#allocation4 + $0x98] sm:$0xff]  ;;  %v5492_v48 = vld [vmem:[#allocation2 + $0x87] sm:$0xff]  ;;  %v3447_v18 = vld [vmem:[#allocation4 + $0xa0] sm:$0xff] }
 0x33d   : > { %v4079_v23 = vld [vmem:[#allocation2 + $0x130] sm:$0xff] }
 0x33e   : > { %4492 = vst.msk [vmem:[#allocation4 + $0x78] sm:$0xff] %vm279_vm2, %v4446_v46  ;;  %8290 = vmatmul.msk.f32.gmra.mxu1 %vm279_vm2, %v5490_v50 }
 0x33f   : > { %v3343_v53 = vpop.f32.mrf.mxu3  ;;  %8173 = vmatmul.msk.f32.gmra.mxu2 %vm279_vm2, %v4077_v44 }
 0x340   : > { %8265 = vmatmul.msk.f32.gmra.mxu0 %vm279_vm2, %v5033_v11  ;;  %v3491_v26 = vadd.f32 %v3445_v20, %v3343_v53  ;;  %v3123_v20 = vld [vmem:[#allocation2 + $0x12a] sm:$0xff] }
 0x341   : > { %v3923_v49 = vld [vmem:[#allocation4 + $0x88] sm:$0xff] }
 0x342   : > { %3537 = vst.msk [vmem:[#allocation4 + $0x90] sm:$0xff] %vm279_vm2, %v3491_v26  ;;  %v3969_v17 = vadd.f32 %v3923_v49, %v10572_v42  ;;  %v4298_v41 = vpop.f32.mrf.mxu2  ;;  %v10840_v49 = vpop.f32.mrf.mxu0 }
 0x343   : > { %v4401_v27 = vld [vmem:[#allocation4 + $0x80] sm:$0xff]  ;;  %v10834_v11 = vpop.f32.mrf.mxu1 }
 0x344   : > { %v4447_v0 = vadd.f32 %v4401_v27, %v4295_v59  ;;  %4015 = vst.msk [vmem:[#allocation4 + $0x88] sm:$0xff] %vm279_vm2, %v3969_v17  ;;  %8081 = vmatmul.msk.f32.gmra.mxu3 %vm279_vm2, %v3121_v35  ;;  %v5036_v17 = vld [vmem:[#allocation2 + $0x13e] sm:$0xff] }
 0x345   : > { %v4080_v27 = vld [vmem:[#allocation2 + $0x138] sm:$0xff] }
 0x346   : > { %4493 = vst.msk [vmem:[#allocation4 + $0x80] sm:$0xff] %vm279_vm2, %v4447_v0  ;;  %8291 = vmatmul.msk.f32.gmra.mxu1 %vm279_vm2, %v5491_v4  ;;  %v3448_v0 = vld [vmem:[#allocation4 + $0xa8] sm:$0xff] }
 0x347   : > { %v3346_v57 = vpop.f32.mrf.mxu3  ;;  %8174 = vmatmul.msk.f32.gmra.mxu2 %vm279_vm2, %v4078_v1 }
 0x348   : > { %8266 = vmatmul.msk.f32.gmra.mxu0 %vm279_vm2, %v5034_v33  ;;  %v3492_v42 = vadd.f32 %v3446_v19, %v3346_v57  ;;  %v3124_v19 = vld [vmem:[#allocation2 + $0x132] sm:$0xff] }
 0x349   : > { %v3924_v10 = vld [vmem:[#allocation4 + $0x90] sm:$0xff] }
 0x34a   : > { %3538 = vst.msk [vmem:[#allocation4 + $0x98] sm:$0xff] %vm279_vm2, %v3492_v42  ;;  %v3970_v56 = vadd.f32 %v3924_v10, %v10581_v14  ;;  %v4301_v47 = vpop.f32.mrf.mxu2 }
 0x34b   : > { %v4402_v36 = vld [vmem:[#allocation4 + $0x88] sm:$0xff]  ;;  %v10848_v42 = vpop.f32.mrf.mxu1 }
 0x34c   : > { %v4448_v15 = vadd.f32 %v4402_v36, %v4298_v41  ;;  %4016 = vst.msk [vmem:[#allocation4 + $0x90] sm:$0xff] %vm279_vm2, %v3970_v56  ;;  %8082 = vmatmul.msk.f32.gmra.mxu3 %vm279_vm2, %v3122_v9  ;;  %v5493_v41 = vld [vmem:[#allocation2 + $0x8f] sm:$0xff]  ;;  %v5037_v56 = vld [vmem:[#allocation2 + $0x146] sm:$0xff]  ;;  %v10853_v36 = vpop.f32.mrf.mxu0  ;;  %v5494_v9 = vld [vmem:[#allocation2 + $0x97] sm:$0xff] }
 0x34e   : > { %4494 = vst.msk [vmem:[#allocation4 + $0x88] sm:$0xff] %vm279_vm2, %v4448_v15  ;;  %8292 = vmatmul.msk.f32.gmra.mxu1 %vm279_vm2, %v5492_v48 }
 0x34f   : > { %v3349_v59 = vpop.f32.mrf.mxu3  ;;  %8175 = vmatmul.msk.f32.gmra.mxu2 %vm279_vm2, %v4079_v23 }
 0x350   : > { %8267 = vmatmul.msk.f32.gmra.mxu0 %vm279_vm2, %v5035_v31  ;;  %v3493_v14 = vadd.f32 %v3447_v18, %v3349_v59  ;;  %v3449_v31 = vld [vmem:[#allocation4 + $0xb0] sm:$0xff] }
 0x351   : > { %v3925_v46 = vld [vmem:[#allocation4 + $0x98] sm:$0xff] }
 0x352   : > { %3539 = vst.msk [vmem:[#allocation4 + $0xa0] sm:$0xff] %vm279_vm2, %v3493_v14  ;;  %v3971_v44 = vadd.f32 %v3925_v46, %v10590_v7  ;;  %v4304_v53 = vpop.f32.mrf.mxu2  ;;  %v3125_v14 = vld [vmem:[#allocation2 + $0x13a] sm:$0xff] }
 0x353   : > { %v4403_v50 = vld [vmem:[#allocation4 + $0x90] sm:$0xff] }
 0x354   : > { %v4449_v26 = vadd.f32 %v4403_v50, %v4301_v47  ;;  %4017 = vst.msk [vmem:[#allocation4 + $0x98] sm:$0xff] %vm279_vm2, %v3971_v44  ;;  %8083 = vmatmul.msk.f32.gmra.mxu3 %vm279_vm2, %v3123_v20  ;;  %v4081_v47 = vld [vmem:[#allocation2 + $0x140] sm:$0xff]  ;;  %v10862_v44 = vpop.f32.mrf.mxu1  ;;  %v5038_v50 = vld [vmem:[#allocation2 + $0x14e] sm:$0xff] }
 0x355   : > { %v5495_v20 = vld [vmem:[#allocation2 + $0x9f] sm:$0xff] }
 0x356   : > { %4495 = vst.msk [vmem:[#allocation4 + $0x90] sm:$0xff] %vm279_vm2, %v4449_v26  ;;  %8293 = vmatmul.msk.f32.gmra.mxu1 %vm279_vm2, %v5493_v41 }
 0x357   : > { %v3352_v35 = vpop.f32.mrf.mxu3  ;;  %8176 = vmatmul.msk.f32.gmra.mxu2 %vm279_vm2, %v4080_v27  ;;  %v10868_v27 = vpop.f32.mrf.mxu0 }
 0x358   : > { %8268 = vmatmul.msk.f32.gmra.mxu0 %vm279_vm2, %v5036_v17  ;;  %v3494_v7 = vadd.f32 %v3448_v0, %v3352_v35  ;;  %v3450_v17 = vld [vmem:[#allocation4 + $0xb8] sm:$0xff] }
 0x359   : > { %v3926_v33 = vld [vmem:[#allocation4 + $0xa0] sm:$0xff] }
 0x35a   : > { %3540 = vst.msk [vmem:[#allocation4 + $0xa8] sm:$0xff] %vm279_vm2, %v3494_v7  ;;  %v3972_v1 = vadd.f32 %v3926_v33, %v10599_v58  ;;  %v4307_v57 = vpop.f32.mrf.mxu2  ;;  %v3126_v33 = vld [vmem:[#allocation2 + $0x142] sm:$0xff] }
 0x35b   : > { %v4404_v4 = vld [vmem:[#allocation4 + $0x98] sm:$0xff] }
 0x35c   : > { %v4450_v10 = vadd.f32 %v4404_v4, %v4304_v53  ;;  %4018 = vst.msk [vmem:[#allocation4 + $0xa0] sm:$0xff] %vm279_vm2, %v3972_v1  ;;  %8084 = vmatmul.msk.f32.gmra.mxu3 %vm279_vm2, %v3124_v19  ;;  %v4082_v53 = vld [vmem:[#allocation2 + $0x148] sm:$0xff]  ;;  %v5039_v4 = vld [vmem:[#allocation2 + $0x156] sm:$0xff] }
 0x35d   : > { %v5496_v19 = vld [vmem:[#allocation2 + $0xa7] sm:$0xff] }
 0x35e   : > { %4496 = vst.msk [vmem:[#allocation4 + $0x98] sm:$0xff] %vm279_vm2, %v4450_v10  ;;  %8294 = vmatmul.msk.f32.gmra.mxu1 %vm279_vm2, %v5494_v9 }
 0x35f   : > { %v3355_v15 = vpop.f32.mrf.mxu3  ;;  %8177 = vmatmul.msk.f32.gmra.mxu2 %vm279_vm2, %v4081_v47  ;;  %v10876_v47 = vpop.f32.mrf.mxu1 }
 0x360   : > { %8269 = vmatmul.msk.f32.gmra.mxu0 %vm279_vm2, %v5037_v56  ;;  %v3495_v58 = vadd.f32 %v3449_v31, %v3355_v15  ;;  %v3451_v56 = vld [vmem:[#allocation4 + $0xc0] sm:$0xff]  ;;  %v10882_v31 = vpop.f32.mrf.mxu0 }
 0x361   : > { %v3927_v23 = vld [vmem:[#allocation4 + $0xa8] sm:$0xff] }
 0x362   : > { %3541 = vst.msk [vmem:[#allocation4 + $0xb0] sm:$0xff] %vm279_vm2, %v3495_v58  ;;  %v3973_v48 = vadd.f32 %v3927_v23, %v10608_v8  ;;  %v4310_v18 = vpop.f32.mrf.mxu2 }
 0x363   : > { %v4405_v59 = vld [vmem:[#allocation4 + $0xa0] sm:$0xff] }
 0x364   : > { %v4451_v46 = vadd.f32 %v4405_v59, %v4307_v57  ;;  %4019 = vst.msk [vmem:[#allocation4 + $0xa8] sm:$0xff] %vm279_vm2, %v3973_v48  ;;  %8085 = vmatmul.msk.f32.gmra.mxu3 %vm279_vm2, %v3125_v14  ;;  %v4083_v57 = vld [vmem:[#allocation2 + $0x150] sm:$0xff]  ;;  %v4084_v14 = vld [vmem:[#allocation2 + $0x158] sm:$0xff] }
 0x365   : > { %v3127_v48 = vld [vmem:[#allocation2 + $0x14a] sm:$0xff] }
 0x366   : > { %4497 = vst.msk [vmem:[#allocation4 + $0xa0] sm:$0xff] %vm279_vm2, %v4451_v46  ;;  %8295 = vmatmul.msk.f32.gmra.mxu1 %vm279_vm2, %v5495_v20  ;;  %v5497_v46 = vld [vmem:[#allocation2 + $0xaf] sm:$0xff] }
 0x367   : > { %v3358_v26 = vpop.f32.mrf.mxu3  ;;  %8178 = vmatmul.msk.f32.gmra.mxu2 %vm279_vm2, %v4082_v53  ;;  %v3452_v53 = vld [vmem:[#allocation4 + $0xc8] sm:$0xff] }
 0x368   : > { %8270 = vmatmul.msk.f32.gmra.mxu0 %vm279_vm2, %v5038_v50  ;;  %v3496_v8 = vadd.f32 %v3450_v17, %v3358_v26  ;;  %v10890_v26 = vpop.f32.mrf.mxu1 }
 0x369   : > { %v3928_v41 = vld [vmem:[#allocation4 + $0xb0] sm:$0xff] }
 0x36a   : > { %3542 = vst.msk [vmem:[#allocation4 + $0xb8] sm:$0xff] %vm279_vm2, %v3496_v8  ;;  %v3974_v35 = vadd.f32 %v3928_v41, %v10617_v32  ;;  %v4313_v7 = vpop.f32.mrf.mxu2 }
 0x36b   : > { %v4406_v0 = vld [vmem:[#allocation4 + $0xa8] sm:$0xff] }
 0x36c   : > { %v4452_v1 = vadd.f32 %v4406_v0, %v4310_v18  ;;  %4020 = vst.msk [vmem:[#allocation4 + $0xb0] sm:$0xff] %vm279_vm2, %v3974_v35  ;;  %8086 = vmatmul.msk.f32.gmra.mxu3 %vm279_vm2, %v3126_v33  ;;  %v5040_v18 = vld [vmem:[#allocation2 + $0x15e] sm:$0xff]  ;;  %v3128_v35 = vld [vmem:[#allocation2 + $0x152] sm:$0xff]  ;;  %v5041_v33 = vld [vmem:[#allocation2 + $0x166] sm:$0xff] }
 0x36e   : > { %4498 = vst.msk [vmem:[#allocation4 + $0xa8] sm:$0xff] %vm279_vm2, %v4452_v1  ;;  %8296 = vmatmul.msk.f32.gmra.mxu1 %vm279_vm2, %v5496_v19  ;;  %v4085_v1 = vld [vmem:[#allocation2 + $0x160] sm:$0xff]  ;;  %v3453_v19 = vld [vmem:[#allocation4 + $0xd0] sm:$0xff] }
 0x36f   : > { %v3361_v10 = vpop.f32.mrf.mxu3  ;;  %8179 = vmatmul.msk.f32.gmra.mxu2 %vm279_vm2, %v4083_v57 }
 0x370   : > { %8271 = vmatmul.msk.f32.gmra.mxu0 %vm279_vm2, %v5039_v4  ;;  %v3497_v32 = vadd.f32 %v3451_v56, %v3361_v10  ;;  %v5498_v4 = vld [vmem:[#allocation2 + $0xb7] sm:$0xff] }
 0x371   : > { %v3929_v9 = vld [vmem:[#allocation4 + $0xb8] sm:$0xff] }
 0x372   : > { %3543 = vst.msk [vmem:[#allocation4 + $0xc0] sm:$0xff] %vm279_vm2, %v3497_v32  ;;  %v3975_v15 = vadd.f32 %v3929_v9, %v10628_v61  ;;  %v4316_v23 = vpop.f32.mrf.mxu2 }
 0x373   : > { %v4407_v58 = vld [vmem:[#allocation4 + $0xb0] sm:$0xff] }
 0x374   : > { %v4453_v59 = vadd.f32 %v4407_v58, %v4313_v7  ;;  %4021 = vst.msk [vmem:[#allocation4 + $0xb8] sm:$0xff] %vm279_vm2, %v3975_v15  ;;  %8087 = vmatmul.msk.f32.gmra.mxu3 %vm279_vm2, %v3127_v48  ;;  %v10896_v7 = vpop.f32.mrf.mxu0  ;;  %v3129_v15 = vld [vmem:[#allocation2 + $0x15a] sm:$0xff]  ;;  %v10904_v58 = vpop.f32.mrf.mxu1  ;;  %v5042_v48 = vld [vmem:[#allocation2 + $0x16e] sm:$0xff] }
 0x376   : > { %4499 = vst.msk [vmem:[#allocation4 + $0xb0] sm:$0xff] %vm279_vm2, %v4453_v59  ;;  %8297 = vmatmul.msk.f32.gmra.mxu1 %vm279_vm2, %v5497_v46 }
 0x377   : > { %v3364_v50 = vpop.f32.mrf.mxu3  ;;  %8180 = vmatmul.msk.f32.gmra.mxu2 %vm279_vm2, %v4084_v14  ;;  %v5499_v14 = vld [vmem:[#allocation2 + $0xbf] sm:$0xff] }
 0x378   : > { %8272 = vmatmul.msk.f32.gmra.mxu0 %vm279_vm2, %v5040_v18  ;;  %v3498_v61 = vadd.f32 %v3452_v53, %v3364_v50  ;;  %v4086_v18 = vld [vmem:[#allocation2 + $0x168] sm:$0xff]  ;;  %v3454_v50 = vld [vmem:[#allocation4 + $0xd8] sm:$0xff] }
 0x379   : > { %v3930_v20 = vld [vmem:[#allocation4 + $0xc0] sm:$0xff] }
 0x37a   : > { %3544 = vst.msk [vmem:[#allocation4 + $0xc8] sm:$0xff] %vm279_vm2, %v3498_v61  ;;  %v3976_v17 = vadd.f32 %v3930_v20, %v10638_v24  ;;  %v4319_v41 = vpop.f32.mrf.mxu2 }
 0x37b   : > { %v4408_v8 = vld [vmem:[#allocation4 + $0xb8] sm:$0xff] }
 0x37c   : > { %v4454_v0 = vadd.f32 %v4408_v8, %v4316_v23  ;;  %4022 = vst.msk [vmem:[#allocation4 + $0xc0] sm:$0xff] %vm279_vm2, %v3976_v17  ;;  %8088 = vmatmul.msk.f32.gmra.mxu3 %vm279_vm2, %v3128_v35  ;;  %v10909_v59 = vpop.f32.mrf.mxu0  ;;  %v3130_v8 = vld [vmem:[#allocation2 + $0x162] sm:$0xff]  ;;  %v10918_v35 = vpop.f32.mrf.mxu1 }
 0x37e   : > { %4500 = vst.msk [vmem:[#allocation4 + $0xb8] sm:$0xff] %vm279_vm2, %v4454_v0  ;;  %8298 = vmatmul.msk.f32.gmra.mxu1 %vm279_vm2, %v5498_v4  ;;  %v5043_v0 = vld [vmem:[#allocation2 + $0x176] sm:$0xff] }
 0x37f   : > { %v3367_v57 = vpop.f32.mrf.mxu3  ;;  %8181 = vmatmul.msk.f32.gmra.mxu2 %vm279_vm2, %v4085_v1  ;;  %v5500_v1 = vld [vmem:[#allocation2 + $0xc7] sm:$0xff] }
 0x380   : > { %8273 = vmatmul.msk.f32.gmra.mxu0 %vm279_vm2, %v5041_v33  ;;  %v3499_v24 = vadd.f32 %v3453_v19, %v3367_v57  ;;  %v4087_v33 = vld [vmem:[#allocation2 + $0x170] sm:$0xff]  ;;  %v3455_v57 = vld [vmem:[#allocation4 + $0xe0] sm:$0xff] }
 0x381   : > { %v3931_v10 = vld [vmem:[#allocation4 + $0xc8] sm:$0xff] }
 0x382   : > { %3545 = vst.msk [vmem:[#allocation4 + $0xd0] sm:$0xff] %vm279_vm2, %v3499_v24  ;;  %v3977_v56 = vadd.f32 %v3931_v10, %v10648_v52  ;;  %v4322_v9 = vpop.f32.mrf.mxu2 }
 0x383   : > { %v4409_v32 = vld [vmem:[#allocation4 + $0xc0] sm:$0xff] }
 0x384   : > { %v4455_v23 = vadd.f32 %v4409_v32, %v4319_v41  ;;  %4023 = vst.msk [vmem:[#allocation4 + $0xc8] sm:$0xff] %vm279_vm2, %v3977_v56  ;;  %8089 = vmatmul.msk.f32.gmra.mxu3 %vm279_vm2, %v3129_v15  ;;  %v10924_v19 = vpop.f32.mrf.mxu0 }
 0x386   : > { %4501 = vst.msk [vmem:[#allocation4 + $0xc0] sm:$0xff] %vm279_vm2, %v4455_v23  ;;  %8299 = vmatmul.msk.f32.gmra.mxu1 %vm279_vm2, %v5499_v14  ;;  %v5044_v23 = vld [vmem:[#allocation2 + $0x17e] sm:$0xff] }
 0x387   : > { %v3370_v46 = vpop.f32.mrf.mxu3  ;;  %8182 = vmatmul.msk.f32.gmra.mxu2 %vm279_vm2, %v4086_v18  ;;  %v5501_v18 = vld [vmem:[#allocation2 + $0xcf] sm:$0xff] }
 0x388   : > { %8274 = vmatmul.msk.f32.gmra.mxu0 %vm279_vm2, %v5042_v48  ;;  %v3500_v52 = vadd.f32 %v3454_v50, %v3370_v46  ;;  %v4088_v48 = vld [vmem:[#allocation2 + $0x178] sm:$0xff]  ;;  %v3456_v46 = vld [vmem:[#allocation4 + $0xe8] sm:$0xff]  ;;  %v10932_v50 = vpop.f32.mrf.mxu1 }
 0x389   : > { %v3932_v53 = vld [vmem:[#allocation4 + $0xd0] sm:$0xff] }
 0x38a   : > { %3546 = vst.msk [vmem:[#allocation4 + $0xd8] sm:$0xff] %vm279_vm2, %v3500_v52  ;;  %v3978_v61 = vadd.f32 %v3932_v53, %v10658_v6  ;;  %v4325_v17 = vpop.f32.mrf.mxu2 }
 0x38b   : > { %v4410_v20 = vld [vmem:[#allocation4 + $0xc8] sm:$0xff] }
 0x38c   : > { %v4456_v41 = vadd.f32 %v4410_v20, %v4322_v9  ;;  %4024 = vst.msk [vmem:[#allocation4 + $0xd0] sm:$0xff] %vm279_vm2, %v3978_v61  ;;  %8090 = vmatmul.msk.f32.gmra.mxu3 %vm279_vm2, %v3130_v8  ;;  %v3131_v9 = vld [vmem:[#allocation2 + $0x16a] sm:$0xff]  ;;  %v10938_v61 = vpop.f32.mrf.mxu0  ;;  %v4523_v8 = vld [vmem:[#allocation2 + $0x19] sm:$0xff] }
 0x38e   : > { %4502 = vst.msk [vmem:[#allocation4 + $0xc8] sm:$0xff] %vm279_vm2, %v4456_v41  ;;  %8300 = vmatmul.msk.f32.gmra.mxu1 %vm279_vm2, %v5500_v1  ;;  %v5502_v1 = vld [vmem:[#allocation2 + $0xd7] sm:$0xff] }
 0x38f   : > { %v3373_v4 = vpop.f32.mrf.mxu3  ;;  %8183 = vmatmul.msk.f32.gmra.mxu2 %vm279_vm2, %v4087_v33  ;;  %v4089_v33 = vld [vmem:[#allocation2 + $0x180] sm:$0xff] }
 0x390   : > { %8275 = vmatmul.msk.f32.gmra.mxu0 %vm279_vm2, %v5043_v0  ;;  %v3501_v6 = vadd.f32 %v3455_v57, %v3373_v4  ;;  %v5045_v0 = vld [vmem:[#allocation2 + $0x186] sm:$0xff] }
 0x391   : > { %v3933_v24 = vld [vmem:[#allocation4 + $0xd8] sm:$0xff]  ;;  %v3457_v57 = vld [vmem:[#allocation4 + $0xf0] sm:$0xff] }
 0x392   : > { %3547 = vst.msk [vmem:[#allocation4 + $0xe0] sm:$0xff] %vm279_vm2, %v3501_v6  ;;  %v3979_v10 = vadd.f32 %v3933_v24, %v10670_v30  ;;  %v4328_v32 = vpop.f32.mrf.mxu2  ;;  %v10946_v24 = vpop.f32.mrf.mxu1 }
 0x393   : > { %v4411_v56 = vld [vmem:[#allocation4 + $0xd0] sm:$0xff] }
 0x394   : > { %v4457_v15 = vadd.f32 %v4411_v56, %v4325_v17  ;;  %4025 = vst.msk [vmem:[#allocation4 + $0xd8] sm:$0xff] %vm279_vm2, %v3979_v10  ;;  %8091 = vmatmul.msk.f32.gmra.mxu3 %vm279_vm2, %v3131_v9  ;;  %v4524_v9 = vld [vmem:[#allocation2 + $0x21] sm:$0xff] }
 0x396   : > { %4503 = vst.msk [vmem:[#allocation4 + $0xd0] sm:$0xff] %vm279_vm2, %v4457_v15  ;;  %8301 = vmatmul.msk.f32.gmra.mxu1 %vm279_vm2, %v5501_v18  ;;  %v5503_v18 = vld [vmem:[#allocation2 + $0xdf] sm:$0xff] }
 0x397   : > { %v3376_v14 = vpop.f32.mrf.mxu3  ;;  %8184 = vmatmul.msk.f32.gmra.mxu2 %vm279_vm2, %v4088_v48  ;;  %v5046_v48 = vld [vmem:[#allocation2 + $0x18e] sm:$0xff] }
 0x398   : > { %8276 = vmatmul.msk.f32.gmra.mxu0 %vm279_vm2, %v5044_v23  ;;  %v3502_v30 = vadd.f32 %v3456_v46, %v3376_v14  ;;  %v10952_v23 = vpop.f32.mrf.mxu0  ;;  %v5960_v14 = vld [vmem:[#allocation2 + $0x30] sm:$0xff] }
 0x399   : > { %v3934_v52 = vld [vmem:[#allocation4 + $0xe0] sm:$0xff] }
 0x39a   : > { %3548 = vst.msk [vmem:[#allocation4 + $0xe8] sm:$0xff] %vm279_vm2, %v3502_v30  ;;  %v3980_v53 = vadd.f32 %v3934_v52, %v10680_v54  ;;  %v4331_v17 = vpop.f32.mrf.mxu2  ;;  %v3458_v30 = vld [vmem:[#allocation4 + $0xf8] sm:$0xff] }
 0x39b   : > { %v4412_v20 = vld [vmem:[#allocation4 + $0xd8] sm:$0xff] }
 0x39c   : > { %v4458_v41 = vadd.f32 %v4412_v20, %v4328_v32  ;;  %4026 = vst.msk [vmem:[#allocation4 + $0xe0] sm:$0xff] %vm279_vm2, %v3980_v53  ;;  %8187 = vmatmul.msk.f32.vlgmr.msrb.gmra.mxu3 %vm279_vm2, %v4523_v8  ;;  %v4525_v8 = vld [vmem:[#allocation2 + $0x29] sm:$0xff] }
 0x39e   : > { %4504 = vst.msk [vmem:[#allocation4 + $0xd8] sm:$0xff] %vm279_vm2, %v4458_v41  ;;  %8302 = vmatmul.msk.f32.gmra.mxu1 %vm279_vm2, %v5502_v1  ;;  %v10960_v41 = vpop.f32.mrf.mxu1 }
 0x39f   : > { %v3379_v4 = vpop.f32.mrf.mxu3  ;;  %8185 = vmatmul.msk.f32.gmra.mxu2 %vm279_vm2, %v4089_v33  ;;  %v5047_v33 = vld [vmem:[#allocation2 + $0x196] sm:$0xff] }
 0x3a0   : > { %8277 = vmatmul.msk.f32.gmra.mxu0 %vm279_vm2, %v5045_v0  ;;  %v3503_v54 = vadd.f32 %v3457_v57, %v3379_v4  ;;  %v10965_v1 = vpop.f32.mrf.mxu0  ;;  %v5504_v4 = vld [vmem:[#allocation2 + $0xe7] sm:$0xff]  ;;  %v5961_v57 = vld [vmem:[#allocation2 + $0x38] sm:$0xff] }
 0x3a1   : > { %v3935_v6 = vld [vmem:[#allocation4 + $0xe8] sm:$0xff] }
 0x3a2   : > { %3549 = vst.msk [vmem:[#allocation4 + $0xf0] sm:$0xff] %vm279_vm2, %v3503_v54  ;;  %v3981_v10 = vadd.f32 %v3935_v6, %v10692_v40  ;;  %v4334_v32 = vpop.f32.mrf.mxu2  ;;  %v3459_v6 = vld [vmem:[#allocation4 + $0x100] sm:$0xff] }
 0x3a3   : > { %v4413_v56 = vld [vmem:[#allocation4 + $0xe0] sm:$0xff] }
 0x3a4   : > { %v4459_v15 = vadd.f32 %v4413_v56, %v4331_v17  ;;  %4027 = vst.msk [vmem:[#allocation4 + $0xe8] sm:$0xff] %vm279_vm2, %v3981_v10  ;;  %8188 = vmatmul.msk.f32.gmra.mxu3 %vm279_vm2, %v4524_v9 }
 0x3a6   : > { %4505 = vst.msk [vmem:[#allocation4 + $0xe0] sm:$0xff] %vm279_vm2, %v4459_v15  ;;  %8303 = vmatmul.msk.f32.gmra.mxu1 %vm279_vm2, %v5503_v18  ;;  %v4526_v15 = vld [vmem:[#allocation2 + $0x31] sm:$0xff]  ;;  %v10974_v18 = vpop.f32.mrf.mxu1 }
 0x3a7   : > { %v3382_v46 = vpop.f32.mrf.mxu3  ;;  %8328 = vmatmul.msk.f32.vlgmr.msra.gmra.mxu2 %vm279_vm2, %v5960_v14  ;;  %v5505_v14 = vld [vmem:[#allocation2 + $0xef] sm:$0xff] }
 0x3a8   : > { %8278 = vmatmul.msk.f32.gmra.mxu0 %vm279_vm2, %v5046_v48  ;;  %v3504_v40 = vadd.f32 %v3458_v30, %v3382_v46  ;;  %v5962_v46 = vld [vmem:[#allocation2 + $0x40] sm:$0xff] }
 0x3a9   : > { %v3936_v52 = vld [vmem:[#allocation4 + $0xf0] sm:$0xff] }
 0x3aa   : > { %3550 = vst.msk [vmem:[#allocation4 + $0xf8] sm:$0xff] %vm279_vm2, %v3504_v40  ;;  %v3982_v53 = vadd.f32 %v3936_v52, %v10704_v51  ;;  %v4337_v17 = vpop.f32.mrf.mxu2  ;;  %v3460_v40 = vld [vmem:[#allocation4 + $0x108] sm:$0xff] }
 0x3ab   : > { %v4414_v20 = vld [vmem:[#allocation4 + $0xe8] sm:$0xff] }
 0x3ac   : > { %v4460_v0 = vadd.f32 %v4414_v20, %v4334_v32  ;;  %4028 = vst.msk [vmem:[#allocation4 + $0xf0] sm:$0xff] %vm279_vm2, %v3982_v53  ;;  %8189 = vmatmul.msk.f32.gmra.mxu3 %vm279_vm2, %v4525_v8  ;;  %v4527_v8 = vld [vmem:[#allocation2 + $0x39] sm:$0xff] }
 0x3ae   : > { %4506 = vst.msk [vmem:[#allocation4 + $0xe8] sm:$0xff] %vm279_vm2, %v4460_v0  ;;  %8304 = vmatmul.msk.f32.gmra.mxu1 %vm279_vm2, %v5504_v4  ;;  %v5963_v4 = vld [vmem:[#allocation2 + $0x48] sm:$0xff] }
 0x3af   : > { %v3385_v54 = vpop.f32.mrf.mxu3  ;;  %8329 = vmatmul.msk.f32.gmra.mxu2 %vm279_vm2, %v5961_v57 }
 0x3b0   : > { %8279 = vmatmul.msk.f32.gmra.mxu0 %vm279_vm2, %v5047_v33  ;;  %v3505_v51 = vadd.f32 %v3459_v6, %v3385_v54  ;;  %v5506_v33 = vld [vmem:[#allocation2 + $0xf7] sm:$0xff]  ;;  %v3461_v54 = vld [vmem:[#allocation4 + $0x110] sm:$0xff]  ;;  %v10984_v6 = vpop.f32.mrf.mxu1 }
 0x3b1   : > { %v3937_v10 = vld [vmem:[#allocation4 + $0xf8] sm:$0xff] }
 0x3b2   : > { %3551 = vst.msk [vmem:[#allocation4 + $0x100] sm:$0xff] %vm279_vm2, %v3505_v51  ;;  %v3983_v56 = vadd.f32 %v3937_v10, %v10716_v34  ;;  %v4340_v9 = vpop.f32.mrf.mxu2 }
 0x3b3   : > { %v4415_v32 = vld [vmem:[#allocation4 + $0xf0] sm:$0xff] }
 0x3b4   : > { %v4461_v48 = vadd.f32 %v4415_v32, %v4337_v17  ;;  %4029 = vst.msk [vmem:[#allocation4 + $0xf8] sm:$0xff] %vm279_vm2, %v3983_v56  ;;  %8190 = vmatmul.msk.f32.gmra.mxu3 %vm279_vm2, %v4526_v15 }
 0x3b6   : > { %4507 = vst.msk [vmem:[#allocation4 + $0xf0] sm:$0xff] %vm279_vm2, %v4461_v48  ;;  %8305 = vmatmul.msk.f32.gmra.mxu1 %vm279_vm2, %v5505_v14  ;;  %v5507_v48 = vld [vmem:[#allocation2 + $0xff] sm:$0xff]  ;;  %v5964_v14 = vld [vmem:[#allocation2 + $0x50] sm:$0xff] }
 0x3b7   : > { %v3388_v30 = vpop.f32.mrf.mxu3  ;;  %8330 = vmatmul.msk.f32.gmra.mxu2 %vm279_vm2, %v5962_v46 }
 0x3b8   : > { %v3506_v34 = vadd.f32 %v3460_v40, %v3388_v30  ;;  %v3462_v30 = vld [vmem:[#allocation4 + $0x118] sm:$0xff] }
 0x3b9   : > { %v3938_v52 = vld [vmem:[#allocation4 + $0x100] sm:$0xff] }
 0x3ba   : > { %3552 = vst.msk [vmem:[#allocation4 + $0x108] sm:$0xff] %vm279_vm2, %v3506_v34  ;;  %v3984_v53 = vadd.f32 %v3938_v52, %v10728_v3  ;;  %v4343_v17 = vpop.f32.mrf.mxu2  ;;  %v10995_v34 = vpop.f32.mrf.mxu1 }
 0x3bb   : > { %v4416_v20 = vld [vmem:[#allocation4 + $0xf8] sm:$0xff] }
 0x3bc   : > { %v4462_v0 = vadd.f32 %v4416_v20, %v4340_v9  ;;  %4030 = vst.msk [vmem:[#allocation4 + $0x100] sm:$0xff] %vm279_vm2, %v3984_v53  ;;  %8191 = vmatmul.msk.f32.gmra.mxu3 %vm279_vm2, %v4527_v8  ;;  %v4528_v9 = vld [vmem:[#allocation2 + $0x41] sm:$0xff] }
 0x3be   : > { %4508 = vst.msk [vmem:[#allocation4 + $0xf8] sm:$0xff] %vm279_vm2, %v4462_v0  ;;  %8306 = vmatmul.msk.f32.gmra.mxu1 %vm279_vm2, %v5506_v33  ;;  %v5508_v0 = vld [vmem:[#allocation2 + $0x107] sm:$0xff]  ;;  %v5965_v33 = vld [vmem:[#allocation2 + $0x58] sm:$0xff] }
 0x3bf   : > { %v3391_v57 = vpop.f32.mrf.mxu3  ;;  %8331 = vmatmul.msk.f32.gmra.mxu2 %vm279_vm2, %v5963_v4 }
 0x3c0   : > { %v3507_v3 = vadd.f32 %v3461_v54, %v3391_v57  ;;  %v3463_v57 = vld [vmem:[#allocation4 + $0x120] sm:$0xff] }
 0x3c1   : > { %v3939_v51 = vld [vmem:[#allocation4 + $0x108] sm:$0xff] }
 0x3c2   : > { %3553 = vst.msk [vmem:[#allocation4 + $0x110] sm:$0xff] %vm279_vm2, %v3507_v3  ;;  %v3985_v10 = vadd.f32 %v3939_v51, %v10738_v39  ;;  %v4346_v32 = vpop.f32.mrf.mxu2 }
 0x3c3   : > { %v4417_v56 = vld [vmem:[#allocation4 + $0x100] sm:$0xff] }
 0x3c4   : > { %v4463_v15 = vadd.f32 %v4417_v56, %v4343_v17  ;;  %4031 = vst.msk [vmem:[#allocation4 + $0x108] sm:$0xff] %vm279_vm2, %v3985_v10  ;;  %8192 = vmatmul.msk.f32.gmra.mxu3 %vm279_vm2, %v4528_v9  ;;  %v4529_v17 = vld [vmem:[#allocation2 + $0x49] sm:$0xff]  ;;  %v4530_v56 = vld [vmem:[#allocation2 + $0x51] sm:$0xff] }
 0x3c6   : > { %4509 = vst.msk [vmem:[#allocation4 + $0x100] sm:$0xff] %vm279_vm2, %v4463_v15  ;;  %8307 = vmatmul.msk.f32.gmra.mxu1 %vm279_vm2, %v5507_v48  ;;  %v5509_v15 = vld [vmem:[#allocation2 + $0x10f] sm:$0xff]  ;;  %v5966_v48 = vld [vmem:[#allocation2 + $0x60] sm:$0xff] }
 0x3c7   : > { %v3394_v46 = vpop.f32.mrf.mxu3  ;;  %8332 = vmatmul.msk.f32.gmra.mxu2 %vm279_vm2, %v5964_v14 }
 0x3c8   : > { %v3508_v40 = vadd.f32 %v3462_v30, %v3394_v46  ;;  %v3464_v46 = vld [vmem:[#allocation4 + $0x128] sm:$0xff] }
 0x3c9   : > { %v3940_v39 = vld [vmem:[#allocation4 + $0x110] sm:$0xff] }
 0x3ca   : > { %3554 = vst.msk [vmem:[#allocation4 + $0x118] sm:$0xff] %vm279_vm2, %v3508_v40  ;;  %v3986_v52 = vadd.f32 %v3940_v39, %v10751_v12  ;;  %v4349_v20 = vpop.f32.mrf.mxu2 }
 0x3cb   : > { %v4418_v53 = vld [vmem:[#allocation4 + $0x108] sm:$0xff] }
 0x3cc   : > { %v4464_v8 = vadd.f32 %v4418_v53, %v4346_v32  ;;  %4032 = vst.msk [vmem:[#allocation4 + $0x110] sm:$0xff] %vm279_vm2, %v3986_v52  ;;  %8193 = vmatmul.msk.f32.gmra.mxu3 %vm279_vm2, %v4529_v17  ;;  %v11006_v32 = vpop.f32.mrf.mxu1  ;;  %v4531_v53 = vld [vmem:[#allocation2 + $0x59] sm:$0xff] }
 0x3ce   : > { %4510 = vst.msk [vmem:[#allocation4 + $0x108] sm:$0xff] %vm279_vm2, %v4464_v8  ;;  %8308 = vmatmul.msk.f32.gmra.mxu1 %vm279_vm2, %v5508_v0  ;;  %v5510_v8 = vld [vmem:[#allocation2 + $0x117] sm:$0xff]  ;;  %v5967_v0 = vld [vmem:[#allocation2 + $0x68] sm:$0xff] }
 0x3cf   : > { %v3397_v4 = vpop.f32.mrf.mxu3  ;;  %8333 = vmatmul.msk.f32.gmra.mxu2 %vm279_vm2, %v5965_v33 }
 0x3d0   : > { %v3509_v54 = vadd.f32 %v3463_v57, %v3397_v4  ;;  %v3465_v4 = vld [vmem:[#allocation4 + $0x130] sm:$0xff] }
 0x3d1   : > { %v3941_v12 = vld [vmem:[#allocation4 + $0x118] sm:$0xff] }
 0x3d2   : > { %3555 = vst.msk [vmem:[#allocation4 + $0x120] sm:$0xff] %vm279_vm2, %v3509_v54  ;;  %v3987_v3 = vadd.f32 %v3941_v12, %v10764_v29  ;;  %v4352_v10 = vpop.f32.mrf.mxu2 }
 0x3d3   : > { %v4419_v51 = vld [vmem:[#allocation4 + $0x110] sm:$0xff] }
 0x3d4   : > { %v4465_v9 = vadd.f32 %v4419_v51, %v4349_v20  ;;  %4033 = vst.msk [vmem:[#allocation4 + $0x118] sm:$0xff] %vm279_vm2, %v3987_v3  ;;  %8194 = vmatmul.msk.f32.gmra.mxu3 %vm279_vm2, %v4530_v56  ;;  %v11017_v17 = vpop.f32.mrf.mxu1  ;;  %v4532_v51 = vld [vmem:[#allocation2 + $0x61] sm:$0xff] }
 0x3d5   : > { %v5511_v56 = vld [vmem:[#allocation2 + $0x11f] sm:$0xff] }
 0x3d6   : > { %4511 = vst.msk [vmem:[#allocation4 + $0x110] sm:$0xff] %vm279_vm2, %v4465_v9  ;;  %8309 = vmatmul.msk.f32.gmra.mxu1 %vm279_vm2, %v5509_v15  ;;  %v5968_v9 = vld [vmem:[#allocation2 + $0x70] sm:$0xff] }
 0x3d7   : > { %v3400_v14 = vpop.f32.mrf.mxu3  ;;  %8334 = vmatmul.msk.f32.gmra.mxu2 %vm279_vm2, %v5966_v48  ;;  %v3466_v48 = vld [vmem:[#allocation4 + $0x138] sm:$0xff] }
 0x3d8   : > { %v3510_v29 = vadd.f32 %v3464_v46, %v3400_v14 }
 0x3d9   : > { %v3942_v30 = vld [vmem:[#allocation4 + $0x120] sm:$0xff] }
 0x3da   : > { %3556 = vst.msk [vmem:[#allocation4 + $0x128] sm:$0xff] %vm279_vm2, %v3510_v29  ;;  %v3988_v40 = vadd.f32 %v3942_v30, %v10778_v62  ;;  %v4355_v52 = vpop.f32.mrf.mxu2 }
 0x3db   : > { %v4420_v39 = vld [vmem:[#allocation4 + $0x118] sm:$0xff] }
 0x3dc   : > { %v4466_v20 = vadd.f32 %v4420_v39, %v4352_v10  ;;  %4034 = vst.msk [vmem:[#allocation4 + $0x120] sm:$0xff] %vm279_vm2, %v3988_v40  ;;  %8195 = vmatmul.msk.f32.gmra.mxu3 %vm279_vm2, %v4531_v53  ;;  %v11027_v14 = vpop.f32.mrf.mxu1  ;;  %v4533_v39 = vld [vmem:[#allocation2 + $0x69] sm:$0xff] }
 0x3dd   : > { %v5512_v53 = vld [vmem:[#allocation2 + $0x127] sm:$0xff] }
 0x3de   : > { %4512 = vst.msk [vmem:[#allocation4 + $0x118] sm:$0xff] %vm279_vm2, %v4466_v20  ;;  %8310 = vmatmul.msk.f32.gmra.mxu1 %vm279_vm2, %v5510_v8  ;;  %v5969_v20 = vld [vmem:[#allocation2 + $0x78] sm:$0xff] }
 0x3df   : > { %v3403_v33 = vpop.f32.mrf.mxu3  ;;  %8335 = vmatmul.msk.f32.gmra.mxu2 %vm279_vm2, %v5967_v0  ;;  %v3467_v0 = vld [vmem:[#allocation4 + $0x140] sm:$0xff] }
 0x3e0   : > { %v3511_v62 = vadd.f32 %v3465_v4, %v3403_v33 }
 0x3e1   : > { %v3943_v57 = vld [vmem:[#allocation4 + $0x128] sm:$0xff] }
 0x3e2   : > { %3557 = vst.msk [vmem:[#allocation4 + $0x130] sm:$0xff] %vm279_vm2, %v3511_v62  ;;  %v3989_v54 = vadd.f32 %v3943_v57, %v10792_v60  ;;  %v4358_v3 = vpop.f32.mrf.mxu2 }
 0x3e3   : > { %v4421_v12 = vld [vmem:[#allocation4 + $0x120] sm:$0xff] }
 0x3e4   : > { %v4467_v10 = vadd.f32 %v4421_v12, %v4355_v52  ;;  %4035 = vst.msk [vmem:[#allocation4 + $0x128] sm:$0xff] %vm279_vm2, %v3989_v54  ;;  %8196 = vmatmul.msk.f32.gmra.mxu3 %vm279_vm2, %v4532_v51  ;;  %v11038_v4 = vpop.f32.mrf.mxu1  ;;  %v4534_v12 = vld [vmem:[#allocation2 + $0x71] sm:$0xff] }
 0x3e5   : > { %v5513_v51 = vld [vmem:[#allocation2 + $0x12f] sm:$0xff] }
 0x3e6   : > { %4513 = vst.msk [vmem:[#allocation4 + $0x120] sm:$0xff] %vm279_vm2, %v4467_v10  ;;  %8311 = vmatmul.msk.f32.gmra.mxu1 %vm279_vm2, %v5511_v56  ;;  %v5970_v10 = vld [vmem:[#allocation2 + $0x80] sm:$0xff] }
 0x3e7   : > { %v3406_v15 = vpop.f32.mrf.mxu3  ;;  %8336 = vmatmul.msk.f32.gmra.mxu2 %vm279_vm2, %v5968_v9  ;;  %v3468_v9 = vld [vmem:[#allocation4 + $0x148] sm:$0xff] }
 0x3e8   : > { %v3512_v60 = vadd.f32 %v3466_v48, %v3406_v15 }
 0x3e9   : > { %v3944_v46 = vld [vmem:[#allocation4 + $0x130] sm:$0xff] }
 0x3ea   : > { %3558 = vst.msk [vmem:[#allocation4 + $0x138] sm:$0xff] %vm279_vm2, %v3512_v60  ;;  %v3990_v29 = vadd.f32 %v3944_v46, %v10807_v43  ;;  %v4361_v40 = vpop.f32.mrf.mxu2 }
 0x3eb   : > { %v4422_v30 = vld [vmem:[#allocation4 + $0x128] sm:$0xff] }
 0x3ec   : > { %v4468_v52 = vadd.f32 %v4422_v30, %v4358_v3  ;;  %4036 = vst.msk [vmem:[#allocation4 + $0x130] sm:$0xff] %vm279_vm2, %v3990_v29  ;;  %8197 = vmatmul.msk.f32.gmra.mxu3 %vm279_vm2, %v4533_v39  ;;  %v4535_v29 = vld [vmem:[#allocation2 + $0x79] sm:$0xff]  ;;  %v11049_v30 = vpop.f32.mrf.mxu1 }
 0x3ed   : > { %v5514_v39 = vld [vmem:[#allocation2 + $0x137] sm:$0xff] }
 0x3ee   : > { %4514 = vst.msk [vmem:[#allocation4 + $0x128] sm:$0xff] %vm279_vm2, %v4468_v52  ;;  %8312 = vmatmul.msk.f32.gmra.mxu1 %vm279_vm2, %v5512_v53  ;;  %v5971_v52 = vld [vmem:[#allocation2 + $0x88] sm:$0xff] }
 0x3ef   : > { %v3409_v8 = vpop.f32.mrf.mxu3  ;;  %8337 = vmatmul.msk.f32.gmra.mxu2 %vm279_vm2, %v5969_v20  ;;  %v3469_v20 = vld [vmem:[#allocation4 + $0x150] sm:$0xff] }
 0x3f0   : > { %v3513_v33 = vadd.f32 %v3467_v0, %v3409_v8 }
 0x3f1   : > { %v3945_v43 = vld [vmem:[#allocation4 + $0x138] sm:$0xff] }
 0x3f2   : > { %3559 = vst.msk [vmem:[#allocation4 + $0x140] sm:$0xff] %vm279_vm2, %v3513_v33  ;;  %v3991_v62 = vadd.f32 %v3945_v43, %v10820_v45  ;;  %v4364_v54 = vpop.f32.mrf.mxu2 }
 0x3f3   : > { %v4423_v57 = vld [vmem:[#allocation4 + $0x130] sm:$0xff] }
 0x3f4   : > { %v4469_v3 = vadd.f32 %v4423_v57, %v4361_v40  ;;  %4037 = vst.msk [vmem:[#allocation4 + $0x138] sm:$0xff] %vm279_vm2, %v3991_v62  ;;  %8198 = vmatmul.msk.f32.gmra.mxu3 %vm279_vm2, %v4534_v12  ;;  %v4536_v62 = vld [vmem:[#allocation2 + $0x81] sm:$0xff] }
 0x3f5   : > { %v5515_v12 = vld [vmem:[#allocation2 + $0x13f] sm:$0xff] }
 0x3f6   : > { %4515 = vst.msk [vmem:[#allocation4 + $0x130] sm:$0xff] %vm279_vm2, %v4469_v3  ;;  %8313 = vmatmul.msk.f32.gmra.mxu1 %vm279_vm2, %v5513_v51  ;;  %v5972_v3 = vld [vmem:[#allocation2 + $0x90] sm:$0xff] }
 0x3f7   : > { %v3412_v56 = vpop.f32.mrf.mxu3  ;;  %8338 = vmatmul.msk.f32.gmra.mxu2 %vm279_vm2, %v5970_v10  ;;  %v3470_v10 = vld [vmem:[#allocation4 + $0x158] sm:$0xff] }
 0x3f8   : > { %v3514_v15 = vadd.f32 %v3468_v9, %v3412_v56 }
 0x3f9   : > { %v3946_v45 = vld [vmem:[#allocation4 + $0x140] sm:$0xff] }
 0x3fa   : > { %3560 = vst.msk [vmem:[#allocation4 + $0x148] sm:$0xff] %vm279_vm2, %v3514_v15  ;;  %v3992_v48 = vadd.f32 %v3946_v45, %v10834_v11  ;;  %v4367_v46 = vpop.f32.mrf.mxu2 }
 0x3fb   : > { %v4424_v60 = vld [vmem:[#allocation4 + $0x138] sm:$0xff] }
 0x3fc   : > { %v4470_v40 = vadd.f32 %v4424_v60, %v4364_v54  ;;  %4038 = vst.msk [vmem:[#allocation4 + $0x140] sm:$0xff] %vm279_vm2, %v3992_v48  ;;  %8199 = vmatmul.msk.f32.gmra.mxu3 %vm279_vm2, %v4535_v29  ;;  %v11060_v54 = vpop.f32.mrf.mxu1  ;;  %v4537_v48 = vld [vmem:[#allocation2 + $0x89] sm:$0xff]  ;;  %v5973_v29 = vld [vmem:[#allocation2 + $0x98] sm:$0xff] }
 0x3fe   : > { %4516 = vst.msk [vmem:[#allocation4 + $0x138] sm:$0xff] %vm279_vm2, %v4470_v40  ;;  %8314 = vmatmul.msk.f32.gmra.mxu1 %vm279_vm2, %v5514_v39  ;;  %v3471_v39 = vld [vmem:[#allocation4 + $0x160] sm:$0xff] }
 0x3ff   : > { %v3415_v53 = vpop.f32.mrf.mxu3  ;;  %8339 = vmatmul.msk.f32.gmra.mxu2 %vm279_vm2, %v5971_v52 }
 0x400   : > { %v3515_v11 = vadd.f32 %v3469_v20, %v3415_v53 }
 0x401   : > { %v3947_v8 = vld [vmem:[#allocation4 + $0x148] sm:$0xff] }
 0x402   : > { %3561 = vst.msk [vmem:[#allocation4 + $0x150] sm:$0xff] %vm279_vm2, %v3515_v11  ;;  %v3993_v0 = vadd.f32 %v3947_v8, %v10848_v42  ;;  %v4370_v43 = vpop.f32.mrf.mxu2 }
 0x403   : > { %v4425_v33 = vld [vmem:[#allocation4 + $0x140] sm:$0xff] }
 0x404   : > { %v4471_v57 = vadd.f32 %v4425_v33, %v4367_v46  ;;  %4039 = vst.msk [vmem:[#allocation4 + $0x148] sm:$0xff] %vm279_vm2, %v3993_v0  ;;  %8200 = vmatmul.msk.f32.gmra.mxu3 %vm279_vm2, %v4536_v62  ;;  %v5516_v46 = vld [vmem:[#allocation2 + $0x147] sm:$0xff]  ;;  %v11070_v52 = vpop.f32.mrf.mxu1  ;;  %v4538_v0 = vld [vmem:[#allocation2 + $0x91] sm:$0xff] }
 0x405   : > { %v5974_v62 = vld [vmem:[#allocation2 + $0xa0] sm:$0xff] }
 0x406   : > { %4517 = vst.msk [vmem:[#allocation4 + $0x140] sm:$0xff] %vm279_vm2, %v4471_v57  ;;  %8315 = vmatmul.msk.f32.gmra.mxu1 %vm279_vm2, %v5515_v12  ;;  %v3472_v12 = vld [vmem:[#allocation4 + $0x168] sm:$0xff] }
 0x407   : > { %v3418_v51 = vpop.f32.mrf.mxu3  ;;  %8340 = vmatmul.msk.f32.gmra.mxu2 %vm279_vm2, %v5972_v3 }
 0x408   : > { %v3516_v42 = vadd.f32 %v3470_v10, %v3418_v51 }
 0x409   : > { %v3948_v56 = vld [vmem:[#allocation4 + $0x150] sm:$0xff] }
 0x40a   : > { %3562 = vst.msk [vmem:[#allocation4 + $0x158] sm:$0xff] %vm279_vm2, %v3516_v42  ;;  %v3994_v9 = vadd.f32 %v3948_v56, %v10862_v44  ;;  %v4373_v45 = vpop.f32.mrf.mxu2 }
 0x40b   : > { %v4426_v15 = vld [vmem:[#allocation4 + $0x148] sm:$0xff] }
 0x40c   : > { %v4472_v60 = vadd.f32 %v4426_v15, %v4370_v43  ;;  %4040 = vst.msk [vmem:[#allocation4 + $0x150] sm:$0xff] %vm279_vm2, %v3994_v9  ;;  %8201 = vmatmul.msk.f32.gmra.mxu3 %vm279_vm2, %v4537_v48  ;;  %v5517_v43 = vld [vmem:[#allocation2 + $0x14f] sm:$0xff]  ;;  %v11081_v51 = vpop.f32.mrf.mxu1  ;;  %v4539_v9 = vld [vmem:[#allocation2 + $0x99] sm:$0xff] }
 0x40d   : > { %v5975_v48 = vld [vmem:[#allocation2 + $0xa8] sm:$0xff] }
 0x40e   : > { %4518 = vst.msk [vmem:[#allocation4 + $0x148] sm:$0xff] %vm279_vm2, %v4472_v60  ;;  %8316 = vmatmul.msk.f32.gmra.mxu1 %vm279_vm2, %v5516_v46  ;;  %v4864_v46 = vld [vmem:[#allocation4] sm:$0xff] }
 0x40f   : > { %v3421_v40 = vpop.f32.mrf.mxu3  ;;  %8341 = vmatmul.msk.f32.gmra.mxu2 %vm279_vm2, %v5973_v29 }
 0x410   : > { %v3517_v44 = vadd.f32 %v3471_v39, %v3421_v40 }
 0x411   : > { %v3949_v53 = vld [vmem:[#allocation4 + $0x158] sm:$0xff] }
 0x412   : > { %3563 = vst.msk [vmem:[#allocation4 + $0x160] sm:$0xff] %vm279_vm2, %v3517_v44  ;;  %v3995_v20 = vadd.f32 %v3949_v53, %v10876_v47  ;;  %v4376_v8 = vpop.f32.mrf.mxu2  ;;  %v4540_v53 = vld [vmem:[#allocation2 + $0xa1] sm:$0xff] }
 0x413   : > { %v4427_v11 = vld [vmem:[#allocation4 + $0x150] sm:$0xff] }
 0x414   : > { %v4473_v33 = vadd.f32 %v4427_v11, %v4373_v45  ;;  %4041 = vst.msk [vmem:[#allocation4 + $0x158] sm:$0xff] %vm279_vm2, %v3995_v20  ;;  %8202 = vmatmul.msk.f32.gmra.mxu3 %vm279_vm2, %v4538_v0  ;;  %v5518_v45 = vld [vmem:[#allocation2 + $0x157] sm:$0xff]  ;;  %v11092_v20 = vpop.f32.mrf.mxu1 }
 0x415   : > { %v5976_v0 = vld [vmem:[#allocation2 + $0xb0] sm:$0xff] }
 0x416   : > { %4519 = vst.msk [vmem:[#allocation4 + $0x150] sm:$0xff] %vm279_vm2, %v4473_v33  ;;  %8317 = vmatmul.msk.f32.gmra.mxu1 %vm279_vm2, %v5517_v43  ;;  %v4865_v43 = vld [vmem:[#allocation4 + $0x8] sm:$0xff] }
 0x417   : > { %v3424_v57 = vpop.f32.mrf.mxu3  ;;  %8342 = vmatmul.msk.f32.gmra.mxu2 %vm279_vm2, %v5974_v62 }
 0x418   : > { %v3518_v3 = vadd.f32 %v3472_v12, %v3424_v57 }
 0x419   : > { %v3950_v47 = vld [vmem:[#allocation4 + $0x160] sm:$0xff] }
 0x41a   : > { %3564 = vst.msk [vmem:[#allocation4 + $0x168] sm:$0xff] %vm279_vm2, %v3518_v3  ;;  %v3996_v10 = vadd.f32 %v3950_v47, %v10890_v26  ;;  %v4379_v56 = vpop.f32.mrf.mxu2  ;;  %v4541_v47 = vld [vmem:[#allocation2 + $0xa9] sm:$0xff] }
 0x41b   : > { %v4428_v42 = vld [vmem:[#allocation4 + $0x158] sm:$0xff] }
 0x41c   : > { %v4474_v15 = vadd.f32 %v4428_v42, %v4376_v8  ;;  %4042 = vst.msk [vmem:[#allocation4 + $0x160] sm:$0xff] %vm279_vm2, %v3996_v10  ;;  %8203 = vmatmul.msk.f32.gmra.mxu3 %vm279_vm2, %v4539_v9  ;;  %v5519_v8 = vld [vmem:[#allocation2 + $0x15f] sm:$0xff]  ;;  %v11103_v42 = vpop.f32.mrf.mxu1 }
 0x41d   : > { %v5977_v9 = vld [vmem:[#allocation2 + $0xb8] sm:$0xff] }
 0x41e   : > { %4520 = vst.msk [vmem:[#allocation4 + $0x158] sm:$0xff] %vm279_vm2, %v4474_v15  ;;  %8318 = vmatmul.msk.f32.gmra.mxu1 %vm279_vm2, %v5518_v45  ;;  %v4866_v45 = vld [vmem:[#allocation4 + $0x10] sm:$0xff] }
 0x41f   : > { %v4726_v60 = vpop.f32.mrf.mxu3  ;;  %8343 = vmatmul.msk.f32.gmra.mxu2 %vm279_vm2, %v5975_v48 }
 0x420   : > { %v4910_v29 = vadd.f32 %v4864_v46, %v4726_v60 }
 0x421   : > { %v3951_v26 = vld [vmem:[#allocation4 + $0x168] sm:$0xff] }
 0x422   : > { %v3997_v40 = vadd.f32 %v3951_v26, %v10904_v58  ;;  %4956 = vst.msk [vmem:[#allocation4] sm:$0xff] %vm279_vm2, %v4910_v29  ;;  %v4382_v44 = vpop.f32.mrf.mxu2  ;;  %v4542_v26 = vld [vmem:[#allocation2 + $0xb1] sm:$0xff] }
 0x423   : > { %v4429_v39 = vld [vmem:[#allocation4 + $0x160] sm:$0xff] }
 0x424   : > { %v4475_v11 = vadd.f32 %v4429_v39, %v4379_v56  ;;  %4043 = vst.msk [vmem:[#allocation4 + $0x168] sm:$0xff] %vm279_vm2, %v3997_v40  ;;  %8204 = vmatmul.msk.f32.gmra.mxu3 %vm279_vm2, %v4540_v53  ;;  %v5520_v56 = vld [vmem:[#allocation2 + $0x167] sm:$0xff]  ;;  %v5521_v39 = vld [vmem:[#allocation2 + $0x16f] sm:$0xff] }
 0x426   : > { %4521 = vst.msk [vmem:[#allocation4 + $0x160] sm:$0xff] %vm279_vm2, %v4475_v11  ;;  %8319 = vmatmul.msk.f32.gmra.mxu1 %vm279_vm2, %v5519_v8  ;;  %v4867_v11 = vld [vmem:[#allocation4 + $0x18] sm:$0xff]  ;;  %v11114_v8 = vpop.f32.mrf.mxu1 }
 0x427   : > { %v4729_v33 = vpop.f32.mrf.mxu3  ;;  %8344 = vmatmul.msk.f32.gmra.mxu2 %vm279_vm2, %v5976_v0 }
 0x428   : > { %v4911_v58 = vadd.f32 %v4865_v43, %v4729_v33 }
 0x429   : > { %v5343_v62 = vld [vmem:[#allocation4] sm:$0xff] }
 0x42a   : > { %v5389_v57 = vadd.f32 %v5343_v62, %v10668_v16  ;;  %4957 = vst.msk [vmem:[#allocation4 + $0x8] sm:$0xff] %vm279_vm2, %v4911_v58  ;;  %v6163_v3 = vpop.f32.mrf.mxu2  ;;  %v4543_v58 = vld [vmem:[#allocation2 + $0xb9] sm:$0xff] }
 0x42b   : > { %v4430_v12 = vld [vmem:[#allocation4 + $0x168] sm:$0xff] }
 0x42c   : > { %v4476_v10 = vadd.f32 %v4430_v12, %v4382_v44  ;;  %5435 = vst.msk [vmem:[#allocation4] sm:$0xff] %vm279_vm2, %v5389_v57  ;;  %8205 = vmatmul.msk.f32.gmra.mxu3 %vm279_vm2, %v4541_v47  ;;  %v5978_v44 = vld [vmem:[#allocation2 + $0xc0] sm:$0xff]  ;;  %v5522_v47 = vld [vmem:[#allocation2 + $0x177] sm:$0xff] }
 0x42e   : > { %4522 = vst.msk [vmem:[#allocation4 + $0x168] sm:$0xff] %vm279_vm2, %v4476_v10  ;;  %8320 = vmatmul.msk.f32.gmra.mxu1 %vm279_vm2, %v5520_v56  ;;  %v5979_v10 = vld [vmem:[#allocation2 + $0xc8] sm:$0xff] }
 0x42f   : > { %v4732_v15 = vpop.f32.mrf.mxu3  ;;  %8345 = vmatmul.msk.f32.gmra.mxu2 %vm279_vm2, %v5977_v9  ;;  %v4868_v9 = vld [vmem:[#allocation4 + $0x20] sm:$0xff] }
 0x430   : > { %v4912_v16 = vadd.f32 %v4866_v45, %v4732_v15  ;;  %v11127_v45 = vpop.f32.mrf.mxu1 }
 0x431   : > { %v5344_v48 = vld [vmem:[#allocation4 + $0x8] sm:$0xff] }
 0x432   : > { %v5390_v60 = vadd.f32 %v5344_v48, %v10683_v38  ;;  %4958 = vst.msk [vmem:[#allocation4 + $0x10] sm:$0xff] %vm279_vm2, %v4912_v16  ;;  %v6166_v29 = vpop.f32.mrf.mxu2  ;;  %v4544_v48 = vld [vmem:[#allocation2 + $0xc1] sm:$0xff] }
 0x433   : > { %v5822_v46 = vld [vmem:[#allocation4] sm:$0xff] }
 0x434   : > { %5436 = vst.msk [vmem:[#allocation4 + $0x8] sm:$0xff] %vm279_vm2, %v5390_v60  ;;  %v5868_v40 = vadd.f32 %v5822_v46, %v10918_v35  ;;  %8206 = vmatmul.msk.f32.gmra.mxu3 %vm279_vm2, %v4542_v26  ;;  %v11134_v60 = vld [vmem:[%s12488_s6] ss:$0 sm:$0xff] }
 0x436   : > { %5914 = vst.msk [vmem:[#allocation4] sm:$0xff] %vm279_vm2, %v5868_v40  ;;  %8321 = vmatmul.msk.f32.gmra.mxu1 %vm279_vm2, %v5521_v39 }
 0x437   : > { %v4735_v53 = vpop.f32.mrf.mxu3  ;;  %8346 = vmatmul.msk.f32.gmra.mxu2 %vm279_vm2, %v5978_v44  ;;  %v5523_v44 = vld [vmem:[#allocation2 + $0x17f] sm:$0xff] }
 0x438   : > { %v4913_v38 = vadd.f32 %v4867_v11, %v4735_v53  ;;  %v4869_v11 = vld [vmem:[#allocation4 + $0x28] sm:$0xff] }
 0x439   : > { %v5345_v0 = vld [vmem:[#allocation4 + $0x10] sm:$0xff] }
 0x43a   : > { %v5391_v33 = vadd.f32 %v5345_v0, %v10698_v13  ;;  %4959 = vst.msk [vmem:[#allocation4 + $0x18] sm:$0xff] %vm279_vm2, %v4913_v38  ;;  %v6169_v43 = vpop.f32.mrf.mxu2 }
 0x43b   : > { %v5823_v35 = vld [vmem:[#allocation4 + $0x8] sm:$0xff] }
 0x43c   : > { %5437 = vst.msk [vmem:[#allocation4 + $0x10] sm:$0xff] %vm279_vm2, %v5391_v33  ;;  %v5869_v62 = vadd.f32 %v5823_v35, %v10932_v50  ;;  %8207 = vmatmul.msk.f32.gmra.mxu3 %vm279_vm2, %v4543_v58 }
 0x43d   : > { %v6301_v57 = vld [vmem:[#allocation4] sm:$0xff] }
 0x43e   : > { %v6347_v12 = vadd.f32 %v6301_v57, %v6163_v3  ;;  %5915 = vst.msk [vmem:[#allocation4 + $0x8] sm:$0xff] %vm279_vm2, %v5869_v62  ;;  %8322 = vmatmul.msk.f32.gmra.mxu1 %vm279_vm2, %v5522_v47  ;;  %v4545_v62 = vld [vmem:[#allocation2 + $0xc9] sm:$0xff]  ;;  %v11151_v57 = vpop.f32.mrf.mxu1 }
 0x43f   : > { %v4738_v56 = vpop.f32.mrf.mxu3  ;;  %8347 = vmatmul.msk.f32.gmra.mxu2 %vm279_vm2, %v5979_v10 }
 0x440   : > { %6393 = vst.msk [vmem:[#allocation4] sm:$0xff] %vm279_vm2, %v6347_v12  ;;  %v4914_v13 = vadd.f32 %v4868_v9, %v4738_v56 }
 0x441   : > { %v5346_v15 = vld [vmem:[#allocation4 + $0x18] sm:$0xff] }
 0x442   : > { %v5392_v50 = vadd.f32 %v5346_v15, %v10712_v37  ;;  %4960 = vst.msk [vmem:[#allocation4 + $0x20] sm:$0xff] %vm279_vm2, %v4914_v13  ;;  %v6172_v16 = vpop.f32.mrf.mxu2  ;;  %v5980_v37 = vld [vmem:[#allocation2 + $0xd0] sm:$0xff]  ;;  %v5524_v13 = vld [vmem:[#allocation2 + $0x187] sm:$0xff] }
 0x443   : > { %v5824_v3 = vld [vmem:[#allocation4 + $0x10] sm:$0xff] }
 0x444   : > { %5438 = vst.msk [vmem:[#allocation4 + $0x18] sm:$0xff] %vm279_vm2, %v5392_v50  ;;  %v5870_v46 = vadd.f32 %v5824_v3, %v10946_v24  ;;  %8208 = vmatmul.msk.f32.gmra.mxu3 %vm279_vm2, %v4544_v48  ;;  %v4870_v50 = vld [vmem:[#allocation4 + $0x30] sm:$0xff] }
 0x445   : > { %v6302_v26 = vld [vmem:[#allocation4 + $0x8] sm:$0xff] }
 0x446   : > { %v6348_v40 = vadd.f32 %v6302_v26, %v6166_v29  ;;  %5916 = vst.msk [vmem:[#allocation4 + $0x10] sm:$0xff] %vm279_vm2, %v5870_v46  ;;  %8323 = vmatmul.msk.f32.gmra.mxu1 %vm279_vm2, %v5523_v44 }
 0x447   : > { %v6439_v39 = vld [vmem:[#allocation4] sm:$0xff]  ;;  %v4741_v53 = vpop.f32.mrf.mxu3  ;;  %8348 = vmatmul.msk.f32.gmra.mxu2 %vm279_vm2, %v5980_v37 }
 0x448   : > { %v11141_v38 = vadd.f32 %v11134_v60, %v6439_v39  ;;  %6394 = vst.msk [vmem:[#allocation4 + $0x8] sm:$0xff] %vm279_vm2, %v6348_v40  ;;  %v4915_v24 = vadd.f32 %v4869_v11, %v4741_v53  ;;  %v4546_v37 = vld [vmem:[#allocation2 + $0xd1] sm:$0xff] }
 0x449   : > { %v5347_v0 = vld [vmem:[#allocation4 + $0x20] sm:$0xff] }
 0x44a   : > { %v6535_v29 = vsub.f32 0.0, %v11141_v38  ;;  %v5393_v33 = vadd.f32 %v5347_v0, %v10726_v5  ;;  %4961 = vst.msk [vmem:[#allocation4 + $0x28] sm:$0xff] %vm279_vm2, %v4915_v24  ;;  %v11149_v58 = vpop.f32.mrf.mxu2  ;;  %v5981_v5 = vld [vmem:[#allocation2 + $0xd8] sm:$0xff]  ;;  %v11173_v0 = vpop.f32.mrf.mxu1 }
 0x44b   : > { %v5825_v35 = vld [vmem:[#allocation4 + $0x18] sm:$0xff] }
 0x44c   : > { %v6581_v12 = vmul.f32 1.442695, %v6535_v29  ;;  %5439 = vst.msk [vmem:[#allocation4 + $0x20] sm:$0xff] %vm279_vm2, %v5393_v33  ;;  %v5871_v47 = vadd.f32 %v5825_v35, %v10960_v41  ;;  %8209 = vmatmul.msk.f32.gmra.mxu3 %vm279_vm2, %v4545_v62  ;;  %v5982_v29 = vld [vmem:[#allocation2 + $0xe0] sm:$0xff]  ;;  %v5525_v35 = vld [vmem:[#allocation2 + $0x18f] sm:$0xff] }
 0x44d   : > { %v6303_v10 = vld [vmem:[#allocation4 + $0x10] sm:$0xff] }
 0x44e   : > { %8604 = vpow2.f32 %v6581_v12  ;;  %v6349_v56 = vadd.f32 %v6303_v10, %v6169_v43  ;;  %5917 = vst.msk [vmem:[#allocation4 + $0x18] sm:$0xff] %vm279_vm2, %v5871_v47  ;;  %8324 = vmatmul.msk.f32.gmra.mxu1 %vm279_vm2, %v5524_v13  ;;  %v4871_v12 = vld [vmem:[#allocation4 + $0x38] sm:$0xff]  ;;  %v4547_v13 = vld [vmem:[#allocation2 + $0xd9] sm:$0xff] }
 0x44f   : > { %v6440_v9 = vld [vmem:[#allocation4 + $0x8] sm:$0xff]  ;;  %v4744_v15 = vpop.f32.mrf.mxu3  ;;  %8349 = vmatmul.msk.f32.gmra.mxu2 %vm279_vm2, %v5981_v5 }
 0x450   : > { %v11158_v3 = vadd.f32 %v11134_v60, %v6440_v9  ;;  %6395 = vst.msk [vmem:[#allocation4 + $0x10] sm:$0xff] %vm279_vm2, %v6349_v56  ;;  %v4916_v41 = vadd.f32 %v4870_v50, %v4744_v15 }
 0x451   : > { %v5348_v48 = vld [vmem:[#allocation4 + $0x28] sm:$0xff] }
 0x452   : > { %v6536_v43 = vsub.f32 0.0, %v11158_v3  ;;  %v5394_v46 = vadd.f32 %v5348_v48, %v10741_v2  ;;  %4962 = vst.msk [vmem:[#allocation4 + $0x30] sm:$0xff] %vm279_vm2, %v4916_v41  ;;  %v11166_v40 = vpop.f32.mrf.mxu2 }
 0x453   : > { %v5826_v26 = vld [vmem:[#allocation4 + $0x20] sm:$0xff] }
 0x454   : > { %v8605_v39 = vpop.eup %8604  ;;  %v6583_v44 = vmul.f32 1.442695, %v6536_v43  ;;  %5440 = vst.msk [vmem:[#allocation4 + $0x28] sm:$0xff] %vm279_vm2, %v5394_v46  ;;  %v5872_v53 = vadd.f32 %v5826_v26, %v10974_v18  ;;  %8210 = vmatmul.msk.f32.gmra.mxu3 %vm279_vm2, %v4546_v37  ;;  %v5526_v37 = vld [vmem:[#allocation2 + $0x197] sm:$0xff] }
 0x455   : > { %v11171_v11 = vadd.f32 1.0, %v8605_v39  ;;  %v6304_v24 = vld [vmem:[#allocation4 + $0x18] sm:$0xff] }
 0x456   : > { %8606 = vpow2.f32 %v6583_v44  ;;  %v6350_v2 = vadd.f32 %v6304_v24, %v6172_v16  ;;  %5918 = vst.msk [vmem:[#allocation4 + $0x20] sm:$0xff] %vm279_vm2, %v5872_v53  ;;  %8325 = vmatmul.msk.f32.gmra.mxu1 %vm279_vm2, %v5525_v35  ;;  %v5983_v44 = vld [vmem:[#allocation2 + $0xe8] sm:$0xff]  ;;  %v11197_v24 = vpop.f32.mrf.mxu1 }
 0x457   : > { %8608 = vrcp.f32 %v11171_v11  ;;  %v6441_v33 = vld [vmem:[#allocation4 + $0x10] sm:$0xff]  ;;  %v4747_v62 = vpop.f32.mrf.mxu3  ;;  %8350 = vmatmul.msk.f32.gmra.mxu2 %vm279_vm2, %v5982_v29  ;;  %v6730_v35 = vand.u32 2147483648, %v11171_v11  ;;  %vm6724_vm5 = vweird.f32 %v11171_v11 }
 0x458   : > { %v11178_v18 = vadd.f32 %v11134_v60, %v6441_v33  ;;  %6396 = vst.msk [vmem:[#allocation4 + $0x18] sm:$0xff] %vm279_vm2, %v6350_v2  ;;  %v4917_v47 = vadd.f32 %v4871_v12, %v4747_v62  ;;  %v6728_v33 = vand.u32 2147483647, %v11171_v11 }
 0x459   : > { %v5349_v16 = vld [vmem:[#allocation4 + $0x30] sm:$0xff] }
 0x45a   : > { %v6537_v10 = vsub.f32 0.0, %v11178_v18  ;;  %v5395_v56 = vadd.f32 %v5349_v16, %v10756_v55  ;;  %4963 = vst.msk [vmem:[#allocation4 + $0x38] sm:$0xff] %vm279_vm2, %v4917_v47  ;;  %v11186_v9 = vpop.f32.mrf.mxu2  ;;  %vm6729_vm7 = vcmp.eq.f32.partialorder %v6728_v33, 8.507059e+37  ;;  %v7412_v33 = vpop.permute.xlu1 %7411 }
 0x45b   : > { %v5827_v5 = vld [vmem:[#allocation4 + $0x28] sm:$0xff] }
 0x45c   : > { %v8607_v15 = vpop.eup %8606  ;;  %v6585_v50 = vmul.f32 1.442695, %v6537_v10  ;;  %5441 = vst.msk [vmem:[#allocation4 + $0x30] sm:$0xff] %vm279_vm2, %v5395_v56  ;;  %v5873_v41 = vadd.f32 %v5827_v5, %v10984_v6  ;;  %8211 = vmatmul.msk.f32.gmra.mxu3 %vm279_vm2, %v4547_v13  ;;  %v4872_v6 = vld [vmem:[#allocation4 + $0x40] sm:$0xff]  ;;  %v4548_v5 = vld [vmem:[#allocation2 + $0xe1] sm:$0xff] }
 0x45d   : > { %v8609_v48 = vpop.eup %8608  ;;  %v11191_v43 = vadd.f32 1.0, %v8607_v15  ;;  %v6305_v46 = vld [vmem:[#allocation4 + $0x20] sm:$0xff] }
 0x45e   : > { %v6720_v55 = vmul.f32 %v8609_v48, %v11171_v11  ;;  %8610 = vpow2.f32 %v6585_v50  ;;  %v6351_v26 = vadd.f32 %v6305_v46, %v11149_v58  ;;  %5919 = vst.msk [vmem:[#allocation4 + $0x28] sm:$0xff] %vm279_vm2, %v5873_v41  ;;  %8326 = vmatmul.msk.f32.gmra.mxu1 %vm279_vm2, %v5526_v37  ;;  %vm6725_vm4 = vweird.f32 %v8609_v48 }
 0x45f   : > { %8612 = vrcp.f32 %v11191_v43  ;;  %v6442_v39 = vld [vmem:[#allocation4 + $0x18] sm:$0xff]  ;;  %v4750_v53 = vpop.f32.mrf.mxu3  ;;  %8351 = vmatmul.msk.f32.gmra.mxu2 %vm279_vm2, %v5983_v44  ;;  %vm6726_vm6 = vmor %vm6724_vm5, %vm6725_vm4  ;;  %vm6738_vm9 = vweird.f32 %v11191_v43 }
 0x460   : > { %v6721_v2 = vsub.f32 1.0, %v6720_v55  ;;  %v11200_v29 = vadd.f32 %v11134_v60, %v6442_v39  ;;  %6397 = vst.msk [vmem:[#allocation4 + $0x20] sm:$0xff] %vm279_vm2, %v6351_v26  ;;  %v4918_v58 = vadd.f32 %v4872_v6, %v4750_v53  ;;  %v5984_v44 = vld [vmem:[#allocation2 + $0xf0] sm:$0xff] }
 0x461   : > { %v5350_v62 = vld [vmem:[#allocation4 + $0x38] sm:$0xff] }
 0x462   : > { %v6722_v12 = vmul.f32 %v8609_v48, %v6721_v2  ;;  %v6538_v47 = vsub.f32 0.0, %v11200_v29  ;;  %v5396_v16 = vadd.f32 %v5350_v62, %v10770_v63  ;;  %4964 = vst.msk [vmem:[#allocation4 + $0x40] sm:$0xff] %vm279_vm2, %v4918_v58  ;;  %v11210_v56 = vpop.f32.mrf.mxu2  ;;  %v6731_v63 = vor.u32 1.1754944e-38, %v6730_v35 }
 0x463   : > { %v5828_v10 = vld [vmem:[#allocation4 + $0x30] sm:$0xff]  ;;  %v6742_v35 = vand.u32 2147483647, %v11191_v43  ;;  %v6744_v62 = vand.u32 2147483648, %v11191_v43 }
 0x464   : > { %v8611_v13 = vpop.eup %8610  ;;  %v6723_v15 = vadd.f32 %v8609_v48, %v6722_v12  ;;  %v6587_v50 = vmul.f32 1.442695, %v6538_v47  ;;  %5442 = vst.msk [vmem:[#allocation4 + $0x38] sm:$0xff] %vm279_vm2, %v5396_v16  ;;  %v5874_v41 = vadd.f32 %v5828_v10, %v10995_v34  ;;  %8212 = vmatmul.msk.f32.gmra.mxu3 %vm279_vm2, %v4548_v5 }
 0x465   : > { %v8613_v46 = vpop.eup %8612  ;;  %v11217_v55 = vadd.f32 1.0, %v8611_v13  ;;  %v6306_v11 = vld [vmem:[#allocation4 + $0x28] sm:$0xff]  ;;  %v7685_v13 = vld [vmem:[#allocation3] sm:$0xff]  ;;  %vm6743_vm10 = vcmp.eq.f32.partialorder %v6742_v35, 8.507059e+37 }
 0x466   : > { %v6727_v26 = vsel %vm6726_vm6, %v8609_v48, %v6723_v15  ;;  %v6734_v37 = vmul.f32 %v8613_v46, %v11191_v43  ;;  %8614 = vpow2.f32 %v6587_v50  ;;  %5920 = vst.msk [vmem:[#allocation4 + $0x30] sm:$0xff] %vm279_vm2, %v5874_v41  ;;  %v4873_v48 = vld [vmem:[#allocation4 + $0x48] sm:$0xff]  ;;  %v6352_v12 = vadd.f32 %v6306_v11, %v11166_v40  ;;  %v4549_v40 = vld [vmem:[#allocation2 + $0xe9] sm:$0xff] }
 0x467   : > { %v6732_v39 = vsel %vm6729_vm7, %v6731_v63, %v6727_v26  ;;  %8616 = vrcp.f32 %v11217_v55  ;;  %v6443_v34 = vld [vmem:[#allocation4 + $0x20] sm:$0xff]  ;;  %v4753_v53 = vpop.f32.mrf.mxu3  ;;  %8352 = vmatmul.msk.f32.gmra.mxu2 %vm279_vm2, %v5984_v44  ;;  %vm6739_vm8 = vweird.f32 %v8613_v46  ;;  %v6758_v35 = vand.u32 2147483648, %v11217_v55 }
 0x468   : > { %v7363_v6 = vmul.f32 %v6732_v39, %v11141_v38  ;;  %v6735_v2 = vsub.f32 1.0, %v6734_v37  ;;  %v11225_v58 = vadd.f32 %v11134_v60, %v6443_v34  ;;  %v4919_v16 = vadd.f32 %v4873_v48, %v4753_v53  ;;  %6398 = vst.msk [vmem:[#allocation4 + $0x28] sm:$0xff] %vm279_vm2, %v6352_v12  ;;  %vm6740_vm1 = vmor %vm6738_vm9, %vm6739_vm8  ;;  %v5985_v48 = vld [vmem:[#allocation2 + $0xf8] sm:$0xff] }
 0x469   : > { %v5351_v47 = vld [vmem:[#allocation4 + $0x40] sm:$0xff]  ;;  %v6745_v34 = vor.u32 1.1754944e-38, %v6744_v62  ;;  %vm6752_vm12 = vweird.f32 %v11217_v55 }
 0x46a   : > { %v7639_v10 = vmul.f32 %v7412_v33, %v7363_v6  ;;  %v6736_v5 = vmul.f32 %v8613_v46, %v6735_v2  ;;  %v6539_v38 = vsub.f32 0.0, %v11225_v58  ;;  %v5397_v15 = vadd.f32 %v5351_v47, %v10784_v28  ;;  %v11239_v41 = vpop.f32.mrf.mxu2  ;;  %4965 = vst.msk [vmem:[#allocation4 + $0x48] sm:$0xff] %vm279_vm2, %v4919_v16 }
 0x46b   : > { %v5829_v50 = vld [vmem:[#allocation4 + $0x38] sm:$0xff] }
 0x46c   : > { %v8615_v63 = vpop.eup %8614  ;;  %v7731_v26 = vadd.f32 %v7685_v13, %v7639_v10  ;;  %v6737_v37 = vadd.f32 %v8613_v46, %v6736_v5  ;;  %v6589_v11 = vmul.f32 1.442695, %v6539_v38  ;;  %8213 = vmatmul.msk.f32.gmra.mxu3 %vm279_vm2, %v4549_v40  ;;  %5443 = vst.msk [vmem:[#allocation4 + $0x40] sm:$0xff] %vm279_vm2, %v5397_v15  ;;  %v5875_v53 = vadd.f32 %v5829_v50, %v11006_v32  ;;  %v4874_v32 = vld [vmem:[#allocation4 + $0x50] sm:$0xff]  ;;  %v7686_v15 = vld [vmem:[#allocation3 + $0x8] sm:$0xff] }
 0x46d   : > { %v8617_v39 = vpop.eup %8616  ;;  %v11245_v28 = vadd.f32 1.0, %v8615_v63  ;;  %v6307_v44 = vld [vmem:[#allocation4 + $0x30] sm:$0xff]  ;;  %v6756_v38 = vand.u32 2147483647, %v11217_v55  ;;  %v4550_v40 = vld [vmem:[#allocation2 + $0xf1] sm:$0xff] }
 0x46e   : > { %7777 = vst.msk [vmem:[%s11235_s13] sm:$0xff] %vm279_vm2, %v7731_v26  ;;  %v6741_v6 = vsel %vm6740_vm1, %v8613_v46, %v6737_v37  ;;  %v6748_v43 = vmul.f32 %v8617_v39, %v11217_v55  ;;  %8618 = vpow2.f32 %v6589_v11  ;;  %v6353_v47 = vadd.f32 %v6307_v44, %v11186_v9  ;;  %v7417_v46 = vpop.permute.xlu2 %7416 }
 0x46f   : > { %v6746_v2 = vsel %vm6743_vm10, %v6745_v34, %v6741_v6  ;;  %8620 = vrcp.f32 %v11245_v28  ;;  %5921 = vst.msk [vmem:[#allocation4 + $0x38] sm:$0xff] %vm279_vm2, %v5875_v53  ;;  %v4756_v33 = vpop.f32.mrf.mxu3  ;;  %8353 = vmatmul.msk.f32.gmra.mxu2 %vm279_vm2, %v5985_v48  ;;  %vm6753_vm11 = vweird.f32 %v8617_v39  ;;  %v6444_v13 = vld [vmem:[#allocation4 + $0x28] sm:$0xff]  ;;  %v6759_v53 = vor.u32 1.1754944e-38, %v6758_v35 }
 0x470   : > { %v7364_v62 = vmul.f32 %v6746_v2, %v11158_v3  ;;  %v6749_v12 = vsub.f32 1.0, %v6748_v43  ;;  %v4920_v16 = vadd.f32 %v4874_v32, %v4756_v33  ;;  %6399 = vst.msk [vmem:[#allocation4 + $0x30] sm:$0xff] %vm279_vm2, %v6353_v47  ;;  %v11261_v3 = vadd.f32 %v11134_v60, %v6444_v13  ;;  %vm6754_vm13 = vmor %vm6752_vm12, %vm6753_vm11 }
 0x471   : > { %v5352_v9 = vld [vmem:[#allocation4 + $0x48] sm:$0xff]  ;;  %vm6757_vm15 = vcmp.eq.f32.partialorder %v6756_v38, 8.507059e+37  ;;  %v6770_v35 = vand.u32 2147483647, %v11245_v28  ;;  %vm6766_vm4 = vweird.f32 %v11245_v28  ;;  %vm7782_vm10 = vcmask 63488  }
 0x472   : > { %v7640_v10 = vmul.f32 %v7417_v46, %v7364_v62  ;;  %v6750_v5 = vmul.f32 %v8617_v39, %v6749_v12  ;;  %4966 = vst.msk [vmem:[#allocation4 + $0x50] sm:$0xff] %vm279_vm2, %v4920_v16  ;;  %v11264_v50 = vpop.f32.mrf.mxu2  ;;  %v5398_v11 = vadd.f32 %v5352_v9, %v10797_v25  ;;  %v6540_v43 = vsub.f32 0.0, %v11261_v3  ;;  %v5986_v62 = vld [vmem:[#allocation2 + $0x100] sm:$0xff]  ;;  %v7687_v9 = vld [vmem:[#allocation3 + $0x10] sm:$0xff] }
 0x473   : > { %v5830_v34 = vld [vmem:[#allocation4 + $0x40] sm:$0xff]  ;;  %v6772_v16 = vand.u32 2147483648, %v11245_v28  ;;  %vm6771_vm6 = vcmp.eq.f32.partialorder %v6770_v35, 8.507059e+37  ;;  %v7427_v35 = vpop.permute.xlu1 %7426 }
 0x474   : > { %v8619_v63 = vpop.eup %8618  ;;  %v7732_v26 = vadd.f32 %v7686_v15, %v7640_v10  ;;  %v6751_v37 = vadd.f32 %v8617_v39, %v6750_v5  ;;  %8214 = vmatmul.msk.f32.gmra.mxu3 %vm279_vm2, %v4550_v40  ;;  %v5876_v2 = vadd.f32 %v5830_v34, %v11017_v17  ;;  %5444 = vst.msk [vmem:[#allocation4 + $0x48] sm:$0xff] %vm279_vm2, %v5398_v11  ;;  %v6591_v46 = vmul.f32 1.442695, %v6540_v43  ;;  %v4875_v17 = vld [vmem:[#allocation4 + $0x58] sm:$0xff] }
 0x475   : > { %v8621_v44 = vpop.eup %8620  ;;  %v11270_v6 = vadd.f32 1.0, %v8619_v63 }
 0x476   : > { %7778 = vst.msk [vmem:[%s11235_s13 + $0x8] sm:$0xff] %vm279_vm2, %v7732_v26  ;;  %v6755_v48 = vsel %vm6754_vm13, %v8617_v39, %v6751_v37  ;;  %v6762_v55 = vmul.f32 %v8621_v44, %v11245_v28  ;;  %v6308_v25 = vld [vmem:[#allocation4 + $0x38] sm:$0xff]  ;;  %v7422_v39 = vpop.permute.xlu0 %7421  ;;  %vm6767_vm0 = vweird.f32 %v8621_v44  ;;  %v4551_v37 = vld [vmem:[#allocation2 + $0xf9] sm:$0xff] }
 0x477   : > { %v6760_v33 = vsel %vm6757_vm15, %v6759_v53, %v6755_v48  ;;  %8622 = vrcp.f32 %v11270_v6  ;;  %v4759_v12 = vpop.f32.mrf.mxu3  ;;  %5922 = vst.msk [vmem:[#allocation4 + $0x40] sm:$0xff] %vm279_vm2, %v5876_v2  ;;  %8354 = vmatmul.msk.f32.gmra.mxu2 %vm279_vm2, %v5986_v62  ;;  %v6445_v10 = vld [vmem:[#allocation4 + $0x30] sm:$0xff]  ;;  %v6354_v5 = vadd.f32 %v6308_v25, %v11210_v56  ;;  %vm6768_vm5 = vmor %vm6766_vm4, %vm6767_vm0  ;;  %v6773_v53 = vor.u32 1.1754944e-38, %v6772_v16 }
 0x478   : > { %v7365_v47 = vmul.f32 %v6760_v33, %v11178_v18  ;;  %v6763_v32 = vsub.f32 1.0, %v6762_v55  ;;  %v4921_v38 = vadd.f32 %v4875_v17, %v4759_v12  ;;  %8624 = vpow2.f32 %v6591_v46  ;;  %v5987_v62 = vld [vmem:[#allocation2 + $0x108] sm:$0xff] }
 0x479   : > { %v5353_v18 = vld [vmem:[#allocation4 + $0x50] sm:$0xff]  ;;  %v11286_v40 = vadd.f32 %v11134_v60, %v6445_v10  ;;  %6400 = vst.msk [vmem:[#allocation4 + $0x38] sm:$0xff] %vm279_vm2, %v6354_v5  ;;  %v6786_v16 = vand.u32 2147483648, %v11270_v6  ;;  %vm6780_vm8 = vweird.f32 %v11270_v6  ;;  %vm7784_vm4 = vcmask 64518  }
 0x47a   : > { %v7641_v13 = vmul.f32 %v7422_v39, %v7365_v47  ;;  %v6764_v15 = vmul.f32 %v8621_v44, %v6763_v32  ;;  %v5399_v63 = vadd.f32 %v5353_v18, %v10812_v22  ;;  %v11290_v26 = vpop.f32.mrf.mxu2  ;;  %4967 = vst.msk [vmem:[#allocation4 + $0x58] sm:$0xff] %vm279_vm2, %v4921_v38  ;;  %v4876_v47 = vld [vmem:[#allocation4 + $0x60] sm:$0xff]  ;;  %v6784_v38 = vand.u32 2147483647, %v11270_v6  ;;  %v4552_v18 = vld [vmem:[#allocation2 + $0x101] sm:$0xff] }
 0x47b   : > { %v6541_v43 = vsub.f32 0.0, %v11286_v40  ;;  %v5831_v48 = vld [vmem:[#allocation4 + $0x48] sm:$0xff] }
 0x47c   : > { %v7733_v56 = vadd.f32 %v7687_v9, %v7641_v13  ;;  %v6765_v11 = vadd.f32 %v8621_v44, %v6764_v15  ;;  %8215 = vmatmul.msk.f32.gmra.mxu3 %vm279_vm2, %v4551_v37  ;;  %5445 = vst.msk [vmem:[#allocation4 + $0x50] sm:$0xff] %vm279_vm2, %v5399_v63  ;;  %v5877_v33 = vadd.f32 %v5831_v48, %v11027_v14  ;;  %vm6785_vm1 = vcmp.eq.f32.partialorder %v6784_v38, 8.507059e+37 }
 0x47d   : > { %v8623_v34 = vpop.eup %8622  ;;  %v6593_v55 = vmul.f32 1.442695, %v6541_v43 }
 0x47e   : > { %7780 = vst.msk [vmem:[%s11235_s13 + $0x9] sm:$0x80] %vm7779_vm3, %v7733_v56  ;;  %v6769_v22 = vsel %vm6768_vm5, %v8621_v44, %v6765_v11  ;;  %v6776_v2 = vmul.f32 %v8623_v34, %v11270_v6  ;;  %v6309_v25 = vld [vmem:[#allocation4 + $0x40] sm:$0xff]  ;;  %v8625_v32 = vpop.eup %8624  ;;  %vm6781_vm7 = vweird.f32 %v8623_v34  ;;  %v6787_v6 = vor.u32 1.1754944e-38, %v6786_v16  ;;  %v4553_v16 = vld [vmem:[#allocation2 + $0x109] sm:$0xff] }
 0x47f   : > { %v6774_v28 = vsel %vm6771_vm6, %v6773_v53, %v6769_v22  ;;  %v4762_v12 = vpop.f32.mrf.mxu3  ;;  %v6355_v39 = vadd.f32 %v6309_v25, %v11239_v41  ;;  %8355 = vmatmul.msk.f32.gmra.mxu2 %vm279_vm2, %v5987_v62  ;;  %v11306_v10 = vadd.f32 1.0, %v8625_v32  ;;  %8626 = vpow2.f32 %v6593_v55  ;;  %5923 = vst.msk [vmem:[#allocation4 + $0x48] sm:$0xff] %vm279_vm2, %v5877_v33  ;;  %v7688_v41 = vld [vmem:[#allocation3 + $0x18] sm:$0xff]  ;;  %vm6782_vm9 = vmor %vm6780_vm8, %vm6781_vm7 }
 0x480   : > { %v7366_v46 = vmul.f32 %v6774_v28, %v11200_v29  ;;  %v6777_v17 = vsub.f32 1.0, %v6776_v2  ;;  %v4922_v44 = vadd.f32 %v4876_v47, %v4762_v12  ;;  %v6446_v29 = vld [vmem:[#allocation4 + $0x38] sm:$0xff]  ;;  %v4877_v55 = vld [vmem:[#allocation4 + $0x68] sm:$0xff]  ;;  %v7432_v47 = vpop.permute.xlu2 %7431 }
 0x481   : > { %6401 = vst.msk [vmem:[#allocation4 + $0x40] sm:$0xff] %vm279_vm2, %v6355_v39  ;;  %8628 = vrcp.f32 %v11306_v10  ;;  %v5354_v13 = vld [vmem:[#allocation4 + $0x58] sm:$0xff]  ;;  %v11317_v37 = vadd.f32 %v11134_v60, %v6446_v29  ;;  %v6798_v29 = vand.u32 2147483647, %v11306_v10  ;;  %vm6794_vm12 = vweird.f32 %v11306_v10 }
 0x482   : > { %v7642_v14 = vmul.f32 %v7427_v35, %v7366_v46  ;;  %v6778_v5 = vmul.f32 %v8623_v34, %v6777_v17  ;;  %4968 = vst.msk [vmem:[#allocation4 + $0x60] sm:$0xff] %vm279_vm2, %v4922_v44  ;;  %v11314_v15 = vpop.f32.mrf.mxu2  ;;  %v5400_v56 = vadd.f32 %v5354_v13, %v10826_v21  ;;  %v5988_v28 = vld [vmem:[#allocation2 + $0x110] sm:$0xff]  ;;  %v7689_v44 = vld [vmem:[#allocation3 + $0x20] sm:$0xff] }
 0x483   : > { %v5832_v11 = vld [vmem:[#allocation4 + $0x50] sm:$0xff]  ;;  %v6542_v22 = vsub.f32 0.0, %v11317_v37  ;;  %vm6799_vm15 = vcmp.eq.f32.partialorder %v6798_v29, 8.507059e+37 }
 0x484   : > { %v7734_v9 = vadd.f32 %v7688_v41, %v7642_v14  ;;  %v6779_v63 = vadd.f32 %v8623_v34, %v6778_v5  ;;  %8216 = vmatmul.msk.f32.gmra.mxu3 %vm279_vm2, %v4552_v18  ;;  %v5878_v53 = vadd.f32 %v5832_v11, %v11038_v4  ;;  %5446 = vst.msk [vmem:[#allocation4 + $0x58] sm:$0xff] %vm279_vm2, %v5400_v56  ;;  %v6800_v41 = vand.u32 2147483648, %v11306_v10  ;;  %v5989_v11 = vld [vmem:[#allocation2 + $0x118] sm:$0xff] }
 0x485   : > { %v8627_v2 = vpop.eup %8626  ;;  %v6595_v62 = vmul.f32 1.442695, %v6542_v22 }
 0x486   : > { %7781 = vst.msk [vmem:[%s11235_s13 + $0x11] sm:$0xff] %vm279_vm2, %v7734_v9  ;;  %v6783_v43 = vsel %vm6782_vm9, %v8623_v34, %v6779_v63  ;;  %v11328_v33 = vadd.f32 1.0, %v8627_v2  ;;  %v6310_v12 = vld [vmem:[#allocation4 + $0x48] sm:$0xff]  ;;  %v4878_v2 = vld [vmem:[#allocation4 + $0x70] sm:$0xff] }
 0x487   : > { %v6788_v48 = vsel %vm6785_vm1, %v6787_v6, %v6783_v43  ;;  %v4765_v21 = vpop.f32.mrf.mxu3  ;;  %5924 = vst.msk [vmem:[#allocation4 + $0x50] sm:$0xff] %vm279_vm2, %v5878_v53  ;;  %8356 = vmatmul.msk.f32.gmra.mxu2 %vm279_vm2, %v5988_v28  ;;  %v8629_v34 = vpop.eup %8628  ;;  %v6356_v46 = vadd.f32 %v6310_v12, %v11264_v50  ;;  %v6801_v28 = vor.u32 1.1754944e-38, %v6800_v41  ;;  %v5990_v41 = vld [vmem:[#allocation2 + $0x120] sm:$0xff] }
 0x488   : > { %v7367_v25 = vmul.f32 %v6788_v48, %v11225_v58  ;;  %v4923_v4 = vadd.f32 %v4877_v55, %v4765_v21  ;;  %v6447_v32 = vld [vmem:[#allocation4 + $0x40] sm:$0xff]  ;;  %v6790_v39 = vmul.f32 %v8629_v34, %v11306_v10  ;;  %8630 = vrcp.f32 %v11328_v33 }
 0x489   : > { %v5355_v58 = vld [vmem:[#allocation4 + $0x60] sm:$0xff]  ;;  %8632 = vpow2.f32 %v6595_v62  ;;  %6402 = vst.msk [vmem:[#allocation4 + $0x48] sm:$0xff] %vm279_vm2, %v6356_v46  ;;  %v11340_v50 = vadd.f32 %v11134_v60, %v6447_v32  ;;  %vm6795_vm11 = vweird.f32 %v8629_v34  ;;  %vm6808_vm5 = vweird.f32 %v11328_v33 }
 0x48a   : > { %v7643_v17 = vmul.f32 %v7432_v47, %v7367_v25  ;;  %4969 = vst.msk [vmem:[#allocation4 + $0x68] sm:$0xff] %vm279_vm2, %v4923_v4  ;;  %v11337_v35 = vpop.f32.mrf.mxu2  ;;  %v6791_v5 = vsub.f32 1.0, %v6790_v39  ;;  %v5401_v38 = vadd.f32 %v5355_v58, %v10840_v49  ;;  %vm6796_vm13 = vmor %vm6794_vm12, %vm6795_vm11  ;;  %v4554_v46 = vld [vmem:[#allocation2 + $0x111] sm:$0xff]  ;;  %v6814_v39 = vand.u32 2147483648, %v11328_v33 }
 0x48b   : > { %v6543_v18 = vsub.f32 0.0, %v11340_v50  ;;  %v5833_v9 = vld [vmem:[#allocation4 + $0x58] sm:$0xff] }
 0x48c   : > { %v7735_v14 = vadd.f32 %v7689_v44, %v7643_v17  ;;  %8217 = vmatmul.msk.f32.gmra.mxu3 %vm279_vm2, %v4553_v16  ;;  %v6792_v13 = vmul.f32 %v8629_v34, %v6791_v5  ;;  %5447 = vst.msk [vmem:[#allocation4 + $0x60] sm:$0xff] %vm279_vm2, %v5401_v38  ;;  %v5879_v56 = vadd.f32 %v5833_v9, %v11049_v30  ;;  %v6812_v17 = vand.u32 2147483647, %v11328_v33 }
 0x48d   : > { %v6597_v43 = vmul.f32 1.442695, %v6543_v18  ;;  %v4879_v18 = vld [vmem:[#allocation4 + $0x78] sm:$0xff] }
 0x48e   : > { %7783 = vst.msk [vmem:[%s11235_s13 + $0x19] sm:$0x7f] %vm7782_vm10, %v7735_v14  ;;  %v6311_v63 = vld [vmem:[#allocation4 + $0x50] sm:$0xff]  ;;  %v11351_v6 = vpop.eup %8630  ;;  %v6793_v53 = vadd.f32 %v8629_v34, %v6792_v13  ;;  %v7690_v14 = vld [vmem:[#allocation3 + $0x28] sm:$0xff]  ;;  %vm6813_vm7 = vcmp.eq.f32.partialorder %v6812_v17, 8.507059e+37 }
 0x48f   : > { %v4768_v49 = vpop.f32.mrf.mxu3  ;;  %v6357_v22 = vadd.f32 %v6311_v63, %v11290_v26  ;;  %8357 = vmatmul.msk.f32.gmra.mxu2 %vm279_vm2, %v5989_v11  ;;  %v8633_v48 = vpop.eup %8632  ;;  %v6804_v30 = vmul.f32 %v11351_v6, %v11328_v33  ;;  %5925 = vst.msk [vmem:[#allocation4 + $0x58] sm:$0xff] %vm279_vm2, %v5879_v56  ;;  %8634 = vpow2.f32 %v6597_v43  ;;  %vm6809_vm0 = vweird.f32 %v11351_v6 }
 0x490   : > { %v4924_v55 = vadd.f32 %v4878_v2, %v4768_v49  ;;  %v6797_v25 = vsel %vm6796_vm13, %v8629_v34, %v6793_v53  ;;  %v11360_v10 = vadd.f32 1.0, %v8633_v48  ;;  %v6448_v26 = vld [vmem:[#allocation4 + $0x48] sm:$0xff]  ;;  %vm6810_vm6 = vmor %vm6808_vm5, %vm6809_vm0  ;;  %v6815_v56 = vor.u32 1.1754944e-38, %v6814_v39 }
 0x491   : > { %v5356_v21 = vld [vmem:[#allocation4 + $0x68] sm:$0xff]  ;;  %6403 = vst.msk [vmem:[#allocation4 + $0x50] sm:$0xff] %vm279_vm2, %v6357_v22  ;;  %v6802_v12 = vsel %vm6799_vm15, %v6801_v28, %v6797_v25  ;;  %v6805_v4 = vsub.f32 1.0, %v6804_v30  ;;  %v11365_v47 = vadd.f32 %v11134_v60, %v6448_v26  ;;  %v7442_v25 = vpop.permute.xlu1 %7441 }
 0x492   : > { %v5402_v62 = vadd.f32 %v5356_v21, %v10853_v36  ;;  %4970 = vst.msk [vmem:[#allocation4 + $0x70] sm:$0xff] %vm279_vm2, %v4924_v55  ;;  %v11368_v32 = vpop.f32.mrf.mxu2  ;;  %v7368_v34 = vmul.f32 %v6802_v12, %v11261_v3  ;;  %8636 = vrcp.f32 %v11360_v10  ;;  %v7437_v36 = vpop.permute.xlu0 %7436  ;;  %v4555_v55 = vld [vmem:[#allocation2 + $0x119] sm:$0xff]  ;;  %vm6822_vm9 = vweird.f32 %v11360_v10 }
 0x493   : > { %v6806_v58 = vmul.f32 %v11351_v6, %v6805_v4  ;;  %v6544_v44 = vsub.f32 0.0, %v11365_v47  ;;  %v5834_v3 = vld [vmem:[#allocation4 + $0x60] sm:$0xff] }
 0x494   : > { %5448 = vst.msk [vmem:[#allocation4 + $0x68] sm:$0xff] %vm279_vm2, %v5402_v62  ;;  %8218 = vmatmul.msk.f32.gmra.mxu3 %vm279_vm2, %v4554_v46  ;;  %v7644_v16 = vmul.f32 %v7437_v36, %v7368_v34  ;;  %v5880_v29 = vadd.f32 %v5834_v3, %v11060_v54  ;;  %v7691_v46 = vld [vmem:[#allocation3 + $0x30] sm:$0xff]  ;;  %v6828_v34 = vand.u32 2147483648, %v11360_v10 }
 0x495   : > { %v6807_v5 = vadd.f32 %v11351_v6, %v6806_v58  ;;  %v6599_v38 = vmul.f32 1.442695, %v6544_v44  ;;  %v8635_v9 = vpop.eup %8634  ;;  %v6826_v44 = vand.u32 2147483647, %v11360_v10 }
 0x496   : > { %v7736_v63 = vadd.f32 %v7690_v14, %v7644_v16  ;;  %v6312_v11 = vld [vmem:[#allocation4 + $0x58] sm:$0xff]  ;;  %v11386_v53 = vadd.f32 1.0, %v8635_v9  ;;  %5926 = vst.msk [vmem:[#allocation4 + $0x60] sm:$0xff] %vm279_vm2, %v5880_v29  ;;  %v5991_v16 = vld [vmem:[#allocation2 + $0x128] sm:$0xff]  ;;  %v4880_v14 = vld [vmem:[#allocation4 + $0x80] sm:$0xff] }
 0x497   : > { %v4771_v13 = vpop.f32.mrf.mxu3  ;;  %8358 = vmatmul.msk.f32.gmra.mxu2 %vm279_vm2, %v5990_v41  ;;  %v6811_v33 = vsel %vm6810_vm6, %v11351_v6, %v6807_v5  ;;  %8638 = vpow2.f32 %v6599_v38  ;;  %v6358_v43 = vadd.f32 %v6312_v11, %v11314_v15  ;;  %vm6827_vm11 = vcmp.eq.f32.partialorder %v6826_v44, 8.507059e+37 }
 0x498   : > { %v4925_v49 = vadd.f32 %v4879_v18, %v4771_v13  ;;  %v6449_v54 = vld [vmem:[#allocation4 + $0x50] sm:$0xff]  ;;  %v8637_v22 = vpop.eup %8636  ;;  %7785 = vst.msk [vmem:[%s11235_s13 + $0x1a] sm:$0xc0] %vm7784_vm4, %v7736_v63  ;;  %v6816_v2 = vsel %vm6813_vm7, %v6815_v56, %v6811_v33  ;;  %8640 = vrcp.f32 %v11386_v53  ;;  %v6829_v13 = vor.u32 1.1754944e-38, %v6828_v34 }
 0x499   : > { %v11393_v48 = vadd.f32 %v11134_v60, %v6449_v54  ;;  %v5357_v28 = vld [vmem:[#allocation4 + $0x70] sm:$0xff]  ;;  %v7369_v30 = vmul.f32 %v6816_v2, %v11286_v40  ;;  %v6818_v6 = vmul.f32 %v8637_v22, %v11360_v10  ;;  %6404 = vst.msk [vmem:[#allocation4 + $0x58] sm:$0xff] %vm279_vm2, %v6358_v43  ;;  %vm6823_vm8 = vweird.f32 %v8637_v22 }
 0x49a   : > { %v11399_v15 = vpop.f32.mrf.mxu2  ;;  %4971 = vst.msk [vmem:[#allocation4 + $0x78] sm:$0xff] %vm279_vm2, %v4925_v49  ;;  %v5403_v40 = vadd.f32 %v5357_v28, %v10868_v27  ;;  %vm6824_vm1 = vmor %vm6822_vm9, %vm6823_vm8  ;;  %v7447_v28 = vpop.permute.xlu2 %7446  ;;  %vm6836_vm13 = vweird.f32 %v11386_v53  ;;  %vm7788_vm6 = vcmask 64517  }
 0x49b   : > { %v5835_v21 = vld [vmem:[#allocation4 + $0x68] sm:$0xff]  ;;  %v6545_v26 = vsub.f32 0.0, %v11393_v48  ;;  %v7645_v62 = vmul.f32 %v7442_v25, %v7369_v30  ;;  %v6819_v12 = vsub.f32 1.0, %v6818_v6  ;;  %v6840_v6 = vand.u32 2147483647, %v11386_v53 }
 0x49c   : > { %8219 = vmatmul.msk.f32.gmra.mxu3 %vm279_vm2, %v4555_v55  ;;  %v5881_v4 = vadd.f32 %v5835_v21, %v11070_v52  ;;  %5449 = vst.msk [vmem:[#allocation4 + $0x70] sm:$0xff] %vm279_vm2, %v5403_v40  ;;  %v4881_v40 = vld [vmem:[#allocation4 + $0x88] sm:$0xff] }
 0x49d   : > { %v6601_v17 = vmul.f32 1.442695, %v6545_v26  ;;  %v8639_v39 = vpop.eup %8638  ;;  %v7737_v36 = vadd.f32 %v7691_v46, %v7645_v62  ;;  %v6820_v58 = vmul.f32 %v8637_v22, %v6819_v12  ;;  %v6313_v27 = vld [vmem:[#allocation4 + $0x60] sm:$0xff]  ;;  %v5992_v62 = vld [vmem:[#allocation2 + $0x130] sm:$0xff]  ;;  %v7692_v46 = vld [vmem:[#allocation3 + $0x38] sm:$0xff]  ;;  %vm6841_vm0 = vcmp.eq.f32.partialorder %v6840_v6, 8.507059e+37 }
 0x49e   : > { %v11409_v5 = vadd.f32 1.0, %v8639_v39  ;;  %5927 = vst.msk [vmem:[#allocation4 + $0x68] sm:$0xff] %vm279_vm2, %v5881_v4  ;;  %v8641_v38 = vpop.eup %8640  ;;  %v6359_v41 = vadd.f32 %v6313_v27, %v11337_v35  ;;  %v4556_v35 = vld [vmem:[#allocation2 + $0x121] sm:$0xff] }
 0x49f   : > { %v4774_v3 = vpop.f32.mrf.mxu3  ;;  %8642 = vpow2.f32 %v6601_v17  ;;  %8359 = vmatmul.msk.f32.gmra.mxu2 %vm279_vm2, %v5991_v16  ;;  %7786 = vst.msk [vmem:[%s11235_s13 + $0x22] sm:$0xff] %vm279_vm2, %v7737_v36  ;;  %v6821_v29 = vadd.f32 %v8637_v22, %v6820_v58  ;;  %v6832_v18 = vmul.f32 %v8641_v38, %v11386_v53  ;;  %vm6837_vm12 = vweird.f32 %v8641_v38  ;;  %v11448_v16 = vpop.f32.mrf.mxu0 }
 0x4a0   : > { %v4926_v52 = vadd.f32 %v4880_v14, %v4774_v3  ;;  %8644 = vrcp.f32 %v11409_v5  ;;  %v6450_v9 = vld [vmem:[#allocation4 + $0x58] sm:$0xff]  ;;  %6405 = vst.msk [vmem:[#allocation4 + $0x60] sm:$0xff] %vm279_vm2, %v6359_v41  ;;  %vm6838_vm15 = vmor %vm6836_vm13, %vm6837_vm12  ;;  %v6856_v41 = vand.u32 2147483648, %v11409_v5  ;;  %vm6850_vm7 = vweird.f32 %v11409_v5 }
 0x4a1   : > { %v6825_v63 = vsel %vm6824_vm1, %v8637_v22, %v6821_v29  ;;  %v11422_v56 = vadd.f32 %v11134_v60, %v6450_v9  ;;  %v5358_v10 = vld [vmem:[#allocation4 + $0x78] sm:$0xff]  ;;  %v6833_v33 = vsub.f32 1.0, %v6832_v18  ;;  %v6842_v22 = vand.u32 2147483648, %v11386_v53  ;;  %v7452_v18 = vpop.permute.xlu0 %7451 }
 0x4a2   : > { %4972 = vst.msk [vmem:[#allocation4 + $0x80] sm:$0xff] %vm279_vm2, %v4926_v52  ;;  %v11425_v11 = vpop.f32.mrf.mxu2  ;;  %v6830_v49 = vsel %vm6827_vm11, %v6829_v13, %v6825_v63  ;;  %v5404_v54 = vadd.f32 %v5358_v10, %v10882_v31  ;;  %v4557_v52 = vld [vmem:[#allocation2 + $0x129] sm:$0xff] }
 0x4a3   : > { %v7370_v43 = vmul.f32 %v6830_v49, %v11317_v37  ;;  %v6546_v2 = vsub.f32 0.0, %v11422_v56  ;;  %v6834_v30 = vmul.f32 %v8641_v38, %v6833_v33  ;;  %v5836_v21 = vld [vmem:[#allocation4 + $0x70] sm:$0xff]  ;;  %v6843_v58 = vor.u32 1.1754944e-38, %v6842_v22 }
 0x4a4   : > { %8220 = vmatmul.msk.f32.gmra.mxu3 %vm279_vm2, %v4556_v35  ;;  %5450 = vst.msk [vmem:[#allocation4 + $0x78] sm:$0xff] %vm279_vm2, %v5404_v54  ;;  %v5882_v37 = vadd.f32 %v5836_v21, %v11081_v51 }
 0x4a5   : > { %v8643_v60 = vpop.eup %8642  ;;  %v7646_v55 = vmul.f32 %v7447_v28, %v7370_v43  ;;  %v6603_v31 = vmul.f32 1.442695, %v6546_v2  ;;  %v6314_v26 = vld [vmem:[#allocation4 + $0x68] sm:$0xff]  ;;  %v6835_v34 = vadd.f32 %v8641_v38, %v6834_v30  ;;  %v7693_v43 = vld [vmem:[#allocation3 + $0x40] sm:$0xff]  ;;  %v5993_v2 = vld [vmem:[#allocation2 + $0x138] sm:$0xff] }
 0x4a6   : > { %v11434_v25 = vadd.f32 1.0, %v8643_v60  ;;  %v11437_v4 = vpop.eup %8644  ;;  %v6360_v17 = vadd.f32 %v6314_v26, %v11368_v32  ;;  %5928 = vst.msk [vmem:[#allocation4 + $0x70] sm:$0xff] %vm279_vm2, %v5882_v37 }
 0x4a7   : > { %v4777_v12 = vpop.f32.mrf.mxu3  ;;  %8360 = vmatmul.msk.f32.gmra.mxu2 %vm279_vm2, %v5992_v62  ;;  %v7738_v36 = vadd.f32 %v7692_v46, %v7646_v55  ;;  %v6846_v51 = vmul.f32 %v11437_v4, %v11409_v5  ;;  %v6839_v44 = vsel %vm6838_vm15, %v8641_v38, %v6835_v34  ;;  %v6451_v53 = vld [vmem:[#allocation4 + $0x60] sm:$0xff]  ;;  %v11459_v38 = vld [vmem:[%s12488_s6] ss:$0 sm:$0xff]  ;;  %vm6851_vm5 = vweird.f32 %v11437_v4 }
 0x4a8   : > { %v4927_v39 = vadd.f32 %v4881_v40, %v4777_v12  ;;  %8646 = vrcp.f32 %v11434_v25  ;;  %6406 = vst.msk [vmem:[#allocation4 + $0x68] sm:$0xff] %vm279_vm2, %v6360_v17  ;;  %v6844_v3 = vsel %vm6841_vm0, %v6843_v58, %v6839_v44  ;;  %v11462_v13 = vadd.f32 %v11459_v38, %v6451_v53  ;;  %vm11479_vm8 = vmor %vm6850_vm7, %vm6851_vm5  ;;  %v4558_v58 = vld [vmem:[#allocation2 + $0x131] sm:$0xff]  ;;  %v11509_v53 = vpop.f32.mrf.mxu0 }
 0x4a9   : > { %v5359_v32 = vld [vmem:[#allocation4 + $0x80] sm:$0xff]  ;;  %7787 = vst.msk [vmem:[%s11235_s13 + $0x2a] sm:$0x3f] %vm332_vm14, %v7738_v36  ;;  %v6847_v14 = vsub.f32 1.0, %v6846_v51  ;;  %8648 = vpow2.f32 %v6603_v31  ;;  %v7371_v29 = vmul.f32 %v6844_v3, %v11340_v50  ;;  %v6854_v50 = vand.u32 2147483647, %v11409_v5  ;;  %v7457_v51 = vpop.permute.xlu1 %7456 }
 0x4aa   : > { %v11452_v27 = vpop.f32.mrf.mxu2  ;;  %4973 = vst.msk [vmem:[#allocation4 + $0x88] sm:$0xff] %vm279_vm2, %v4927_v39  ;;  %v5405_v63 = vadd.f32 %v5359_v32, %v10896_v7  ;;  %v6547_v49 = vsub.f32 0.0, %v11462_v13  ;;  %v4882_v5 = vld [vmem:[#allocation4 + $0x90] sm:$0xff]  ;;  %v6868_v17 = vand.u32 2147483647, %v11434_v25  ;;  %v6870_v39 = vand.u32 2147483648, %v11434_v25 }
 0x4ab   : > { %v6848_v9 = vmul.f32 %v11437_v4, %v6847_v14  ;;  %v5837_v10 = vld [vmem:[#allocation4 + $0x78] sm:$0xff]  ;;  %v7647_v35 = vmul.f32 %v7452_v18, %v7371_v29  ;;  %vm6855_vm9 = vcmp.eq.f32.partialorder %v6854_v50, 8.507059e+37  ;;  %vm6864_vm11 = vweird.f32 %v11434_v25 }
 0x4ac   : > { %8221 = vmatmul.msk.f32.gmra.mxu3 %vm279_vm2, %v4557_v52  ;;  %v5883_v33 = vadd.f32 %v5837_v10, %v11092_v20  ;;  %5451 = vst.msk [vmem:[#allocation4 + $0x80] sm:$0xff] %vm279_vm2, %v5405_v63  ;;  %v6857_v20 = vor.u32 1.1754944e-38, %v6856_v41  ;;  %v6605_v6 = vmul.f32 1.442695, %v6547_v49  ;;  %v5994_v41 = vld [vmem:[#allocation2 + $0x140] sm:$0xff]  ;;  %v4883_v18 = vld [vmem:[#allocation4 + $0x98] sm:$0xff] }
 0x4ad   : > { %v6849_v22 = vadd.f32 %v11437_v4, %v6848_v9  ;;  %v7739_v7 = vadd.f32 %v7693_v43, %v7647_v35  ;;  %v6315_v21 = vld [vmem:[#allocation4 + $0x70] sm:$0xff]  ;;  %vm6869_vm13 = vcmp.eq.f32.partialorder %v6868_v17, 8.507059e+37  ;;  %v6871_v63 = vor.u32 1.1754944e-38, %v6870_v39 }
 0x4ae   : > { %v11472_v54 = vpop.eup %8646  ;;  %5929 = vst.msk [vmem:[#allocation4 + $0x78] sm:$0xff] %vm279_vm2, %v5883_v33  ;;  %v6361_v37 = vadd.f32 %v6315_v21, %v11399_v15  ;;  %8650 = vpow2.f32 %v6605_v6  ;;  %v4559_v21 = vld [vmem:[#allocation2 + $0x139] sm:$0xff]  ;;  %vm7791_vm15 = vcmask 61440  }
 0x4af   : > { %v4780_v60 = vpop.f32.mrf.mxu3  ;;  %v6860_v30 = vmul.f32 %v11472_v54, %v11434_v25  ;;  %8361 = vmatmul.msk.f32.gmra.mxu2 %vm279_vm2, %v5993_v2  ;;  %v8649_v55 = vpop.eup %8648  ;;  %v6853_v31 = vsel %vm11479_vm8, %v11437_v4, %v6849_v22  ;;  %v6452_v26 = vld [vmem:[#allocation4 + $0x68] sm:$0xff]  ;;  %7789 = vst.msk [vmem:[%s11235_s13 + $0x2b] sm:$0xe0] %vm7788_vm6, %v7739_v7  ;;  %vm6865_vm1 = vweird.f32 %v11472_v54 }
 0x4b0   : > { %v4928_v62 = vadd.f32 %v4882_v5, %v4780_v60  ;;  %v6858_v12 = vsel %vm6855_vm9, %v6857_v20, %v6853_v31  ;;  %v11493_v46 = vadd.f32 1.0, %v8649_v55  ;;  %v11499_v4 = vadd.f32 %v11459_v38, %v6452_v26  ;;  %6407 = vst.msk [vmem:[#allocation4 + $0x70] sm:$0xff] %vm279_vm2, %v6361_v37  ;;  %vm11517_vm12 = vmor %vm6864_vm11, %vm6865_vm1  ;;  %v11522_v25 = vpop.f32.mrf.mxu1  ;;  %v11549_v17 = vpop.f32.mrf.mxu0 }
 0x4b1   : > { %v6861_v40 = vsub.f32 1.0, %v6860_v30  ;;  %v7372_v34 = vmul.f32 %v6858_v12, %v11365_v47  ;;  %v5360_v15 = vld [vmem:[#allocation4 + $0x88] sm:$0xff]  ;;  %v7694_v47 = vld [vmem:[#allocation3 + $0x48] sm:$0xff]  ;;  %vm7793_vm1 = vcmask 64516  }
 0x4b2   : > { %v11502_v36 = vpop.f32.mrf.mxu2  ;;  %8652 = vrcp.f32 %v11493_v46  ;;  %4974 = vst.msk [vmem:[#allocation4 + $0x90] sm:$0xff] %vm279_vm2, %v4928_v62  ;;  %v6548_v3 = vsub.f32 0.0, %v11499_v4  ;;  %v5406_v14 = vadd.f32 %v5360_v15, %v10909_v59  ;;  %v6884_v62 = vand.u32 2147483648, %v11493_v46 }
 0x4b3   : > { %v6862_v44 = vmul.f32 %v11472_v54, %v6861_v40  ;;  %v7648_v32 = vmul.f32 %v7457_v51, %v7372_v34  ;;  %v5838_v29 = vld [vmem:[#allocation4 + $0x80] sm:$0xff]  ;;  %v6882_v15 = vand.u32 2147483647, %v11493_v46  ;;  %v5995_v51 = vld [vmem:[#allocation2 + $0x148] sm:$0xff]  ;;  %vm6878_vm5 = vweird.f32 %v11493_v46 }
 0x4b4   : > { %8222 = vmatmul.msk.f32.gmra.mxu3 %vm279_vm2, %v4558_v58  ;;  %v6607_v10 = vmul.f32 1.442695, %v6548_v3  ;;  %5452 = vst.msk [vmem:[#allocation4 + $0x88] sm:$0xff] %vm279_vm2, %v5406_v14  ;;  %v8651_v49 = vpop.eup %8650  ;;  %v5884_v22 = vadd.f32 %v5838_v29, %v11103_v42 }
 0x4b5   : > { %v6863_v52 = vadd.f32 %v11472_v54, %v6862_v44  ;;  %v7740_v9 = vadd.f32 %v7694_v47, %v7648_v32  ;;  %v6316_v35 = vld [vmem:[#allocation4 + $0x78] sm:$0xff]  ;;  %v11532_v7 = vadd.f32 1.0, %v8651_v49  ;;  %vm6883_vm8 = vcmp.eq.f32.partialorder %v6882_v15, 8.507059e+37 }
 0x4b6   : > { %v6362_v43 = vadd.f32 %v6316_v35, %v11425_v11  ;;  %8654 = vpow2.f32 %v6607_v10  ;;  %5930 = vst.msk [vmem:[#allocation4 + $0x80] sm:$0xff] %vm279_vm2, %v5884_v22  ;;  %v4560_v35 = vld [vmem:[#allocation2 + $0x141] sm:$0xff] }
 0x4b7   : > { %v4783_v59 = vpop.f32.mrf.mxu3  ;;  %v6867_v33 = vsel %vm11517_vm12, %v11472_v54, %v6863_v52  ;;  %8362 = vmatmul.msk.f32.gmra.mxu2 %vm279_vm2, %v5994_v41  ;;  %7790 = vst.msk [vmem:[%s11235_s13 + $0x33] sm:$0xff] %vm279_vm2, %v7740_v9  ;;  %v6453_v30 = vld [vmem:[#allocation4 + $0x70] sm:$0xff]  ;;  %v7462_v54 = vpop.permute.xlu2 %7461  ;;  %8656 = vrcp.f32 %v11532_v7  ;;  %v6885_v41 = vor.u32 1.1754944e-38, %v6884_v62  ;;  %vm6892_vm11 = vweird.f32 %v11532_v7 }
 0x4b8   : > { %v4929_v2 = vadd.f32 %v4883_v18, %v4783_v59  ;;  %v6872_v60 = vsel %vm6869_vm13, %v6871_v63, %v6867_v33  ;;  %v8653_v28 = vpop.eup %8652  ;;  %6408 = vst.msk [vmem:[#allocation4 + $0x78] sm:$0xff] %vm279_vm2, %v6362_v43  ;;  %v11542_v55 = vadd.f32 %v11459_v38, %v6453_v30 }
 0x4b9   : > { %v7373_v20 = vmul.f32 %v6872_v60, %v11393_v48  ;;  %v6874_v11 = vmul.f32 %v8653_v28, %v11493_v46  ;;  %v5361_v42 = vld [vmem:[#allocation4 + $0x90] sm:$0xff]  ;;  %v7695_v48 = vld [vmem:[#allocation3 + $0x50] sm:$0xff]  ;;  %vm6879_vm0 = vweird.f32 %v8653_v28  ;;  %v6896_v46 = vand.u32 2147483647, %v11532_v7 }
 0x4ba   : > { %v11539_v6 = vpop.f32.mrf.mxu2  ;;  %4975 = vst.msk [vmem:[#allocation4 + $0x98] sm:$0xff] %vm279_vm2, %v4929_v2  ;;  %v5407_v26 = vadd.f32 %v5361_v42, %v10924_v19  ;;  %v6549_v12 = vsub.f32 0.0, %v11542_v55  ;;  %v4884_v19 = vld [vmem:[#allocation4 + $0xa0] sm:$0xff]  ;;  %vm6880_vm7 = vmor %vm6878_vm5, %vm6879_vm0  ;;  %v6898_v2 = vand.u32 2147483648, %v11532_v7  ;;  %v4885_v42 = vld [vmem:[#allocation4 + $0xa8] sm:$0xff] }
 0x4bb   : > { %v7649_v5 = vmul.f32 %v7462_v54, %v7373_v20  ;;  %v6875_v31 = vsub.f32 1.0, %v6874_v11  ;;  %v5839_v40 = vld [vmem:[#allocation4 + $0x88] sm:$0xff]  ;;  %vm11591_vm12 = vcmp.eq.f32.partialorder %v6896_v46, 8.507059e+37 }
 0x4bc   : > { %8223 = vmatmul.msk.f32.gmra.mxu3 %vm279_vm2, %v4559_v21  ;;  %v8655_v34 = vpop.eup %8654  ;;  %5453 = vst.msk [vmem:[#allocation4 + $0x90] sm:$0xff] %vm279_vm2, %v5407_v26  ;;  %v5885_v58 = vadd.f32 %v5839_v40, %v11114_v8  ;;  %v6609_v32 = vmul.f32 1.442695, %v6549_v12  ;;  %v11563_v8 = vpop.f32.mrf.mxu1 }
 0x4bd   : > { %v7741_v37 = vadd.f32 %v7695_v48, %v7649_v5  ;;  %v6876_v39 = vmul.f32 %v8653_v28, %v6875_v31  ;;  %v11556_v47 = vadd.f32 1.0, %v8655_v34  ;;  %v11559_v14 = vpop.eup %8656  ;;  %v6317_v9 = vld [vmem:[#allocation4 + $0x80] sm:$0xff]  ;;  %v7696_v5 = vld [vmem:[#allocation3 + $0x58] sm:$0xff]  ;;  %v6899_v34 = vor.u32 1.1754944e-38, %v6898_v2 }
 0x4be   : > { %5931 = vst.msk [vmem:[#allocation4 + $0x88] sm:$0xff] %vm279_vm2, %v5885_v58  ;;  %v6888_v18 = vmul.f32 %v11559_v14, %v11532_v7  ;;  %v6363_v43 = vadd.f32 %v6317_v9, %v11452_v27  ;;  %vm6893_vm9 = vweird.f32 %v11559_v14  ;;  %v5996_v27 = vld [vmem:[#allocation2 + $0x150] sm:$0xff] }
 0x4bf   : > { %v4786_v44 = vpop.f32.mrf.mxu3  ;;  %7792 = vst.msk [vmem:[%s11235_s13 + $0x3b] sm:$0x1f] %vm7791_vm15, %v7741_v37  ;;  %8363 = vmatmul.msk.f32.gmra.mxu2 %vm279_vm2, %v5995_v51  ;;  %v6877_v52 = vadd.f32 %v8653_v28, %v6876_v39  ;;  %v6454_v29 = vld [vmem:[#allocation4 + $0x78] sm:$0xff]  ;;  %8658 = vrcp.f32 %v11556_v47  ;;  %vm6894_vm13 = vmor %vm6892_vm11, %vm6893_vm9  ;;  %vm6906_vm5 = vweird.f32 %v11556_v47  ;;  %vm7796_vm9 = vcmask 60416  }
 0x4c0   : > { %v4930_v3 = vadd.f32 %v4884_v19, %v4786_v44  ;;  %8660 = vpow2.f32 %v6609_v32  ;;  %v6889_v49 = vsub.f32 1.0, %v6888_v18  ;;  %v11574_v33 = vadd.f32 %v11459_v38, %v6454_v29  ;;  %6409 = vst.msk [vmem:[#allocation4 + $0x80] sm:$0xff] %vm279_vm2, %v6363_v43 }
 0x4c1   : > { %v6881_v50 = vsel %vm6880_vm7, %v8653_v28, %v6877_v52  ;;  %v5362_v63 = vld [vmem:[#allocation4 + $0x98] sm:$0xff]  ;;  %v7467_v28 = vpop.permute.xlu0 %7466  ;;  %v6910_v29 = vand.u32 2147483647, %v11556_v47 }
 0x4c2   : > { %4976 = vst.msk [vmem:[#allocation4 + $0xa0] sm:$0xff] %vm279_vm2, %v4930_v3  ;;  %v11571_v10 = vpop.f32.mrf.mxu2  ;;  %v6886_v59 = vsel %vm6883_vm8, %v6885_v41, %v6881_v50  ;;  %v5408_v60 = vadd.f32 %v5362_v63, %v10938_v61  ;;  %v6890_v20 = vmul.f32 %v11559_v14, %v6889_v49  ;;  %v6550_v30 = vsub.f32 0.0, %v11574_v33  ;;  %v7697_v63 = vld [vmem:[#allocation3 + $0x60] sm:$0xff]  ;;  %v5997_v49 = vld [vmem:[#allocation2 + $0x158] sm:$0xff] }
 0x4c3   : > { %v7374_v22 = vmul.f32 %v6886_v59, %v11422_v56  ;;  %v5840_v54 = vld [vmem:[#allocation4 + $0x90] sm:$0xff]  ;;  %v6912_v41 = vand.u32 2147483648, %v11556_v47  ;;  %vm6911_vm8 = vcmp.eq.f32.partialorder %v6910_v29, 8.507059e+37  ;;  %v4887_v29 = vld [vmem:[#allocation4 + $0xb8] sm:$0xff] }
 0x4c4   : > { %8224 = vmatmul.msk.f32.gmra.mxu3 %vm279_vm2, %v4560_v35  ;;  %5454 = vst.msk [vmem:[#allocation4 + $0x98] sm:$0xff] %vm279_vm2, %v5408_v60  ;;  %v5886_v56 = vadd.f32 %v5840_v54, %v11127_v45  ;;  %v6891_v48 = vadd.f32 %v11559_v14, %v6890_v20  ;;  %v6611_v26 = vmul.f32 1.442695, %v6550_v30  ;;  %v11596_v45 = vpop.f32.mrf.mxu0  ;;  %v11617_v52 = vpop.f32.mrf.mxu1  ;;  %v4886_v54 = vld [vmem:[#allocation4 + $0xb0] sm:$0xff]  ;;  %v4563_v60 = vld [vmem:[#allocation2 + $0x159] sm:$0xff] }
 0x4c5   : > { %v7650_v11 = vmul.f32 %v7467_v28, %v7374_v22  ;;  %v11588_v21 = vpop.eup %8658  ;;  %v6318_v37 = vld [vmem:[#allocation4 + $0x88] sm:$0xff]  ;;  %v6913_v28 = vor.u32 1.1754944e-38, %v6912_v41 }
 0x4c6   : > { %v8661_v12 = vpop.eup %8660  ;;  %v6902_v39 = vmul.f32 %v11588_v21, %v11556_v47  ;;  %v6364_v15 = vadd.f32 %v6318_v37, %v11502_v36  ;;  %5932 = vst.msk [vmem:[#allocation4 + $0x90] sm:$0xff] %vm279_vm2, %v5886_v56  ;;  %v6895_v51 = vsel %vm6894_vm13, %v11559_v14, %v6891_v48  ;;  %8662 = vpow2.f32 %v6611_v26  ;;  %v4561_v36 = vld [vmem:[#allocation2 + $0x149] sm:$0xff] }
 0x4c7   : > { %v4789_v61 = vpop.f32.mrf.mxu3  ;;  %8364 = vmatmul.msk.f32.gmra.mxu2 %vm279_vm2, %v5996_v27  ;;  %v7742_v40 = vadd.f32 %v7696_v5, %v7650_v11  ;;  %v11607_v44 = vadd.f32 1.0, %v8661_v12  ;;  %v6900_v7 = vsel %vm11591_vm12, %v6899_v34, %v6895_v51  ;;  %vm6907_vm0 = vweird.f32 %v11588_v21  ;;  %v6455_v9 = vld [vmem:[#allocation4 + $0x80] sm:$0xff]  ;;  %v7477_v12 = vpop.permute.xlu2 %7476 }
 0x4c8   : > { %v4931_v62 = vadd.f32 %v4885_v42, %v4789_v61  ;;  %v6903_v32 = vsub.f32 1.0, %v6902_v39  ;;  %v7375_v14 = vmul.f32 %v6900_v7, %v11462_v13  ;;  %6410 = vst.msk [vmem:[#allocation4 + $0x88] sm:$0xff] %vm279_vm2, %v6364_v15  ;;  %v11629_v13 = vadd.f32 %v11459_v38, %v6455_v9  ;;  %vm11634_vm7 = vmor %vm6906_vm5, %vm6907_vm0  ;;  %v7698_v15 = vld [vmem:[#allocation3 + $0x68] sm:$0xff] }
 0x4c9   : > { %v5363_v58 = vld [vmem:[#allocation4 + $0xa0] sm:$0xff]  ;;  %7794 = vst.msk [vmem:[%s11235_s13 + $0x3c] sm:$0xf0] %vm7793_vm1, %v7742_v40  ;;  %8664 = vrcp.f32 %v11607_v44  ;;  %v6924_v51 = vand.u32 2147483647, %v11607_v44  ;;  %vm6920_vm12 = vweird.f32 %v11607_v44 }
 0x4ca   : > { %v5409_v19 = vadd.f32 %v5363_v58, %v10952_v23  ;;  %4977 = vst.msk [vmem:[#allocation4 + $0xa8] sm:$0xff] %vm279_vm2, %v4931_v62  ;;  %v11615_v3 = vpop.f32.mrf.mxu2  ;;  %v7472_v23 = vpop.permute.xlu1 %7471  ;;  %v6904_v18 = vmul.f32 %v11588_v21, %v6903_v32  ;;  %v6551_v20 = vsub.f32 0.0, %v11629_v13  ;;  %v4562_v62 = vld [vmem:[#allocation2 + $0x151] sm:$0xff] }
 0x4cb   : > { %v7651_v50 = vmul.f32 %v7472_v23, %v7375_v14  ;;  %v5841_v46 = vld [vmem:[#allocation4 + $0x98] sm:$0xff]  ;;  %v5998_v14 = vld [vmem:[#allocation2 + $0x160] sm:$0xff]  ;;  %vm6925_vm0 = vcmp.eq.f32.partialorder %v6924_v51, 8.507059e+37 }
 0x4cc   : > { %8225 = vmatmul.msk.f32.gmra.mxu3 %vm279_vm2, %v4561_v36  ;;  %5455 = vst.msk [vmem:[#allocation4 + $0xa0] sm:$0xff] %vm279_vm2, %v5409_v19  ;;  %v6905_v35 = vadd.f32 %v11588_v21, %v6904_v18  ;;  %v5887_v59 = vadd.f32 %v5841_v46, %v11151_v57  ;;  %v8663_v22 = vpop.eup %8662  ;;  %v6613_v5 = vmul.f32 1.442695, %v6551_v20  ;;  %v11650_v31 = vpop.f32.mrf.mxu0  ;;  %v6926_v19 = vand.u32 2147483648, %v11607_v44 }
 0x4cd   : > { %v7743_v2 = vadd.f32 %v7697_v63, %v7651_v50  ;;  %v6319_v30 = vld [vmem:[#allocation4 + $0x90] sm:$0xff]  ;;  %v11643_v47 = vadd.f32 1.0, %v8663_v22  ;;  %v11665_v58 = vpop.f32.mrf.mxu1 }
 0x4ce   : > { %v6909_v57 = vsel %vm11634_vm7, %v11588_v21, %v6905_v35  ;;  %v6365_v11 = vadd.f32 %v6319_v30, %v11539_v6  ;;  %5933 = vst.msk [vmem:[#allocation4 + $0x98] sm:$0xff] %vm279_vm2, %v5887_v59  ;;  %v6927_v35 = vor.u32 1.1754944e-38, %v6926_v19  ;;  %vm7798_vm7 = vcmask 64515  }
 0x4cf   : > { %v4792_v43 = vpop.f32.mrf.mxu3  ;;  %8365 = vmatmul.msk.f32.gmra.mxu2 %vm279_vm2, %v5997_v49  ;;  %v8665_v61 = vpop.eup %8664  ;;  %7795 = vst.msk [vmem:[%s11235_s13 + $0x44] sm:$0xff] %vm279_vm2, %v7743_v2  ;;  %v6914_v42 = vsel %vm6911_vm8, %v6913_v28, %v6909_v57  ;;  %8666 = vrcp.f32 %v11643_v47  ;;  %v6456_v6 = vld [vmem:[#allocation4 + $0x88] sm:$0xff]  ;;  %vm6934_vm8 = vweird.f32 %v11643_v47 }
 0x4d0   : > { %v4932_v27 = vadd.f32 %v4886_v54, %v4792_v43  ;;  %v7376_v26 = vmul.f32 %v6914_v42, %v11499_v4  ;;  %v6916_v21 = vmul.f32 %v8665_v61, %v11607_v44  ;;  %6411 = vst.msk [vmem:[#allocation4 + $0x90] sm:$0xff] %vm279_vm2, %v6365_v11  ;;  %8668 = vpow2.f32 %v6613_v5 }
 0x4d1   : > { %v5364_v56 = vld [vmem:[#allocation4 + $0xa8] sm:$0xff]  ;;  %v11661_v4 = vadd.f32 %v11459_v38, %v6456_v6  ;;  %vm6921_vm11 = vweird.f32 %v8665_v61 }
 0x4d2   : > { %v5410_v48 = vadd.f32 %v5364_v56, %v10965_v1  ;;  %v11656_v37 = vpop.f32.mrf.mxu2  ;;  %v7652_v1 = vmul.f32 %v7477_v12, %v7376_v26  ;;  %v6917_v34 = vsub.f32 1.0, %v6916_v21  ;;  %4978 = vst.msk [vmem:[#allocation4 + $0xb0] sm:$0xff] %vm279_vm2, %v4932_v27  ;;  %vm6922_vm13 = vmor %vm6920_vm12, %vm6921_vm11  ;;  %v6938_v56 = vand.u32 2147483647, %v11643_v47  ;;  %v5999_v21 = vld [vmem:[#allocation2 + $0x168] sm:$0xff]  ;;  %v7699_v12 = vld [vmem:[#allocation3 + $0x70] sm:$0xff] }
 0x4d3   : > { %v5842_v40 = vld [vmem:[#allocation4 + $0xa0] sm:$0xff]  ;;  %v6552_v36 = vsub.f32 0.0, %v11661_v4  ;;  %v6940_v27 = vand.u32 2147483648, %v11643_v47 }
 0x4d4   : > { %5456 = vst.msk [vmem:[#allocation4 + $0xa8] sm:$0xff] %vm279_vm2, %v5410_v48  ;;  %8226 = vmatmul.msk.f32.gmra.mxu3 %vm279_vm2, %v4562_v62  ;;  %v5888_v39 = vadd.f32 %v5842_v40, %v11173_v0  ;;  %v7744_v7 = vadd.f32 %v7698_v15, %v7652_v1  ;;  %v6918_v32 = vmul.f32 %v8665_v61, %v6917_v34  ;;  %v11692_v57 = vpop.f32.mrf.mxu0  ;;  %v4888_v62 = vld [vmem:[#allocation4 + $0xc0] sm:$0xff]  ;;  %vm6939_vm12 = vcmp.eq.f32.partialorder %v6938_v56, 8.507059e+37 }
 0x4d5   : > { %v6320_v41 = vld [vmem:[#allocation4 + $0x98] sm:$0xff]  ;;  %v11672_v18 = vpop.eup %8666  ;;  %v6615_v50 = vmul.f32 1.442695, %v6552_v36  ;;  %v11704_v40 = vpop.f32.mrf.mxu1 }
 0x4d6   : > { %5934 = vst.msk [vmem:[#allocation4 + $0xa0] sm:$0xff] %vm279_vm2, %v5888_v39  ;;  %v6919_v9 = vadd.f32 %v8665_v61, %v6918_v32  ;;  %v6366_v46 = vadd.f32 %v6320_v41, %v11571_v10  ;;  %v8669_v63 = vpop.eup %8668  ;;  %v6930_v59 = vmul.f32 %v11672_v18, %v11643_v47  ;;  %vm6935_vm5 = vweird.f32 %v11672_v18  ;;  %v4564_v41 = vld [vmem:[#allocation2 + $0x161] sm:$0xff] }
 0x4d7   : > { %v4795_v0 = vpop.f32.mrf.mxu3  ;;  %8366 = vmatmul.msk.f32.gmra.mxu2 %vm279_vm2, %v5998_v14  ;;  %7797 = vst.msk [vmem:[%s11235_s13 + $0x4c] sm:$0xf] %vm7796_vm9, %v7744_v7  ;;  %v6457_v49 = vld [vmem:[#allocation4 + $0x90] sm:$0xff]  ;;  %v11682_v22 = vadd.f32 1.0, %v8669_v63  ;;  %8670 = vpow2.f32 %v6615_v50  ;;  %vm6936_vm11 = vmor %vm6934_vm8, %vm6935_vm5 }
 0x4d8   : > { %v4933_v23 = vadd.f32 %v4887_v29, %v4795_v0  ;;  %v6923_v43 = vsel %vm6922_vm13, %v8665_v61, %v6919_v9  ;;  %v11685_v44 = vadd.f32 %v11459_v38, %v6457_v49  ;;  %6412 = vst.msk [vmem:[#allocation4 + $0x98] sm:$0xff] %vm279_vm2, %v6366_v46  ;;  %v6931_v20 = vsub.f32 1.0, %v6930_v59  ;;  %v7482_v61 = vpop.permute.xlu0 %7481  ;;  %v7700_v46 = vld [vmem:[#allocation3 + $0x78] sm:$0xff]  ;;  %v6000_v49 = vld [vmem:[#allocation2 + $0x170] sm:$0xff] }
 0x4d9   : > { %v6928_v28 = vsel %vm6925_vm0, %v6927_v35, %v6923_v43  ;;  %v5365_v30 = vld [vmem:[#allocation4 + $0xb0] sm:$0xff]  ;;  %8672 = vrcp.f32 %v11682_v22  ;;  %vm6948_vm0 = vweird.f32 %v11682_v22 }
 0x4da   : > { %4979 = vst.msk [vmem:[#allocation4 + $0xb8] sm:$0xff] %vm279_vm2, %v4933_v23  ;;  %v11688_v2 = vpop.f32.mrf.mxu2  ;;  %v7377_v11 = vmul.f32 %v6928_v28, %v11542_v55  ;;  %v6932_v42 = vmul.f32 %v11672_v18, %v6931_v20  ;;  %v6553_v5 = vsub.f32 0.0, %v11685_v44  ;;  %v5411_v48 = vadd.f32 %v5365_v30, %v11448_v16 }
 0x4db   : > { %v5843_v10 = vld [vmem:[#allocation4 + $0xa8] sm:$0xff] }
 0x4dc   : > { %v5889_v54 = vadd.f32 %v5843_v10, %v11197_v24  ;;  %8227 = vmatmul.msk.f32.gmra.mxu3 %vm279_vm2, %v4563_v60  ;;  %v7653_v26 = vmul.f32 %v7482_v61, %v7377_v11  ;;  %v6933_v1 = vadd.f32 %v11672_v18, %v6932_v42  ;;  %v6617_v34 = vmul.f32 1.442695, %v6553_v5  ;;  %5457 = vst.msk [vmem:[#allocation4 + $0xb0] sm:$0xff] %vm279_vm2, %v5411_v48  ;;  %v11732_v43 = vpop.f32.mrf.mxu0 }
 0x4dd   : > { %v6321_v24 = vld [vmem:[#allocation4 + $0xa0] sm:$0xff]  ;;  %v8671_v39 = vpop.eup %8670  ;;  %v6954_v10 = vand.u32 2147483648, %v11682_v22 }
 0x4de   : > { %5935 = vst.msk [vmem:[#allocation4 + $0xa8] sm:$0xff] %vm279_vm2, %v5889_v54  ;;  %v6367_v55 = vadd.f32 %v6321_v24, %v11615_v3  ;;  %v7745_v15 = vadd.f32 %v7699_v12, %v7653_v26  ;;  %v6941_v3 = vor.u32 1.1754944e-38, %v6940_v27  ;;  %v6937_v19 = vsel %vm6936_vm11, %v11672_v18, %v6933_v1  ;;  %v4889_v27 = vld [vmem:[#allocation4 + $0xc8] sm:$0xff]  ;;  %v11746_v26 = vpop.f32.mrf.mxu1  ;;  %v4565_v1 = vld [vmem:[#allocation2 + $0x169] sm:$0xff] }
 0x4df   : > { %v4798_v6 = vpop.f32.mrf.mxu3  ;;  %8367 = vmatmul.msk.f32.gmra.mxu2 %vm279_vm2, %v5999_v21  ;;  %v11714_v47 = vadd.f32 1.0, %v8671_v39  ;;  %8674 = vpow2.f32 %v6617_v34  ;;  %v6458_v7 = vld [vmem:[#allocation4 + $0x98] sm:$0xff]  ;;  %v8673_v36 = vpop.eup %8672  ;;  %v6955_v21 = vor.u32 1.1754944e-38, %v6954_v10 }
 0x4e0   : > { %v4934_v16 = vadd.f32 %v4888_v62, %v4798_v6  ;;  %6413 = vst.msk [vmem:[#allocation4 + $0xa0] sm:$0xff] %vm279_vm2, %v6367_v55  ;;  %v6942_v14 = vsel %vm6939_vm12, %v6941_v3, %v6937_v19  ;;  %v11721_v0 = vadd.f32 %v11459_v38, %v6458_v7  ;;  %v6944_v18 = vmul.f32 %v8673_v36, %v11682_v22  ;;  %v7492_v7 = vpop.permute.xlu2 %7491 }
 0x4e1   : > { %v5366_v51 = vld [vmem:[#allocation4 + $0xb8] sm:$0xff]  ;;  %7799 = vst.msk [vmem:[%s11235_s13 + $0x4d] sm:$0xf8] %vm7798_vm7, %v7745_v15  ;;  %v7378_v23 = vmul.f32 %v6942_v14, %v11574_v33  ;;  %8676 = vrcp.f32 %v11714_v47  ;;  %v6952_v33 = vand.u32 2147483647, %v11682_v22  ;;  %vm6949_vm13 = vweird.f32 %v8673_v36 }
 0x4e2   : > { %v5412_v32 = vadd.f32 %v5366_v51, %v11509_v53  ;;  %4980 = vst.msk [vmem:[#allocation4 + $0xc0] sm:$0xff] %vm279_vm2, %v4934_v16  ;;  %v11723_v29 = vpop.f32.mrf.mxu2  ;;  %v7487_v53 = vpop.permute.xlu1 %7486  ;;  %v6554_v9 = vsub.f32 0.0, %v11721_v0  ;;  %v6945_v35 = vsub.f32 1.0, %v6944_v18  ;;  %vm6950_vm5 = vmor %vm6948_vm0, %vm6949_vm13  ;;  %v6968_v3 = vand.u32 2147483648, %v11714_v47 }
 0x4e3   : > { %v7654_v63 = vmul.f32 %v7487_v53, %v7378_v23  ;;  %v5844_v28 = vld [vmem:[#allocation4 + $0xb0] sm:$0xff]  ;;  %vm6953_vm8 = vcmp.eq.f32.partialorder %v6952_v33, 8.507059e+37  ;;  %vm12494_vm12 = vcmask 59392   ;;  %vm6962_vm13 = vweird.f32 %v11714_v47 }
 0x4e4   : > { %5458 = vst.msk [vmem:[#allocation4 + $0xb8] sm:$0xff] %vm279_vm2, %v5412_v32  ;;  %8228 = vmatmul.msk.f32.gmra.mxu3 %vm279_vm2, %v4564_v41  ;;  %v6619_v60 = vmul.f32 1.442695, %v6554_v9  ;;  %v6946_v11 = vmul.f32 %v8673_v36, %v6945_v35  ;;  %v6001_v41 = vld [vmem:[#allocation2 + $0x178] sm:$0xff]  ;;  %v4890_v53 = vld [vmem:[#allocation4 + $0xd0] sm:$0xff] }
 0x4e5   : > { %v6322_v50 = vld [vmem:[#allocation4 + $0xa8] sm:$0xff]  ;;  %v8675_v30 = vpop.eup %8674  ;;  %v7746_v54 = vadd.f32 %v7700_v46, %v7654_v63  ;;  %v11778_v46 = vpop.f32.mrf.mxu0 }
 0x4e6   : > { %v6368_v59 = vadd.f32 %v6322_v50, %v11656_v37  ;;  %v5890_v37 = vadd.f32 %v5844_v28, %v11522_v25  ;;  %v11739_v61 = vadd.f32 1.0, %v8675_v30  ;;  %8678 = vpow2.f32 %v6619_v60  ;;  %v7701_v50 = vld [vmem:[#allocation3 + $0x80] sm:$0xff]  ;;  %v11791_v30 = vpop.f32.mrf.mxu1 }
 0x4e7   : > { %v4801_v20 = vpop.f32.mrf.mxu3  ;;  %v6459_v56 = vld [vmem:[#allocation4 + $0xa0] sm:$0xff]  ;;  %8368 = vmatmul.msk.f32.gmra.mxu2 %vm279_vm2, %v6000_v49  ;;  %v11744_v48 = vpop.eup %8676  ;;  %7800 = vst.msk [vmem:[%s11235_s13 + $0x55] sm:$0xff] %vm279_vm2, %v7746_v54  ;;  %v6947_v55 = vadd.f32 %v8673_v36, %v6946_v11  ;;  %v6969_v49 = vor.u32 1.1754944e-38, %v6968_v3 }
 0x4e8   : > { %6414 = vst.msk [vmem:[#allocation4 + $0xa8] sm:$0xff] %vm279_vm2, %v6368_v59  ;;  %v11742_v42 = vadd.f32 %v11459_v38, %v6459_v56  ;;  %v4935_v24 = vadd.f32 %v4889_v27, %v4801_v20  ;;  %v6958_v6 = vmul.f32 %v11744_v48, %v11714_v47  ;;  %8680 = vrcp.f32 %v11739_v61 }
 0x4e9   : > { %v5367_v5 = vld [vmem:[#allocation4 + $0xc0] sm:$0xff]  ;;  %5936 = vst.msk [vmem:[#allocation4 + $0xb0] sm:$0xff] %vm279_vm2, %v5890_v37  ;;  %v6951_v34 = vsel %vm6950_vm5, %v8673_v36, %v6947_v55  ;;  %vm6963_vm11 = vweird.f32 %v11744_v48  ;;  %v6966_v36 = vand.u32 2147483647, %v11714_v47 }
 0x4ea   : > { %v5413_v25 = vadd.f32 %v5367_v5, %v11549_v17  ;;  %v11757_v12 = vpop.f32.mrf.mxu2  ;;  %v6555_v22 = vsub.f32 0.0, %v11742_v42  ;;  %v6956_v17 = vsel %vm6953_vm8, %v6955_v21, %v6951_v34  ;;  %v6959_v16 = vsub.f32 1.0, %v6958_v6  ;;  %4981 = vst.msk [vmem:[#allocation4 + $0xc8] sm:$0xff] %vm279_vm2, %v4935_v24  ;;  %vm6964_vm0 = vmor %vm6962_vm13, %vm6963_vm11  ;;  %v4566_v47 = vld [vmem:[#allocation2 + $0x171] sm:$0xff]  ;;  %v7497_v21 = vpop.permute.xlu0 %7496 }
 0x4eb   : > { %v5845_v62 = vld [vmem:[#allocation4 + $0xb8] sm:$0xff]  ;;  %v7379_v15 = vmul.f32 %v6956_v17, %v11629_v13  ;;  %vm6967_vm5 = vcmp.eq.f32.partialorder %v6966_v36, 8.507059e+37  ;;  %v6980_v24 = vand.u32 2147483647, %v11739_v61  ;;  %vm12490_vm11 = vcmask 64514  }
 0x4ec   : > { %5459 = vst.msk [vmem:[#allocation4 + $0xc0] sm:$0xff] %vm279_vm2, %v5413_v25  ;;  %8229 = vmatmul.msk.f32.gmra.mxu3 %vm279_vm2, %v4565_v1  ;;  %v5891_v39 = vadd.f32 %v5845_v62, %v11563_v8  ;;  %v6621_v51 = vmul.f32 1.442695, %v6555_v22  ;;  %v8679_v19 = vpop.eup %8678  ;;  %v6960_v32 = vmul.f32 %v11744_v48, %v6959_v16  ;;  %v4891_v16 = vld [vmem:[#allocation4 + $0xd8] sm:$0xff]  ;;  %vm6976_vm13 = vweird.f32 %v11739_v61 }
 0x4ed   : > { %v7655_v23 = vmul.f32 %v7492_v7, %v7379_v15  ;;  %v11770_v18 = vadd.f32 1.0, %v8679_v19  ;;  %v7702_v15 = vld [vmem:[#allocation3 + $0x88] sm:$0xff] }
 0x4ee   : > { %5937 = vst.msk [vmem:[#allocation4 + $0xb8] sm:$0xff] %vm279_vm2, %v5891_v39  ;;  %8682 = vpow2.f32 %v6621_v51  ;;  %v11776_v9 = vpop.eup %8680  ;;  %v6961_v63 = vadd.f32 %v11744_v48, %v6960_v32  ;;  %v11821_v32 = vpop.f32.mrf.mxu0 }
 0x4ef   : > { %v6460_v14 = vld [vmem:[#allocation4 + $0xa8] sm:$0xff]  ;;  %v4804_v8 = vpop.f32.mrf.mxu3  ;;  %8369 = vmatmul.msk.f32.gmra.mxu2 %vm279_vm2, %v6001_v41  ;;  %v7747_v59 = vadd.f32 %v7701_v50, %v7655_v23  ;;  %v6972_v33 = vmul.f32 %v11776_v9, %v11739_v61  ;;  %8684 = vrcp.f32 %v11770_v18  ;;  %vm6977_vm8 = vweird.f32 %v11776_v9 }
 0x4f0   : > { %v11773_v13 = vadd.f32 %v11459_v38, %v6460_v14  ;;  %v4936_v35 = vadd.f32 %v4890_v53, %v4804_v8  ;;  %v6323_v10 = vld [vmem:[#allocation4 + $0xb0] sm:$0xff]  ;;  %v6965_v60 = vsel %vm6964_vm0, %v11744_v48, %v6961_v63  ;;  %v6982_v48 = vand.u32 2147483648, %v11739_v61  ;;  %vm6978_vm0 = vmor %vm6976_vm13, %vm6977_vm8  ;;  %v4567_v23 = vld [vmem:[#allocation2 + $0x179] sm:$0xff] }
 0x4f1   : > { %7802 = vst.msk [vmem:[%s11235_s13 + $0x5d] sm:$0x7] %vm12494_vm12, %v7747_v59  ;;  %v6970_v54 = vsel %vm6967_vm5, %v6969_v49, %v6965_v60  ;;  %v6973_v11 = vsub.f32 1.0, %v6972_v33  ;;  %v6369_v37 = vadd.f32 %v6323_v10, %v11688_v2  ;;  %v5368_v27 = vld [vmem:[#allocation4 + $0xc8] sm:$0xff]  ;;  %vm6981_vm5 = vcmp.eq.f32.partialorder %v6980_v24, 8.507059e+37  ;;  %v11833_v33 = vpop.f32.mrf.mxu1 }
 0x4f2   : > { %4982 = vst.msk [vmem:[#allocation4 + $0xd0] sm:$0xff] %vm279_vm2, %v4936_v35  ;;  %v11789_v20 = vpop.f32.mrf.mxu2  ;;  %v6556_v56 = vsub.f32 0.0, %v11773_v13  ;;  %v7380_v5 = vmul.f32 %v6970_v54, %v11661_v4  ;;  %v5414_v55 = vadd.f32 %v5368_v27, %v11596_v45  ;;  %v6002_v45 = vld [vmem:[#allocation2 + $0x180] sm:$0xff]  ;;  %v6996_v50 = vand.u32 2147483648, %v11770_v18 }
 0x4f3   : > { %v5846_v28 = vld [vmem:[#allocation4 + $0xc0] sm:$0xff]  ;;  %v6974_v6 = vmul.f32 %v11776_v9, %v6973_v11  ;;  %6415 = vst.msk [vmem:[#allocation4 + $0xb0] sm:$0xff] %vm279_vm2, %v6369_v37  ;;  %v6994_v35 = vand.u32 2147483647, %v11770_v18  ;;  %vm6990_vm13 = vweird.f32 %v11770_v18 }
 0x4f4   : > { %8230 = vmatmul.msk.f32.gmra.mxu3 %vm279_vm2, %v4566_v47  ;;  %v8683_v25 = vpop.eup %8682  ;;  %v6623_v62 = vmul.f32 1.442695, %v6556_v56  ;;  %v5892_v1 = vadd.f32 %v5846_v28, %v11617_v52  ;;  %v7656_v34 = vmul.f32 %v7497_v21, %v7380_v5  ;;  %5460 = vst.msk [vmem:[#allocation4 + $0xc8] sm:$0xff] %vm279_vm2, %v5414_v55  ;;  %v7703_v28 = vld [vmem:[#allocation3 + $0x90] sm:$0xff]  ;;  %v6003_v56 = vld [vmem:[#allocation2 + $0x188] sm:$0xff]  ;;  %v6997_v5 = vor.u32 1.1754944e-38, %v6996_v50 }
 0x4f5   : > { %v6324_v2 = vld [vmem:[#allocation4 + $0xb8] sm:$0xff]  ;;  %v11806_v4 = vadd.f32 1.0, %v8683_v25  ;;  %v8685_v39 = vpop.eup %8684  ;;  %v6975_v3 = vadd.f32 %v11776_v9, %v6974_v6 }
 0x4f6   : > { %v6370_v22 = vadd.f32 %v6324_v2, %v11723_v29  ;;  %8686 = vpow2.f32 %v6623_v62  ;;  %5938 = vst.msk [vmem:[#allocation4 + $0xc0] sm:$0xff] %vm279_vm2, %v5892_v1  ;;  %v7748_v51 = vadd.f32 %v7702_v15, %v7656_v34  ;;  %v6983_v29 = vor.u32 1.1754944e-38, %v6982_v48  ;;  %v11859_v34 = vld [vmem:[%s12488_s6] ss:$0 sm:$0xff] }
 0x4f7   : > { %v4807_v17 = vpop.f32.mrf.mxu3  ;;  %8370 = vmatmul.msk.f32.gmra.mxu2 %vm279_vm2, %v6002_v45  ;;  %v6986_v19 = vmul.f32 %v8685_v39, %v11770_v18  ;;  %8688 = vrcp.f32 %v11806_v4  ;;  %v6979_v61 = vsel %vm6978_vm0, %v11776_v9, %v6975_v3  ;;  %v7502_v9 = vpop.permute.xlu1 %7501  ;;  %vm6991_vm8 = vweird.f32 %v8685_v39 }
 0x4f8   : > { %v4937_v52 = vadd.f32 %v4891_v16, %v4807_v17  ;;  %6416 = vst.msk [vmem:[#allocation4 + $0xb8] sm:$0xff] %vm279_vm2, %v6370_v22  ;;  %v6984_v36 = vsel %vm6981_vm5, %v6983_v29, %v6979_v61  ;;  %vm6992_vm0 = vmor %vm6990_vm13, %vm6991_vm8  ;;  %vm6995_vm5 = vcmp.eq.f32.partialorder %v6994_v35, 8.507059e+37  ;;  %v7008_v2 = vand.u32 2147483647, %v11806_v4  ;;  %v4568_v17 = vld [vmem:[#allocation2 + $0x181] sm:$0xff]  ;;  %v7507_v16 = vpop.permute.xlu2 %7506  ;;  %v11870_v3 = vpop.f32.mrf.mxu0  ;;  %v4892_v61 = vld [vmem:[#allocation4 + $0xe0] sm:$0xff] }
 0x4f9   : > { %v5369_v7 = vld [vmem:[#allocation4 + $0xd0] sm:$0xff]  ;;  %7804 = vst.msk [vmem:[%s11235_s13 + $0x5e] sm:$0xfc] %vm12490_vm11, %v7748_v51  ;;  %v6987_v14 = vsub.f32 1.0, %v6986_v19  ;;  %v7381_v53 = vmul.f32 %v6984_v36, %v11685_v44  ;;  %v7010_v1 = vand.u32 2147483648, %v11806_v4  ;;  %vm12491_vm13 = vcmask 58368  }
 0x4fa   : > { %4983 = vst.msk [vmem:[#allocation4 + $0xd8] sm:$0xff] %vm279_vm2, %v4937_v52  ;;  %v5415_v41 = vadd.f32 %v5369_v7, %v11650_v31  ;;  %v11826_v8 = vpop.f32.mrf.mxu2  ;;  %v6461_v59 = vld [vmem:[#allocation4 + $0xb0] sm:$0xff]  ;;  %v7704_v7 = vld [vmem:[#allocation3 + $0x98] sm:$0xff]  ;;  %vm7009_vm11 = vcmp.eq.f32.partialorder %v7008_v2, 8.507059e+37 }
 0x4fb   : > { %v6988_v63 = vmul.f32 %v8685_v39, %v6987_v14  ;;  %v7657_v31 = vmul.f32 %v7502_v9, %v7381_v53  ;;  %v11836_v10 = vadd.f32 %v11459_v38, %v6461_v59  ;;  %v5847_v44 = vld [vmem:[#allocation4 + $0xc8] sm:$0xff]  ;;  %v6004_v53 = vld [vmem:[#allocation2 + $0x190] sm:$0xff] }
 0x4fc   : > { %8231 = vmatmul.msk.f32.gmra.mxu3 %vm279_vm2, %v4567_v23  ;;  %5461 = vst.msk [vmem:[#allocation4 + $0xd0] sm:$0xff] %vm279_vm2, %v5415_v41  ;;  %v8687_v49 = vpop.eup %8686  ;;  %v5893_v11 = vadd.f32 %v5847_v44, %v11665_v58  ;;  %v4893_v9 = vld [vmem:[#allocation4 + $0xe8] sm:$0xff] }
 0x4fd   : > { %v11838_v60 = vpop.eup %8688  ;;  %v6989_v47 = vadd.f32 %v8685_v39, %v6988_v63  ;;  %v11841_v54 = vadd.f32 1.0, %v8687_v49  ;;  %v7749_v27 = vadd.f32 %v7703_v28, %v7657_v31  ;;  %v6557_v24 = vsub.f32 0.0, %v11836_v10  ;;  %v6325_v55 = vld [vmem:[#allocation4 + $0xc0] sm:$0xff] }
 0x4fe   : > { %v7000_v38 = vmul.f32 %v11838_v60, %v11806_v4  ;;  %5939 = vst.msk [vmem:[#allocation4 + $0xc8] sm:$0xff] %vm279_vm2, %v5893_v11  ;;  %vm7005_vm8 = vweird.f32 %v11838_v60 }
 0x4ff   : > { %v4810_v37 = vpop.f32.mrf.mxu3  ;;  %v6462_v48 = vld [vmem:[#allocation4 + $0xb8] sm:$0xff]  ;;  %8371 = vmatmul.msk.f32.gmra.mxu2 %vm279_vm2, %v6003_v56  ;;  %v6993_v18 = vsel %vm6992_vm0, %v8685_v39, %v6989_v47  ;;  %8690 = vrcp.f32 %v11841_v54  ;;  %7805 = vst.msk [vmem:[%s11235_s13 + $0x66] sm:$0xff] %vm279_vm2, %v7749_v27  ;;  %v6625_v21 = vmul.f32 1.442695, %v6557_v24  ;;  %vm7004_vm0 = vweird.f32 %v11806_v4  ;;  %v11885_v4 = vpop.f32.mrf.mxu1 }
 0x500   : > { %v6998_v58 = vsel %vm6995_vm5, %v6997_v5, %v6993_v18  ;;  %v7001_v25 = vsub.f32 1.0, %v7000_v38  ;;  %v11862_v22 = vadd.f32 %v11859_v34, %v6462_v48  ;;  %vm11880_vm5 = vmor %vm7004_vm0, %vm7005_vm8  ;;  %v7022_v56 = vand.u32 2147483647, %v11841_v54 }
 0x501   : > { %v5370_v6 = vld [vmem:[#allocation4 + $0xd8] sm:$0xff]  ;;  %v7382_v62 = vmul.f32 %v6998_v58, %v11721_v0  ;;  %8692 = vpow2.f32 %v6625_v21  ;;  %v6371_v0 = vadd.f32 %v6325_v55, %v11757_v12  ;;  %v4938_v12 = vadd.f32 %v4892_v61, %v4810_v37  ;;  %v11911_v21 = vpop.f32.mrf.mxu0 }
 0x502   : > { %v11864_v45 = vpop.f32.mrf.mxu2  ;;  %v7002_v39 = vmul.f32 %v11838_v60, %v7001_v25  ;;  %v6558_v51 = vsub.f32 0.0, %v11862_v22  ;;  %v5416_v29 = vadd.f32 %v5370_v6, %v11692_v57  ;;  %v7011_v57 = vor.u32 1.1754944e-38, %v7010_v1  ;;  %v6005_v1 = vld [vmem:[#allocation2 + $0x198] sm:$0xff] }
 0x503   : > { %v5848_v15 = vld [vmem:[#allocation4 + $0xd0] sm:$0xff]  ;;  %v7658_v52 = vmul.f32 %v7507_v16, %v7382_v62  ;;  %6417 = vst.msk [vmem:[#allocation4 + $0xc0] sm:$0xff] %vm279_vm2, %v6371_v0  ;;  %v7024_v37 = vand.u32 2147483648, %v11841_v54  ;;  %vm12492_vm8 = vcmask 64513   ;;  %vm7018_vm0 = vweird.f32 %v11841_v54 }
 0x504   : > { %8232 = vmatmul.msk.f32.gmra.mxu3 %vm279_vm2, %v4568_v17  ;;  %v5894_v19 = vadd.f32 %v5848_v15, %v11704_v40  ;;  %v7003_v36 = vadd.f32 %v11838_v60, %v7002_v39  ;;  %v6627_v40 = vmul.f32 1.442695, %v6558_v51  ;;  %5462 = vst.msk [vmem:[#allocation4 + $0xd8] sm:$0xff] %vm279_vm2, %v5416_v29  ;;  %v4894_v15 = vld [vmem:[#allocation4 + $0xf0] sm:$0xff] }
 0x505   : > { %v8691_v14 = vpop.eup %8690  ;;  %v7750_v41 = vadd.f32 %v7704_v7, %v7658_v52  ;;  %v6326_v59 = vld [vmem:[#allocation4 + $0xc8] sm:$0xff]  ;;  %4984 = vst.msk [vmem:[#allocation4 + $0xe0] sm:$0xff] %vm279_vm2, %v4938_v12  ;;  %v7025_v6 = vor.u32 1.1754944e-38, %v7024_v37 }
 0x506   : > { %v7007_v63 = vsel %vm11880_vm5, %v11838_v60, %v7003_v36  ;;  %v7014_v35 = vmul.f32 %v8691_v14, %v11841_v54  ;;  %5940 = vst.msk [vmem:[#allocation4 + $0xd0] sm:$0xff] %vm279_vm2, %v5894_v19  ;;  %8694 = vpow2.f32 %v6627_v40  ;;  %v6372_v44 = vadd.f32 %v6326_v59, %v11789_v20  ;;  %v7512_v60 = vpop.permute.xlu0 %7511  ;;  %v7517_v36 = vpop.permute.xlu1 %7516  ;;  %v7706_v40 = vld [vmem:[#allocation3 + $0xa8] sm:$0xff] }
 0x507   : > { %v4813_v50 = vpop.f32.mrf.mxu3  ;;  %8372 = vmatmul.msk.f32.gmra.mxu2 %vm279_vm2, %v6004_v53  ;;  %7807 = vst.msk [vmem:[%s11235_s13 + $0x6e] sm:$0x3] %vm12491_vm13, %v7750_v41  ;;  %v7012_v31 = vsel %vm7009_vm11, %v7011_v57, %v7007_v63  ;;  %v8693_v28 = vpop.eup %8692  ;;  %vm7019_vm11 = vweird.f32 %v8691_v14  ;;  %vm7023_vm13 = vcmp.eq.f32.partialorder %v7022_v56, 8.507059e+37 }
 0x508   : > { %v4939_v49 = vadd.f32 %v4893_v9, %v4813_v50  ;;  %v7383_v47 = vmul.f32 %v7012_v31, %v11742_v42  ;;  %v7015_v11 = vsub.f32 1.0, %v7014_v35  ;;  %v11900_v27 = vadd.f32 1.0, %v8693_v28  ;;  %6418 = vst.msk [vmem:[#allocation4 + $0xc8] sm:$0xff] %vm279_vm2, %v6372_v44  ;;  %v7705_v42 = vld [vmem:[#allocation3 + $0xa0] sm:$0xff]  ;;  %vm7020_vm5 = vmor %vm7018_vm0, %vm7019_vm11  ;;  %v4895_v31 = vld [vmem:[#allocation4 + $0xf8] sm:$0xff] }
 0x50a   : > { %v11903_v5 = vpop.f32.mrf.mxu2  ;;  %v7659_v38 = vmul.f32 %v7512_v60, %v7383_v47  ;;  %v7016_v24 = vmul.f32 %v8691_v14, %v7015_v11  ;;  %4985 = vst.msk [vmem:[#allocation4 + $0xe8] sm:$0xff] %vm279_vm2, %v4939_v49  ;;  %8696 = vrcp.f32 %v11900_v27  ;;  %v6463_v20 = vld [vmem:[#allocation4 + $0xc0] sm:$0xff]  ;;  %v7038_v35 = vand.u32 2147483648, %v11900_v27 }
 0x50b   : > { %v11909_v55 = vadd.f32 %v11859_v34, %v6463_v20  ;;  %v5849_v58 = vld [vmem:[#allocation4 + $0xd8] sm:$0xff]  ;;  %vm7032_vm11 = vweird.f32 %v11900_v27 }
 0x50c   : > { %v7751_v48 = vadd.f32 %v7705_v42, %v7659_v38  ;;  %v7017_v18 = vadd.f32 %v8691_v14, %v7016_v24  ;;  %v8695_v25 = vpop.eup %8694  ;;  %v5895_v2 = vadd.f32 %v5849_v58, %v11746_v26  ;;  %v5371_v51 = vld [vmem:[#allocation4 + $0xe0] sm:$0xff]  ;;  %v11922_v26 = vpop.f32.mrf.mxu1 }
 0x50d   : > { %v6327_v62 = vld [vmem:[#allocation4 + $0xd0] sm:$0xff]  ;;  %v11916_v39 = vadd.f32 1.0, %v8695_v25  ;;  %v6559_v54 = vsub.f32 0.0, %v11909_v55 }
 0x50e   : > { %7809 = vst.msk [vmem:[%s11235_s13 + $0x6f] sm:$0xfe] %vm12492_vm8, %v7751_v48  ;;  %v7021_v16 = vsel %vm7020_vm5, %v8691_v14, %v7017_v18  ;;  %v6373_v0 = vadd.f32 %v6327_v62, %v11826_v8  ;;  %v5417_v14 = vadd.f32 %v5371_v51, %v11732_v43  ;;  %v7036_v43 = vand.u32 2147483647, %v11900_v27 }
 0x50f   : > { %v4816_v17 = vpop.f32.mrf.mxu3  ;;  %8373 = vmatmul.msk.f32.gmra.mxu2 %vm279_vm2, %v6005_v1  ;;  %v7026_v52 = vsel %vm7023_vm13, %v7025_v6, %v7021_v16  ;;  %5941 = vst.msk [vmem:[#allocation4 + $0xd8] sm:$0xff] %vm279_vm2, %v5895_v2  ;;  %8698 = vrcp.f32 %v11916_v39  ;;  %v6464_v61 = vld [vmem:[#allocation4 + $0xc8] sm:$0xff]  ;;  %v6629_v8 = vmul.f32 1.442695, %v6559_v54  ;;  %v7039_v18 = vor.u32 1.1754944e-38, %v7038_v35 }
 0x510   : > { %v4940_v29 = vadd.f32 %v4894_v15, %v4816_v17  ;;  %v7384_v19 = vmul.f32 %v7026_v52, %v11773_v13  ;;  %6419 = vst.msk [vmem:[#allocation4 + $0xd0] sm:$0xff] %vm279_vm2, %v6373_v0  ;;  %v8697_v7 = vpop.eup %8696  ;;  %v11928_v12 = vadd.f32 %v11859_v34, %v6464_v61  ;;  %vm11951_vm0 = vcmp.eq.f32.partialorder %v7036_v43, 8.507059e+37 }
 0x511   : > { %v5372_v41 = vld [vmem:[#allocation4 + $0xe8] sm:$0xff]  ;;  %v7028_v13 = vmul.f32 %v8697_v7, %v11900_v27  ;;  %8700 = vpow2.f32 %v6629_v8  ;;  %5463 = vst.msk [vmem:[#allocation4 + $0xe0] sm:$0xff] %vm279_vm2, %v5417_v14  ;;  %vm7033_vm13 = vweird.f32 %v8697_v7  ;;  %v7052_v2 = vand.u32 2147483648, %v11916_v39 }
 0x512   : > { %4986 = vst.msk [vmem:[#allocation4 + $0xf0] sm:$0xff] %vm279_vm2, %v4940_v29  ;;  %v11932_v23 = vpop.f32.mrf.mxu2  ;;  %v7660_v57 = vmul.f32 %v7517_v36, %v7384_v19  ;;  %v6560_v53 = vsub.f32 0.0, %v11928_v12  ;;  %v5418_v50 = vadd.f32 %v5372_v41, %v11778_v46  ;;  %v11945_v46 = vpop.f32.mrf.mxu0  ;;  %vm7034_vm5 = vmor %vm7032_vm11, %vm7033_vm13  ;;  %vm7046_vm11 = vweird.f32 %v11916_v39 }
 0x513   : > { %v7029_v63 = vsub.f32 1.0, %v7028_v13  ;;  %v7522_v29 = vpop.permute.xlu2 %7521 }
 0x514   : > { %v7752_v9 = vadd.f32 %v7706_v40, %v7660_v57  ;;  %v6631_v59 = vmul.f32 1.442695, %v6560_v53  ;;  %5464 = vst.msk [vmem:[#allocation4 + $0xe8] sm:$0xff] %vm279_vm2, %v5418_v50  ;;  %v11965_v6 = vpop.f32.mrf.mxu1  ;;  %v7707_v57 = vld [vmem:[#allocation3 + $0xb0] sm:$0xff] }
 0x515   : > { %v11941_v44 = vpop.eup %8698  ;;  %v7030_v28 = vmul.f32 %v8697_v7, %v7029_v63 }
 0x516   : > { %7810 = vst.msk [vmem:[%s11235_s13 + $0x77] sm:$0xff] %vm279_vm2, %v7752_v9  ;;  %v6328_v47 = vld [vmem:[#allocation4 + $0xd8] sm:$0xff]  ;;  %v7042_v60 = vmul.f32 %v11941_v44, %v11916_v39  ;;  %8702 = vpow2.f32 %v6631_v59  ;;  %vm7047_vm13 = vweird.f32 %v11941_v44  ;;  %v7527_v59 = vpop.permute.xlu0 %7526 }
 0x517   : > { %v4819_v49 = vpop.f32.mrf.mxu3  ;;  %v6465_v56 = vld [vmem:[#allocation4 + $0xd0] sm:$0xff]  ;;  %v6374_v37 = vadd.f32 %v6328_v47, %v11864_v45  ;;  %v7031_v38 = vadd.f32 %v8697_v7, %v7030_v28  ;;  %v8701_v48 = vpop.eup %8700  ;;  %v7050_v45 = vand.u32 2147483647, %v11916_v39  ;;  %v7708_v47 = vld [vmem:[#allocation3 + $0xb8] sm:$0xff] }
 0x518   : > { %v4941_v11 = vadd.f32 %v4895_v31, %v4819_v49  ;;  %v11956_v42 = vadd.f32 %v11859_v34, %v6465_v56  ;;  %v7043_v58 = vsub.f32 1.0, %v7042_v60  ;;  %v11968_v1 = vadd.f32 1.0, %v8701_v48  ;;  %v5850_v16 = vld [vmem:[#allocation4 + $0xe0] sm:$0xff] }
 0x519   : > { %v5373_v20 = vld [vmem:[#allocation4 + $0xf0] sm:$0xff]  ;;  %6420 = vst.msk [vmem:[#allocation4 + $0xd8] sm:$0xff] %vm279_vm2, %v6374_v37  ;;  %v7035_v62 = vsel %vm7034_vm5, %v8697_v7, %v7031_v38  ;;  %vm12493_vm5 = vcmask 57344   ;;  %vm7051_vm8 = vcmp.eq.f32.partialorder %v7050_v45, 8.507059e+37 }
 0x51a   : > { %4987 = vst.msk [vmem:[#allocation4 + $0xf8] sm:$0xff] %vm279_vm2, %v4941_v11  ;;  %v5419_v27 = vadd.f32 %v5373_v20, %v11821_v32  ;;  %v11963_v25 = vpop.f32.mrf.mxu2  ;;  %v6561_v17 = vsub.f32 0.0, %v11956_v42  ;;  %v7040_v54 = vsel %vm11951_vm0, %v7039_v18, %v7035_v62  ;;  %v7044_v0 = vmul.f32 %v11941_v44, %v7043_v58  ;;  %vm7048_vm0 = vmor %vm7046_vm11, %vm7047_vm13  ;;  %v11991_v50 = vpop.f32.mrf.mxu0  ;;  %v4897_v18 = vld [vmem:[#allocation4 + $0x108] sm:$0xff] }
 0x51b   : > { %v5896_v32 = vadd.f32 %v5850_v16, %v11791_v30  ;;  %v7385_v15 = vmul.f32 %v7040_v54, %v11836_v10  ;;  %8704 = vrcp.f32 %v11968_v1  ;;  %v5851_v52 = vld [vmem:[#allocation4 + $0xe8] sm:$0xff]  ;;  %v4896_v30 = vld [vmem:[#allocation4 + $0x100] sm:$0xff]  ;;  %v7053_v10 = vor.u32 1.1754944e-38, %v7052_v2 }
 0x51c   : > { %5465 = vst.msk [vmem:[#allocation4 + $0xf0] sm:$0xff] %vm279_vm2, %v5419_v27  ;;  %v8703_v51 = vpop.eup %8702  ;;  %v7045_v19 = vadd.f32 %v11941_v44, %v7044_v0  ;;  %v6633_v61 = vmul.f32 1.442695, %v6561_v17  ;;  %v5897_v7 = vadd.f32 %v5851_v52, %v11833_v33  ;;  %v12003_v11 = vpop.f32.mrf.mxu1  ;;  %v7066_v45 = vand.u32 2147483648, %v11968_v1 }
 0x51d   : > { %5942 = vst.msk [vmem:[#allocation4 + $0xe0] sm:$0xff] %vm279_vm2, %v5896_v32  ;;  %v7661_v8 = vmul.f32 %v7522_v29, %v7385_v15  ;;  %v11985_v14 = vadd.f32 1.0, %v8703_v51  ;;  %vm7060_vm13 = vweird.f32 %v11968_v1 }
 0x51e   : > { %v7049_v13 = vsel %vm7048_vm0, %v11941_v44, %v7045_v19  ;;  %8706 = vpow2.f32 %v6633_v61  ;;  %5943 = vst.msk [vmem:[#allocation4 + $0xe8] sm:$0xff] %vm279_vm2, %v5897_v7  ;;  %v7067_v51 = vor.u32 1.1754944e-38, %v7066_v45 }
 0x51f   : > { %v4822_v36 = vpop.f32.mrf.mxu3  ;;  %v7753_v39 = vadd.f32 %v7707_v57, %v7661_v8  ;;  %v7054_v40 = vsel %vm7051_vm8, %v7053_v10, %v7049_v13  ;;  %8708 = vrcp.f32 %v11985_v14  ;;  %v7078_v61 = vand.u32 2147483647, %v11985_v14  ;;  %v4898_v57 = vld [vmem:[#allocation4 + $0x110] sm:$0xff] }
 0x520   : > { %v4942_v41 = vadd.f32 %v4896_v30, %v4822_v36  ;;  %v6466_v53 = vld [vmem:[#allocation4 + $0xd8] sm:$0xff]  ;;  %v7386_v9 = vmul.f32 %v7054_v40, %v11862_v22 }
 0x521   : > { %v5374_v33 = vld [vmem:[#allocation4 + $0xf8] sm:$0xff]  ;;  %v11995_v63 = vadd.f32 %v11859_v34, %v6466_v53  ;;  %v8705_v35 = vpop.eup %8704  ;;  %7812 = vst.msk [vmem:[%s11235_s13 + $0x7f] sm:$0x1] %vm12493_vm5, %v7753_v39 }
 0x522   : > { %4988 = vst.msk [vmem:[#allocation4 + $0x100] sm:$0xff] %vm279_vm2, %v4942_v41  ;;  %v11997_v43 = vpop.f32.mrf.mxu2  ;;  %v5420_v49 = vadd.f32 %v5374_v33, %v11870_v3  ;;  %v7662_v44 = vmul.f32 %v7527_v59, %v7386_v9  ;;  %v7056_v28 = vmul.f32 %v8705_v35, %v11968_v1  ;;  %v7064_v3 = vand.u32 2147483647, %v11968_v1  ;;  %v12027_v1 = vpop.f32.mrf.mxu0 }
 0x523   : > { %v5852_v31 = vld [vmem:[#allocation4 + $0xf0] sm:$0xff]  ;;  %v6562_v22 = vsub.f32 0.0, %v11995_v63  ;;  %vm7061_vm8 = vweird.f32 %v8705_v35  ;;  %v7532_v33 = vpop.permute.xlu1 %7531 }
 0x524   : > { %v6329_v60 = vld [vmem:[#allocation4 + $0xe0] sm:$0xff]  ;;  %5466 = vst.msk [vmem:[#allocation4 + $0xf8] sm:$0xff] %vm279_vm2, %v5420_v49  ;;  %v5898_v56 = vadd.f32 %v5852_v31, %v11885_v4  ;;  %v8707_v37 = vpop.eup %8706  ;;  %v7754_v38 = vadd.f32 %v7708_v47, %v7662_v44  ;;  %v7057_v24 = vsub.f32 1.0, %v7056_v28  ;;  %vm7062_vm11 = vmor %vm7060_vm13, %vm7061_vm8  ;;  %vm7065_vm0 = vcmp.eq.f32.partialorder %v7064_v3, 8.507059e+37  ;;  %v12036_v39 = vpop.f32.mrf.mxu1  ;;  %v7709_v49 = vld [vmem:[#allocation3 + $0xc0] sm:$0xff] }
 0x525   : > { %v6375_v20 = vadd.f32 %v6329_v60, %v11903_v5  ;;  %v8709_v58 = vpop.eup %8708  ;;  %v12011_v27 = vadd.f32 1.0, %v8707_v37  ;;  %v6635_v62 = vmul.f32 1.442695, %v6562_v22  ;;  %v6330_v2 = vld [vmem:[#allocation4 + $0xe8] sm:$0xff]  ;;  %vm7074_vm8 = vweird.f32 %v11985_v14 }
 0x526   : > { %5944 = vst.msk [vmem:[#allocation4 + $0xf0] sm:$0xff] %vm279_vm2, %v5898_v56  ;;  %v7058_v4 = vmul.f32 %v8705_v35, %v7057_v24  ;;  %v7070_v16 = vmul.f32 %v8709_v58, %v11985_v14  ;;  %v6376_v5 = vadd.f32 %v6330_v2, %v11932_v23  ;;  %v7080_v23 = vand.u32 2147483648, %v11985_v14  ;;  %v7537_v24 = vpop.permute.xlu2 %7536 }
 0x527   : > { %v4825_v48 = vpop.f32.mrf.mxu3  ;;  %7813 = vst.msk [vmem:[%s11235_s13 + $0x80] sm:$0xff] %vm279_vm2, %v7754_v38  ;;  %8710 = vrcp.f32 %v12011_v27  ;;  %vm7075_vm5 = vweird.f32 %v8709_v58  ;;  %v7092_v3 = vand.u32 2147483647, %v12011_v27 }
 0x528   : > { %v4943_v17 = vadd.f32 %v4897_v18, %v4825_v48  ;;  %6421 = vst.msk [vmem:[#allocation4 + $0xe0] sm:$0xff] %vm279_vm2, %v6375_v20  ;;  %v7059_v0 = vadd.f32 %v8705_v35, %v7058_v4  ;;  %v7071_v32 = vsub.f32 1.0, %v7070_v16  ;;  %8712 = vpow2.f32 %v6635_v62  ;;  %vm7076_vm13 = vmor %vm7074_vm8, %vm7075_vm5  ;;  %v7710_v62 = vld [vmem:[#allocation3 + $0xc8] sm:$0xff] }
 0x529   : > { %v5375_v54 = vld [vmem:[#allocation4 + $0x100] sm:$0xff]  ;;  %6422 = vst.msk [vmem:[#allocation4 + $0xe8] sm:$0xff] %vm279_vm2, %v6376_v5  ;;  %v7081_v40 = vor.u32 1.1754944e-38, %v7080_v23  ;;  %v7094_v20 = vand.u32 2147483648, %v12011_v27 }
 0x52a   : > { %v5421_v15 = vadd.f32 %v5375_v54, %v11911_v21  ;;  %v12023_v52 = vpop.f32.mrf.mxu2  ;;  %4989 = vst.msk [vmem:[#allocation4 + $0x108] sm:$0xff] %vm279_vm2, %v4943_v17  ;;  %v7063_v29 = vsel %vm7062_vm11, %v8705_v35, %v7059_v0  ;;  %v7072_v19 = vmul.f32 %v8709_v58, %v7071_v32  ;;  %vm7079_vm11 = vcmp.eq.f32.partialorder %v7078_v61, 8.507059e+37  ;;  %v12068_v4 = vpop.f32.mrf.mxu0 }
 0x52b   : > { %v5853_v7 = vld [vmem:[#allocation4 + $0xf8] sm:$0xff]  ;;  %v7068_v21 = vsel %vm7065_vm0, %v7067_v51, %v7063_v29  ;;  %vm7088_vm0 = vweird.f32 %v12011_v27  ;;  %v7095_v23 = vor.u32 1.1754944e-38, %v7094_v20 }
 0x52c   : > { %5467 = vst.msk [vmem:[#allocation4 + $0x100] sm:$0xff] %vm279_vm2, %v5421_v15  ;;  %v5899_v36 = vadd.f32 %v5853_v7, %v11922_v26  ;;  %v7387_v30 = vmul.f32 %v7068_v21, %v11909_v55  ;;  %v7073_v8 = vadd.f32 %v8709_v58, %v7072_v19  ;;  %v4899_v51 = vld [vmem:[#allocation4 + $0x118] sm:$0xff]  ;;  %v12078_v61 = vpop.f32.mrf.mxu1 }
 0x52d   : > { %v6331_v10 = vld [vmem:[#allocation4 + $0xf0] sm:$0xff]  ;;  %v12034_v13 = vpop.eup %8710 }
 0x52e   : > { %v6377_v53 = vadd.f32 %v6331_v10, %v11963_v25  ;;  %5945 = vst.msk [vmem:[#allocation4 + $0xf8] sm:$0xff] %vm279_vm2, %v5899_v36  ;;  %v8713_v55 = vpop.eup %8712  ;;  %v7663_v9 = vmul.f32 %v7532_v33, %v7387_v30  ;;  %v7077_v35 = vsel %vm7076_vm13, %v8709_v58, %v7073_v8  ;;  %v7084_v14 = vmul.f32 %v12034_v13, %v12011_v27 }
 0x52f   : > { %v4828_v41 = vpop.f32.mrf.mxu3  ;;  %v6467_v59 = vld [vmem:[#allocation4 + $0xe0] sm:$0xff]  ;;  %v7082_v31 = vsel %vm7079_vm11, %v7081_v40, %v7077_v35  ;;  %v12043_v44 = vadd.f32 1.0, %v8713_v55  ;;  %vm7089_vm5 = vweird.f32 %v12034_v13  ;;  %vm7093_vm13 = vcmp.eq.f32.partialorder %v7092_v3, 8.507059e+37 }
 0x530   : > { %v4944_v26 = vadd.f32 %v4898_v57, %v4828_v41  ;;  %v12046_v28 = vadd.f32 %v11859_v34, %v6467_v59  ;;  %v6468_v25 = vld [vmem:[#allocation4 + $0xe8] sm:$0xff]  ;;  %6423 = vst.msk [vmem:[#allocation4 + $0xf0] sm:$0xff] %vm279_vm2, %v6377_v53  ;;  %v7755_v47 = vadd.f32 %v7709_v49, %v7663_v9  ;;  %v7388_v22 = vmul.f32 %v7082_v31, %v11928_v12  ;;  %vm7090_vm8 = vmor %vm7088_vm0, %vm7089_vm5  ;;  %v7542_v41 = vpop.permute.xlu0 %7541  ;;  %v7711_v40 = vld [vmem:[#allocation3 + $0xd0] sm:$0xff] }
 0x531   : > { %v7085_v60 = vsub.f32 1.0, %v7084_v14  ;;  %v12051_v56 = vadd.f32 %v11859_v34, %v6468_v25  ;;  %v5376_v37 = vld [vmem:[#allocation4 + $0x108] sm:$0xff]  ;;  %8714 = vrcp.f32 %v12043_v44  ;;  %v4900_v59 = vld [vmem:[#allocation4 + $0x120] sm:$0xff]  ;;  %vm7102_vm11 = vweird.f32 %v12043_v44 }
 0x532   : > { %4990 = vst.msk [vmem:[#allocation4 + $0x110] sm:$0xff] %vm279_vm2, %v4944_v26  ;;  %v12054_v38 = vpop.f32.mrf.mxu2  ;;  %v7664_v12 = vmul.f32 %v7537_v24, %v7388_v22  ;;  %v6563_v58 = vsub.f32 0.0, %v12046_v28  ;;  %v5422_v2 = vadd.f32 %v5376_v37, %v11945_v46  ;;  %v12098_v22 = vpop.f32.mrf.mxu0 }
 0x533   : > { %v5854_v48 = vld [vmem:[#allocation4 + $0x100] sm:$0xff]  ;;  %7814 = vst.msk [vmem:[%s11235_s13 + $0x88] sm:$0xff] %vm279_vm2, %v7755_v47  ;;  %v7086_v18 = vmul.f32 %v12034_v13, %v7085_v60  ;;  %v6564_v45 = vsub.f32 0.0, %v12051_v56 }
 0x534   : > { %v5900_v17 = vadd.f32 %v5854_v48, %v11965_v6  ;;  %v7756_v16 = vadd.f32 %v7710_v62, %v7664_v12  ;;  %v6637_v54 = vmul.f32 1.442695, %v6563_v58  ;;  %5468 = vst.msk [vmem:[#allocation4 + $0x108] sm:$0xff] %vm279_vm2, %v5422_v2  ;;  %v12110_v12 = vpop.f32.mrf.mxu1 }
 0x535   : > { %v7087_v5 = vadd.f32 %v12034_v13, %v7086_v18  ;;  %v6639_v0 = vmul.f32 1.442695, %v6564_v45  ;;  %v6332_v32 = vld [vmem:[#allocation4 + $0xf8] sm:$0xff] }
 0x536   : > { %v6378_v27 = vadd.f32 %v6332_v32, %v11997_v43  ;;  %7815 = vst.msk [vmem:[%s11235_s13 + $0x89] sm:$0x80] %vm7779_vm3, %v7756_v16  ;;  %8716 = vpow2.f32 %v6637_v54  ;;  %v7547_v16 = vpop.permute.xlu1 %7546 }
 0x537   : > { %v4831_v15 = vpop.f32.mrf.mxu3  ;;  %v7091_v6 = vsel %vm7090_vm8, %v12034_v13, %v7087_v5  ;;  %v6469_v29 = vld [vmem:[#allocation4 + $0xf0] sm:$0xff]  ;;  %v8715_v19 = vpop.eup %8714  ;;  %8718 = vpow2.f32 %v6639_v0  ;;  %5946 = vst.msk [vmem:[#allocation4 + $0x100] sm:$0xff] %vm279_vm2, %v5900_v17 }
 0x538   : > { %v4945_v46 = vadd.f32 %v4899_v51, %v4831_v15  ;;  %v7096_v7 = vsel %vm7093_vm13, %v7095_v23, %v7091_v6  ;;  %v12081_v21 = vadd.f32 %v11859_v34, %v6469_v29  ;;  %6424 = vst.msk [vmem:[#allocation4 + $0xf8] sm:$0xff] %vm279_vm2, %v6378_v27  ;;  %v7098_v30 = vmul.f32 %v8715_v19, %v12043_v44  ;;  %v7712_v27 = vld [vmem:[#allocation3 + $0xd8] sm:$0xff] }
 0x539   : > { %v5377_v43 = vld [vmem:[#allocation4 + $0x110] sm:$0xff]  ;;  %v7389_v36 = vmul.f32 %v7096_v7, %v11956_v42  ;;  %v7108_v42 = vand.u32 2147483648, %v12043_v44  ;;  %vm7103_vm3 = vweird.f32 %v8715_v19 }
 0x53a   : > { %v5423_v8 = vadd.f32 %v5377_v43, %v11991_v50  ;;  %v12088_v10 = vpop.f32.mrf.mxu2  ;;  %v6565_v57 = vsub.f32 0.0, %v12081_v21  ;;  %4991 = vst.msk [vmem:[#allocation4 + $0x118] sm:$0xff] %vm279_vm2, %v4945_v46  ;;  %v7099_v33 = vsub.f32 1.0, %v7098_v30  ;;  %v7106_v50 = vand.u32 2147483647, %v12043_v44  ;;  %vm7104_vm5 = vmor %vm7102_vm11, %vm7103_vm3  ;;  %v12137_v30 = vpop.f32.mrf.mxu0 }
 0x53b   : > { %v7665_v13 = vmul.f32 %v7542_v41, %v7389_v36  ;;  %v5855_v35 = vld [vmem:[#allocation4 + $0x108] sm:$0xff]  ;;  %v7109_v24 = vor.u32 1.1754944e-38, %v7108_v42 }
 0x53c   : > { %5469 = vst.msk [vmem:[#allocation4 + $0x110] sm:$0xff] %vm279_vm2, %v5423_v8  ;;  %v6641_v53 = vmul.f32 1.442695, %v6565_v57  ;;  %v8717_v26 = vpop.eup %8716  ;;  %v7100_v9 = vmul.f32 %v8715_v19, %v7099_v33  ;;  %v5901_v25 = vadd.f32 %v5855_v35, %v12003_v11  ;;  %vm7107_vm0 = vcmp.eq.f32.partialorder %v7106_v50, 8.507059e+37 }
 0x53d   : > { %v7757_v55 = vadd.f32 %v7711_v40, %v7665_v13  ;;  %v8719_v49 = vpop.eup %8718  ;;  %v12095_v31 = vadd.f32 1.0, %v8717_v26 }
 0x53e   : > { %8720 = vpow2.f32 %v6641_v53  ;;  %v7101_v60 = vadd.f32 %v8715_v19, %v7100_v9  ;;  %v12103_v37 = vadd.f32 1.0, %v8719_v49  ;;  %v6333_v20 = vld [vmem:[#allocation4 + $0x100] sm:$0xff]  ;;  %5947 = vst.msk [vmem:[#allocation4 + $0x108] sm:$0xff] %vm279_vm2, %v5901_v25  ;;  %v12147_v53 = vpop.f32.mrf.mxu1 }
 0x53f   : > { %v4834_v14 = vpop.f32.mrf.mxu3  ;;  %7816 = vst.msk [vmem:[%s11235_s13 + $0x91] sm:$0xff] %vm279_vm2, %v7757_v55  ;;  %8722 = vrcp.f32 %v12095_v31  ;;  %v6470_v3 = vld [vmem:[#allocation4 + $0xf8] sm:$0xff]  ;;  %v6379_v2 = vadd.f32 %v6333_v20, %v12023_v52  ;;  %v7120_v6 = vand.u32 2147483647, %v12095_v31  ;;  %vm7116_vm8 = vweird.f32 %v12095_v31 }
 0x540   : > { %v4946_v47 = vadd.f32 %v4900_v59, %v4834_v14  ;;  %v7105_v11 = vsel %vm7104_vm5, %v8715_v19, %v7101_v60  ;;  %8724 = vrcp.f32 %v12103_v37  ;;  %v12116_v62 = vadd.f32 %v11859_v34, %v6470_v3 }
 0x541   : > { %v5378_v48 = vld [vmem:[#allocation4 + $0x118] sm:$0xff]  ;;  %v7110_v44 = vsel %vm7107_vm0, %v7109_v24, %v7105_v11  ;;  %6425 = vst.msk [vmem:[#allocation4 + $0x100] sm:$0xff] %vm279_vm2, %v6379_v2  ;;  %v7122_v19 = vand.u32 2147483648, %v12095_v31  ;;  %v7134_v43 = vand.u32 2147483647, %v12103_v37  ;;  %v7136_v41 = vand.u32 2147483648, %v12103_v37 }
 0x542   : > { %4992 = vst.msk [vmem:[#allocation4 + $0x120] sm:$0xff] %vm279_vm2, %v4946_v47  ;;  %v12112_v58 = vpop.f32.mrf.mxu2  ;;  %v7390_v45 = vmul.f32 %v7110_v44, %v11995_v63  ;;  %v5424_v5 = vadd.f32 %v5378_v48, %v12027_v1  ;;  %v6566_v15 = vsub.f32 0.0, %v12116_v62  ;;  %v4901_v63 = vld [vmem:[#allocation4 + $0x128] sm:$0xff]  ;;  %vm7130_vm3 = vweird.f32 %v12103_v37  ;;  %v4902_v48 = vld [vmem:[#allocation4 + $0x130] sm:$0xff] }
 0x543   : > { %v5856_v18 = vld [vmem:[#allocation4 + $0x110] sm:$0xff]  ;;  %v7123_v55 = vor.u32 1.1754944e-38, %v7122_v19  ;;  %vm12160_vm5 = vcmp.eq.f32.partialorder %v7134_v43, 8.507059e+37  ;;  %v7137_v59 = vor.u32 1.1754944e-38, %v7136_v41  ;;  %v7714_v19 = vld [vmem:[#allocation3 + $0xe8] sm:$0xff] }
 0x544   : > { %v8721_v17 = vpop.eup %8720  ;;  %v5902_v54 = vadd.f32 %v5856_v18, %v12036_v39  ;;  %v7666_v0 = vmul.f32 %v7547_v16, %v7390_v45  ;;  %5470 = vst.msk [vmem:[#allocation4 + $0x118] sm:$0xff] %vm279_vm2, %v5424_v5  ;;  %v6643_v57 = vmul.f32 1.442695, %v6566_v15  ;;  %v4903_v41 = vld [vmem:[#allocation4 + $0x138] sm:$0xff] }
 0x545   : > { %v12121_v32 = vadd.f32 1.0, %v8721_v17  ;;  %v8723_v23 = vpop.eup %8722  ;;  %v6334_v29 = vld [vmem:[#allocation4 + $0x108] sm:$0xff] }
 0x546   : > { %v12126_v46 = vpop.eup %8724  ;;  %v7758_v1 = vadd.f32 %v7712_v27, %v7666_v0  ;;  %v7112_v39 = vmul.f32 %v8723_v23, %v12095_v31  ;;  %5948 = vst.msk [vmem:[#allocation4 + $0x110] sm:$0xff] %vm279_vm2, %v5902_v54  ;;  %v6380_v13 = vadd.f32 %v6334_v29, %v12054_v38  ;;  %vm7117_vm13 = vweird.f32 %v8723_v23 }
 0x547   : > { %v4837_v51 = vpop.f32.mrf.mxu3  ;;  %8726 = vrcp.f32 %v12121_v32  ;;  %v7126_v7 = vmul.f32 %v12126_v46, %v12103_v37  ;;  %vm7131_vm11 = vweird.f32 %v12126_v46  ;;  %vm7118_vm0 = vmor %vm7116_vm8, %vm7117_vm13  ;;  %v7148_v3 = vand.u32 2147483647, %v12121_v32 }
 0x548   : > { %v4947_v52 = vadd.f32 %v4901_v63, %v4837_v51  ;;  %7817 = vst.msk [vmem:[%s11235_s13 + $0x99] sm:$0x7f] %vm7782_vm10, %v7758_v1  ;;  %v7113_v8 = vsub.f32 1.0, %v7112_v39  ;;  %8728 = vpow2.f32 %v6643_v57  ;;  %vm12149_vm10 = vcmp.eq.f32.partialorder %v7120_v6, 8.507059e+37  ;;  %v6471_v9 = vld [vmem:[#allocation4 + $0x100] sm:$0xff]  ;;  %vm7132_vm12 = vmor %vm7130_vm3, %vm7131_vm11  ;;  %v7552_v51 = vpop.permute.xlu2 %7551  ;;  %v12209_v57 = vpop.f32.mrf.mxu1 }
 0x549   : > { %v5379_v36 = vld [vmem:[#allocation4 + $0x120] sm:$0xff]  ;;  %v7127_v33 = vsub.f32 1.0, %v7126_v7  ;;  %6426 = vst.msk [vmem:[#allocation4 + $0x108] sm:$0xff] %vm279_vm2, %v6380_v13  ;;  %v12165_v49 = vadd.f32 %v11859_v34, %v6471_v9  ;;  %vm7144_vm8 = vweird.f32 %v12121_v32  ;;  %vm7149_vm3 = vcmp.eq.f32.partialorder %v7148_v3, 8.507059e+37 }
 0x54a   : > { %4993 = vst.msk [vmem:[#allocation4 + $0x128] sm:$0xff] %vm279_vm2, %v4947_v52  ;;  %v5425_v40 = vadd.f32 %v5379_v36, %v12068_v4  ;;  %v7114_v42 = vmul.f32 %v8723_v23, %v7113_v8  ;;  %v12156_v4 = vpop.f32.mrf.mxu2  ;;  %v12197_v52 = vpop.f32.mrf.mxu0 }
 0x54b   : > { %v7128_v38 = vmul.f32 %v12126_v46, %v7127_v33  ;;  %v5857_v25 = vld [vmem:[#allocation4 + $0x118] sm:$0xff]  ;;  %v6567_v31 = vsub.f32 0.0, %v12165_v49 }
 0x54c   : > { %5471 = vst.msk [vmem:[#allocation4 + $0x120] sm:$0xff] %vm279_vm2, %v5425_v40  ;;  %v7115_v35 = vadd.f32 %v8723_v23, %v7114_v42  ;;  %v5903_v11 = vadd.f32 %v5857_v25, %v12078_v61 }
 0x54d   : > { %v12158_v50 = vpop.eup %8726  ;;  %v7129_v60 = vadd.f32 %v12126_v46, %v7128_v38  ;;  %v6335_v20 = vld [vmem:[#allocation4 + $0x110] sm:$0xff]  ;;  %v6645_v15 = vmul.f32 1.442695, %v6567_v31 }
 0x54e   : > { %v7140_v24 = vmul.f32 %v12158_v50, %v12121_v32  ;;  %v7119_v44 = vsel %vm7118_vm0, %v8723_v23, %v7115_v35  ;;  %v6381_v18 = vadd.f32 %v6335_v20, %v12088_v10  ;;  %5949 = vst.msk [vmem:[#allocation4 + $0x118] sm:$0xff] %vm279_vm2, %v5903_v11  ;;  %v8729_v54 = vpop.eup %8728  ;;  %v7150_v10 = vand.u32 2147483648, %v12121_v32  ;;  %v7715_v20 = vld [vmem:[#allocation3 + $0xf0] sm:$0xff] }
 0x54f   : > { %v4840_v47 = vpop.f32.mrf.mxu3  ;;  %v7124_v17 = vsel %vm12149_vm10, %v7123_v55, %v7119_v44  ;;  %v7133_v16 = vsel %vm7132_vm12, %v12126_v46, %v7129_v60  ;;  %vm7145_vm12 = vweird.f32 %v12158_v50  ;;  %v12194_v27 = vadd.f32 1.0, %v8729_v54 }
 0x550   : > { %v4948_v2 = vadd.f32 %v4902_v48, %v4840_v47  ;;  %v7141_v5 = vsub.f32 1.0, %v7140_v24  ;;  %v7391_v37 = vmul.f32 %v7124_v17, %v12046_v28  ;;  %v7138_v0 = vsel %vm12160_vm5, %v7137_v59, %v7133_v16  ;;  %6427 = vst.msk [vmem:[#allocation4 + $0x110] sm:$0xff] %vm279_vm2, %v6381_v18  ;;  %v7557_v28 = vpop.permute.xlu0 %7556  ;;  %vm7146_vm13 = vmor %vm7144_vm8, %vm7145_vm12  ;;  %v7562_v59 = vpop.permute.xlu1 %7561 }
 0x551   : > { %v5380_v45 = vld [vmem:[#allocation4 + $0x128] sm:$0xff]  ;;  %v7392_v63 = vmul.f32 %v7138_v0, %v12051_v56  ;;  %8730 = vpow2.f32 %v6645_v15  ;;  %v7713_v56 = vld [vmem:[#allocation3 + $0xe0] sm:$0xff]  ;;  %v7151_v43 = vor.u32 1.1754944e-38, %v7150_v10 }
 0x552   : > { %v5426_v61 = vadd.f32 %v5380_v45, %v12098_v22  ;;  %v7142_v23 = vmul.f32 %v12158_v50, %v7141_v5  ;;  %v6472_v22 = vld [vmem:[#allocation4 + $0x108] sm:$0xff]  ;;  %v7667_v46 = vmul.f32 %v7552_v51, %v7391_v37  ;;  %4994 = vst.msk [vmem:[#allocation4 + $0x130] sm:$0xff] %vm279_vm2, %v4948_v2  ;;  %8732 = vrcp.f32 %v12194_v27  ;;  %v12213_v40 = vpop.f32.mrf.mxu2  ;;  %v12235_v44 = vpop.f32.mrf.mxu0  ;;  %v4904_v45 = vld [vmem:[#allocation4 + $0x140] sm:$0xff] }
 0x553   : > { %v12200_v1 = vadd.f32 %v11859_v34, %v6472_v22  ;;  %v5858_v39 = vld [vmem:[#allocation4 + $0x120] sm:$0xff]  ;;  %v7668_v6 = vmul.f32 %v7557_v28, %v7392_v63  ;;  %v7164_v2 = vand.u32 2147483648, %v12194_v27  ;;  %v7162_v5 = vand.u32 2147483647, %v12194_v27 }
 0x554   : > { %5472 = vst.msk [vmem:[#allocation4 + $0x128] sm:$0xff] %vm279_vm2, %v5426_v61  ;;  %v7143_v29 = vadd.f32 %v12158_v50, %v7142_v23  ;;  %v7759_v7 = vadd.f32 %v7713_v56, %v7667_v46  ;;  %v5904_v33 = vadd.f32 %v5858_v39, %v12110_v12  ;;  %v12242_v61 = vpop.f32.mrf.mxu1  ;;  %v12256_v39 = vld [vmem:[%s12488_s6] ss:$0 sm:$0xff] }
 0x555   : > { %v6568_v36 = vsub.f32 0.0, %v12200_v1  ;;  %v7760_v13 = vadd.f32 %v7714_v19, %v7668_v6  ;;  %v6336_v35 = vld [vmem:[#allocation4 + $0x118] sm:$0xff]  ;;  %v7165_v63 = vor.u32 1.1754944e-38, %v7164_v2  ;;  %vm7163_vm11 = vcmp.eq.f32.partialorder %v7162_v5, 8.507059e+37 }
 0x556   : > { %v7147_v32 = vsel %vm7146_vm13, %v12158_v50, %v7143_v29  ;;  %7818 = vst.msk [vmem:[%s11235_s13 + $0x9a] sm:$0xc0] %vm7784_vm4, %v7759_v7  ;;  %v6382_v12 = vadd.f32 %v6336_v35, %v12112_v58 }
 0x557   : > { %v4843_v8 = vpop.f32.mrf.mxu3  ;;  %v7152_v26 = vsel %vm7149_vm3, %v7151_v43, %v7147_v32  ;;  %v6647_v55 = vmul.f32 1.442695, %v6568_v36  ;;  %7819 = vst.msk [vmem:[%s11235_s13 + $0xa2] sm:$0xff] %vm279_vm2, %v7760_v13  ;;  %v6473_v9 = vld [vmem:[#allocation4 + $0x110] sm:$0xff]  ;;  %v8731_v14 = vpop.eup %8730  ;;  %v4905_v32 = vld [vmem:[#allocation4 + $0x148] sm:$0xff] }
 0x558   : > { %v4949_v42 = vadd.f32 %v4903_v41, %v4843_v8  ;;  %v7393_v38 = vmul.f32 %v7152_v26, %v12081_v21  ;;  %v12221_v50 = vadd.f32 %v11859_v34, %v6473_v9  ;;  %5950 = vst.msk [vmem:[#allocation4 + $0x120] sm:$0xff] %vm279_vm2, %v5904_v33  ;;  %v8733_v47 = vpop.eup %8732  ;;  %v12225_v24 = vadd.f32 1.0, %v8731_v14  ;;  %v7567_v33 = vpop.permute.xlu2 %7566 }
 0x559   : > { %8734 = vpow2.f32 %v6647_v55  ;;  %v5381_v3 = vld [vmem:[#allocation4 + $0x130] sm:$0xff]  ;;  %v7154_v11 = vmul.f32 %v8733_v47, %v12194_v27  ;;  %6428 = vst.msk [vmem:[#allocation4 + $0x118] sm:$0xff] %vm279_vm2, %v6382_v12  ;;  %vm7159_vm4 = vweird.f32 %v8733_v47  ;;  %v7572_v5 = vpop.permute.xlu0 %7571 }
 0x55a   : > { %v7669_v60 = vmul.f32 %v7562_v59, %v7393_v38  ;;  %4995 = vst.msk [vmem:[#allocation4 + $0x138] sm:$0xff] %vm279_vm2, %v4949_v42  ;;  %v6569_v34 = vsub.f32 0.0, %v12221_v50  ;;  %v5427_v58 = vadd.f32 %v5381_v3, %v12137_v30  ;;  %8736 = vrcp.f32 %v12225_v24  ;;  %v12246_v0 = vpop.f32.mrf.mxu2  ;;  %v12272_v38 = vpop.f32.mrf.mxu0  ;;  %v7716_v59 = vld [vmem:[#allocation3 + $0xf8] sm:$0xff] }
 0x55b   : > { %v5859_v25 = vld [vmem:[#allocation4 + $0x128] sm:$0xff]  ;;  %v7176_v6 = vand.u32 2147483647, %v12225_v24  ;;  %v7178_v42 = vand.u32 2147483648, %v12225_v24  ;;  %vm7172_vm0 = vweird.f32 %v12225_v24 }
 0x55c   : > { %v5905_v21 = vadd.f32 %v5859_v25, %v12147_v53  ;;  %v7761_v48 = vadd.f32 %v7715_v20, %v7669_v60  ;;  %v7155_v53 = vsub.f32 1.0, %v7154_v11  ;;  %v6649_v31 = vmul.f32 1.442695, %v6569_v34  ;;  %5473 = vst.msk [vmem:[#allocation4 + $0x130] sm:$0xff] %vm279_vm2, %v5427_v58  ;;  %v12281_v60 = vpop.f32.mrf.mxu1 }
 0x55d   : > { %v7179_v3 = vor.u32 1.1754944e-38, %v7178_v42  ;;  %vm7177_vm8 = vcmp.eq.f32.partialorder %v7176_v6, 8.507059e+37  ;;  %v7577_v42 = vpop.permute.xlu1 %7576 }
 0x55e   : > { %5951 = vst.msk [vmem:[#allocation4 + $0x128] sm:$0xff] %vm279_vm2, %v5905_v21  ;;  %v7156_v30 = vmul.f32 %v8733_v47, %v7155_v53  ;;  %8738 = vpow2.f32 %v6649_v31 }
 0x55f   : > { %v4846_v18 = vpop.f32.mrf.mxu3  ;;  %7820 = vst.msk [vmem:[%s11235_s13 + $0xaa] sm:$0x3f] %vm332_vm14, %v7761_v48  ;;  %v8735_v16 = vpop.eup %8734  ;;  %v6337_v37 = vld [vmem:[#allocation4 + $0x120] sm:$0xff]  ;;  %vm7158_vm14 = vweird.f32 %v12194_v27 }
 0x560   : > { %v4950_v17 = vadd.f32 %v4904_v45, %v4846_v18  ;;  %v12244_v54 = vadd.f32 1.0, %v8735_v16  ;;  %v7157_v10 = vadd.f32 %v8733_v47, %v7156_v30  ;;  %v6383_v15 = vadd.f32 %v6337_v37, %v12156_v4  ;;  %v8737_v51 = vpop.eup %8736  ;;  %vm7160_vm10 = vmor %vm7158_vm14, %vm7159_vm4  ;;  %v6474_v23 = vld [vmem:[#allocation4 + $0x118] sm:$0xff]  ;;  %v4906_v16 = vld [vmem:[#allocation4 + $0x150] sm:$0xff]  ;;  %v7582_v31 = vpop.permute.xlu2 %7581 }
 0x561   : > { %v5382_v22 = vld [vmem:[#allocation4 + $0x138] sm:$0xff]  ;;  %v7168_v46 = vmul.f32 %v8737_v51, %v12225_v24  ;;  %v12259_v27 = vadd.f32 %v12256_v39, %v6474_v23  ;;  %vm7173_vm5 = vweird.f32 %v8737_v51 }
 0x562   : > { %4996 = vst.msk [vmem:[#allocation4 + $0x140] sm:$0xff] %vm279_vm2, %v4950_v17  ;;  %8740 = vrcp.f32 %v12244_v54  ;;  %v7161_v28 = vsel %vm7160_vm10, %v8733_v47, %v7157_v10  ;;  %v5428_v41 = vadd.f32 %v5382_v22, %v12197_v52  ;;  %v7190_v12 = vand.u32 2147483647, %v12244_v54  ;;  %vm7174_vm12 = vmor %vm7172_vm0, %vm7173_vm5  ;;  %v12286_v34 = vpop.f32.mrf.mxu2 }
 0x563   : > { %6429 = vst.msk [vmem:[#allocation4 + $0x120] sm:$0xff] %vm279_vm2, %v6383_v15  ;;  %v7166_v56 = vsel %vm7163_vm11, %v7165_v63, %v7161_v28  ;;  %v5860_v19 = vld [vmem:[#allocation4 + $0x130] sm:$0xff]  ;;  %v7169_v36 = vsub.f32 1.0, %v7168_v46  ;;  %v6570_v8 = vsub.f32 0.0, %v12259_v27  ;;  %v7192_v21 = vand.u32 2147483648, %v12244_v54 }
 0x564   : > { %v8739_v7 = vpop.eup %8738  ;;  %v7394_v43 = vmul.f32 %v7166_v56, %v12116_v62  ;;  %5474 = vst.msk [vmem:[#allocation4 + $0x138] sm:$0xff] %vm279_vm2, %v5428_v41  ;;  %vm7186_vm13 = vweird.f32 %v12244_v54  ;;  %vm12294_vm3 = vcmp.eq.f32.partialorder %v7190_v12, 8.507059e+37  ;;  %v7717_v56 = vld [vmem:[#allocation3 + $0x100] sm:$0xff] }
 0x565   : > { %v6338_v4 = vld [vmem:[#allocation4 + $0x128] sm:$0xff]  ;;  %v12268_v26 = vadd.f32 1.0, %v8739_v7  ;;  %v7170_v9 = vmul.f32 %v8737_v51, %v7169_v36  ;;  %v6651_v35 = vmul.f32 1.442695, %v6570_v8  ;;  %v7193_v37 = vor.u32 1.1754944e-38, %v7192_v21  ;;  %v5331_v36 = vpop.f32.mrf.mxu0 }
 0x566   : > { %v6384_v29 = vadd.f32 %v6338_v4, %v12213_v40  ;;  %v5906_v40 = vadd.f32 %v5860_v19, %v12209_v57  ;;  %v7670_v62 = vmul.f32 %v7567_v33, %v7394_v43 }
 0x567   : > { %v4849_v13 = vpop.f32.mrf.mxu3  ;;  %8742 = vrcp.f32 %v12268_v26  ;;  %v7171_v25 = vadd.f32 %v8737_v51, %v7170_v9  ;;  %v7204_v10 = vand.u32 2147483647, %v12268_v26  ;;  %v7206_v28 = vand.u32 2147483648, %v12268_v26 }
 0x568   : > { %6430 = vst.msk [vmem:[#allocation4 + $0x128] sm:$0xff] %vm279_vm2, %v6384_v29  ;;  %v4951_v55 = vadd.f32 %v4905_v32, %v4849_v13  ;;  %v8741_v14 = vpop.eup %8740  ;;  %v7762_v57 = vadd.f32 %v7716_v59, %v7670_v62  ;;  %8744 = vpow2.f32 %v6651_v35  ;;  %v5807_v62 = vpop.f32.mrf.mxu1  ;;  %vm7200_vm10 = vweird.f32 %v12268_v26  ;;  %v7718_v59 = vld [vmem:[#allocation3 + $0x108] sm:$0xff] }
 0x569   : > { %v5383_v52 = vld [vmem:[#allocation4 + $0x140] sm:$0xff]  ;;  %5952 = vst.msk [vmem:[#allocation4 + $0x130] sm:$0xff] %vm279_vm2, %v5906_v40  ;;  %v7182_v47 = vmul.f32 %v8741_v14, %v12244_v54  ;;  %v7175_v24 = vsel %vm7174_vm12, %v8737_v51, %v7171_v25  ;;  %vm7187_vm4 = vweird.f32 %v8741_v14  ;;  %v7207_v12 = vor.u32 1.1754944e-38, %v7206_v28 }
 0x56a   : > { %4997 = vst.msk [vmem:[#allocation4 + $0x148] sm:$0xff] %vm279_vm2, %v4951_v55  ;;  %v6475_v20 = vld [vmem:[#allocation4 + $0x120] sm:$0xff]  ;;  %v5429_v11 = vadd.f32 %v5383_v52, %v12235_v44  ;;  %v7180_v53 = vsel %vm7177_vm8, %v7179_v3, %v7175_v24  ;;  %v6283_v35 = vpop.f32.mrf.mxu2  ;;  %vm7205_vm5 = vcmp.eq.f32.partialorder %v7204_v10, 8.507059e+37 }
 0x56b   : > { %7821 = vst.msk [vmem:[%s11235_s13 + $0xab] sm:$0xe0] %vm7788_vm6, %v7762_v57  ;;  %v7183_v58 = vsub.f32 1.0, %v7182_v47  ;;  %v12291_v48 = vadd.f32 %v12256_v39, %v6475_v20  ;;  %v7395_v44 = vmul.f32 %v7180_v53, %v12165_v49  ;;  %v5861_v51 = vld [vmem:[#allocation4 + $0x138] sm:$0xff]  ;;  %vm7188_vm6 = vmor %vm7186_vm13, %vm7187_vm4 }
 0x56c   : > { %5475 = vst.msk [vmem:[#allocation4 + $0x140] sm:$0xff] %vm279_vm2, %v5429_v11  ;;  %v5907_v7 = vadd.f32 %v5861_v51, %v12242_v61 }
 0x56d   : > { %v7184_v18 = vmul.f32 %v8741_v14, %v7183_v58  ;;  %v6571_v45 = vsub.f32 0.0, %v12291_v48  ;;  %v8743_v30 = vpop.eup %8742  ;;  %v7671_v23 = vmul.f32 %v7572_v5, %v7395_v44 }
 0x56e   : > { %v7196_v49 = vmul.f32 %v8743_v30, %v12268_v26  ;;  %v8745_v4 = vpop.eup %8744  ;;  %vm7201_vm14 = vweird.f32 %v8743_v30  ;;  %5953 = vst.msk [vmem:[#allocation4 + $0x138] sm:$0xff] %vm279_vm2, %v5907_v7 }
 0x56f   : > { %v6476_v2 = vld [vmem:[#allocation4 + $0x128] sm:$0xff]  ;;  %v4852_v17 = vpop.f32.mrf.mxu3  ;;  %v7185_v22 = vadd.f32 %v8741_v14, %v7184_v18  ;;  %v6653_v6 = vmul.f32 1.442695, %v6571_v45  ;;  %v7763_v8 = vadd.f32 %v7717_v56, %v7671_v23  ;;  %v12314_v32 = vadd.f32 1.0, %v8745_v4  ;;  %vm7202_vm11 = vmor %vm7200_vm10, %vm7201_vm14  ;;  %v5334_v45 = vpop.f32.mrf.mxu0 }
 0x570   : > { %v12303_v15 = vadd.f32 %v12256_v39, %v6476_v2  ;;  %v4952_v63 = vadd.f32 %v4906_v16, %v4852_v17  ;;  %v6339_v46 = vld [vmem:[#allocation4 + $0x130] sm:$0xff]  ;;  %v7197_v13 = vsub.f32 1.0, %v7196_v49  ;;  %v7719_v16 = vld [vmem:[#allocation3 + $0x110] sm:$0xff]  ;;  %v5810_v28 = vpop.f32.mrf.mxu1 }
 0x571   : > { %v6385_v19 = vadd.f32 %v6339_v46, %v12246_v0  ;;  %v5384_v43 = vld [vmem:[#allocation4 + $0x148] sm:$0xff]  ;;  %v7189_v41 = vsel %vm7188_vm6, %v8741_v14, %v7185_v22  ;;  %8746 = vpow2.f32 %v6653_v6  ;;  %7822 = vst.msk [vmem:[%s11235_s13 + $0xb3] sm:$0xff] %vm279_vm2, %v7763_v8  ;;  %v7218_v51 = vand.u32 2147483647, %v12314_v32 }
 0x572   : > { %v6572_v29 = vsub.f32 0.0, %v12303_v15  ;;  %4998 = vst.msk [vmem:[#allocation4 + $0x150] sm:$0xff] %vm279_vm2, %v4952_v63  ;;  %v7194_v54 = vsel %vm12294_vm3, %v7193_v37, %v7189_v41  ;;  %v5430_v0 = vadd.f32 %v5384_v43, %v12272_v38  ;;  %v7198_v40 = vmul.f32 %v8743_v30, %v7197_v13  ;;  %v12349_v56 = vpop.f32.mrf.mxu2 }
 0x573   : > { %6431 = vst.msk [vmem:[#allocation4 + $0x130] sm:$0xff] %vm279_vm2, %v6385_v19  ;;  %v7396_v61 = vmul.f32 %v7194_v54, %v12200_v1  ;;  %8748 = vrcp.f32 %v12314_v32  ;;  %v5862_v55 = vld [vmem:[#allocation4 + $0x140] sm:$0xff]  ;;  %v4907_v1 = vld [vmem:[#allocation4 + $0x158] sm:$0xff]  ;;  %v7220_v63 = vand.u32 2147483648, %v12314_v32  ;;  %vm7214_vm0 = vweird.f32 %v12314_v32 }
 0x574   : > { %v6655_v33 = vmul.f32 1.442695, %v6572_v29  ;;  %v5908_v9 = vadd.f32 %v5862_v55, %v12281_v60  ;;  %v7199_v14 = vadd.f32 %v8743_v30, %v7198_v40  ;;  %5476 = vst.msk [vmem:[#allocation4 + $0x148] sm:$0xff] %vm279_vm2, %v5430_v0  ;;  %v4908_v19 = vld [vmem:[#allocation4 + $0x160] sm:$0xff]  ;;  %v7587_v40 = vpop.permute.xlu0 %7586 }
 0x575   : > { %v7672_v52 = vmul.f32 %v7577_v42, %v7396_v61  ;;  %v6340_v17 = vld [vmem:[#allocation4 + $0x138] sm:$0xff]  ;;  %v7221_v41 = vor.u32 1.1754944e-38, %v7220_v63 }
 0x576   : > { %8750 = vpow2.f32 %v6655_v33  ;;  %5954 = vst.msk [vmem:[#allocation4 + $0x140] sm:$0xff] %vm279_vm2, %v5908_v9  ;;  %v7203_v47 = vsel %vm7202_vm11, %v8743_v30, %v7199_v14  ;;  %v6386_v23 = vadd.f32 %v6340_v17, %v12286_v34 }
 0x577   : > { %v4855_v38 = vpop.f32.mrf.mxu3  ;;  %v7764_v25 = vadd.f32 %v7718_v59, %v7672_v52  ;;  %v8747_v3 = vpop.eup %8746  ;;  %v7208_v21 = vsel %vm7205_vm5, %v7207_v12, %v7203_v47 }
 0x578   : > { %v4953_v57 = vadd.f32 %v4907_v1, %v4855_v38  ;;  %v7397_v11 = vmul.f32 %v7208_v21, %v12221_v50  ;;  %v12334_v24 = vadd.f32 1.0, %v8747_v3  ;;  %6432 = vst.msk [vmem:[#allocation4 + $0x138] sm:$0xff] %vm279_vm2, %v6386_v23  ;;  %v5337_v9 = vpop.f32.mrf.mxu0  ;;  %v4909_v38 = vld [vmem:[#allocation4 + $0x168] sm:$0xff]  ;;  %v5813_v21 = vpop.f32.mrf.mxu1 }
 0x579   : > { %v5385_v60 = vld [vmem:[#allocation4 + $0x150] sm:$0xff]  ;;  %v8749_v26 = vpop.eup %8748  ;;  %7823 = vst.msk [vmem:[%s11235_s13 + $0xbb] sm:$0x1f] %vm7791_vm15, %v7764_v25 }
 0x57a   : > { %v5431_v20 = vadd.f32 %v5385_v60, %v5331_v36  ;;  %4999 = vst.msk [vmem:[#allocation4 + $0x158] sm:$0xff] %vm279_vm2, %v4953_v57  ;;  %v6477_v58 = vld [vmem:[#allocation4 + $0x130] sm:$0xff]  ;;  %v7210_v44 = vmul.f32 %v8749_v26, %v12314_v32  ;;  %v7673_v2 = vmul.f32 %v7582_v31, %v7397_v11  ;;  %8752 = vrcp.f32 %v12334_v24  ;;  %v7720_v57 = vld [vmem:[#allocation3 + $0x118] sm:$0xff]  ;;  %v6289_v31 = vpop.f32.mrf.mxu2 }
 0x57b   : > { %v12338_v18 = vadd.f32 %v12256_v39, %v6477_v58  ;;  %v5863_v37 = vld [vmem:[#allocation4 + $0x148] sm:$0xff]  ;;  %vm7215_vm15 = vweird.f32 %v8749_v26  ;;  %v7234_v0 = vand.u32 2147483648, %v12334_v24  ;;  %vm7228_vm13 = vweird.f32 %v12334_v24 }
 0x57c   : > { %v8751_v53 = vpop.eup %8750  ;;  %5477 = vst.msk [vmem:[#allocation4 + $0x150] sm:$0xff] %vm279_vm2, %v5431_v20  ;;  %v7211_v30 = vsub.f32 1.0, %v7210_v44  ;;  %v7765_v10 = vadd.f32 %v7719_v16, %v7673_v2  ;;  %v5909_v4 = vadd.f32 %v5863_v37, %v5807_v62  ;;  %vm7216_vm12 = vmor %vm7214_vm0, %vm7215_vm15 }
 0x57d   : > { %v12342_v50 = vadd.f32 1.0, %v8751_v53  ;;  %v6573_v5 = vsub.f32 0.0, %v12338_v18  ;;  %v6341_v22 = vld [vmem:[#allocation4 + $0x140] sm:$0xff] }
 0x57e   : > { %v7212_v46 = vmul.f32 %v8749_v26, %v7211_v30  ;;  %7824 = vst.msk [vmem:[%s11235_s13 + $0xbc] sm:$0xf0] %vm7793_vm1, %v7765_v10  ;;  %v6387_v6 = vadd.f32 %v6341_v22, %v6283_v35  ;;  %vm7219_vm1 = vcmp.eq.f32.partialorder %v7218_v51, 8.507059e+37  ;;  %v7232_v35 = vand.u32 2147483647, %v12334_v24 }
 0x57f   : > { %v4858_v49 = vpop.f32.mrf.mxu3  ;;  %8754 = vrcp.f32 %v12342_v50  ;;  %v6657_v43 = vmul.f32 1.442695, %v6573_v5  ;;  %5955 = vst.msk [vmem:[#allocation4 + $0x148] sm:$0xff] %vm279_vm2, %v5909_v4  ;;  %v7246_v47 = vand.u32 2147483647, %v12342_v50  ;;  %v6478_v60 = vld [vmem:[#allocation4 + $0x138] sm:$0xff]  ;;  %vm7242_vm14 = vweird.f32 %v12342_v50 }
 0x580   : > { %v7213_v7 = vadd.f32 %v8749_v26, %v7212_v46  ;;  %v4954_v36 = vadd.f32 %v4908_v19, %v4858_v49  ;;  %v8753_v8 = vpop.eup %8752  ;;  %6433 = vst.msk [vmem:[#allocation4 + $0x140] sm:$0xff] %vm279_vm2, %v6387_v6  ;;  %v7248_v11 = vand.u32 2147483648, %v12342_v50  ;;  %v12370_v58 = vadd.f32 %v12256_v39, %v6478_v60  ;;  %v7592_v49 = vpop.permute.xlu1 %7591  ;;  %v7721_v19 = vld [vmem:[#allocation3 + $0x120] sm:$0xff] }
 0x581   : > { %v5386_v29 = vld [vmem:[#allocation4 + $0x158] sm:$0xff]  ;;  %v7224_v32 = vmul.f32 %v8753_v8, %v12334_v24  ;;  %8756 = vpow2.f32 %v6657_v43  ;;  %vm7229_vm8 = vweird.f32 %v8753_v8  ;;  %vm7233_vm6 = vcmp.eq.f32.partialorder %v7232_v35, 8.507059e+37 }
 0x582   : > { %v5432_v34 = vadd.f32 %v5386_v29, %v5334_v45  ;;  %v7217_v54 = vsel %vm7216_vm12, %v8749_v26, %v7213_v7  ;;  %5000 = vst.msk [vmem:[#allocation4 + $0x160] sm:$0xff] %vm279_vm2, %v4954_v36  ;;  %vm7230_vm3 = vmor %vm7228_vm13, %vm7229_vm8  ;;  %v6574_v16 = vsub.f32 0.0, %v12370_v58  ;;  %vm7247_vm11 = vcmp.eq.f32.partialorder %v7246_v47, 8.507059e+37  ;;  %v5340_v7 = vpop.f32.mrf.mxu0 }
 0x583   : > { %v5864_v13 = vld [vmem:[#allocation4 + $0x150] sm:$0xff]  ;;  %v7222_v33 = vsel %vm7219_vm1, %v7221_v41, %v7217_v54  ;;  %v7225_v62 = vsub.f32 1.0, %v7224_v32  ;;  %v7249_v23 = vor.u32 1.1754944e-38, %v7248_v11 }
 0x584   : > { %5478 = vst.msk [vmem:[#allocation4 + $0x158] sm:$0xff] %vm279_vm2, %v5432_v34  ;;  %v5910_v42 = vadd.f32 %v5864_v13, %v5810_v28  ;;  %v7398_v55 = vmul.f32 %v7222_v33, %v12259_v27  ;;  %v7235_v27 = vor.u32 1.1754944e-38, %v7234_v0  ;;  %v6659_v22 = vmul.f32 1.442695, %v6574_v16  ;;  %v7722_v33 = vld [vmem:[#allocation3 + $0x128] sm:$0xff] }
 0x585   : > { %v8755_v61 = vpop.eup %8754  ;;  %v7226_v59 = vmul.f32 %v8753_v8, %v7225_v62 }
 0x586   : > { %v7238_v52 = vmul.f32 %v8755_v61, %v12342_v50  ;;  %5956 = vst.msk [vmem:[#allocation4 + $0x150] sm:$0xff] %vm279_vm2, %v5910_v42  ;;  %v7674_v1 = vmul.f32 %v7587_v40, %v7398_v55  ;;  %vm7243_vm4 = vweird.f32 %v8755_v61  ;;  %v6342_v2 = vld [vmem:[#allocation4 + $0x148] sm:$0xff]  ;;  %v6292_v42 = vpop.f32.mrf.mxu2 }
 0x587   : > { %v4861_v14 = vpop.f32.mrf.mxu3  ;;  %v8757_v3 = vpop.eup %8756  ;;  %v7227_v26 = vadd.f32 %v8753_v8, %v7226_v59  ;;  %v6479_v53 = vld [vmem:[#allocation4 + $0x140] sm:$0xff]  ;;  %v6388_v30 = vadd.f32 %v6342_v2, %v12349_v56  ;;  %vm7244_vm10 = vmor %vm7242_vm14, %vm7243_vm4  ;;  %vm12527_vm14 = vcmask 59392  }
 0x588   : > { %v4955_v12 = vadd.f32 %v4909_v38, %v4861_v14  ;;  %v7239_v25 = vsub.f32 1.0, %v7238_v52  ;;  %v7766_v20 = vadd.f32 %v7720_v57, %v7674_v1  ;;  %v12374_v44 = vadd.f32 1.0, %v8757_v3 }
 0x589   : > { %v12377_v45 = vadd.f32 %v12256_v39, %v6479_v53  ;;  %v7231_v17 = vsel %vm7230_vm3, %v8753_v8, %v7227_v26  ;;  %v5387_v51 = vld [vmem:[#allocation4 + $0x160] sm:$0xff]  ;;  %6434 = vst.msk [vmem:[#allocation4 + $0x148] sm:$0xff] %vm279_vm2, %v6388_v30  ;;  %v7597_v8 = vpop.permute.xlu2 %7596 }
 0x58a   : > { %5001 = vst.msk [vmem:[#allocation4 + $0x168] sm:$0xff] %vm279_vm2, %v4955_v12  ;;  %v7240_v24 = vmul.f32 %v8755_v61, %v7239_v25  ;;  %v7236_v37 = vsel %vm7233_vm6, %v7235_v27, %v7231_v17  ;;  %8758 = vrcp.f32 %v12374_v44  ;;  %v5433_v56 = vadd.f32 %v5387_v51, %v5337_v9  ;;  %v7602_v17 = vpop.permute.xlu0 %7601 }
 0x58b   : > { %7825 = vst.msk [vmem:[%s11235_s13 + $0xc4] sm:$0xff] %vm279_vm2, %v7766_v20  ;;  %v5865_v5 = vld [vmem:[#allocation4 + $0x158] sm:$0xff]  ;;  %v7399_v63 = vmul.f32 %v7236_v37, %v12291_v48  ;;  %v6575_v46 = vsub.f32 0.0, %v12377_v45  ;;  %8760 = vpow2.f32 %v6659_v22  ;;  %v7260_v35 = vand.u32 2147483647, %v12374_v44 }
 0x58c   : > { %v7241_v10 = vadd.f32 %v8755_v61, %v7240_v24  ;;  %v5911_v6 = vadd.f32 %v5865_v5, %v5813_v21  ;;  %5479 = vst.msk [vmem:[#allocation4 + $0x160] sm:$0xff] %vm279_vm2, %v5433_v56  ;;  %v7262_v52 = vand.u32 2147483648, %v12374_v44  ;;  %vm7256_vm5 = vweird.f32 %v12374_v44 }
 0x58d   : > { %v6343_v4 = vld [vmem:[#allocation4 + $0x150] sm:$0xff]  ;;  %v7675_v50 = vmul.f32 %v7592_v49, %v7399_v63  ;;  %v6661_v43 = vmul.f32 1.442695, %v6575_v46  ;;  %vm7261_vm15 = vcmp.eq.f32.partialorder %v7260_v35, 8.507059e+37 }
 0x58e   : > { %v7245_v28 = vsel %vm7244_vm10, %v8755_v61, %v7241_v10  ;;  %v6389_v34 = vadd.f32 %v6343_v4, %v6289_v31  ;;  %5957 = vst.msk [vmem:[#allocation4 + $0x158] sm:$0xff] %vm279_vm2, %v5911_v6  ;;  %v7263_v60 = vor.u32 1.1754944e-38, %v7262_v52  ;;  %v6295_v2 = vpop.f32.mrf.mxu2  ;;  %v7723_v10 = vld [vmem:[#allocation3 + $0x130] sm:$0xff]  ;;  %v7607_v52 = vpop.permute.xlu1 %7606 }
 0x58f   : > { %v7250_v29 = vsel %vm7247_vm11, %v7249_v23, %v7245_v28  ;;  %v7767_v41 = vadd.f32 %v7721_v19, %v7675_v50  ;;  %8762 = vpow2.f32 %v6661_v43  ;;  %vm12528_vm11 = vcmask 64514  }
 0x590   : > { %v7400_v48 = vmul.f32 %v7250_v29, %v12303_v15  ;;  %v8759_v54 = vpop.eup %8758  ;;  %6435 = vst.msk [vmem:[#allocation4 + $0x150] sm:$0xff] %vm279_vm2, %v6389_v34  ;;  %v5816_v15 = vpop.f32.mrf.mxu1  ;;  %v6480_v40 = vld [vmem:[#allocation4 + $0x148] sm:$0xff] }
 0x591   : > { %v5388_v36 = vld [vmem:[#allocation4 + $0x168] sm:$0xff]  ;;  %7826 = vst.msk [vmem:[%s11235_s13 + $0xcc] sm:$0xf] %vm7796_vm9, %v7767_v41  ;;  %v7252_v0 = vmul.f32 %v8759_v54, %v12374_v44  ;;  %v12398_v62 = vadd.f32 %v12256_v39, %v6480_v40  ;;  %v8761_v9 = vpop.eup %8760  ;;  %vm7257_vm9 = vweird.f32 %v8759_v54 }
 0x592   : > { %v5434_v13 = vadd.f32 %v5388_v36, %v5340_v7  ;;  %v7676_v32 = vmul.f32 %v7597_v8, %v7400_v48  ;;  %v12404_v38 = vadd.f32 1.0, %v8761_v9 }
 0x593   : > { %v7253_v55 = vsub.f32 1.0, %v7252_v0  ;;  %v6576_v1 = vsub.f32 0.0, %v12398_v62  ;;  %v5866_v59 = vld [vmem:[#allocation4 + $0x160] sm:$0xff] }
 0x594   : > { %v7768_v61 = vadd.f32 %v7722_v33, %v7676_v32  ;;  %5480 = vst.msk [vmem:[#allocation4 + $0x168] sm:$0xff] %vm279_vm2, %v5434_v13  ;;  %v5912_v27 = vadd.f32 %v5866_v59, %v5816_v15  ;;  %8764 = vrcp.f32 %v12404_v38  ;;  %v7276_v28 = vand.u32 2147483648, %v12404_v38 }
 0x595   : > { %v7254_v14 = vmul.f32 %v8759_v54, %v7253_v55  ;;  %v8763_v12 = vpop.eup %8762  ;;  %v6344_v57 = vld [vmem:[#allocation4 + $0x158] sm:$0xff]  ;;  %v6663_v21 = vmul.f32 1.442695, %v6576_v1  ;;  %v7274_v50 = vand.u32 2147483647, %v12404_v38  ;;  %vm7270_vm12 = vweird.f32 %v12404_v38 }
 0x596   : > { %7827 = vst.msk [vmem:[%s11235_s13 + $0xcd] sm:$0xf8] %vm7798_vm7, %v7768_v61  ;;  %vm7258_vm7 = vmor %vm7256_vm5, %vm7257_vm9  ;;  %v12409_v3 = vadd.f32 1.0, %v8763_v12  ;;  %v6390_v11 = vadd.f32 %v6344_v57, %v6292_v42  ;;  %v7277_v34 = vor.u32 1.1754944e-38, %v7276_v28  ;;  %v7724_v57 = vld [vmem:[#allocation3 + $0x138] sm:$0xff] }
 0x597   : > { %v7255_v25 = vadd.f32 %v8759_v54, %v7254_v14  ;;  %v6481_v47 = vld [vmem:[#allocation4 + $0x150] sm:$0xff]  ;;  %5958 = vst.msk [vmem:[#allocation4 + $0x160] sm:$0xff] %vm279_vm2, %v5912_v27  ;;  %vm7275_vm13 = vcmp.eq.f32.partialorder %v7274_v50, 8.507059e+37 }
 0x598   : > { %v12412_v20 = vadd.f32 %v12256_v39, %v6481_v47  ;;  %8766 = vrcp.f32 %v12409_v3  ;;  %v5819_v24 = vpop.f32.mrf.mxu1  ;;  %6436 = vst.msk [vmem:[#allocation4 + $0x158] sm:$0xff] %vm279_vm2, %v6390_v11  ;;  %v7290_v36 = vand.u32 2147483648, %v12409_v3  ;;  %v7288_v41 = vand.u32 2147483647, %v12409_v3  ;;  %v7725_v11 = vld [vmem:[#allocation3 + $0x140] sm:$0xff] }
 0x599   : > { %v7259_v26 = vsel %vm7258_vm7, %v8759_v54, %v7255_v25  ;;  %8768 = vpow2.f32 %v6663_v21  ;;  %v6298_v54 = vpop.f32.mrf.mxu2  ;;  %vm7284_vm3 = vweird.f32 %v12409_v3  ;;  %v7612_v25 = vpop.permute.xlu2 %7611 }
 0x59a   : > { %v7264_v31 = vsel %vm7261_vm15, %v7263_v60, %v7259_v26  ;;  %v6577_v16 = vsub.f32 0.0, %v12412_v20  ;;  %v8765_v5 = vpop.eup %8764  ;;  %v7291_v9 = vor.u32 1.1754944e-38, %v7290_v36  ;;  %vm7289_vm6 = vcmp.eq.f32.partialorder %v7288_v41, 8.507059e+37 }
 0x59b   : > { %v5867_v53 = vld [vmem:[#allocation4 + $0x168] sm:$0xff]  ;;  %v7401_v44 = vmul.f32 %v7264_v31, %v12338_v18  ;;  %v7266_v51 = vmul.f32 %v8765_v5, %v12404_v38  ;;  %vm7271_vm0 = vweird.f32 %v8765_v5 }
 0x59c   : > { %v5913_v30 = vadd.f32 %v5867_v53, %v5819_v24  ;;  %v6665_v63 = vmul.f32 1.442695, %v6577_v16  ;;  %vm7272_vm1 = vmor %vm7270_vm12, %vm7271_vm0 }
 0x59d   : > { %v7677_v37 = vmul.f32 %v7602_v17, %v7401_v44  ;;  %v7267_v49 = vsub.f32 1.0, %v7266_v51 }
 0x59e   : > { %5959 = vst.msk [vmem:[#allocation4 + $0x168] sm:$0xff] %vm279_vm2, %v5913_v30  ;;  %v6345_v22 = vld [vmem:[#allocation4 + $0x160] sm:$0xff]  ;;  %v8767_v18 = vpop.eup %8766  ;;  %8770 = vpow2.f32 %v6665_v63 }
 0x59f   : > { %v7769_v23 = vadd.f32 %v7723_v10, %v7677_v37  ;;  %v6391_v46 = vadd.f32 %v6345_v22, %v6295_v2  ;;  %v8769_v4 = vpop.eup %8768  ;;  %v7280_v56 = vmul.f32 %v8767_v18, %v12409_v3  ;;  %v7268_v6 = vmul.f32 %v8765_v5, %v7267_v49  ;;  %v6482_v19 = vld [vmem:[#allocation4 + $0x158] sm:$0xff] }
 0x5a0   : > { %v12426_v29 = vadd.f32 1.0, %v8769_v4  ;;  %v12431_v48 = vadd.f32 %v12256_v39, %v6482_v19  ;;  %vm7285_vm8 = vweird.f32 %v8767_v18 }
 0x5a1   : > { %7828 = vst.msk [vmem:[%s11235_s13 + $0xd5] sm:$0xff] %vm279_vm2, %v7769_v23  ;;  %v7281_v7 = vsub.f32 1.0, %v7280_v56  ;;  %v7269_v43 = vadd.f32 %v8765_v5, %v7268_v6  ;;  %vm7286_vm4 = vmor %vm7284_vm3, %vm7285_vm8  ;;  %v7617_v56 = vpop.permute.xlu0 %7616 }
 0x5a2   : > { %6437 = vst.msk [vmem:[#allocation4 + $0x160] sm:$0xff] %vm279_vm2, %v6391_v46  ;;  %8772 = vrcp.f32 %v12426_v29  ;;  %v6578_v13 = vsub.f32 0.0, %v12431_v48  ;;  %v7302_v26 = vand.u32 2147483647, %v12426_v29  ;;  %v7304_v53 = vand.u32 2147483648, %v12426_v29 }
 0x5a3   : > { %v7282_v8 = vmul.f32 %v8767_v18, %v7281_v7  ;;  %v7273_v15 = vsel %vm7272_vm1, %v8765_v5, %v7269_v43  ;;  %vm7298_vm9 = vweird.f32 %v12426_v29  ;;  %v7726_v7 = vld [vmem:[#allocation3 + $0x148] sm:$0xff] }
 0x5a4   : > { %v8771_v33 = vpop.eup %8770  ;;  %v7278_v42 = vsel %vm7275_vm13, %v7277_v34, %v7273_v15  ;;  %v6667_v35 = vmul.f32 1.442695, %v6578_v13  ;;  %vm7303_vm5 = vcmp.eq.f32.partialorder %v7302_v26, 8.507059e+37  ;;  %v7305_v51 = vor.u32 1.1754944e-38, %v7304_v53  ;;  %v7728_v26 = vld [vmem:[#allocation3 + $0x158] sm:$0xff] }
 0x5a5   : > { %v6346_v32 = vld [vmem:[#allocation4 + $0x168] sm:$0xff]  ;;  %v7283_v61 = vadd.f32 %v8767_v18, %v7282_v8  ;;  %v12438_v40 = vadd.f32 1.0, %v8771_v33  ;;  %v7402_v55 = vmul.f32 %v7278_v42, %v12370_v58  ;;  %vm12529_vm13 = vcmask 58368  }
 0x5a6   : > { %v6392_v0 = vadd.f32 %v6346_v32, %v6298_v54  ;;  %v7622_v54 = vpop.permute.xlu1 %7621 }
 0x5a7   : > { %v7287_v14 = vsel %vm7286_vm4, %v8767_v18, %v7283_v61  ;;  %8774 = vrcp.f32 %v12438_v40  ;;  %v7678_v59 = vmul.f32 %v7607_v52, %v7402_v55  ;;  %v7316_v18 = vand.u32 2147483647, %v12438_v40 }
 0x5a8   : > { %6438 = vst.msk [vmem:[#allocation4 + $0x168] sm:$0xff] %vm279_vm2, %v6392_v0  ;;  %v8773_v1 = vpop.eup %8772  ;;  %v7292_v12 = vsel %vm7289_vm6, %v7291_v9, %v7287_v14  ;;  %8776 = vpow2.f32 %v6667_v35  ;;  %v7318_v49 = vand.u32 2147483648, %v12438_v40  ;;  %vm7312_vm0 = vweird.f32 %v12438_v40  ;;  %v7727_v0 = vld [vmem:[#allocation3 + $0x150] sm:$0xff] }
 0x5a9   : > { %v6483_v38 = vld [vmem:[#allocation4 + $0x160] sm:$0xff]  ;;  %v7403_v27 = vmul.f32 %v7292_v12, %v12377_v45  ;;  %v7294_v58 = vmul.f32 %v8773_v1, %v12426_v29  ;;  %v7770_v47 = vadd.f32 %v7724_v57, %v7678_v59  ;;  %vm7299_vm10 = vweird.f32 %v8773_v1 }
 0x5aa   : > { %v12446_v60 = vadd.f32 %v12256_v39, %v6483_v38  ;;  %vm7300_vm7 = vmor %vm7298_vm9, %vm7299_vm10  ;;  %v7319_v29 = vor.u32 1.1754944e-38, %v7318_v49  ;;  %vm7317_vm1 = vcmp.eq.f32.partialorder %v7316_v18, 8.507059e+37 }
 0x5ab   : > { %v7679_v3 = vmul.f32 %v7612_v25, %v7403_v27  ;;  %v7295_v21 = vsub.f32 1.0, %v7294_v58  ;;  %7829 = vst.msk [vmem:[%s11235_s13 + $0xdd] sm:$0x7] %vm12527_vm14, %v7770_v47  ;;  %v7627_v27 = vpop.permute.xlu2 %7626 }
 0x5ac   : > { %v6579_v31 = vsub.f32 0.0, %v12446_v60 }
 0x5ad   : > { %v8775_v45 = vpop.eup %8774  ;;  %v7771_v24 = vadd.f32 %v7725_v11, %v7679_v3  ;;  %v7296_v44 = vmul.f32 %v8773_v1, %v7295_v21 }
 0x5ae   : > { %v8777_v17 = vpop.eup %8776  ;;  %v7308_v16 = vmul.f32 %v8775_v45, %v12438_v40  ;;  %v6669_v30 = vmul.f32 1.442695, %v6579_v31  ;;  %vm7313_vm15 = vweird.f32 %v8775_v45 }
 0x5af   : > { %v6484_v2 = vld [vmem:[#allocation4 + $0x168] sm:$0xff]  ;;  %7830 = vst.msk [vmem:[%s11235_s13 + $0xde] sm:$0xfc] %vm12528_vm11, %v7771_v24  ;;  %v7297_v37 = vadd.f32 %v8773_v1, %v7296_v44  ;;  %v6716_v10 = vadd.f32 1.0, %v8777_v17  ;;  %vm7314_vm12 = vmor %vm7312_vm0, %vm7313_vm15 }
 0x5b0   : > { %v12455_v5 = vadd.f32 %v12256_v39, %v6484_v2  ;;  %v7309_v63 = vsub.f32 1.0, %v7308_v16  ;;  %8778 = vpow2.f32 %v6669_v30 }
 0x5b1   : > { %v7301_v22 = vsel %vm7300_vm7, %v8773_v1, %v7297_v37  ;;  %8780 = vrcp.f32 %v6716_v10  ;;  %v7332_v42 = vand.u32 2147483648, %v6716_v10  ;;  %v7330_v9 = vand.u32 2147483647, %v6716_v10  ;;  %v7632_v37 = vpop.permute.xlu0 %7631 }
 0x5b2   : > { %v6580_v23 = vsub.f32 0.0, %v12455_v5  ;;  %v7306_v39 = vsel %vm7303_vm5, %v7305_v51, %v7301_v22  ;;  %v7310_v28 = vmul.f32 %v8775_v45, %v7309_v63  ;;  %vm7326_vm3 = vweird.f32 %v6716_v10 }
 0x5b3   : > { %v7404_v4 = vmul.f32 %v7306_v39, %v12398_v62  ;;  %v7333_v52 = vor.u32 1.1754944e-38, %v7332_v42  ;;  %vm7331_vm6 = vcmp.eq.f32.partialorder %v7330_v9, 8.507059e+37  ;;  %vm12530_vm5 = vcmask 64513   ;;  %v7637_v39 = vpop.permute.xlu1 %7636 }
 0x5b4   : > { %v6671_v46 = vmul.f32 1.442695, %v6580_v23  ;;  %v7311_v6 = vadd.f32 %v8775_v45, %v7310_v28  ;;  %v7729_v23 = vld [vmem:[#allocation3 + $0x160] sm:$0xff] }
 0x5b5   : > { %v7680_v50 = vmul.f32 %v7617_v56, %v7404_v4 }
 0x5b6   : > { %8782 = vpow2.f32 %v6671_v46  ;;  %v8779_v19 = vpop.eup %8778  ;;  %v7315_v43 = vsel %vm7314_vm12, %v8775_v45, %v7311_v6  ;;  %v7730_v46 = vld [vmem:[#allocation3 + $0x168] sm:$0xff] }
 0x5b7   : > { %v8781_v34 = vpop.eup %8780  ;;  %v7772_v36 = vadd.f32 %v7726_v7, %v7680_v50  ;;  %v7320_v8 = vsel %vm7317_vm1, %v7319_v29, %v7315_v43  ;;  %v6717_v41 = vadd.f32 1.0, %v8779_v19  ;;  %vm12531_vm1 = vcmask 57344  }
 0x5b8   : > { %v7405_v13 = vmul.f32 %v7320_v8, %v12412_v20  ;;  %v7322_v62 = vmul.f32 %v8781_v34, %v6716_v10  ;;  %vm7327_vm8 = vweird.f32 %v8781_v34 }
 0x5b9   : > { %7831 = vst.msk [vmem:[%s11235_s13 + $0xe6] sm:$0xff] %vm279_vm2, %v7772_v36  ;;  %8784 = vrcp.f32 %v6717_v41  ;;  %vm7328_vm4 = vmor %vm7326_vm3, %vm7327_vm8  ;;  %v7344_v58 = vand.u32 2147483647, %v6717_v41  ;;  %v7346_v25 = vand.u32 2147483648, %v6717_v41  ;;  %vm7340_vm10 = vweird.f32 %v6717_v41 }
 0x5ba   : > { %v7681_v33 = vmul.f32 %v7622_v54, %v7405_v13  ;;  %v7323_v15 = vsub.f32 1.0, %v7322_v62 }
 0x5bb   : > { %vm7345_vm9 = vcmp.eq.f32.partialorder %v7344_v58, 8.507059e+37  ;;  %v7347_v45 = vor.u32 1.1754944e-38, %v7346_v25 }
 0x5bc   : > { %v8783_v32 = vpop.eup %8782  ;;  %v7773_v40 = vadd.f32 %v7727_v0, %v7681_v33  ;;  %v7324_v55 = vmul.f32 %v8781_v34, %v7323_v15 }
 0x5bd   : > { %v6718_v61 = vadd.f32 1.0, %v8783_v32 }
 0x5be   : > { %7832 = vst.msk [vmem:[%s11235_s13 + $0xee] sm:$0x3] %vm12529_vm13, %v7773_v40  ;;  %v7325_v20 = vadd.f32 %v8781_v34, %v7324_v55 }
 0x5bf   : > { %8786 = vrcp.f32 %v6718_v61  ;;  %v8785_v35 = vpop.eup %8784  ;;  %v7360_v24 = vand.u32 2147483648, %v6718_v61  ;;  %v7358_v2 = vand.u32 2147483647, %v6718_v61  ;;  %vm7354_vm15 = vweird.f32 %v6718_v61 }
 0x5c0   : > { %v7329_v14 = vsel %vm7328_vm4, %v8781_v34, %v7325_v20  ;;  %v7336_v38 = vmul.f32 %v8785_v35, %v6717_v41  ;;  %vm7341_vm14 = vweird.f32 %v8785_v35 }
 0x5c1   : > { %v7334_v1 = vsel %vm7331_vm6, %v7333_v52, %v7329_v14  ;;  %vm7342_vm11 = vmor %vm7340_vm10, %vm7341_vm14  ;;  %v7361_v10 = vor.u32 1.1754944e-38, %v7360_v24  ;;  %vm7359_vm12 = vcmp.eq.f32.partialorder %v7358_v2, 8.507059e+37 }
 0x5c2   : > { %v7406_v59 = vmul.f32 %v7334_v1, %v12431_v48  ;;  %v7337_v12 = vsub.f32 1.0, %v7336_v38 }
 0x5c4   : > { %v7682_v47 = vmul.f32 %v7627_v27, %v7406_v59  ;;  %v7338_v3 = vmul.f32 %v8785_v35, %v7337_v12 }
 0x5c5   : > { %v8787_v57 = vpop.eup %8786 }
 0x5c6   : > { %v7350_v21 = vmul.f32 %v8787_v57, %v6718_v61  ;;  %v7774_v11 = vadd.f32 %v7728_v26, %v7682_v47  ;;  %v7339_v53 = vadd.f32 %v8785_v35, %v7338_v3  ;;  %vm7355_vm7 = vweird.f32 %v8787_v57 }
 0x5c7   : > { %vm7356_vm0 = vmor %vm7354_vm15, %vm7355_vm7 }
 0x5c8   : > { %v7351_v31 = vsub.f32 1.0, %v7350_v21  ;;  %7833 = vst.msk [vmem:[%s11235_s13 + $0xef] sm:$0xfe] %vm12530_vm5, %v7774_v11  ;;  %v7343_v48 = vsel %vm7342_vm11, %v8785_v35, %v7339_v53 }
 0x5c9   : > { %v7348_v17 = vsel %vm7345_vm9, %v7347_v45, %v7343_v48 }
 0x5ca   : > { %v7352_v44 = vmul.f32 %v8787_v57, %v7351_v31  ;;  %v7407_v16 = vmul.f32 %v7348_v17, %v12446_v60 }
 0x5cc   : > { %v7353_v30 = vadd.f32 %v8787_v57, %v7352_v44  ;;  %v7683_v51 = vmul.f32 %v7632_v37, %v7407_v16 }
 0x5ce   : > { %v7357_v63 = vsel %vm7356_vm0, %v8787_v57, %v7353_v30  ;;  %v7775_v18 = vadd.f32 %v7729_v23, %v7683_v51 }
 0x5cf   : > { %v7362_v22 = vsel %vm7359_vm12, %v7361_v10, %v7357_v63 }
 0x5d0   : > { %v7408_v49 = vmul.f32 %v7362_v22, %v12455_v5  ;;  %7834 = vst.msk [vmem:[%s11235_s13 + $0xf7] sm:$0xff] %vm279_vm2, %v7775_v18 }
 0x5d2   : > { %v7684_v28 = vmul.f32 %v7637_v39, %v7408_v49 }
 0x5d4   : > { %v7776_v60 = vadd.f32 %v7730_v46, %v7684_v28 }
 0x5d6   : > { %7835 = vst.msk [vmem:[%s11235_s13 + $0xff] sm:$0x1] %vm12531_vm1, %v7776_v60 }
 0x5d7 PF: > { %s17_s24 = sadd.s32 1, %s8800_s24  }
 0x5d8   : > { %p14_p4 = scmp.ge.s32.totalorder %s17_s24, 4  }
 0x5da   :  { %16 = sbr.rel (!%p14_p4) target bundleno = 1 (0x1), region = 86 }

</bundles_post_ra>
